<compile_context>
chip_gen: v7x
topology: tpu7x:2x2x1
jax: 0.10.0
libtpu: 0.0.40
codegen_flags: <defaults>
</compile_context>

<pallas_src>
import functools
import jax
import jax.numpy as jnp
from jax.experimental import pallas as pl
from jax.experimental.pallas import tpu as pltpu

_BN_EPS = 1e-5
_SLOPE = 0.1


# ----------------------------------------------------------------------------
# Pallas kernels
# ----------------------------------------------------------------------------
def _mm_kernel(a_ref, b_ref, o_ref):
    # Single-block K/N: one MXU matmul, f32 accumulation, direct store.
    o_ref[...] = jnp.dot(a_ref[...], b_ref[...],
                         preferred_element_type=jnp.float32).astype(o_ref.dtype)


def _mm_bn_lrelu_kernel(a_ref, b_ref, s_ref, t_ref, o_ref):
    # Matmul + fused per-channel BN affine + LeakyReLU(0.1) epilogue.
    acc = jnp.dot(a_ref[...], b_ref[...], preferred_element_type=jnp.float32)
    y = acc * s_ref[...] + t_ref[...]
    o_ref[...] = jnp.where(y >= 0.0, y, _SLOPE * y).astype(o_ref.dtype)


def _mm_residual_kernel(a_ref, b_ref, r_ref, o_ref):
    # Matmul + fused residual (skip-connection) add epilogue.
    acc = jnp.dot(a_ref[...], b_ref[...], preferred_element_type=jnp.float32)
    o_ref[...] = (acc + r_ref[...]).astype(o_ref.dtype)


def _bn_lrelu_kernel(x_ref, s_ref, t_ref, o_ref):
    y = x_ref[...] * s_ref[...] + t_ref[...]
    o_ref[...] = jnp.where(y >= 0.0, y, _SLOPE * y).astype(o_ref.dtype)


# ----------------------------------------------------------------------------
# Pallas wrappers
# ----------------------------------------------------------------------------
def _pick_tm(M, prefer=(512, 1024, 256, 128, 64, 32, 16, 8)):
    """Tile height that divides M exactly (no padded activation copies).

    Prefers >=2 tiles (so both v7x TensorCores get work) and large tiles
    (amortize the ~0.35us per-grid-step overhead; 512-1024 rows sit near the
    HBM roofline for the mem-bound elementwise/matmul passes)."""
    for t in prefer:
        if M % t == 0 and M // t >= 2:
            return t
    for t in sorted(prefer, reverse=True):
        if M % t == 0:
            return t
    return M


def fused_matmul(a, b, *, scale=None, shift=None, residual=None,
                 out_dtype=jnp.float32):
    """[M, K] @ [K, N] on the MXU in bf16 with f32 accumulation.

    Optional fused epilogues (mutually exclusive):
      * scale/shift [N]: per-column BN affine followed by LeakyReLU(0.1)
      * residual [M, N]: elementwise skip-connection add
    Full K and N live in one block (K <= 576, N <= 64 here), so the grid only
    iterates over M; B / scale / shift stay resident (same block index)."""
    M, K = a.shape
    K2, N = b.shape
    assert K == K2
    assert scale is None or residual is None
    a = a.astype(jnp.bfloat16)
    b = b.astype(jnp.bfloat16)
    tm = _pick_tm(M)

    in_specs = [pl.BlockSpec((tm, K), lambda i: (i, 0)),   # A tile
                pl.BlockSpec((K, N), lambda i: (0, 0))]    # full B, resident
    args = [a, b]
    if scale is not None:
        kernel = _mm_bn_lrelu_kernel
        in_specs += [pl.BlockSpec((1, N), lambda i: (0, 0)),
                     pl.BlockSpec((1, N), lambda i: (0, 0))]
        args += [scale.reshape(1, N).astype(jnp.float32),
                 shift.reshape(1, N).astype(jnp.float32)]
    elif residual is not None:
        kernel = _mm_residual_kernel
        in_specs += [pl.BlockSpec((tm, N), lambda i: (i, 0))]
        args += [residual.astype(jnp.float32)]
    else:
        kernel = _mm_kernel

    return pl.pallas_call(
        kernel,
        out_shape=jax.ShapeDtypeStruct((M, N), out_dtype),
        grid_spec=pltpu.PrefetchScalarGridSpec(
            num_scalar_prefetch=0,
            grid=(M // tm,),
            in_specs=in_specs,
            out_specs=pl.BlockSpec((tm, N), lambda i: (i, 0))),
        compiler_params=pltpu.CompilerParams(
            dimension_semantics=("parallel",)),
    )(*args)


def bn_leaky_relu_2d(x2d, scale, shift, out_dtype=jnp.float32):
    """Standalone fused inference-BN affine + LeakyReLU(0.1). x2d: [M, C]."""
    M, C = x2d.shape
    tm = _pick_tm(M, prefer=(1024, 512, 256, 128, 64, 32, 16, 8))
    return pl.pallas_call(
        _bn_lrelu_kernel,
        out_shape=jax.ShapeDtypeStruct((M, C), out_dtype),
        grid_spec=pltpu.PrefetchScalarGridSpec(
            num_scalar_prefetch=0,
            grid=(M // tm,),
            in_specs=[pl.BlockSpec((tm, C), lambda i: (i, 0)),
                      pl.BlockSpec((1, C), lambda i: (0, 0)),
                      pl.BlockSpec((1, C), lambda i: (0, 0))],
            out_specs=pl.BlockSpec((tm, C), lambda i: (i, 0))),
        compiler_params=pltpu.CompilerParams(
            dimension_semantics=("parallel",)),
    )(x2d.astype(jnp.float32),
      scale.reshape(1, C).astype(jnp.float32),
      shift.reshape(1, C).astype(jnp.float32))


# ----------------------------------------------------------------------------
# Layer helpers (glue: im2col / reshapes; all heavy math inside Pallas)
# ----------------------------------------------------------------------------
def _bn_affine(bn):
    scale = bn["gamma"] / jnp.sqrt(bn["var"] + _BN_EPS)
    shift = bn["beta"] - bn["mean"] * scale
    return scale, shift


def bn_leaky_relu(x, bn, out_dtype=jnp.float32):
    """x: NHWC. bn = dict(gamma, beta, mean, var)."""
    N, H, W, C = x.shape
    scale, shift = _bn_affine(bn)
    y = bn_leaky_relu_2d(x.reshape(N * H * W, C), scale, shift, out_dtype)
    return y.reshape(N, H, W, C)


def _im2col(x, kh, kw, stride, padding):
    """NHWC -> bf16 patches [N*Ho*Wo, kh*kw*Cin] via shifted slices (no gather)."""
    N, H, W, C = x.shape
    x = x.astype(jnp.bfloat16)          # halve the materialized patch bytes
    if padding:
        x = jnp.pad(x, ((0, 0), (padding, padding), (padding, padding), (0, 0)))
    Ho = (H + 2 * padding - kh) // stride + 1
    Wo = (W + 2 * padding - kw) // stride + 1
    cols = []
    for i in range(kh):
        for j in range(kw):
            cols.append(x[:, i:i + (Ho - 1) * stride + 1:stride,
                          j:j + (Wo - 1) * stride + 1:stride, :])
    patches = cols[0] if len(cols) == 1 else jnp.concatenate(cols, axis=-1)
    return patches.reshape(N * Ho * Wo, kh * kw * C), Ho, Wo


def conv2d(x, w, stride, padding, *, bn=None, residual=None,
           out_dtype=jnp.float32):
    """x: NHWC; w: PyTorch layout [Cout, Cin, kh, kw]; bias-free conv.

    bn: optional BN dict -> fused BN affine + LeakyReLU(0.1) epilogue.
    residual: optional NHWC tensor added in the epilogue (skip connection)."""
    Cout, Cin, kh, kw = w.shape
    N = x.shape[0]
    patches, Ho, Wo = _im2col(x, kh, kw, stride, padding)
    w2 = jnp.transpose(w, (2, 3, 1, 0)).reshape(kh * kw * Cin, Cout)
    scale = shift = res2d = None
    if bn is not None:
        scale, shift = _bn_affine(bn)
    if residual is not None:
        res2d = residual.reshape(N * Ho * Wo, Cout)
    out = fused_matmul(patches, w2, scale=scale, shift=shift,
                       residual=res2d, out_dtype=out_dtype)
    return out.reshape(N, Ho, Wo, Cout)


def basic_block(x, p):
    """Pre-activation BasicBlock (expansion=1), LeakyReLU slope 0.1.

      pre = lrelu(bn1(x))
      sc  = conv_sc(pre)  if planes/stride change, else x   (identity)
      h   = conv1(pre)    with fused bn2 + lrelu epilogue
      y   = conv2(h)      with fused '+ sc' epilogue
    """
    pre = bn_leaky_relu(x, p["bn1"], out_dtype=jnp.bfloat16)
    if "shortcut" in p:
        sc = conv2d(pre, p["shortcut"], stride=p["stride"], padding=0)
    else:
        sc = x
    h = conv2d(pre, p["conv1"], stride=p["stride"], padding=1,
               bn=p["bn2"], out_dtype=jnp.bfloat16)
    y = conv2d(h, p["conv2"], stride=1, padding=1, residual=sc)
    return y


def wideresnet_forward(params, x_nchw):
    """Reproduces WideResNet.forward(x) (default flags, eval-mode BN)."""
    x = jnp.transpose(x_nchw, (0, 2, 3, 1))            # NCHW -> NHWC
    f = conv2d(x, params["conv1"], stride=1, padding=1)   # f32: residual of blk 1
    for blk in params["layer1"] + params["layer2"] + params["layer3"]:
        f = basic_block(f, blk)
    out = bn_leaky_relu(f, params["bn1"])               # final pre-activation, f32
    # F.avg_pool2d(out, 8) on the 8x8 stage-3 map == global spatial mean, and
    # the 64->num_classes head is tiny -> keep both in plain JAX (per review).
    N, H, W, C = out.shape
    out4 = out.reshape(N, H * W, C).mean(axis=1)        # [N, C] == out.view(N, -1)
    logits = out4 @ params["linear_w"].T + params["linear_b"][None, :]
    return logits


# ----------------------------------------------------------------------------
# Deterministic parameter construction (matches __init__ shapes & init scheme)
# ----------------------------------------------------------------------------
def make_params(key, depth=10, width=1, num_classes=10):
    assert (depth - 4) % 6 == 0
    n = (depth - 4) // 6
    widths = [int(v * width) for v in (16, 32, 64)]

    keys = list(jax.random.split(key, 1024))
    kit = iter(keys)

    def kaiming_conv(cout, cin, kh, kw):
        fan_in = cin * kh * kw
        std = (2.0 / fan_in) ** 0.5
        return std * jax.random.normal(next(kit), (cout, cin, kh, kw), jnp.float32)

    def kaiming_linear(dout, din):
        std = (2.0 / din) ** 0.5
        return std * jax.random.normal(next(kit), (dout, din), jnp.float32)

    def bn_params(c):
        return dict(gamma=jax.random.uniform(next(kit), (c,), jnp.float32),
                    beta=jnp.zeros((c,), jnp.float32),
                    mean=jnp.zeros((c,), jnp.float32),
                    var=jnp.ones((c,), jnp.float32))

    params = {"conv1": kaiming_conv(16, 3, 3, 3)}
    in_planes = 16

    def make_layer(planes, num_blocks, stride):
        nonlocal in_planes
        blocks = []
        for s in [stride] + [1] * (num_blocks - 1):
            blk = dict(stride=s,
                       bn1=bn_params(in_planes),
                       conv1=kaiming_conv(planes, in_planes, 3, 3),
                       bn2=bn_params(planes),
                       conv2=kaiming_conv(planes, planes, 3, 3))
            if s != 1 or in_planes != planes:
                blk["shortcut"] = kaiming_conv(planes, in_planes, 1, 1)
            blocks.append(blk)
            in_planes = planes
        return blocks

    params["layer1"] = make_layer(widths[0], n, 1)
    params["layer2"] = make_layer(widths[1], n, 2)
    params["layer3"] = make_layer(widths[2], n, 2)
    params["bn1"] = bn_params(widths[2])
    params["linear_w"] = kaiming_linear(num_classes, widths[2])
    params["linear_b"] = jnp.zeros((num_classes,), jnp.float32)
    # linear_rot exists in __init__ but is unused by forward(); kept for parity.
    params["linear_rot_w"] = kaiming_linear(4, widths[2])
    params["linear_rot_b"] = jnp.zeros((4,), jnp.float32)
    return params


# ----------------------------------------------------------------------------
if __name__ == "__main__":
    key = jax.random.PRNGKey(0)
    pkey, xkey = jax.random.split(key)

    # WRN-10-1 (depth=10 -> 1 block per stage), CIFAR-style 32x32 input so that
    # avg_pool2d(out, 8) sees an exactly-8x8 feature map.
    params = make_params(pkey, depth=10, width=1, num_classes=10)
    x = jax.random.normal(xkey, (2, 3, 32, 32), jnp.float32)   # NCHW, like PyTorch

    fwd = jax.jit(functools.partial(wideresnet_forward, params))
    logits = fwd(x)
    jax.block_until_ready(logits)
    assert logits.shape == (2, 10), logits.shape
    assert jnp.all(jnp.isfinite(logits))
    print("KERNEL_OK")
</pallas_src>

<mosaic_0001>
module attributes {stable_mosaic.version = 11 : i64} {
  func.func @_mm_kernel(%arg0: i32, %arg1: memref<512x27xbf16, #tpu.memory_space<vmem>>, %arg2: memref<27x16xbf16, #tpu.memory_space<vmem>>, %arg3: memref<512x16xf32, #tpu.memory_space<vmem>>) attributes {dimension_semantics = [#tpu.dimension_semantics<parallel>], iteration_bounds = array<i64: 4>, scalar_prefetch = 0 : i64, scratch_operands = 0 : i64, tpu.core_type = #tpu.core_type<tc>, window_params = [{transform_indices = @transform_0, window_bounds = array<i64: 512, 27>}, {pipeline_mode = #tpu.pipeline_mode<synchronous>, transform_indices = @transform_1, window_bounds = array<i64: 27, 16>}, {transform_indices = @transform_2, window_bounds = array<i64: 512, 16>}]} {
    %c0 = arith.constant 0 : index
    %c0_0 = arith.constant 0 : index
    %0 = vector.load %arg1[%c0, %c0_0] : memref<512x27xbf16, #tpu.memory_space<vmem>>, vector<512x27xbf16>
    %c0_1 = arith.constant 0 : index
    %c0_2 = arith.constant 0 : index
    %1 = vector.load %arg2[%c0_1, %c0_2] : memref<27x16xbf16, #tpu.memory_space<vmem>>, vector<27x16xbf16>
    %cst = arith.constant dense<0.000000e+00> : vector<512x16xf32>
    %2 = tpu.matmul %0, %1, %cst {dimension_numbers = #tpu.dot_dimension_numbers<[1], [0], [0], [1], [0, 0, 1, 1], [], []>} : vector<512x27xbf16>, vector<27x16xbf16>, vector<512x16xf32> -> vector<512x16xf32>
    %c0_3 = arith.constant 0 : index
    %c0_4 = arith.constant 0 : index
    %3 = vector.load %arg3[%c0_3, %c0_4] : memref<512x16xf32, #tpu.memory_space<vmem>>, vector<512x16xf32>
    tpu.vector_store %arg3[%c0_3, %c0_4], %2 {strides = array<i32>} : memref<512x16xf32, #tpu.memory_space<vmem>>, vector<512x16xf32>,
    return
  }
  func.func @transform_0(%arg0: i32) -> (i32, i32) {
    %c0_i32 = arith.constant 0 : i32
    %c0_i32_0 = arith.constant 0 : i32
    return %arg0, %c0_i32 : i32, i32
  }
  func.func @transform_1(%arg0: i32) -> (i32, i32) {
    %c0_i32 = arith.constant 0 : i32
    %c0_i32_0 = arith.constant 0 : i32
    %c0_i32_1 = arith.constant 0 : i32
    return %c0_i32, %c0_i32_0 : i32, i32
  }
  func.func @transform_2(%arg0: i32) -> (i32, i32) {
    %c0_i32 = arith.constant 0 : i32
    %c0_i32_0 = arith.constant 0 : i32
    return %arg0, %c0_i32 : i32, i32
  }
}

module attributes {stable_mosaic.version = 11 : i64} {
  func.func @_bn_lrelu_kernel(%arg0: i32, %arg1: memref<1024x16xf32, #tpu.memory_space<vmem>>, %arg2: memref<1x16xf32, #tpu.memory_space<vmem>>, %arg3: memref<1x16xf32, #tpu.memory_space<vmem>>, %arg4: memref<1024x16xbf16, #tpu.memory_space<vmem>>) attributes {dimension_semantics = [#tpu.dimension_semantics<parallel>], iteration_bounds = array<i64: 2>, scalar_prefetch = 0 : i64, scratch_operands = 0 : i64, tpu.core_type = #tpu.core_type<tc>, window_params = [{transform_indices = @transform_0, window_bounds = array<i64: 1024, 16>}, {pipeline_mode = #tpu.pipeline_mode<synchronous>, transform_indices = @transform_1, window_bounds = array<i64: 1, 16>}, {pipeline_mode = #tpu.pipeline_mode<synchronous>, transform_indices = @transform_2, window_bounds = array<i64: 1, 16>}, {transform_indices = @transform_3, window_bounds = array<i64: 1024, 16>}]} {
    %c0 = arith.constant 0 : index
    %c0_0 = arith.constant 0 : index
    %0 = vector.load %arg1[%c0, %c0_0] : memref<1024x16xf32, #tpu.memory_space<vmem>>, vector<1024x16xf32>
    %c0_1 = arith.constant 0 : index
    %c0_2 = arith.constant 0 : index
    %1 = vector.load %arg2[%c0_1, %c0_2] : memref<1x16xf32, #tpu.memory_space<vmem>>, vector<1x16xf32>
    %2 = vector.broadcast %1 : vector<1x16xf32> to vector<1024x16xf32>
    %3 = arith.mulf %0, %2 : vector<1024x16xf32>
    %c0_3 = arith.constant 0 : index
    %c0_4 = arith.constant 0 : index
    %4 = vector.load %arg3[%c0_3, %c0_4] : memref<1x16xf32, #tpu.memory_space<vmem>>, vector<1x16xf32>
    %5 = vector.broadcast %4 : vector<1x16xf32> to vector<1024x16xf32>
    %6 = arith.addf %3, %5 : vector<1024x16xf32>
    %cst = arith.constant 0.000000e+00 : f32
    %7 = vector.broadcast %cst : f32 to vector<1024x16xf32>
    %8 = arith.cmpf oge, %6, %7 : vector<1024x16xf32>
    %cst_5 = arith.constant 1.000000e-01 : f32
    %9 = vector.broadcast %cst_5 : f32 to vector<1024x16xf32>
    %10 = arith.mulf %9, %6 : vector<1024x16xf32>
    %11 = arith.select %8, %6, %10 : vector<1024x16xi1>, vector<1024x16xf32>
    %12 = arith.truncf %11 : vector<1024x16xf32> to vector<1024x16xbf16>
    %c0_6 = arith.constant 0 : index
    %c0_7 = arith.constant 0 : index
    %13 = vector.load %arg4[%c0_6, %c0_7] : memref<1024x16xbf16, #tpu.memory_space<vmem>>, vector<1024x16xbf16>
    tpu.vector_store %arg4[%c0_6, %c0_7], %12 {strides = array<i32>} : memref<1024x16xbf16, #tpu.memory_space<vmem>>, vector<1024x16xbf16>,
    return
  }
  func.func @transform_0(%arg0: i32) -> (i32, i32) {
    %c0_i32 = arith.constant 0 : i32
    %c0_i32_0 = arith.constant 0 : i32
    return %arg0, %c0_i32 : i32, i32
  }
  func.func @transform_1(%arg0: i32) -> (i32, i32) {
    %c0_i32 = arith.constant 0 : i32
    %c0_i32_0 = arith.constant 0 : i32
    %c0_i32_1 = arith.constant 0 : i32
    return %c0_i32, %c0_i32_0 : i32, i32
  }
  func.func @transform_2(%arg0: i32) -> (i32, i32) {
    %c0_i32 = arith.constant 0 : i32
    %c0_i32_0 = arith.constant 0 : i32
    %c0_i32_1 = arith.constant 0 : i32
    return %c0_i32, %c0_i32_0 : i32, i32
  }
  func.func @transform_3(%arg0: i32) -> (i32, i32) {
    %c0_i32 = arith.constant 0 : i32
    %c0_i32_0 = arith.constant 0 : i32
    return %arg0, %c0_i32 : i32, i32
  }
}

module attributes {stable_mosaic.version = 11 : i64} {
  func.func @_mm_bn_lrelu_kernel(%arg0: i32, %arg1: memref<512x144xbf16, #tpu.memory_space<vmem>>, %arg2: memref<144x16xbf16, #tpu.memory_space<vmem>>, %arg3: memref<1x16xf32, #tpu.memory_space<vmem>>, %arg4: memref<1x16xf32, #tpu.memory_space<vmem>>, %arg5: memref<512x16xbf16, #tpu.memory_space<vmem>>) attributes {dimension_semantics = [#tpu.dimension_semantics<parallel>], iteration_bounds = array<i64: 4>, scalar_prefetch = 0 : i64, scratch_operands = 0 : i64, tpu.core_type = #tpu.core_type<tc>, window_params = [{transform_indices = @transform_0, window_bounds = array<i64: 512, 144>}, {pipeline_mode = #tpu.pipeline_mode<synchronous>, transform_indices = @transform_1, window_bounds = array<i64: 144, 16>}, {pipeline_mode = #tpu.pipeline_mode<synchronous>, transform_indices = @transform_2, window_bounds = array<i64: 1, 16>}, {pipeline_mode = #tpu.pipeline_mode<synchronous>, transform_indices = @transform_3, window_bounds = array<i64: 1, 16>}, {transform_indices = @transform_4, window_bounds = array<i64: 512, 16>}]} {
    %c0 = arith.constant 0 : index
    %c0_0 = arith.constant 0 : index
    %0 = vector.load %arg1[%c0, %c0_0] : memref<512x144xbf16, #tpu.memory_space<vmem>>, vector<512x144xbf16>
    %c0_1 = arith.constant 0 : index
    %c0_2 = arith.constant 0 : index
    %1 = vector.load %arg2[%c0_1, %c0_2] : memref<144x16xbf16, #tpu.memory_space<vmem>>, vector<144x16xbf16>
    %cst = arith.constant dense<0.000000e+00> : vector<512x16xf32>
    %2 = tpu.matmul %0, %1, %cst {dimension_numbers = #tpu.dot_dimension_numbers<[1], [0], [0], [1], [0, 0, 1, 1], [], []>} : vector<512x144xbf16>, vector<144x16xbf16>, vector<512x16xf32> -> vector<512x16xf32>
    %c0_3 = arith.constant 0 : index
    %c0_4 = arith.constant 0 : index
    %3 = vector.load %arg3[%c0_3, %c0_4] : memref<1x16xf32, #tpu.memory_space<vmem>>, vector<1x16xf32>
    %4 = vector.broadcast %3 : vector<1x16xf32> to vector<512x16xf32>
    %5 = arith.mulf %2, %4 : vector<512x16xf32>
    %c0_5 = arith.constant 0 : index
    %c0_6 = arith.constant 0 : index
    %6 = vector.load %arg4[%c0_5, %c0_6] : memref<1x16xf32, #tpu.memory_space<vmem>>, vector<1x16xf32>
    %7 = vector.broadcast %6 : vector<1x16xf32> to vector<512x16xf32>
    %8 = arith.addf %5, %7 : vector<512x16xf32>
    %cst_7 = arith.constant 0.000000e+00 : f32
    %9 = vector.broadcast %cst_7 : f32 to vector<512x16xf32>
    %10 = arith.cmpf oge, %8, %9 : vector<512x16xf32>
    %cst_8 = arith.constant 1.000000e-01 : f32
    %11 = vector.broadcast %cst_8 : f32 to vector<512x16xf32>
    %12 = arith.mulf %11, %8 : vector<512x16xf32>
    %13 = arith.select %10, %8, %12 : vector<512x16xi1>, vector<512x16xf32>
    %14 = arith.truncf %13 : vector<512x16xf32> to vector<512x16xbf16>
    %c0_9 = arith.constant 0 : index
    %c0_10 = arith.constant 0 : index
    %15 = vector.load %arg5[%c0_9, %c0_10] : memref<512x16xbf16, #tpu.memory_space<vmem>>, vector<512x16xbf16>
    tpu.vector_store %arg5[%c0_9, %c0_10], %14 {strides = array<i32>} : memref<512x16xbf16, #tpu.memory_space<vmem>>, vector<512x16xbf16>,
    return
  }
  func.func @transform_0(%arg0: i32) -> (i32, i32) {
    %c0_i32 = arith.constant 0 : i32
    %c0_i32_0 = arith.constant 0 : i32
    return %arg0, %c0_i32 : i32, i32
  }
  func.func @transform_1(%arg0: i32) -> (i32, i32) {
    %c0_i32 = arith.constant 0 : i32
    %c0_i32_0 = arith.constant 0 : i32
    %c0_i32_1 = arith.constant 0 : i32
    return %c0_i32, %c0_i32_0 : i32, i32
  }
  func.func @transform_2(%arg0: i32) -> (i32, i32) {
    %c0_i32 = arith.constant 0 : i32
    %c0_i32_0 = arith.constant 0 : i32
    %c0_i32_1 = arith.constant 0 : i32
    return %c0_i32, %c0_i32_0 : i32, i32
  }
  func.func @transform_3(%arg0: i32) -> (i32, i32) {
    %c0_i32 = arith.constant 0 : i32
    %c0_i32_0 = arith.constant 0 : i32
    %c0_i32_1 = arith.constant 0 : i32
    return %c0_i32, %c0_i32_0 : i32, i32
  }
  func.func @transform_4(%arg0: i32) -> (i32, i32) {
    %c0_i32 = arith.constant 0 : i32
    %c0_i32_0 = arith.constant 0 : i32
    return %arg0, %c0_i32 : i32, i32
  }
}

module attributes {stable_mosaic.version = 11 : i64} {
  func.func @_mm_residual_kernel(%arg0: i32, %arg1: memref<512x144xbf16, #tpu.memory_space<vmem>>, %arg2: memref<144x16xbf16, #tpu.memory_space<vmem>>, %arg3: memref<512x16xf32, #tpu.memory_space<vmem>>, %arg4: memref<512x16xf32, #tpu.memory_space<vmem>>) attributes {dimension_semantics = [#tpu.dimension_semantics<parallel>], iteration_bounds = array<i64: 4>, scalar_prefetch = 0 : i64, scratch_operands = 0 : i64, tpu.core_type = #tpu.core_type<tc>, window_params = [{transform_indices = @transform_0, window_bounds = array<i64: 512, 144>}, {pipeline_mode = #tpu.pipeline_mode<synchronous>, transform_indices = @transform_1, window_bounds = array<i64: 144, 16>}, {transform_indices = @transform_2, window_bounds = array<i64: 512, 16>}, {transform_indices = @transform_3, window_bounds = array<i64: 512, 16>}]} {
    %c0 = arith.constant 0 : index
    %c0_0 = arith.constant 0 : index
    %0 = vector.load %arg1[%c0, %c0_0] : memref<512x144xbf16, #tpu.memory_space<vmem>>, vector<512x144xbf16>
    %c0_1 = arith.constant 0 : index
    %c0_2 = arith.constant 0 : index
    %1 = vector.load %arg2[%c0_1, %c0_2] : memref<144x16xbf16, #tpu.memory_space<vmem>>, vector<144x16xbf16>
    %cst = arith.constant dense<0.000000e+00> : vector<512x16xf32>
    %2 = tpu.matmul %0, %1, %cst {dimension_numbers = #tpu.dot_dimension_numbers<[1], [0], [0], [1], [0, 0, 1, 1], [], []>} : vector<512x144xbf16>, vector<144x16xbf16>, vector<512x16xf32> -> vector<512x16xf32>
    %c0_3 = arith.constant 0 : index
    %c0_4 = arith.constant 0 : index
    %3 = vector.load %arg3[%c0_3, %c0_4] : memref<512x16xf32, #tpu.memory_space<vmem>>, vector<512x16xf32>
    %4 = arith.addf %2, %3 : vector<512x16xf32>
    %c0_5 = arith.constant 0 : index
    %c0_6 = arith.constant 0 : index
    %5 = vector.load %arg4[%c0_5, %c0_6] : memref<512x16xf32, #tpu.memory_space<vmem>>, vector<512x16xf32>
    tpu.vector_store %arg4[%c0_5, %c0_6], %4 {strides = array<i32>} : memref<512x16xf32, #tpu.memory_space<vmem>>, vector<512x16xf32>,
    return
  }
  func.func @transform_0(%arg0: i32) -> (i32, i32) {
    %c0_i32 = arith.constant 0 : i32
    %c0_i32_0 = arith.constant 0 : i32
    return %arg0, %c0_i32 : i32, i32
  }
  func.func @transform_1(%arg0: i32) -> (i32, i32) {
    %c0_i32 = arith.constant 0 : i32
    %c0_i32_0 = arith.constant 0 : i32
    %c0_i32_1 = arith.constant 0 : i32
    return %c0_i32, %c0_i32_0 : i32, i32
  }
  func.func @transform_2(%arg0: i32) -> (i32, i32) {
    %c0_i32 = arith.constant 0 : i32
    %c0_i32_0 = arith.constant 0 : i32
    return %arg0, %c0_i32 : i32, i32
  }
  func.func @transform_3(%arg0: i32) -> (i32, i32) {
    %c0_i32 = arith.constant 0 : i32
    %c0_i32_0 = arith.constant 0 : i32
    return %arg0, %c0_i32 : i32, i32
  }
}

module attributes {stable_mosaic.version = 11 : i64} {
  func.func @_mm_bn_lrelu_kernel(%arg0: i32, %arg1: memref<256x144xbf16, #tpu.memory_space<vmem>>, %arg2: memref<144x32xbf16, #tpu.memory_space<vmem>>, %arg3: memref<1x32xf32, #tpu.memory_space<vmem>>, %arg4: memref<1x32xf32, #tpu.memory_space<vmem>>, %arg5: memref<256x32xbf16, #tpu.memory_space<vmem>>) attributes {dimension_semantics = [#tpu.dimension_semantics<parallel>], iteration_bounds = array<i64: 2>, scalar_prefetch = 0 : i64, scratch_operands = 0 : i64, tpu.core_type = #tpu.core_type<tc>, window_params = [{transform_indices = @transform_0, window_bounds = array<i64: 256, 144>}, {pipeline_mode = #tpu.pipeline_mode<synchronous>, transform_indices = @transform_1, window_bounds = array<i64: 144, 32>}, {pipeline_mode = #tpu.pipeline_mode<synchronous>, transform_indices = @transform_2, window_bounds = array<i64: 1, 32>}, {pipeline_mode = #tpu.pipeline_mode<synchronous>, transform_indices = @transform_3, window_bounds = array<i64: 1, 32>}, {transform_indices = @transform_4, window_bounds = array<i64: 256, 32>}]} {
    %c0 = arith.constant 0 : index
    %c0_0 = arith.constant 0 : index
    %0 = vector.load %arg1[%c0, %c0_0] : memref<256x144xbf16, #tpu.memory_space<vmem>>, vector<256x144xbf16>
    %c0_1 = arith.constant 0 : index
    %c0_2 = arith.constant 0 : index
    %1 = vector.load %arg2[%c0_1, %c0_2] : memref<144x32xbf16, #tpu.memory_space<vmem>>, vector<144x32xbf16>
    %cst = arith.constant dense<0.000000e+00> : vector<256x32xf32>
    %2 = tpu.matmul %0, %1, %cst {dimension_numbers = #tpu.dot_dimension_numbers<[1], [0], [0], [1], [0, 0, 1, 1], [], []>} : vector<256x144xbf16>, vector<144x32xbf16>, vector<256x32xf32> -> vector<256x32xf32>
    %c0_3 = arith.constant 0 : index
    %c0_4 = arith.constant 0 : index
    %3 = vector.load %arg3[%c0_3, %c0_4] : memref<1x32xf32, #tpu.memory_space<vmem>>, vector<1x32xf32>
    %4 = vector.broadcast %3 : vector<1x32xf32> to vector<256x32xf32>
    %5 = arith.mulf %2, %4 : vector<256x32xf32>
    %c0_5 = arith.constant 0 : index
    %c0_6 = arith.constant 0 : index
    %6 = vector.load %arg4[%c0_5, %c0_6] : memref<1x32xf32, #tpu.memory_space<vmem>>, vector<1x32xf32>
    %7 = vector.broadcast %6 : vector<1x32xf32> to vector<256x32xf32>
    %8 = arith.addf %5, %7 : vector<256x32xf32>
    %cst_7 = arith.constant 0.000000e+00 : f32
    %9 = vector.broadcast %cst_7 : f32 to vector<256x32xf32>
    %10 = arith.cmpf oge, %8, %9 : vector<256x32xf32>
    %cst_8 = arith.constant 1.000000e-01 : f32
    %11 = vector.broadcast %cst_8 : f32 to vector<256x32xf32>
    %12 = arith.mulf %11, %8 : vector<256x32xf32>
    %13 = arith.select %10, %8, %12 : vector<256x32xi1>, vector<256x32xf32>
    %14 = arith.truncf %13 : vector<256x32xf32> to vector<256x32xbf16>
    %c0_9 = arith.constant 0 : index
    %c0_10 = arith.constant 0 : index
    %15 = vector.load %arg5[%c0_9, %c0_10] : memref<256x32xbf16, #tpu.memory_space<vmem>>, vector<256x32xbf16>
    tpu.vector_store %arg5[%c0_9, %c0_10], %14 {strides = array<i32>} : memref<256x32xbf16, #tpu.memory_space<vmem>>, vector<256x32xbf16>,
    return
  }
  func.func @transform_0(%arg0: i32) -> (i32, i32) {
    %c0_i32 = arith.constant 0 : i32
    %c0_i32_0 = arith.constant 0 : i32
    return %arg0, %c0_i32 : i32, i32
  }
  func.func @transform_1(%arg0: i32) -> (i32, i32) {
    %c0_i32 = arith.constant 0 : i32
    %c0_i32_0 = arith.constant 0 : i32
    %c0_i32_1 = arith.constant 0 : i32
    return %c0_i32, %c0_i32_0 : i32, i32
  }
  func.func @transform_2(%arg0: i32) -> (i32, i32) {
    %c0_i32 = arith.constant 0 : i32
    %c0_i32_0 = arith.constant 0 : i32
    %c0_i32_1 = arith.constant 0 : i32
    return %c0_i32, %c0_i32_0 : i32, i32
  }
  func.func @transform_3(%arg0: i32) -> (i32, i32) {
    %c0_i32 = arith.constant 0 : i32
    %c0_i32_0 = arith.constant 0 : i32
    %c0_i32_1 = arith.constant 0 : i32
    return %c0_i32, %c0_i32_0 : i32, i32
  }
  func.func @transform_4(%arg0: i32) -> (i32, i32) {
    %c0_i32 = arith.constant 0 : i32
    %c0_i32_0 = arith.constant 0 : i32
    return %arg0, %c0_i32 : i32, i32
  }
}

module attributes {stable_mosaic.version = 11 : i64} {
  func.func @_mm_kernel(%arg0: i32, %arg1: memref<256x16xbf16, #tpu.memory_space<vmem>>, %arg2: memref<16x32xbf16, #tpu.memory_space<vmem>>, %arg3: memref<256x32xf32, #tpu.memory_space<vmem>>) attributes {dimension_semantics = [#tpu.dimension_semantics<parallel>], iteration_bounds = array<i64: 2>, scalar_prefetch = 0 : i64, scratch_operands = 0 : i64, tpu.core_type = #tpu.core_type<tc>, window_params = [{transform_indices = @transform_0, window_bounds = array<i64: 256, 16>}, {pipeline_mode = #tpu.pipeline_mode<synchronous>, transform_indices = @transform_1, window_bounds = array<i64: 16, 32>}, {transform_indices = @transform_2, window_bounds = array<i64: 256, 32>}]} {
    %c0 = arith.constant 0 : index
    %c0_0 = arith.constant 0 : index
    %0 = vector.load %arg1[%c0, %c0_0] : memref<256x16xbf16, #tpu.memory_space<vmem>>, vector<256x16xbf16>
    %c0_1 = arith.constant 0 : index
    %c0_2 = arith.constant 0 : index
    %1 = vector.load %arg2[%c0_1, %c0_2] : memref<16x32xbf16, #tpu.memory_space<vmem>>, vector<16x32xbf16>
    %cst = arith.constant dense<0.000000e+00> : vector<256x32xf32>
    %2 = tpu.matmul %0, %1, %cst {dimension_numbers = #tpu.dot_dimension_numbers<[1], [0], [0], [1], [0, 0, 1, 1], [], []>} : vector<256x16xbf16>, vector<16x32xbf16>, vector<256x32xf32> -> vector<256x32xf32>
    %c0_3 = arith.constant 0 : index
    %c0_4 = arith.constant 0 : index
    %3 = vector.load %arg3[%c0_3, %c0_4] : memref<256x32xf32, #tpu.memory_space<vmem>>, vector<256x32xf32>
    tpu.vector_store %arg3[%c0_3, %c0_4], %2 {strides = array<i32>} : memref<256x32xf32, #tpu.memory_space<vmem>>, vector<256x32xf32>,
    return
  }
  func.func @transform_0(%arg0: i32) -> (i32, i32) {
    %c0_i32 = arith.constant 0 : i32
    %c0_i32_0 = arith.constant 0 : i32
    return %arg0, %c0_i32 : i32, i32
  }
  func.func @transform_1(%arg0: i32) -> (i32, i32) {
    %c0_i32 = arith.constant 0 : i32
    %c0_i32_0 = arith.constant 0 : i32
    %c0_i32_1 = arith.constant 0 : i32
    return %c0_i32, %c0_i32_0 : i32, i32
  }
  func.func @transform_2(%arg0: i32) -> (i32, i32) {
    %c0_i32 = arith.constant 0 : i32
    %c0_i32_0 = arith.constant 0 : i32
    return %arg0, %c0_i32 : i32, i32
  }
}

module attributes {stable_mosaic.version = 11 : i64} {
  func.func @_mm_residual_kernel(%arg0: i32, %arg1: memref<256x288xbf16, #tpu.memory_space<vmem>>, %arg2: memref<288x32xbf16, #tpu.memory_space<vmem>>, %arg3: memref<256x32xf32, #tpu.memory_space<vmem>>, %arg4: memref<256x32xf32, #tpu.memory_space<vmem>>) attributes {dimension_semantics = [#tpu.dimension_semantics<parallel>], iteration_bounds = array<i64: 2>, scalar_prefetch = 0 : i64, scratch_operands = 0 : i64, tpu.core_type = #tpu.core_type<tc>, window_params = [{transform_indices = @transform_0, window_bounds = array<i64: 256, 288>}, {pipeline_mode = #tpu.pipeline_mode<synchronous>, transform_indices = @transform_1, window_bounds = array<i64: 288, 32>}, {transform_indices = @transform_2, window_bounds = array<i64: 256, 32>}, {transform_indices = @transform_3, window_bounds = array<i64: 256, 32>}]} {
    %c0 = arith.constant 0 : index
    %c0_0 = arith.constant 0 : index
    %0 = vector.load %arg1[%c0, %c0_0] : memref<256x288xbf16, #tpu.memory_space<vmem>>, vector<256x288xbf16>
    %c0_1 = arith.constant 0 : index
    %c0_2 = arith.constant 0 : index
    %1 = vector.load %arg2[%c0_1, %c0_2] : memref<288x32xbf16, #tpu.memory_space<vmem>>, vector<288x32xbf16>
    %cst = arith.constant dense<0.000000e+00> : vector<256x32xf32>
    %2 = tpu.matmul %0, %1, %cst {dimension_numbers = #tpu.dot_dimension_numbers<[1], [0], [0], [1], [0, 0, 1, 1], [], []>} : vector<256x288xbf16>, vector<288x32xbf16>, vector<256x32xf32> -> vector<256x32xf32>
    %c0_3 = arith.constant 0 : index
    %c0_4 = arith.constant 0 : index
    %3 = vector.load %arg3[%c0_3, %c0_4] : memref<256x32xf32, #tpu.memory_space<vmem>>, vector<256x32xf32>
    %4 = arith.addf %2, %3 : vector<256x32xf32>
    %c0_5 = arith.constant 0 : index
    %c0_6 = arith.constant 0 : index
    %5 = vector.load %arg4[%c0_5, %c0_6] : memref<256x32xf32, #tpu.memory_space<vmem>>, vector<256x32xf32>
    tpu.vector_store %arg4[%c0_5, %c0_6], %4 {strides = array<i32>} : memref<256x32xf32, #tpu.memory_space<vmem>>, vector<256x32xf32>,
    return
  }
  func.func @transform_0(%arg0: i32) -> (i32, i32) {
    %c0_i32 = arith.constant 0 : i32
    %c0_i32_0 = arith.constant 0 : i32
    return %arg0, %c0_i32 : i32, i32
  }
  func.func @transform_1(%arg0: i32) -> (i32, i32) {
    %c0_i32 = arith.constant 0 : i32
    %c0_i32_0 = arith.constant 0 : i32
    %c0_i32_1 = arith.constant 0 : i32
    return %c0_i32, %c0_i32_0 : i32, i32
  }
  func.func @transform_2(%arg0: i32) -> (i32, i32) {
    %c0_i32 = arith.constant 0 : i32
    %c0_i32_0 = arith.constant 0 : i32
    return %arg0, %c0_i32 : i32, i32
  }
  func.func @transform_3(%arg0: i32) -> (i32, i32) {
    %c0_i32 = arith.constant 0 : i32
    %c0_i32_0 = arith.constant 0 : i32
    return %arg0, %c0_i32 : i32, i32
  }
}

module attributes {stable_mosaic.version = 11 : i64} {
  func.func @_bn_lrelu_kernel(%arg0: i32, %arg1: memref<256x32xf32, #tpu.memory_space<vmem>>, %arg2: memref<1x32xf32, #tpu.memory_space<vmem>>, %arg3: memref<1x32xf32, #tpu.memory_space<vmem>>, %arg4: memref<256x32xbf16, #tpu.memory_space<vmem>>) attributes {dimension_semantics = [#tpu.dimension_semantics<parallel>], iteration_bounds = array<i64: 2>, scalar_prefetch = 0 : i64, scratch_operands = 0 : i64, tpu.core_type = #tpu.core_type<tc>, window_params = [{transform_indices = @transform_0, window_bounds = array<i64: 256, 32>}, {pipeline_mode = #tpu.pipeline_mode<synchronous>, transform_indices = @transform_1, window_bounds = array<i64: 1, 32>}, {pipeline_mode = #tpu.pipeline_mode<synchronous>, transform_indices = @transform_2, window_bounds = array<i64: 1, 32>}, {transform_indices = @transform_3, window_bounds = array<i64: 256, 32>}]} {
    %c0 = arith.constant 0 : index
    %c0_0 = arith.constant 0 : index
    %0 = vector.load %arg1[%c0, %c0_0] : memref<256x32xf32, #tpu.memory_space<vmem>>, vector<256x32xf32>
    %c0_1 = arith.constant 0 : index
    %c0_2 = arith.constant 0 : index
    %1 = vector.load %arg2[%c0_1, %c0_2] : memref<1x32xf32, #tpu.memory_space<vmem>>, vector<1x32xf32>
    %2 = vector.broadcast %1 : vector<1x32xf32> to vector<256x32xf32>
    %3 = arith.mulf %0, %2 : vector<256x32xf32>
    %c0_3 = arith.constant 0 : index
    %c0_4 = arith.constant 0 : index
    %4 = vector.load %arg3[%c0_3, %c0_4] : memref<1x32xf32, #tpu.memory_space<vmem>>, vector<1x32xf32>
    %5 = vector.broadcast %4 : vector<1x32xf32> to vector<256x32xf32>
    %6 = arith.addf %3, %5 : vector<256x32xf32>
    %cst = arith.constant 0.000000e+00 : f32
    %7 = vector.broadcast %cst : f32 to vector<256x32xf32>
    %8 = arith.cmpf oge, %6, %7 : vector<256x32xf32>
    %cst_5 = arith.constant 1.000000e-01 : f32
    %9 = vector.broadcast %cst_5 : f32 to vector<256x32xf32>
    %10 = arith.mulf %9, %6 : vector<256x32xf32>
    %11 = arith.select %8, %6, %10 : vector<256x32xi1>, vector<256x32xf32>
    %12 = arith.truncf %11 : vector<256x32xf32> to vector<256x32xbf16>
    %c0_6 = arith.constant 0 : index
    %c0_7 = arith.constant 0 : index
    %13 = vector.load %arg4[%c0_6, %c0_7] : memref<256x32xbf16, #tpu.memory_space<vmem>>, vector<256x32xbf16>
    tpu.vector_store %arg4[%c0_6, %c0_7], %12 {strides = array<i32>} : memref<256x32xbf16, #tpu.memory_space<vmem>>, vector<256x32xbf16>,
    return
  }
  func.func @transform_0(%arg0: i32) -> (i32, i32) {
    %c0_i32 = arith.constant 0 : i32
    %c0_i32_0 = arith.constant 0 : i32
    return %arg0, %c0_i32 : i32, i32
  }
  func.func @transform_1(%arg0: i32) -> (i32, i32) {
    %c0_i32 = arith.constant 0 : i32
    %c0_i32_0 = arith.constant 0 : i32
    %c0_i32_1 = arith.constant 0 : i32
    return %c0_i32, %c0_i32_0 : i32, i32
  }
  func.func @transform_2(%arg0: i32) -> (i32, i32) {
    %c0_i32 = arith.constant 0 : i32
    %c0_i32_0 = arith.constant 0 : i32
    %c0_i32_1 = arith.constant 0 : i32
    return %c0_i32, %c0_i32_0 : i32, i32
  }
  func.func @transform_3(%arg0: i32) -> (i32, i32) {
    %c0_i32 = arith.constant 0 : i32
    %c0_i32_0 = arith.constant 0 : i32
    return %arg0, %c0_i32 : i32, i32
  }
}

module attributes {stable_mosaic.version = 11 : i64} {
  func.func @_mm_bn_lrelu_kernel(%arg0: i32, %arg1: memref<64x288xbf16, #tpu.memory_space<vmem>>, %arg2: memref<288x64xbf16, #tpu.memory_space<vmem>>, %arg3: memref<1x64xf32, #tpu.memory_space<vmem>>, %arg4: memref<1x64xf32, #tpu.memory_space<vmem>>, %arg5: memref<64x64xbf16, #tpu.memory_space<vmem>>) attributes {dimension_semantics = [#tpu.dimension_semantics<parallel>], iteration_bounds = array<i64: 2>, scalar_prefetch = 0 : i64, scratch_operands = 0 : i64, tpu.core_type = #tpu.core_type<tc>, window_params = [{transform_indices = @transform_0, window_bounds = array<i64: 64, 288>}, {pipeline_mode = #tpu.pipeline_mode<synchronous>, transform_indices = @transform_1, window_bounds = array<i64: 288, 64>}, {pipeline_mode = #tpu.pipeline_mode<synchronous>, transform_indices = @transform_2, window_bounds = array<i64: 1, 64>}, {pipeline_mode = #tpu.pipeline_mode<synchronous>, transform_indices = @transform_3, window_bounds = array<i64: 1, 64>}, {transform_indices = @transform_4, window_bounds = array<i64: 64, 64>}]} {
    %c0 = arith.constant 0 : index
    %c0_0 = arith.constant 0 : index
    %0 = vector.load %arg1[%c0, %c0_0] : memref<64x288xbf16, #tpu.memory_space<vmem>>, vector<64x288xbf16>
    %c0_1 = arith.constant 0 : index
    %c0_2 = arith.constant 0 : index
    %1 = vector.load %arg2[%c0_1, %c0_2] : memref<288x64xbf16, #tpu.memory_space<vmem>>, vector<288x64xbf16>
    %cst = arith.constant dense<0.000000e+00> : vector<64x64xf32>
    %2 = tpu.matmul %0, %1, %cst {dimension_numbers = #tpu.dot_dimension_numbers<[1], [0], [0], [1], [0, 0, 1, 1], [], []>} : vector<64x288xbf16>, vector<288x64xbf16>, vector<64x64xf32> -> vector<64x64xf32>
    %c0_3 = arith.constant 0 : index
    %c0_4 = arith.constant 0 : index
    %3 = vector.load %arg3[%c0_3, %c0_4] : memref<1x64xf32, #tpu.memory_space<vmem>>, vector<1x64xf32>
    %4 = vector.broadcast %3 : vector<1x64xf32> to vector<64x64xf32>
    %5 = arith.mulf %2, %4 : vector<64x64xf32>
    %c0_5 = arith.constant 0 : index
    %c0_6 = arith.constant 0 : index
    %6 = vector.load %arg4[%c0_5, %c0_6] : memref<1x64xf32, #tpu.memory_space<vmem>>, vector<1x64xf32>
    %7 = vector.broadcast %6 : vector<1x64xf32> to vector<64x64xf32>
    %8 = arith.addf %5, %7 : vector<64x64xf32>
    %cst_7 = arith.constant 0.000000e+00 : f32
    %9 = vector.broadcast %cst_7 : f32 to vector<64x64xf32>
    %10 = arith.cmpf oge, %8, %9 : vector<64x64xf32>
    %cst_8 = arith.constant 1.000000e-01 : f32
    %11 = vector.broadcast %cst_8 : f32 to vector<64x64xf32>
    %12 = arith.mulf %11, %8 : vector<64x64xf32>
    %13 = arith.select %10, %8, %12 : vector<64x64xi1>, vector<64x64xf32>
    %14 = arith.truncf %13 : vector<64x64xf32> to vector<64x64xbf16>
    %c0_9 = arith.constant 0 : index
    %c0_10 = arith.constant 0 : index
    %15 = vector.load %arg5[%c0_9, %c0_10] : memref<64x64xbf16, #tpu.memory_space<vmem>>, vector<64x64xbf16>
    tpu.vector_store %arg5[%c0_9, %c0_10], %14 {strides = array<i32>} : memref<64x64xbf16, #tpu.memory_space<vmem>>, vector<64x64xbf16>,
    return
  }
  func.func @transform_0(%arg0: i32) -> (i32, i32) {
    %c0_i32 = arith.constant 0 : i32
    %c0_i32_0 = arith.constant 0 : i32
    return %arg0, %c0_i32 : i32, i32
  }
  func.func @transform_1(%arg0: i32) -> (i32, i32) {
    %c0_i32 = arith.constant 0 : i32
    %c0_i32_0 = arith.constant 0 : i32
    %c0_i32_1 = arith.constant 0 : i32
    return %c0_i32, %c0_i32_0 : i32, i32
  }
  func.func @transform_2(%arg0: i32) -> (i32, i32) {
    %c0_i32 = arith.constant 0 : i32
    %c0_i32_0 = arith.constant 0 : i32
    %c0_i32_1 = arith.constant 0 : i32
    return %c0_i32, %c0_i32_0 : i32, i32
  }
  func.func @transform_3(%arg0: i32) -> (i32, i32) {
    %c0_i32 = arith.constant 0 : i32
    %c0_i32_0 = arith.constant 0 : i32
    %c0_i32_1 = arith.constant 0 : i32
    return %c0_i32, %c0_i32_0 : i32, i32
  }
  func.func @transform_4(%arg0: i32) -> (i32, i32) {
    %c0_i32 = arith.constant 0 : i32
    %c0_i32_0 = arith.constant 0 : i32
    return %arg0, %c0_i32 : i32, i32
  }
}

module attributes {stable_mosaic.version = 11 : i64} {
  func.func @_mm_kernel(%arg0: i32, %arg1: memref<64x32xbf16, #tpu.memory_space<vmem>>, %arg2: memref<32x64xbf16, #tpu.memory_space<vmem>>, %arg3: memref<64x64xf32, #tpu.memory_space<vmem>>) attributes {dimension_semantics = [#tpu.dimension_semantics<parallel>], iteration_bounds = array<i64: 2>, scalar_prefetch = 0 : i64, scratch_operands = 0 : i64, tpu.core_type = #tpu.core_type<tc>, window_params = [{transform_indices = @transform_0, window_bounds = array<i64: 64, 32>}, {pipeline_mode = #tpu.pipeline_mode<synchronous>, transform_indices = @transform_1, window_bounds = array<i64: 32, 64>}, {transform_indices = @transform_2, window_bounds = array<i64: 64, 64>}]} {
    %c0 = arith.constant 0 : index
    %c0_0 = arith.constant 0 : index
    %0 = vector.load %arg1[%c0, %c0_0] : memref<64x32xbf16, #tpu.memory_space<vmem>>, vector<64x32xbf16>
    %c0_1 = arith.constant 0 : index
    %c0_2 = arith.constant 0 : index
    %1 = vector.load %arg2[%c0_1, %c0_2] : memref<32x64xbf16, #tpu.memory_space<vmem>>, vector<32x64xbf16>
    %cst = arith.constant dense<0.000000e+00> : vector<64x64xf32>
    %2 = tpu.matmul %0, %1, %cst {dimension_numbers = #tpu.dot_dimension_numbers<[1], [0], [0], [1], [0, 0, 1, 1], [], []>} : vector<64x32xbf16>, vector<32x64xbf16>, vector<64x64xf32> -> vector<64x64xf32>
    %c0_3 = arith.constant 0 : index
    %c0_4 = arith.constant 0 : index
    %3 = vector.load %arg3[%c0_3, %c0_4] : memref<64x64xf32, #tpu.memory_space<vmem>>, vector<64x64xf32>
    tpu.vector_store %arg3[%c0_3, %c0_4], %2 {strides = array<i32>} : memref<64x64xf32, #tpu.memory_space<vmem>>, vector<64x64xf32>,
    return
  }
  func.func @transform_0(%arg0: i32) -> (i32, i32) {
    %c0_i32 = arith.constant 0 : i32
    %c0_i32_0 = arith.constant 0 : i32
    return %arg0, %c0_i32 : i32, i32
  }
  func.func @transform_1(%arg0: i32) -> (i32, i32) {
    %c0_i32 = arith.constant 0 : i32
    %c0_i32_0 = arith.constant 0 : i32
    %c0_i32_1 = arith.constant 0 : i32
    return %c0_i32, %c0_i32_0 : i32, i32
  }
  func.func @transform_2(%arg0: i32) -> (i32, i32) {
    %c0_i32 = arith.constant 0 : i32
    %c0_i32_0 = arith.constant 0 : i32
    return %arg0, %c0_i32 : i32, i32
  }
}

module attributes {stable_mosaic.version = 11 : i64} {
  func.func @_mm_residual_kernel(%arg0: i32, %arg1: memref<64x576xbf16, #tpu.memory_space<vmem>>, %arg2: memref<576x64xbf16, #tpu.memory_space<vmem>>, %arg3: memref<64x64xf32, #tpu.memory_space<vmem>>, %arg4: memref<64x64xf32, #tpu.memory_space<vmem>>) attributes {dimension_semantics = [#tpu.dimension_semantics<parallel>], iteration_bounds = array<i64: 2>, scalar_prefetch = 0 : i64, scratch_operands = 0 : i64, tpu.core_type = #tpu.core_type<tc>, window_params = [{transform_indices = @transform_0, window_bounds = array<i64: 64, 576>}, {pipeline_mode = #tpu.pipeline_mode<synchronous>, transform_indices = @transform_1, window_bounds = array<i64: 576, 64>}, {transform_indices = @transform_2, window_bounds = array<i64: 64, 64>}, {transform_indices = @transform_3, window_bounds = array<i64: 64, 64>}]} {
    %c0 = arith.constant 0 : index
    %c0_0 = arith.constant 0 : index
    %0 = vector.load %arg1[%c0, %c0_0] : memref<64x576xbf16, #tpu.memory_space<vmem>>, vector<64x576xbf16>
    %c0_1 = arith.constant 0 : index
    %c0_2 = arith.constant 0 : index
    %1 = vector.load %arg2[%c0_1, %c0_2] : memref<576x64xbf16, #tpu.memory_space<vmem>>, vector<576x64xbf16>
    %cst = arith.constant dense<0.000000e+00> : vector<64x64xf32>
    %2 = tpu.matmul %0, %1, %cst {dimension_numbers = #tpu.dot_dimension_numbers<[1], [0], [0], [1], [0, 0, 1, 1], [], []>} : vector<64x576xbf16>, vector<576x64xbf16>, vector<64x64xf32> -> vector<64x64xf32>
    %c0_3 = arith.constant 0 : index
    %c0_4 = arith.constant 0 : index
    %3 = vector.load %arg3[%c0_3, %c0_4] : memref<64x64xf32, #tpu.memory_space<vmem>>, vector<64x64xf32>
    %4 = arith.addf %2, %3 : vector<64x64xf32>
    %c0_5 = arith.constant 0 : index
    %c0_6 = arith.constant 0 : index
    %5 = vector.load %arg4[%c0_5, %c0_6] : memref<64x64xf32, #tpu.memory_space<vmem>>, vector<64x64xf32>
    tpu.vector_store %arg4[%c0_5, %c0_6], %4 {strides = array<i32>} : memref<64x64xf32, #tpu.memory_space<vmem>>, vector<64x64xf32>,
    return
  }
  func.func @transform_0(%arg0: i32) -> (i32, i32) {
    %c0_i32 = arith.constant 0 : i32
    %c0_i32_0 = arith.constant 0 : i32
    return %arg0, %c0_i32 : i32, i32
  }
  func.func @transform_1(%arg0: i32) -> (i32, i32) {
    %c0_i32 = arith.constant 0 : i32
    %c0_i32_0 = arith.constant 0 : i32
    %c0_i32_1 = arith.constant 0 : i32
    return %c0_i32, %c0_i32_0 : i32, i32
  }
  func.func @transform_2(%arg0: i32) -> (i32, i32) {
    %c0_i32 = arith.constant 0 : i32
    %c0_i32_0 = arith.constant 0 : i32
    return %arg0, %c0_i32 : i32, i32
  }
  func.func @transform_3(%arg0: i32) -> (i32, i32) {
    %c0_i32 = arith.constant 0 : i32
    %c0_i32_0 = arith.constant 0 : i32
    return %arg0, %c0_i32 : i32, i32
  }
}

module attributes {stable_mosaic.version = 11 : i64} {
  func.func @_bn_lrelu_kernel(%arg0: i32, %arg1: memref<64x64xf32, #tpu.memory_space<vmem>>, %arg2: memref<1x64xf32, #tpu.memory_space<vmem>>, %arg3: memref<1x64xf32, #tpu.memory_space<vmem>>, %arg4: memref<64x64xf32, #tpu.memory_space<vmem>>) attributes {dimension_semantics = [#tpu.dimension_semantics<parallel>], iteration_bounds = array<i64: 2>, scalar_prefetch = 0 : i64, scratch_operands = 0 : i64, tpu.core_type = #tpu.core_type<tc>, window_params = [{transform_indices = @transform_0, window_bounds = array<i64: 64, 64>}, {pipeline_mode = #tpu.pipeline_mode<synchronous>, transform_indices = @transform_1, window_bounds = array<i64: 1, 64>}, {pipeline_mode = #tpu.pipeline_mode<synchronous>, transform_indices = @transform_2, window_bounds = array<i64: 1, 64>}, {transform_indices = @transform_3, window_bounds = array<i64: 64, 64>}]} {
    %c0 = arith.constant 0 : index
    %c0_0 = arith.constant 0 : index
    %0 = vector.load %arg1[%c0, %c0_0] : memref<64x64xf32, #tpu.memory_space<vmem>>, vector<64x64xf32>
    %c0_1 = arith.constant 0 : index
    %c0_2 = arith.constant 0 : index
    %1 = vector.load %arg2[%c0_1, %c0_2] : memref<1x64xf32, #tpu.memory_space<vmem>>, vector<1x64xf32>
    %2 = vector.broadcast %1 : vector<1x64xf32> to vector<64x64xf32>
    %3 = arith.mulf %0, %2 : vector<64x64xf32>
    %c0_3 = arith.constant 0 : index
    %c0_4 = arith.constant 0 : index
    %4 = vector.load %arg3[%c0_3, %c0_4] : memref<1x64xf32, #tpu.memory_space<vmem>>, vector<1x64xf32>
    %5 = vector.broadcast %4 : vector<1x64xf32> to vector<64x64xf32>
    %6 = arith.addf %3, %5 : vector<64x64xf32>
    %cst = arith.constant 0.000000e+00 : f32
    %7 = vector.broadcast %cst : f32 to vector<64x64xf32>
    %8 = arith.cmpf oge, %6, %7 : vector<64x64xf32>
    %cst_5 = arith.constant 1.000000e-01 : f32
    %9 = vector.broadcast %cst_5 : f32 to vector<64x64xf32>
    %10 = arith.mulf %9, %6 : vector<64x64xf32>
    %11 = arith.select %8, %6, %10 : vector<64x64xi1>, vector<64x64xf32>
    %c0_6 = arith.constant 0 : index
    %c0_7 = arith.constant 0 : index
    %12 = vector.load %arg4[%c0_6, %c0_7] : memref<64x64xf32, #tpu.memory_space<vmem>>, vector<64x64xf32>
    tpu.vector_store %arg4[%c0_6, %c0_7], %11 {strides = array<i32>} : memref<64x64xf32, #tpu.memory_space<vmem>>, vector<64x64xf32>,
    return
  }
  func.func @transform_0(%arg0: i32) -> (i32, i32) {
    %c0_i32 = arith.constant 0 : i32
    %c0_i32_0 = arith.constant 0 : i32
    return %arg0, %c0_i32 : i32, i32
  }
  func.func @transform_1(%arg0: i32) -> (i32, i32) {
    %c0_i32 = arith.constant 0 : i32
    %c0_i32_0 = arith.constant 0 : i32
    %c0_i32_1 = arith.constant 0 : i32
    return %c0_i32, %c0_i32_0 : i32, i32
  }
  func.func @transform_2(%arg0: i32) -> (i32, i32) {
    %c0_i32 = arith.constant 0 : i32
    %c0_i32_0 = arith.constant 0 : i32
    %c0_i32_1 = arith.constant 0 : i32
    return %c0_i32, %c0_i32_0 : i32, i32
  }
  func.func @transform_3(%arg0: i32) -> (i32, i32) {
    %c0_i32 = arith.constant 0 : i32
    %c0_i32_0 = arith.constant 0 : i32
    return %arg0, %c0_i32 : i32, i32
  }
}

</mosaic_0001>

<bundles_post_ra>
// kernel: wideresnet_forward.13
= control target key start
LH: loop header
LB: loop body
LE: loop exit
PB: predicated region body
PF: predicated region fallthrough
CT: control target
= control target key end

     0   :  { %s1151_s9 = smov 0   ;;  %s1374_s0 = inlined_call_operand.vmem [shape: bf16[2048,27], index: 0, kind: input, shape index: {}]   ;;  %s1375_s1 = inlined_call_operand.vmem [shape: bf16[27,16], index: 1, kind: input, shape index: {}]   ;;  %s1376_s2 = inlined_call_operand.vmem [shape: f32[2048,16], index: 2, kind: output, shape index: {}]  }
   0x1 LB: > { %s901_s10 = sadd.s32 4294967295, %s1133_s9   ;;  %p905_p0 = scmp.ge.s32.totalorder %s1133_s9, 1  ;;  %s1133_s9 = sphi %s1151_s9, %s12_s9  }
   0x2   : > { %p113_p1 = scmp.lt.s32.totalorder %s1133_s9, 5 }
   0x4   : > { %p114_p2 = pnand %p905_p0, %p113_p1 }
   0x5   : > { %v1093_v0 = vld [vmem:[%s1375_s1] sm:$0xff] (!%p114_p2)   ;;  %vm484_vm0 = vcmask (!%p114_p2), 1044480   ;;  %v1094_v1 = vld [vmem:[%s1375_s1 + $0x8] sm:$0x3f] (!%p114_p2)   ;;  %vm485_vm1 = vcmask (!%p114_p2), 1045504   ;;  %s906_s15 = sshll.u32 (!%p114_p2), %s901_s10, 6 }
   0x6   : > { %117 = sbr.rel (%p114_p2) target bundleno = 291 (0x123), region = 28  ;;  %1012 = vmatprep.subr.bf16.mxu0 (!%p114_p2), %v1093_v0  ;;  %1080 = vmatprep.subr.bf16.mxu1 (!%p114_p2), %v1093_v0  ;;  %v1135_v2 = vmov (!%p114_p2), 65535   ;;  %p136_p3 = scmp.lt.s32.totalorder (!%p114_p2), %s906_s15, 255  ;;  %vm387_vm2 = vcmask (!%p114_p2), 220160   ;;  %vm780_vm3 = vcmask (!%p114_p2), 130048  }
   0x7   : > { %1013 = vmatpush3.bf16.msra.mxu0 (!%p114_p2), %v1093_v0  ;;  %1082 = vmatpush3.bf16.msra.mxu1 (!%p114_p2), %v1093_v0  ;;  %v486_v3 = vsel (!%p114_p2), %vm484_vm0, 4294967295, %v1135_v2 }
   0x8   : > { %v487_v4 = vsel (!%p114_p2), %vm485_vm1, %v486_v3, 0 }
   0x9   : > { %v489_v5 = vand.u32 (!%p114_p2), %v1094_v1, %v487_v4 }
   0xb   : > { %1014 = vmatprep.subr.bf16.mxu0 (!%p114_p2), %v489_v5  ;;  %1081 = vmatprep.subr.bf16.mxu1 (!%p114_p2), %v489_v5 }
   0xc   : > { %1015 = vmatpush3.bf16.msra.mxu0 (!%p114_p2), %v489_v5  ;;  %1083 = vmatpush3.bf16.msra.mxu1 (!%p114_p2), %v489_v5 }
   0xd   : > { %s1378_s15 = smov (!%p136_p3, %s906_s15), 255 }
   0xe   : > { %s907_s16 = sshll.u32 %s1378_s15, 2  ;;  %s909_s20 = sshll.u32 %s1378_s15, 3 }
   0xf   : > { %s1171_s19 = scalar_lea.vmem %s1374_s0, %s907_s16  ;;  %s1241_s23 = scalar_lea.vmem %s1376_s2, %s909_s20 }
  0x10   : > { %v1095_v6 = vld [vmem:[%s1171_s19] sm:$0xff]   ;;  %v1097_v8 = vld [vmem:[%s1171_s19 + $0x8] sm:$0xff]   ;;  %v1099_v10 = vld [vmem:[%s1171_s19 + $0x10] sm:$0xff]  }
  0x11   : > { %v1096_v7 = vld [vmem:[%s1171_s19 + $0x80] sm:$0xff]   ;;  %1016 = vmatprep.mubr.msk.bf16.mxu0 %vm387_vm2, %v1095_v6  ;;  %v1098_v9 = vld [vmem:[%s1171_s19 + $0x88] sm:$0xff]   ;;  %v1100_v11 = vld [vmem:[%s1171_s19 + $0x90] sm:$0xff]  }
  0x12   : > { %1048 = vmatprep.mubr.msk.bf16.mxu1 %vm387_vm2, %v1096_v7  ;;  %1017 = vmatmul.mubr.msk.bf16.vlgmr.msra.gmra.mrb[0].mxu0 %vm387_vm2, %v1097_v8  ;;  %v1101_v12 = vld [vmem:[%s1171_s19 + $0x18] sm:$0xff]   ;;  %v1103_v14 = vld [vmem:[%s1171_s19 + $0x20] sm:$0xff]   ;;  %v1105_v16 = vld [vmem:[%s1171_s19 + $0x28] sm:$0xff]  }
  0x13   : > { %1049 = vmatmul.mubr.msk.bf16.vlgmr.msra.gmra.mrb[0].mxu1 %vm387_vm2, %v1098_v9  ;;  %1020 = vmatprep.mubr.msk.bf16.mxu0 %vm387_vm2, %v1099_v10  ;;  %v1102_v13 = vld [vmem:[%s1171_s19 + $0x98] sm:$0xff]   ;;  %v1104_v15 = vld [vmem:[%s1171_s19 + $0xa0] sm:$0xff]   ;;  %v1106_v17 = vld [vmem:[%s1171_s19 + $0xa8] sm:$0xff]  }
  0x14   : > { %1052 = vmatprep.mubr.msk.bf16.mxu1 %vm387_vm2, %v1100_v11  ;;  %v1107_v18 = vld [vmem:[%s1171_s19 + $0x30] sm:$0xff]   ;;  %v1109_v20 = vld [vmem:[%s1171_s19 + $0x38] sm:$0xff]   ;;  %v1111_v22 = vld [vmem:[%s1171_s19 + $0x40] sm:$0xff]  }
  0x15   : > { %v1108_v19 = vld [vmem:[%s1171_s19 + $0xb0] sm:$0xff]   ;;  %v1110_v21 = vld [vmem:[%s1171_s19 + $0xb8] sm:$0xff]   ;;  %v1112_v23 = vld [vmem:[%s1171_s19 + $0xc0] sm:$0xff]  }
  0x16   : > { %v1113_v24 = vld [vmem:[%s1171_s19 + $0x48] sm:$0xff]   ;;  %v1115_v26 = vld [vmem:[%s1171_s19 + $0x50] sm:$0xff]   ;;  %v1117_v28 = vld [vmem:[%s1171_s19 + $0x58] sm:$0xff]  }
  0x17   : > { %v1114_v25 = vld [vmem:[%s1171_s19 + $0xc8] sm:$0xff]   ;;  %v1116_v27 = vld [vmem:[%s1171_s19 + $0xd0] sm:$0xff]   ;;  %v1118_v29 = vld [vmem:[%s1171_s19 + $0xd8] sm:$0xff]  }
  0x18   : > { %v1119_v30 = vld [vmem:[%s1171_s19 + $0x60] sm:$0xff]   ;;  %v1121_v32 = vld [vmem:[%s1171_s19 + $0x68] sm:$0xff]   ;;  %v1123_v34 = vld [vmem:[%s1171_s19 + $0x70] sm:$0xff]  }
  0x19   : > { %v1120_v31 = vld [vmem:[%s1171_s19 + $0xe0] sm:$0xff]   ;;  %v1122_v33 = vld [vmem:[%s1171_s19 + $0xe8] sm:$0xff]   ;;  %v1124_v35 = vld [vmem:[%s1171_s19 + $0xf0] sm:$0xff]  }
  0x1a   : > { %1021 = vmatmul.mubr.msk.bf16.gmra.mrb[4].mxu0 %vm387_vm2, %v1101_v12  ;;  %v1125_v36 = vld [vmem:[%s1171_s19 + $0x78] sm:$0xff]  }
  0x1b   : > { %1053 = vmatmul.mubr.msk.bf16.gmra.mrb[4].mxu1 %vm387_vm2, %v1102_v13  ;;  %1024 = vmatprep.mubr.msk.bf16.mxu0 %vm387_vm2, %v1103_v14  ;;  %v1126_v37 = vld [vmem:[%s1171_s19 + $0xf8] sm:$0xff]  }
  0x1c   : > { %1056 = vmatprep.mubr.msk.bf16.mxu1 %vm387_vm2, %v1104_v15 }
  0x22   : > { %1025 = vmatmul.mubr.msk.bf16.gmra.mrb[8].mxu0 %vm387_vm2, %v1105_v16 }
  0x23   : > { %1057 = vmatmul.mubr.msk.bf16.gmra.mrb[8].mxu1 %vm387_vm2, %v1106_v17  ;;  %1028 = vmatprep.mubr.msk.bf16.mxu0 %vm387_vm2, %v1107_v18 }
  0x24   : > { %1060 = vmatprep.mubr.msk.bf16.mxu1 %vm387_vm2, %v1108_v19 }
  0x2a   : > { %1029 = vmatmul.mubr.msk.bf16.gmra.mrb[12].mxu0 %vm387_vm2, %v1109_v20 }
  0x2b   : > { %1061 = vmatmul.mubr.msk.bf16.gmra.mrb[12].mxu1 %vm387_vm2, %v1110_v21  ;;  %1032 = vmatprep.mubr.msk.bf16.mxu0 %vm387_vm2, %v1111_v22 }
  0x2c   : > { %1064 = vmatprep.mubr.msk.bf16.mxu1 %vm387_vm2, %v1112_v23 }
  0x32   : > { %1033 = vmatmul.mubr.msk.bf16.gmra.mrb[16].mxu0 %vm387_vm2, %v1113_v24 }
  0x33   : > { %1065 = vmatmul.mubr.msk.bf16.gmra.mrb[16].mxu1 %vm387_vm2, %v1114_v25  ;;  %1036 = vmatprep.mubr.msk.bf16.mxu0 %vm387_vm2, %v1115_v26 }
  0x34   : > { %1068 = vmatprep.mubr.msk.bf16.mxu1 %vm387_vm2, %v1116_v27 }
  0x3a   : > { %1037 = vmatmul.mubr.msk.bf16.gmra.mrb[20].mxu0 %vm387_vm2, %v1117_v28 }
  0x3b   : > { %1069 = vmatmul.mubr.msk.bf16.gmra.mrb[20].mxu1 %vm387_vm2, %v1118_v29  ;;  %1040 = vmatprep.mubr.msk.bf16.mxu0 %vm387_vm2, %v1119_v30 }
  0x3c   : > { %1072 = vmatprep.mubr.msk.bf16.mxu1 %vm387_vm2, %v1120_v31 }
  0x42   : > { %1041 = vmatmul.mubr.msk.bf16.gmra.mrb[24].mxu0 %vm387_vm2, %v1121_v32 }
  0x43   : > { %1073 = vmatmul.mubr.msk.bf16.gmra.mrb[24].mxu1 %vm387_vm2, %v1122_v33  ;;  %1044 = vmatprep.mubr.msk.bf16.mxu0 %vm387_vm2, %v1123_v34 }
  0x44   : > { %1076 = vmatprep.mubr.msk.bf16.mxu1 %vm387_vm2, %v1124_v35 }
  0x4a   : > { %1045 = vmatmul.mubr.msk.bf16.gmra.mrb[28].mxu0 %vm387_vm2, %v1125_v36 }
  0x4b   : > { %1077 = vmatmul.mubr.msk.bf16.gmra.mrb[28].mxu1 %vm387_vm2, %v1126_v37 }
  0xe5   : > { %v1018_v38 = vpop.f32.mrb[0].mxu0 }
  0xe6   : > { %783 = vst.msk [vmem:[%s1241_s23 + $0x10] sm:$0xff] %vm780_vm3, %v1018_v38  ;;  %v1050_v39 = vpop.f32.mrb[0].mxu1  ;;  %v525_v40 = vpop.f32.mrb[1].mxu0 }
  0xe7   : > { %815 = vst.msk [vmem:[%s1241_s23 + $0x110] sm:$0xff] %vm780_vm3, %v1050_v39  ;;  %781 = vst.msk [vmem:[%s1241_s23] sm:$0xff] %vm780_vm3, %v525_v40  ;;  %v653_v41 = vpop.f32.mrb[1].mxu1  ;;  %v1019_v42 = vpop.f32.mrb[2].mxu0 }
  0xe8   : > { %813 = vst.msk [vmem:[%s1241_s23 + $0x100] sm:$0xff] %vm780_vm3, %v653_v41  ;;  %784 = vst.msk [vmem:[%s1241_s23 + $0x18] sm:$0xff] %vm780_vm3, %v1019_v42  ;;  %v1051_v43 = vpop.f32.mrb[2].mxu1  ;;  %v528_v44 = vpop.f32.mrb[3].mxu0 }
  0xe9   : > { %816 = vst.msk [vmem:[%s1241_s23 + $0x118] sm:$0xff] %vm780_vm3, %v1051_v43  ;;  %782 = vst.msk [vmem:[%s1241_s23 + $0x8] sm:$0xff] %vm780_vm3, %v528_v44  ;;  %v656_v45 = vpop.f32.mrb[3].mxu1 }
  0xea   : > { %814 = vst.msk [vmem:[%s1241_s23 + $0x108] sm:$0xff] %vm780_vm3, %v656_v45 }
  0xed   : > { %v1022_v46 = vpop.f32.mrb[4].mxu0 }
  0xee   : > { %787 = vst.msk [vmem:[%s1241_s23 + $0x30] sm:$0xff] %vm780_vm3, %v1022_v46  ;;  %v1054_v47 = vpop.f32.mrb[4].mxu1  ;;  %v541_v48 = vpop.f32.mrb[5].mxu0 }
  0xef   : > { %819 = vst.msk [vmem:[%s1241_s23 + $0x130] sm:$0xff] %vm780_vm3, %v1054_v47  ;;  %785 = vst.msk [vmem:[%s1241_s23 + $0x20] sm:$0xff] %vm780_vm3, %v541_v48  ;;  %v669_v49 = vpop.f32.mrb[5].mxu1  ;;  %v1023_v50 = vpop.f32.mrb[6].mxu0 }
  0xf0   : > { %817 = vst.msk [vmem:[%s1241_s23 + $0x120] sm:$0xff] %vm780_vm3, %v669_v49  ;;  %788 = vst.msk [vmem:[%s1241_s23 + $0x38] sm:$0xff] %vm780_vm3, %v1023_v50  ;;  %v1055_v51 = vpop.f32.mrb[6].mxu1  ;;  %v544_v52 = vpop.f32.mrb[7].mxu0 }
  0xf1   : > { %820 = vst.msk [vmem:[%s1241_s23 + $0x138] sm:$0xff] %vm780_vm3, %v1055_v51  ;;  %786 = vst.msk [vmem:[%s1241_s23 + $0x28] sm:$0xff] %vm780_vm3, %v544_v52  ;;  %v672_v53 = vpop.f32.mrb[7].mxu1 }
  0xf2   : > { %818 = vst.msk [vmem:[%s1241_s23 + $0x128] sm:$0xff] %vm780_vm3, %v672_v53 }
  0xf5   : > { %v1026_v54 = vpop.f32.mrb[8].mxu0 }
  0xf6   : > { %791 = vst.msk [vmem:[%s1241_s23 + $0x50] sm:$0xff] %vm780_vm3, %v1026_v54  ;;  %v1058_v55 = vpop.f32.mrb[8].mxu1  ;;  %v557_v56 = vpop.f32.mrb[9].mxu0 }
  0xf7   : > { %823 = vst.msk [vmem:[%s1241_s23 + $0x150] sm:$0xff] %vm780_vm3, %v1058_v55  ;;  %789 = vst.msk [vmem:[%s1241_s23 + $0x40] sm:$0xff] %vm780_vm3, %v557_v56  ;;  %v685_v57 = vpop.f32.mrb[9].mxu1  ;;  %v1027_v58 = vpop.f32.mrb[10].mxu0 }
  0xf8   : > { %821 = vst.msk [vmem:[%s1241_s23 + $0x140] sm:$0xff] %vm780_vm3, %v685_v57  ;;  %792 = vst.msk [vmem:[%s1241_s23 + $0x58] sm:$0xff] %vm780_vm3, %v1027_v58  ;;  %v1059_v59 = vpop.f32.mrb[10].mxu1  ;;  %v560_v60 = vpop.f32.mrb[11].mxu0 }
  0xf9   : > { %824 = vst.msk [vmem:[%s1241_s23 + $0x158] sm:$0xff] %vm780_vm3, %v1059_v59  ;;  %790 = vst.msk [vmem:[%s1241_s23 + $0x48] sm:$0xff] %vm780_vm3, %v560_v60  ;;  %v688_v61 = vpop.f32.mrb[11].mxu1 }
  0xfa   : > { %822 = vst.msk [vmem:[%s1241_s23 + $0x148] sm:$0xff] %vm780_vm3, %v688_v61 }
  0xfd   : > { %v1030_v62 = vpop.f32.mrb[12].mxu0 }
  0xfe   : > { %795 = vst.msk [vmem:[%s1241_s23 + $0x70] sm:$0xff] %vm780_vm3, %v1030_v62  ;;  %v1062_v63 = vpop.f32.mrb[12].mxu1  ;;  %v573_v0 = vpop.f32.mrb[13].mxu0 }
  0xff   : > { %827 = vst.msk [vmem:[%s1241_s23 + $0x170] sm:$0xff] %vm780_vm3, %v1062_v63  ;;  %793 = vst.msk [vmem:[%s1241_s23 + $0x60] sm:$0xff] %vm780_vm3, %v573_v0  ;;  %v701_v1 = vpop.f32.mrb[13].mxu1  ;;  %v1031_v2 = vpop.f32.mrb[14].mxu0 }
 0x100   : > { %825 = vst.msk [vmem:[%s1241_s23 + $0x160] sm:$0xff] %vm780_vm3, %v701_v1  ;;  %796 = vst.msk [vmem:[%s1241_s23 + $0x78] sm:$0xff] %vm780_vm3, %v1031_v2  ;;  %v1063_v3 = vpop.f32.mrb[14].mxu1  ;;  %v576_v4 = vpop.f32.mrb[15].mxu0 }
 0x101   : > { %828 = vst.msk [vmem:[%s1241_s23 + $0x178] sm:$0xff] %vm780_vm3, %v1063_v3  ;;  %794 = vst.msk [vmem:[%s1241_s23 + $0x68] sm:$0xff] %vm780_vm3, %v576_v4  ;;  %v704_v5 = vpop.f32.mrb[15].mxu1 }
 0x102   : > { %826 = vst.msk [vmem:[%s1241_s23 + $0x168] sm:$0xff] %vm780_vm3, %v704_v5 }
 0x105   : > { %v1034_v6 = vpop.f32.mrb[16].mxu0 }
 0x106   : > { %799 = vst.msk [vmem:[%s1241_s23 + $0x90] sm:$0xff] %vm780_vm3, %v1034_v6  ;;  %v1066_v7 = vpop.f32.mrb[16].mxu1  ;;  %v589_v8 = vpop.f32.mrb[17].mxu0 }
 0x107   : > { %831 = vst.msk [vmem:[%s1241_s23 + $0x190] sm:$0xff] %vm780_vm3, %v1066_v7  ;;  %797 = vst.msk [vmem:[%s1241_s23 + $0x80] sm:$0xff] %vm780_vm3, %v589_v8  ;;  %v717_v9 = vpop.f32.mrb[17].mxu1  ;;  %v1035_v10 = vpop.f32.mrb[18].mxu0 }
 0x108   : > { %829 = vst.msk [vmem:[%s1241_s23 + $0x180] sm:$0xff] %vm780_vm3, %v717_v9  ;;  %800 = vst.msk [vmem:[%s1241_s23 + $0x98] sm:$0xff] %vm780_vm3, %v1035_v10  ;;  %v1067_v11 = vpop.f32.mrb[18].mxu1  ;;  %v592_v12 = vpop.f32.mrb[19].mxu0 }
 0x109   : > { %832 = vst.msk [vmem:[%s1241_s23 + $0x198] sm:$0xff] %vm780_vm3, %v1067_v11  ;;  %798 = vst.msk [vmem:[%s1241_s23 + $0x88] sm:$0xff] %vm780_vm3, %v592_v12  ;;  %v720_v13 = vpop.f32.mrb[19].mxu1 }
 0x10a   : > { %830 = vst.msk [vmem:[%s1241_s23 + $0x188] sm:$0xff] %vm780_vm3, %v720_v13 }
 0x10d   : > { %v1038_v14 = vpop.f32.mrb[20].mxu0 }
 0x10e   : > { %803 = vst.msk [vmem:[%s1241_s23 + $0xb0] sm:$0xff] %vm780_vm3, %v1038_v14  ;;  %v1070_v15 = vpop.f32.mrb[20].mxu1  ;;  %v605_v16 = vpop.f32.mrb[21].mxu0 }
 0x10f   : > { %835 = vst.msk [vmem:[%s1241_s23 + $0x1b0] sm:$0xff] %vm780_vm3, %v1070_v15  ;;  %801 = vst.msk [vmem:[%s1241_s23 + $0xa0] sm:$0xff] %vm780_vm3, %v605_v16  ;;  %v733_v17 = vpop.f32.mrb[21].mxu1  ;;  %v1039_v18 = vpop.f32.mrb[22].mxu0 }
 0x110   : > { %833 = vst.msk [vmem:[%s1241_s23 + $0x1a0] sm:$0xff] %vm780_vm3, %v733_v17  ;;  %804 = vst.msk [vmem:[%s1241_s23 + $0xb8] sm:$0xff] %vm780_vm3, %v1039_v18  ;;  %v1071_v19 = vpop.f32.mrb[22].mxu1  ;;  %v608_v20 = vpop.f32.mrb[23].mxu0 }
 0x111   : > { %836 = vst.msk [vmem:[%s1241_s23 + $0x1b8] sm:$0xff] %vm780_vm3, %v1071_v19  ;;  %802 = vst.msk [vmem:[%s1241_s23 + $0xa8] sm:$0xff] %vm780_vm3, %v608_v20  ;;  %v736_v21 = vpop.f32.mrb[23].mxu1 }
 0x112   : > { %834 = vst.msk [vmem:[%s1241_s23 + $0x1a8] sm:$0xff] %vm780_vm3, %v736_v21 }
 0x115   : > { %v1042_v22 = vpop.f32.mrb[24].mxu0 }
 0x116   : > { %807 = vst.msk [vmem:[%s1241_s23 + $0xd0] sm:$0xff] %vm780_vm3, %v1042_v22  ;;  %v1074_v23 = vpop.f32.mrb[24].mxu1  ;;  %v621_v24 = vpop.f32.mrb[25].mxu0 }
 0x117   : > { %839 = vst.msk [vmem:[%s1241_s23 + $0x1d0] sm:$0xff] %vm780_vm3, %v1074_v23  ;;  %805 = vst.msk [vmem:[%s1241_s23 + $0xc0] sm:$0xff] %vm780_vm3, %v621_v24  ;;  %v749_v25 = vpop.f32.mrb[25].mxu1  ;;  %v1043_v26 = vpop.f32.mrb[26].mxu0 }
 0x118   : > { %837 = vst.msk [vmem:[%s1241_s23 + $0x1c0] sm:$0xff] %vm780_vm3, %v749_v25  ;;  %808 = vst.msk [vmem:[%s1241_s23 + $0xd8] sm:$0xff] %vm780_vm3, %v1043_v26  ;;  %v1075_v27 = vpop.f32.mrb[26].mxu1  ;;  %v624_v28 = vpop.f32.mrb[27].mxu0 }
 0x119   : > { %840 = vst.msk [vmem:[%s1241_s23 + $0x1d8] sm:$0xff] %vm780_vm3, %v1075_v27  ;;  %806 = vst.msk [vmem:[%s1241_s23 + $0xc8] sm:$0xff] %vm780_vm3, %v624_v28  ;;  %v752_v29 = vpop.f32.mrb[27].mxu1 }
 0x11a   : > { %838 = vst.msk [vmem:[%s1241_s23 + $0x1c8] sm:$0xff] %vm780_vm3, %v752_v29 }
 0x11d   : > { %v1046_v30 = vpop.f32.mrb[28].mxu0 }
 0x11e   : > { %811 = vst.msk [vmem:[%s1241_s23 + $0xf0] sm:$0xff] %vm780_vm3, %v1046_v30  ;;  %v1078_v31 = vpop.f32.mrb[28].mxu1  ;;  %v637_v32 = vpop.f32.mrb[29].mxu0 }
 0x11f   : > { %843 = vst.msk [vmem:[%s1241_s23 + $0x1f0] sm:$0xff] %vm780_vm3, %v1078_v31  ;;  %809 = vst.msk [vmem:[%s1241_s23 + $0xe0] sm:$0xff] %vm780_vm3, %v637_v32  ;;  %v765_v33 = vpop.f32.mrb[29].mxu1  ;;  %v1047_v34 = vpop.f32.mrb[30].mxu0 }
 0x120   : > { %841 = vst.msk [vmem:[%s1241_s23 + $0x1e0] sm:$0xff] %vm780_vm3, %v765_v33  ;;  %812 = vst.msk [vmem:[%s1241_s23 + $0xf8] sm:$0xff] %vm780_vm3, %v1047_v34  ;;  %v1079_v35 = vpop.f32.mrb[30].mxu1  ;;  %v640_v36 = vpop.f32.mrb[31].mxu0 }
 0x121   : > { %844 = vst.msk [vmem:[%s1241_s23 + $0x1f8] sm:$0xff] %vm780_vm3, %v1079_v35  ;;  %810 = vst.msk [vmem:[%s1241_s23 + $0xe8] sm:$0xff] %vm780_vm3, %v640_v36  ;;  %v768_v37 = vpop.f32.mrb[31].mxu1 }
 0x122   : > { %842 = vst.msk [vmem:[%s1241_s23 + $0x1e8] sm:$0xff] %vm780_vm3, %v768_v37 }
 0x123 PF: > { %s12_s9 = sadd.s32 1, %s1133_s9  }
 0x124   : > { %p9_p4 = scmp.ge.s32.totalorder %s12_s9, 6  }
 0x126   :  { %11 = sbr.rel (!%p9_p4) target bundleno = 1 (0x1), region = 58 }

// kernel: wideresnet_forward.14
= control target key start
LH: loop header
LB: loop body
LE: loop exit
PB: predicated region body
PF: predicated region fallthrough
CT: control target
= control target key end

     0   :  { %s1960_s12 = smov 0   ;;  %s2645_s0 = inlined_call_operand.vmem [shape: f32[2048,16], index: 0, kind: input, shape index: {}]   ;;  %s2646_s1 = inlined_call_operand.vmem [shape: f32[1,16], index: 1, kind: input, shape index: {}]   ;;  %s2647_s2 = inlined_call_operand.vmem [shape: f32[1,16], index: 2, kind: input, shape index: {}]   ;;  %s2648_s3 = inlined_call_operand.vmem [shape: bf16[2048,16], index: 3, kind: output, shape index: {}]  }
   0x1 LB: > { %s1653_s13 = sadd.s32 4294967295, %s1938_s12   ;;  %p1657_p0 = scmp.ge.s32.totalorder %s1938_s12, 1  ;;  %s1938_s12 = sphi %s1960_s12, %s13_s12  }
   0x2   : > { %p138_p1 = scmp.lt.s32.totalorder %s1938_s12, 3 }
   0x4   : > { %p139_p2 = pnand %p1657_p0, %p138_p1 }
   0x5   : > { %s1658_s14 = sshll.u32 (!%p139_p2), %s1653_s13, 7  ;;  %v1974_v0 = vld [vmem:[%s2646_s1] ss:$0 sm:$0xff] (!%p139_p2)  ;;  %vm1468_vm0 = vcmask (!%p139_p2), 125952  }
   0x6   : > { %142 = sbr.rel (%p139_p2) target bundleno = 215 (0xd7), region = 32  ;;  %p163_p3 = scmp.lt.s32.totalorder (!%p139_p2), %s1658_s14, 255  ;;  %v1984_v1 = vld [vmem:[%s2647_s2] ss:$0 sm:$0xff] (!%p139_p2) }
   0xd   : > { %s2650_s14 = smov (!%p163_p3, %s1658_s14), 255 }
   0xe   : > { %s1659_s15 = sshll.u32 %s2650_s14, 3  ;;  %s1661_s23 = sshll.u32 %s2650_s14, 2 }
   0xf   : > { %s1979_s20 = scalar_lea.vmem %s2645_s0, %s1659_s15  ;;  %s2012_s26 = scalar_lea.vmem %s2648_s3, %s1661_s23 }
  0x10   : > { %v174_v2 = vld [vmem:[%s1979_s20] sm:$0xff]  ;;  %v175_v3 = vld [vmem:[%s1979_s20 + $0x8] sm:$0xff]  ;;  %v176_v4 = vld [vmem:[%s1979_s20 + $0x10] sm:$0xff] }
  0x11   : > { %v309_v5 = vmul.f32 %v1974_v0, %v174_v2  ;;  %v310_v6 = vmul.f32 %v1974_v0, %v175_v3  ;;  %v311_v7 = vmul.f32 %v1974_v0, %v176_v4  ;;  %v177_v8 = vld [vmem:[%s1979_s20 + $0x18] sm:$0xff]  ;;  %v178_v9 = vld [vmem:[%s1979_s20 + $0x20] sm:$0xff]  ;;  %v179_v10 = vld [vmem:[%s1979_s20 + $0x28] sm:$0xff] }
  0x12   : > { %v312_v11 = vmul.f32 %v1974_v0, %v177_v8  ;;  %v313_v12 = vmul.f32 %v1974_v0, %v178_v9  ;;  %v314_v13 = vmul.f32 %v1974_v0, %v179_v10  ;;  %v180_v14 = vld [vmem:[%s1979_s20 + $0x30] sm:$0xff]  ;;  %v181_v15 = vld [vmem:[%s1979_s20 + $0x38] sm:$0xff]  ;;  %v182_v31 = vld [vmem:[%s1979_s20 + $0x40] sm:$0xff] }
  0x13   : > { %v444_v16 = vadd.f32 %v1984_v1, %v309_v5  ;;  %v445_v17 = vadd.f32 %v1984_v1, %v310_v6  ;;  %v446_v18 = vadd.f32 %v1984_v1, %v311_v7  ;;  %v315_v19 = vmul.f32 %v1974_v0, %v180_v14  ;;  %v183_v36 = vld [vmem:[%s1979_s20 + $0x48] sm:$0xff]  ;;  %v184_v37 = vld [vmem:[%s1979_s20 + $0x50] sm:$0xff]  ;;  %v185_v38 = vld [vmem:[%s1979_s20 + $0x58] sm:$0xff] }
  0x14   : > { %v447_v20 = vadd.f32 %v1984_v1, %v312_v11  ;;  %v448_v21 = vadd.f32 %v1984_v1, %v313_v12  ;;  %v449_v22 = vadd.f32 %v1984_v1, %v314_v13  ;;  %v316_v23 = vmul.f32 %v1974_v0, %v181_v15  ;;  %v186_v50 = vld [vmem:[%s1979_s20 + $0x60] sm:$0xff]  ;;  %v187_v2 = vld [vmem:[%s1979_s20 + $0x68] sm:$0xff]  ;;  %v188_v5 = vld [vmem:[%s1979_s20 + $0x70] sm:$0xff] }
  0x15   : > { %vm572_vm1 = vcmp.ge.f32.partialorder %v444_v16, 0.0  ;;  %v700_v24 = vmul.f32 0.1, %v444_v16  ;;  %vm573_vm2 = vcmp.ge.f32.partialorder %v445_v17, 0.0  ;;  %v701_v25 = vmul.f32 0.1, %v445_v17 }
  0x16   : > { %vm574_vm3 = vcmp.ge.f32.partialorder %v446_v18, 0.0  ;;  %v702_v26 = vmul.f32 0.1, %v446_v18  ;;  %vm575_vm4 = vcmp.ge.f32.partialorder %v447_v20, 0.0  ;;  %v703_v27 = vmul.f32 0.1, %v447_v20 }
  0x17   : > { %v828_v28 = vsel %vm572_vm1, %v444_v16, %v700_v24  ;;  %v829_v29 = vsel %vm573_vm2, %v445_v17, %v701_v25  ;;  %vm576_vm5 = vcmp.ge.f32.partialorder %v448_v21, 0.0  ;;  %v704_v30 = vmul.f32 0.1, %v448_v21  ;;  %v189_v13 = vld [vmem:[%s1979_s20 + $0x78] sm:$0xff]  ;;  %v190_v14 = vld [vmem:[%s1979_s20 + $0x80] sm:$0xff] }
  0x18   : > { %v1794_v32 = vpack.c.bf16 %v828_v28, %v828_v28  ;;  %v1795_v33 = vpack.c.bf16 %v829_v29, %v829_v29  ;;  %v830_v34 = vsel %vm574_vm3, %v446_v18, %v702_v26  ;;  %v831_v35 = vsel %vm575_vm4, %v447_v20, %v703_v27  ;;  %v192_v20 = vld [vmem:[%s1979_s20 + $0x90] sm:$0xff] }
  0x19   : > { %v1796_v39 = vpack.c.bf16 %v830_v34, %v830_v34  ;;  %v1797_v40 = vpack.c.bf16 %v831_v35, %v831_v35  ;;  %v832_v41 = vsel %vm576_vm5, %v448_v21, %v704_v30  ;;  %vm577_vm6 = vcmp.ge.f32.partialorder %v449_v22, 0.0  ;;  %v193_v21 = vld [vmem:[%s1979_s20 + $0x98] sm:$0xff] }
  0x1a   : > { %1469 = vst.msk [vmem:[%s2012_s26] sm:$0xf] %vm1468_vm0, %v1794_v32  ;;  %1470 = vst.msk [vmem:[%s2012_s26 + $0x4] sm:$0xf] %vm1468_vm0, %v1795_v33  ;;  %v1798_v42 = vpack.c.bf16 %v832_v41, %v832_v41  ;;  %v705_v43 = vmul.f32 0.1, %v449_v22  ;;  %v450_v44 = vadd.f32 %v1984_v1, %v315_v19  ;;  %v451_v45 = vadd.f32 %v1984_v1, %v316_v23 }
  0x1b   : > { %1471 = vst.msk [vmem:[%s2012_s26 + $0x8] sm:$0xf] %vm1468_vm0, %v1796_v39  ;;  %1472 = vst.msk [vmem:[%s2012_s26 + $0xc] sm:$0xf] %vm1468_vm0, %v1797_v40  ;;  %v317_v46 = vmul.f32 %v1974_v0, %v182_v31  ;;  %v318_v47 = vmul.f32 %v1974_v0, %v183_v36  ;;  %v319_v48 = vmul.f32 %v1974_v0, %v184_v37  ;;  %v191_v19 = vld [vmem:[%s1979_s20 + $0x88] sm:$0xff]  ;;  %v194_v33 = vld [vmem:[%s1979_s20 + $0xa0] sm:$0xff] }
  0x1c   : > { %v320_v49 = vmul.f32 %v1974_v0, %v185_v38  ;;  %1473 = vst.msk [vmem:[%s2012_s26 + $0x10] sm:$0xf] %vm1468_vm0, %v1798_v42  ;;  %v833_v51 = vsel %vm577_vm6, %v449_v22, %v705_v43  ;;  %vm578_vm7 = vcmp.ge.f32.partialorder %v450_v44, 0.0  ;;  %v706_v52 = vmul.f32 0.1, %v450_v44 }
  0x1d   : > { %vm579_vm8 = vcmp.ge.f32.partialorder %v451_v45, 0.0  ;;  %v1799_v53 = vpack.c.bf16 %v833_v51, %v833_v51  ;;  %v707_v54 = vmul.f32 0.1, %v451_v45  ;;  %v452_v55 = vadd.f32 %v1984_v1, %v317_v46 }
  0x1e   : > { %v453_v56 = vadd.f32 %v1984_v1, %v318_v47  ;;  %v834_v57 = vsel %vm578_vm7, %v450_v44, %v706_v52  ;;  %v454_v58 = vadd.f32 %v1984_v1, %v319_v48  ;;  %v455_v59 = vadd.f32 %v1984_v1, %v320_v49  ;;  %v195_v52 = vld [vmem:[%s1979_s20 + $0xa8] sm:$0xff] }
  0x1f   : > { %v321_v60 = vmul.f32 %v1974_v0, %v186_v50  ;;  %1474 = vst.msk [vmem:[%s2012_s26 + $0x14] sm:$0xf] %vm1468_vm0, %v1799_v53  ;;  %v1800_v61 = vpack.c.bf16 %v834_v57, %v834_v57  ;;  %v835_v62 = vsel %vm579_vm8, %v451_v45, %v707_v54  ;;  %vm580_vm9 = vcmp.ge.f32.partialorder %v452_v55, 0.0 }
  0x20   : > { %v708_v63 = vmul.f32 0.1, %v452_v55  ;;  %v1801_v3 = vpack.c.bf16 %v835_v62, %v835_v62  ;;  %vm581_vm10 = vcmp.ge.f32.partialorder %v453_v56, 0.0  ;;  %v709_v4 = vmul.f32 0.1, %v453_v56  ;;  %v198_v62 = vld [vmem:[%s1979_s20 + $0xc0] sm:$0xff] }
  0x21   : > { %vm582_vm11 = vcmp.ge.f32.partialorder %v454_v58, 0.0  ;;  %1475 = vst.msk [vmem:[%s2012_s26 + $0x18] sm:$0xf] %vm1468_vm0, %v1800_v61  ;;  %v710_v7 = vmul.f32 0.1, %v454_v58  ;;  %vm583_vm12 = vcmp.ge.f32.partialorder %v455_v59, 0.0  ;;  %v456_v11 = vadd.f32 %v1984_v1, %v321_v60 }
  0x22   : > { %v836_v6 = vsel %vm580_vm9, %v452_v55, %v708_v63  ;;  %v711_v8 = vmul.f32 0.1, %v455_v59  ;;  %1476 = vst.msk [vmem:[%s2012_s26 + $0x1c] sm:$0xf] %vm1468_vm0, %v1801_v3  ;;  %v837_v10 = vsel %vm581_vm10, %v453_v56, %v709_v4  ;;  %v322_v12 = vmul.f32 %v1974_v0, %v187_v2  ;;  %v196_v56 = vld [vmem:[%s1979_s20 + $0xb0] sm:$0xff]  ;;  %v197_v61 = vld [vmem:[%s1979_s20 + $0xb8] sm:$0xff] }
  0x23   : > { %v1802_v9 = vpack.c.bf16 %v836_v6, %v836_v6  ;;  %v1803_v15 = vpack.c.bf16 %v837_v10, %v837_v10  ;;  %v838_v16 = vsel %vm582_vm11, %v454_v58, %v710_v7  ;;  %v323_v18 = vmul.f32 %v1974_v0, %v188_v5  ;;  %v199_v63 = vld [vmem:[%s1979_s20 + $0xc8] sm:$0xff]  ;;  %v200_v6 = vld [vmem:[%s1979_s20 + $0xd0] sm:$0xff]  ;;  %v201_v7 = vld [vmem:[%s1979_s20 + $0xd8] sm:$0xff] }
  0x24   : > { %v839_v17 = vsel %vm583_vm12, %v455_v59, %v711_v8  ;;  %v1804_v22 = vpack.c.bf16 %v838_v16, %v838_v16  ;;  %vm584_vm13 = vcmp.ge.f32.partialorder %v456_v11, 0.0  ;;  %v712_v24 = vmul.f32 0.1, %v456_v11 }
  0x25   : > { %1477 = vst.msk [vmem:[%s2012_s26 + $0x20] sm:$0xf] %vm1468_vm0, %v1802_v9  ;;  %v1805_v23 = vpack.c.bf16 %v839_v17, %v839_v17  ;;  %1478 = vst.msk [vmem:[%s2012_s26 + $0x24] sm:$0xf] %vm1468_vm0, %v1803_v15  ;;  %v457_v25 = vadd.f32 %v1984_v1, %v322_v12  ;;  %v458_v26 = vadd.f32 %v1984_v1, %v323_v18 }
  0x26   : > { %v324_v27 = vmul.f32 %v1974_v0, %v189_v13  ;;  %v325_v28 = vmul.f32 %v1974_v0, %v190_v14  ;;  %1479 = vst.msk [vmem:[%s2012_s26 + $0x28] sm:$0xf] %vm1468_vm0, %v1804_v22  ;;  %v840_v29 = vsel %vm584_vm13, %v456_v11, %v712_v24  ;;  %v326_v30 = vmul.f32 %v1974_v0, %v191_v19 }
  0x27   : > { %1480 = vst.msk [vmem:[%s2012_s26 + $0x2c] sm:$0xf] %vm1468_vm0, %v1805_v23  ;;  %v327_v31 = vmul.f32 %v1974_v0, %v192_v20  ;;  %v328_v32 = vmul.f32 %v1974_v0, %v193_v21  ;;  %v1806_v34 = vpack.c.bf16 %v840_v29, %v840_v29  ;;  %vm585_vm14 = vcmp.ge.f32.partialorder %v457_v25, 0.0 }
  0x28   : > { %v713_v35 = vmul.f32 0.1, %v457_v25  ;;  %vm586_vm15 = vcmp.ge.f32.partialorder %v458_v26, 0.0  ;;  %v714_v36 = vmul.f32 0.1, %v458_v26  ;;  %v459_v37 = vadd.f32 %v1984_v1, %v324_v27 }
  0x29   : > { %v460_v38 = vadd.f32 %v1984_v1, %v325_v28  ;;  %v461_v39 = vadd.f32 %v1984_v1, %v326_v30  ;;  %1481 = vst.msk [vmem:[%s2012_s26 + $0x30] sm:$0xf] %vm1468_vm0, %v1806_v34  ;;  %v462_v41 = vadd.f32 %v1984_v1, %v327_v31  ;;  %v463_v42 = vadd.f32 %v1984_v1, %v328_v32  ;;  %v202_v31 = vld [vmem:[%s1979_s20 + $0xe0] sm:$0xff] }
  0x2a   : > { %v841_v40 = vsel %vm585_vm14, %v457_v25, %v713_v35  ;;  %v329_v43 = vmul.f32 %v1974_v0, %v194_v33  ;;  %v842_v45 = vsel %vm586_vm15, %v458_v26, %v714_v36  ;;  %vm587_vm1 = vcmp.ge.f32.partialorder %v459_v37, 0.0  ;;  %v203_v35 = vld [vmem:[%s1979_s20 + $0xe8] sm:$0xff]  ;;  %v204_v36 = vld [vmem:[%s1979_s20 + $0xf0] sm:$0xff] }
  0x2b   : > { %v1807_v44 = vpack.c.bf16 %v841_v40, %v841_v40  ;;  %v715_v46 = vmul.f32 0.1, %v459_v37  ;;  %v1808_v47 = vpack.c.bf16 %v842_v45, %v842_v45  ;;  %vm588_vm2 = vcmp.ge.f32.partialorder %v460_v38, 0.0  ;;  %v206_v45 = vld [vmem:[%s1979_s20 + $0x100] sm:$0xff] }
  0x2c   : > { %v716_v48 = vmul.f32 0.1, %v460_v38  ;;  %vm589_vm3 = vcmp.ge.f32.partialorder %v461_v39, 0.0  ;;  %v717_v50 = vmul.f32 0.1, %v461_v39  ;;  %vm590_vm4 = vcmp.ge.f32.partialorder %v462_v41, 0.0 }
  0x2d   : > { %1482 = vst.msk [vmem:[%s2012_s26 + $0x34] sm:$0xf] %vm1468_vm0, %v1807_v44  ;;  %v843_v49 = vsel %vm587_vm1, %v459_v37, %v715_v46  ;;  %v718_v51 = vmul.f32 0.1, %v462_v41  ;;  %1483 = vst.msk [vmem:[%s2012_s26 + $0x38] sm:$0xf] %vm1468_vm0, %v1808_v47  ;;  %v464_v60 = vadd.f32 %v1984_v1, %v329_v43  ;;  %v330_v5 = vmul.f32 %v1974_v0, %v195_v52 }
  0x2e   : > { %v1809_v53 = vpack.c.bf16 %v843_v49, %v843_v49  ;;  %v844_v54 = vsel %vm588_vm2, %v460_v38, %v716_v48  ;;  %vm591_vm5 = vcmp.ge.f32.partialorder %v463_v42, 0.0  ;;  %v719_v55 = vmul.f32 0.1, %v463_v42  ;;  %v205_v44 = vld [vmem:[%s1979_s20 + $0xf8] sm:$0xff] }
  0x2f   : > { %v1810_v57 = vpack.c.bf16 %v844_v54, %v844_v54  ;;  %v845_v58 = vsel %vm589_vm3, %v461_v39, %v717_v50  ;;  %v846_v59 = vsel %vm590_vm4, %v462_v41, %v718_v51  ;;  %vm592_vm6 = vcmp.ge.f32.partialorder %v464_v60, 0.0  ;;  %v207_v50 = vld [vmem:[%s1979_s20 + $0x108] sm:$0xff] }
  0x30   : > { %1484 = vst.msk [vmem:[%s2012_s26 + $0x3c] sm:$0xf] %vm1468_vm0, %v1809_v53  ;;  %v1811_v2 = vpack.c.bf16 %v845_v58, %v845_v58  ;;  %v1812_v3 = vpack.c.bf16 %v846_v59, %v846_v59  ;;  %v847_v4 = vsel %vm591_vm5, %v463_v42, %v719_v55  ;;  %v720_v9 = vmul.f32 0.1, %v464_v60 }
  0x31   : > { %1485 = vst.msk [vmem:[%s2012_s26 + $0x40] sm:$0xf] %vm1468_vm0, %v1810_v57  ;;  %v1813_v8 = vpack.c.bf16 %v847_v4, %v847_v4  ;;  %v331_v10 = vmul.f32 %v1974_v0, %v196_v56  ;;  %v465_v11 = vadd.f32 %v1984_v1, %v330_v5  ;;  %v332_v12 = vmul.f32 %v1974_v0, %v197_v61  ;;  %v208_v61 = vld [vmem:[%s1979_s20 + $0x110] sm:$0xff] }
  0x32   : > { %1486 = vst.msk [vmem:[%s2012_s26 + $0x44] sm:$0xf] %vm1468_vm0, %v1811_v2  ;;  %1487 = vst.msk [vmem:[%s2012_s26 + $0x48] sm:$0xf] %vm1468_vm0, %v1812_v3  ;;  %v333_v13 = vmul.f32 %v1974_v0, %v198_v62  ;;  %v334_v14 = vmul.f32 %v1974_v0, %v199_v63  ;;  %v848_v15 = vsel %vm592_vm6, %v464_v60, %v720_v9 }
  0x33   : > { %1488 = vst.msk [vmem:[%s2012_s26 + $0x4c] sm:$0xf] %vm1468_vm0, %v1813_v8  ;;  %v466_v16 = vadd.f32 %v1984_v1, %v331_v10  ;;  %v335_v17 = vmul.f32 %v1974_v0, %v200_v6  ;;  %v336_v18 = vmul.f32 %v1974_v0, %v201_v7  ;;  %v1814_v19 = vpack.c.bf16 %v848_v15, %v848_v15  ;;  %v209_v10 = vld [vmem:[%s1979_s20 + $0x118] sm:$0xff]  ;;  %v211_v15 = vld [vmem:[%s1979_s20 + $0x128] sm:$0xff] }
  0x34   : > { %vm593_vm7 = vcmp.ge.f32.partialorder %v465_v11, 0.0  ;;  %v721_v20 = vmul.f32 0.1, %v465_v11  ;;  %v467_v21 = vadd.f32 %v1984_v1, %v332_v12  ;;  %v468_v23 = vadd.f32 %v1984_v1, %v333_v13 }
  0x35   : > { %vm594_vm8 = vcmp.ge.f32.partialorder %v466_v16, 0.0  ;;  %v722_v22 = vmul.f32 0.1, %v466_v16  ;;  %v469_v24 = vadd.f32 %v1984_v1, %v334_v14  ;;  %1489 = vst.msk [vmem:[%s2012_s26 + $0x50] sm:$0xf] %vm1468_vm0, %v1814_v19  ;;  %v470_v27 = vadd.f32 %v1984_v1, %v335_v17  ;;  %v210_v14 = vld [vmem:[%s1979_s20 + $0x120] sm:$0xff] }
  0x36   : > { %v849_v25 = vsel %vm593_vm7, %v465_v11, %v721_v20  ;;  %vm595_vm9 = vcmp.ge.f32.partialorder %v467_v21, 0.0  ;;  %v723_v26 = vmul.f32 0.1, %v467_v21  ;;  %vm596_vm10 = vcmp.ge.f32.partialorder %v468_v23, 0.0 }
  0x37   : > { %v1815_v28 = vpack.c.bf16 %v849_v25, %v849_v25  ;;  %v850_v29 = vsel %vm594_vm8, %v466_v16, %v722_v22  ;;  %v724_v30 = vmul.f32 0.1, %v468_v23  ;;  %vm597_vm11 = vcmp.ge.f32.partialorder %v469_v24, 0.0 }
  0x38   : > { %v1816_v32 = vpack.c.bf16 %v850_v29, %v850_v29  ;;  %v851_v33 = vsel %vm595_vm9, %v467_v21, %v723_v26  ;;  %v725_v34 = vmul.f32 0.1, %v469_v24  ;;  %vm598_vm12 = vcmp.ge.f32.partialorder %v470_v27, 0.0  ;;  %v212_v26 = vld [vmem:[%s1979_s20 + $0x130] sm:$0xff] }
  0x39   : > { %1490 = vst.msk [vmem:[%s2012_s26 + $0x54] sm:$0xf] %vm1468_vm0, %v1815_v28  ;;  %v1817_v37 = vpack.c.bf16 %v851_v33, %v851_v33  ;;  %v852_v38 = vsel %vm596_vm10, %v468_v23, %v724_v30  ;;  %v726_v39 = vmul.f32 0.1, %v470_v27  ;;  %v471_v42 = vadd.f32 %v1984_v1, %v336_v18  ;;  %v214_v28 = vld [vmem:[%s1979_s20 + $0x140] sm:$0xff] }
  0x3a   : > { %1491 = vst.msk [vmem:[%s2012_s26 + $0x58] sm:$0xf] %vm1468_vm0, %v1816_v32  ;;  %v1818_v40 = vpack.c.bf16 %v852_v38, %v852_v38  ;;  %v853_v41 = vsel %vm597_vm11, %v469_v24, %v725_v34  ;;  %v337_v43 = vmul.f32 %v1974_v0, %v202_v31  ;;  %v338_v48 = vmul.f32 %v1974_v0, %v203_v35 }
  0x3b   : > { %1492 = vst.msk [vmem:[%s2012_s26 + $0x5c] sm:$0xf] %vm1468_vm0, %v1817_v37  ;;  %v1819_v46 = vpack.c.bf16 %v853_v41, %v853_v41  ;;  %v854_v47 = vsel %vm598_vm12, %v470_v27, %v726_v39  ;;  %v339_v49 = vmul.f32 %v1974_v0, %v204_v36  ;;  %vm599_vm13 = vcmp.ge.f32.partialorder %v471_v42, 0.0  ;;  %v213_v27 = vld [vmem:[%s1979_s20 + $0x138] sm:$0xff] }
  0x3c   : > { %1493 = vst.msk [vmem:[%s2012_s26 + $0x60] sm:$0xf] %vm1468_vm0, %v1818_v40  ;;  %v1820_v51 = vpack.c.bf16 %v854_v47, %v854_v47  ;;  %v727_v52 = vmul.f32 0.1, %v471_v42  ;;  %v472_v53 = vadd.f32 %v1984_v1, %v337_v43  ;;  %v473_v54 = vadd.f32 %v1984_v1, %v338_v48  ;;  %v215_v40 = vld [vmem:[%s1979_s20 + $0x148] sm:$0xff] }
  0x3d   : > { %1494 = vst.msk [vmem:[%s2012_s26 + $0x64] sm:$0xf] %vm1468_vm0, %v1819_v46  ;;  %v474_v55 = vadd.f32 %v1984_v1, %v339_v49  ;;  %v340_v56 = vmul.f32 %v1974_v0, %v205_v44  ;;  %v341_v57 = vmul.f32 %v1974_v0, %v206_v45  ;;  %v342_v60 = vmul.f32 %v1974_v0, %v207_v50 }
  0x3e   : > { %1495 = vst.msk [vmem:[%s2012_s26 + $0x68] sm:$0xf] %vm1468_vm0, %v1820_v51  ;;  %v855_v58 = vsel %vm599_vm13, %v471_v42, %v727_v52  ;;  %vm600_vm14 = vcmp.ge.f32.partialorder %v472_v53, 0.0  ;;  %v728_v59 = vmul.f32 0.1, %v472_v53  ;;  %vm601_vm15 = vcmp.ge.f32.partialorder %v473_v54, 0.0 }
  0x3f   : > { %v1821_v62 = vpack.c.bf16 %v855_v58, %v855_v58  ;;  %v729_v63 = vmul.f32 0.1, %v473_v54  ;;  %vm602_vm1 = vcmp.ge.f32.partialorder %v474_v55, 0.0  ;;  %v730_v3 = vmul.f32 0.1, %v474_v55 }
  0x40   : > { %v856_v2 = vsel %vm600_vm14, %v472_v53, %v728_v59  ;;  %v475_v4 = vadd.f32 %v1984_v1, %v340_v56  ;;  %v476_v5 = vadd.f32 %v1984_v1, %v341_v57  ;;  %v477_v8 = vadd.f32 %v1984_v1, %v342_v60  ;;  %v216_v53 = vld [vmem:[%s1979_s20 + $0x150] sm:$0xff] }
  0x41   : > { %1496 = vst.msk [vmem:[%s2012_s26 + $0x6c] sm:$0xf] %vm1468_vm0, %v1821_v62  ;;  %v1822_v6 = vpack.c.bf16 %v856_v2, %v856_v2  ;;  %v857_v7 = vsel %vm601_vm15, %v473_v54, %v729_v63  ;;  %v343_v9 = vmul.f32 %v1974_v0, %v208_v61  ;;  %v858_v12 = vsel %vm602_vm1, %v474_v55, %v730_v3  ;;  %v217_v54 = vld [vmem:[%s1979_s20 + $0x158] sm:$0xff]  ;;  %v218_v55 = vld [vmem:[%s1979_s20 + $0x160] sm:$0xff] }
  0x42   : > { %v1823_v11 = vpack.c.bf16 %v857_v7, %v857_v7  ;;  %vm603_vm2 = vcmp.ge.f32.partialorder %v475_v4, 0.0  ;;  %v731_v13 = vmul.f32 0.1, %v475_v4  ;;  %v1824_v16 = vpack.c.bf16 %v858_v12, %v858_v12 }
  0x43   : > { %1497 = vst.msk [vmem:[%s2012_s26 + $0x70] sm:$0xf] %vm1468_vm0, %v1822_v6  ;;  %vm604_vm3 = vcmp.ge.f32.partialorder %v476_v5, 0.0  ;;  %v732_v17 = vmul.f32 0.1, %v476_v5  ;;  %vm605_vm4 = vcmp.ge.f32.partialorder %v477_v8, 0.0  ;;  %v478_v20 = vadd.f32 %v1984_v1, %v343_v9 }
  0x44   : > { %1498 = vst.msk [vmem:[%s2012_s26 + $0x74] sm:$0xf] %vm1468_vm0, %v1823_v11  ;;  %v859_v18 = vsel %vm603_vm2, %v475_v4, %v731_v13  ;;  %v733_v19 = vmul.f32 0.1, %v477_v8  ;;  %v344_v21 = vmul.f32 %v1974_v0, %v209_v10  ;;  %1499 = vst.msk [vmem:[%s2012_s26 + $0x78] sm:$0xf] %vm1468_vm0, %v1824_v16  ;;  %v345_v24 = vmul.f32 %v1974_v0, %v210_v14 }
  0x45   : > { %v1825_v22 = vpack.c.bf16 %v859_v18, %v859_v18  ;;  %v860_v23 = vsel %vm604_vm3, %v476_v5, %v732_v17  ;;  %v346_v25 = vmul.f32 %v1974_v0, %v211_v15  ;;  %vm606_vm5 = vcmp.ge.f32.partialorder %v478_v20, 0.0  ;;  %v219_v4 = vld [vmem:[%s1979_s20 + $0x168] sm:$0xff]  ;;  %v220_v5 = vld [vmem:[%s1979_s20 + $0x170] sm:$0xff]  ;;  %v221_v9 = vld [vmem:[%s1979_s20 + $0x178] sm:$0xff] }
  0x46   : > { %v1826_v29 = vpack.c.bf16 %v860_v23, %v860_v23  ;;  %v861_v30 = vsel %vm605_vm4, %v477_v8, %v733_v19  ;;  %v734_v31 = vmul.f32 0.1, %v478_v20  ;;  %v479_v33 = vadd.f32 %v1984_v1, %v344_v21  ;;  %v222_v21 = vld [vmem:[%s1979_s20 + $0x180] sm:$0xff] }
  0x47   : > { %1500 = vst.msk [vmem:[%s2012_s26 + $0x7c] sm:$0xf] %vm1468_vm0, %v1825_v22  ;;  %v1827_v32 = vpack.c.bf16 %v861_v30, %v861_v30  ;;  %v480_v34 = vadd.f32 %v1984_v1, %v345_v24  ;;  %v481_v35 = vadd.f32 %v1984_v1, %v346_v25  ;;  %v347_v37 = vmul.f32 %v1974_v0, %v212_v26 }
  0x48   : > { %1501 = vst.msk [vmem:[%s2012_s26 + $0x80] sm:$0xf] %vm1468_vm0, %v1826_v29  ;;  %v862_v36 = vsel %vm606_vm5, %v478_v20, %v734_v31  ;;  %v348_v38 = vmul.f32 %v1974_v0, %v213_v27  ;;  %v349_v39 = vmul.f32 %v1974_v0, %v214_v28  ;;  %vm607_vm6 = vcmp.ge.f32.partialorder %v479_v33, 0.0 }
  0x49   : > { %1502 = vst.msk [vmem:[%s2012_s26 + $0x84] sm:$0xf] %vm1468_vm0, %v1827_v32  ;;  %v1828_v41 = vpack.c.bf16 %v862_v36, %v862_v36  ;;  %v735_v42 = vmul.f32 0.1, %v479_v33  ;;  %vm608_vm7 = vcmp.ge.f32.partialorder %v480_v34, 0.0  ;;  %vm609_vm8 = vcmp.ge.f32.partialorder %v481_v35, 0.0 }
  0x4a   : > { %v736_v43 = vmul.f32 0.1, %v480_v34  ;;  %v737_v44 = vmul.f32 0.1, %v481_v35  ;;  %v482_v45 = vadd.f32 %v1984_v1, %v347_v37  ;;  %v483_v47 = vadd.f32 %v1984_v1, %v348_v38  ;;  %v223_v32 = vld [vmem:[%s1979_s20 + $0x188] sm:$0xff]  ;;  %v224_v36 = vld [vmem:[%s1979_s20 + $0x190] sm:$0xff] }
  0x4b   : > { %1503 = vst.msk [vmem:[%s2012_s26 + $0x88] sm:$0xf] %vm1468_vm0, %v1828_v41  ;;  %v863_v46 = vsel %vm607_vm6, %v479_v33, %v735_v42  ;;  %v484_v48 = vadd.f32 %v1984_v1, %v349_v39  ;;  %v350_v49 = vmul.f32 %v1974_v0, %v215_v40  ;;  %v351_v63 = vmul.f32 %v1974_v0, %v216_v53  ;;  %v225_v37 = vld [vmem:[%s1979_s20 + $0x198] sm:$0xff] }
  0x4c   : > { %v1829_v50 = vpack.c.bf16 %v863_v46, %v863_v46  ;;  %v864_v51 = vsel %vm608_vm7, %v480_v34, %v736_v43  ;;  %v865_v52 = vsel %vm609_vm8, %v481_v35, %v737_v44  ;;  %vm610_vm9 = vcmp.ge.f32.partialorder %v482_v45, 0.0 }
  0x4d   : > { %v1830_v56 = vpack.c.bf16 %v864_v51, %v864_v51  ;;  %v1831_v57 = vpack.c.bf16 %v865_v52, %v865_v52  ;;  %v738_v58 = vmul.f32 0.1, %v482_v45  ;;  %vm611_vm10 = vcmp.ge.f32.partialorder %v483_v47, 0.0 }
  0x4e   : > { %1504 = vst.msk [vmem:[%s2012_s26 + $0x8c] sm:$0xf] %vm1468_vm0, %v1829_v50  ;;  %v739_v59 = vmul.f32 0.1, %v483_v47  ;;  %vm612_vm11 = vcmp.ge.f32.partialorder %v484_v48, 0.0  ;;  %v485_v61 = vadd.f32 %v1984_v1, %v350_v49  ;;  %v352_v2 = vmul.f32 %v1974_v0, %v217_v54  ;;  %v227_v49 = vld [vmem:[%s1979_s20 + $0x1a8] sm:$0xff] }
  0x4f   : > { %v740_v60 = vmul.f32 0.1, %v484_v48  ;;  %1505 = vst.msk [vmem:[%s2012_s26 + $0x90] sm:$0xf] %vm1468_vm0, %v1830_v56  ;;  %1506 = vst.msk [vmem:[%s2012_s26 + $0x94] sm:$0xf] %vm1468_vm0, %v1831_v57  ;;  %v866_v62 = vsel %vm610_vm9, %v482_v45, %v738_v58  ;;  %v353_v3 = vmul.f32 %v1974_v0, %v218_v55  ;;  %v486_v13 = vadd.f32 %v1984_v1, %v351_v63 }
  0x50   : > { %v1832_v6 = vpack.c.bf16 %v866_v62, %v866_v62  ;;  %v867_v7 = vsel %vm611_vm10, %v483_v47, %v739_v59  ;;  %vm613_vm12 = vcmp.ge.f32.partialorder %v485_v61, 0.0  ;;  %v741_v12 = vmul.f32 0.1, %v485_v61  ;;  %v228_v50 = vld [vmem:[%s1979_s20 + $0x1b0] sm:$0xff]  ;;  %v229_v62 = vld [vmem:[%s1979_s20 + $0x1b8] sm:$0xff] }
  0x51   : > { %v868_v8 = vsel %vm612_vm11, %v484_v48, %v740_v60  ;;  %v1833_v10 = vpack.c.bf16 %v867_v7, %v867_v7  ;;  %v487_v14 = vadd.f32 %v1984_v1, %v352_v2  ;;  %v488_v15 = vadd.f32 %v1984_v1, %v353_v3  ;;  %v226_v48 = vld [vmem:[%s1979_s20 + $0x1a0] sm:$0xff] }
  0x52   : > { %v1834_v11 = vpack.c.bf16 %v868_v8, %v868_v8  ;;  %1507 = vst.msk [vmem:[%s2012_s26 + $0x98] sm:$0xf] %vm1468_vm0, %v1832_v6  ;;  %v354_v16 = vmul.f32 %v1974_v0, %v219_v4  ;;  %v355_v17 = vmul.f32 %v1974_v0, %v220_v5  ;;  %v869_v18 = vsel %vm613_vm12, %v485_v61, %v741_v12 }
  0x53   : > { %1508 = vst.msk [vmem:[%s2012_s26 + $0x9c] sm:$0xf] %vm1468_vm0, %v1833_v10  ;;  %vm614_vm13 = vcmp.ge.f32.partialorder %v486_v13, 0.0  ;;  %v742_v19 = vmul.f32 0.1, %v486_v13  ;;  %v356_v20 = vmul.f32 %v1974_v0, %v221_v9  ;;  %v1835_v22 = vpack.c.bf16 %v869_v18, %v869_v18 }
  0x54   : > { %1509 = vst.msk [vmem:[%s2012_s26 + $0xa0] sm:$0xf] %vm1468_vm0, %v1834_v11  ;;  %vm615_vm14 = vcmp.ge.f32.partialorder %v487_v14, 0.0  ;;  %v743_v23 = vmul.f32 0.1, %v487_v14  ;;  %vm616_vm15 = vcmp.ge.f32.partialorder %v488_v15, 0.0  ;;  %v489_v26 = vadd.f32 %v1984_v1, %v354_v16 }
  0x55   : > { %v870_v24 = vsel %vm614_vm13, %v486_v13, %v742_v19  ;;  %v744_v25 = vmul.f32 0.1, %v488_v15  ;;  %v490_v27 = vadd.f32 %v1984_v1, %v355_v17  ;;  %1510 = vst.msk [vmem:[%s2012_s26 + $0xa4] sm:$0xf] %vm1468_vm0, %v1835_v22  ;;  %v491_v30 = vadd.f32 %v1984_v1, %v356_v20  ;;  %v230_v13 = vld [vmem:[%s1979_s20 + $0x1c0] sm:$0xff] }
  0x56   : > { %v1836_v28 = vpack.c.bf16 %v870_v24, %v870_v24  ;;  %v871_v29 = vsel %vm615_vm14, %v487_v14, %v743_v23  ;;  %v357_v31 = vmul.f32 %v1974_v0, %v222_v21  ;;  %vm617_vm1 = vcmp.ge.f32.partialorder %v489_v26, 0.0  ;;  %v231_v14 = vld [vmem:[%s1979_s20 + $0x1c8] sm:$0xff] }
  0x57   : > { %v1837_v33 = vpack.c.bf16 %v871_v29, %v871_v29  ;;  %v872_v34 = vsel %vm616_vm15, %v488_v15, %v744_v25  ;;  %v745_v35 = vmul.f32 0.1, %v489_v26  ;;  %vm618_vm2 = vcmp.ge.f32.partialorder %v490_v27, 0.0  ;;  %v232_v15 = vld [vmem:[%s1979_s20 + $0x1d0] sm:$0xff] }
  0x58   : > { %1511 = vst.msk [vmem:[%s2012_s26 + $0xa8] sm:$0xf] %vm1468_vm0, %v1836_v28  ;;  %v1838_v38 = vpack.c.bf16 %v872_v34, %v872_v34  ;;  %v746_v39 = vmul.f32 0.1, %v490_v27  ;;  %vm619_vm3 = vcmp.ge.f32.partialorder %v491_v30, 0.0  ;;  %v492_v42 = vadd.f32 %v1984_v1, %v357_v31  ;;  %v235_v31 = vld [vmem:[%s1979_s20 + $0x1e8] sm:$0xff] }
  0x59   : > { %1512 = vst.msk [vmem:[%s2012_s26 + $0xac] sm:$0xf] %vm1468_vm0, %v1837_v33  ;;  %v873_v40 = vsel %vm617_vm1, %v489_v26, %v745_v35  ;;  %v747_v41 = vmul.f32 0.1, %v491_v30  ;;  %v358_v43 = vmul.f32 %v1974_v0, %v223_v32  ;;  %v359_v46 = vmul.f32 %v1974_v0, %v224_v36  ;;  %v233_v26 = vld [vmem:[%s1979_s20 + $0x1d8] sm:$0xff] }
  0x5a   : > { %1513 = vst.msk [vmem:[%s2012_s26 + $0xb0] sm:$0xf] %vm1468_vm0, %v1838_v38  ;;  %v1839_v44 = vpack.c.bf16 %v873_v40, %v873_v40  ;;  %v874_v45 = vsel %vm618_vm2, %v490_v27, %v746_v39  ;;  %v360_v47 = vmul.f32 %v1974_v0, %v225_v37  ;;  %vm620_vm4 = vcmp.ge.f32.partialorder %v492_v42, 0.0  ;;  %v234_v27 = vld [vmem:[%s1979_s20 + $0x1e0] sm:$0xff] }
  0x5b   : > { %v1840_v51 = vpack.c.bf16 %v874_v45, %v874_v45  ;;  %v875_v52 = vsel %vm619_vm3, %v491_v30, %v747_v41  ;;  %v748_v53 = vmul.f32 0.1, %v492_v42  ;;  %v493_v55 = vadd.f32 %v1984_v1, %v358_v43  ;;  %v236_v43 = vld [vmem:[%s1979_s20 + $0x1f0] sm:$0xff] }
  0x5c   : > { %1514 = vst.msk [vmem:[%s2012_s26 + $0xb4] sm:$0xf] %vm1468_vm0, %v1839_v44  ;;  %v1841_v54 = vpack.c.bf16 %v875_v52, %v875_v52  ;;  %v494_v56 = vadd.f32 %v1984_v1, %v359_v46  ;;  %v495_v57 = vadd.f32 %v1984_v1, %v360_v47  ;;  %v361_v59 = vmul.f32 %v1974_v0, %v226_v48 }
  0x5d   : > { %1515 = vst.msk [vmem:[%s2012_s26 + $0xb8] sm:$0xf] %vm1468_vm0, %v1840_v51  ;;  %v876_v58 = vsel %vm620_vm4, %v492_v42, %v748_v53  ;;  %v362_v60 = vmul.f32 %v1974_v0, %v227_v49  ;;  %v363_v61 = vmul.f32 %v1974_v0, %v228_v50  ;;  %vm621_vm5 = vcmp.ge.f32.partialorder %v493_v55, 0.0 }
  0x5e   : > { %1516 = vst.msk [vmem:[%s2012_s26 + $0xbc] sm:$0xf] %vm1468_vm0, %v1841_v54  ;;  %v1842_v63 = vpack.c.bf16 %v876_v58, %v876_v58  ;;  %v749_v2 = vmul.f32 0.1, %v493_v55  ;;  %vm622_vm6 = vcmp.ge.f32.partialorder %v494_v56, 0.0  ;;  %vm623_vm7 = vcmp.ge.f32.partialorder %v495_v57, 0.0 }
  0x5f   : > { %v750_v3 = vmul.f32 0.1, %v494_v56  ;;  %v751_v4 = vmul.f32 0.1, %v495_v57  ;;  %v496_v5 = vadd.f32 %v1984_v1, %v361_v59  ;;  %v497_v7 = vadd.f32 %v1984_v1, %v362_v60  ;;  %v237_v54 = vld [vmem:[%s1979_s20 + $0x1f8] sm:$0xff]  ;;  %v238_v58 = vld [vmem:[%s1979_s20 + $0x200] sm:$0xff] }
  0x60   : > { %1517 = vst.msk [vmem:[%s2012_s26 + $0xc0] sm:$0xf] %vm1468_vm0, %v1842_v63  ;;  %v877_v6 = vsel %vm621_vm5, %v493_v55, %v749_v2  ;;  %v498_v8 = vadd.f32 %v1984_v1, %v363_v61  ;;  %v364_v9 = vmul.f32 %v1974_v0, %v229_v62  ;;  %v365_v23 = vmul.f32 %v1974_v0, %v230_v13  ;;  %v239_v59 = vld [vmem:[%s1979_s20 + $0x208] sm:$0xff] }
  0x61   : > { %v1843_v10 = vpack.c.bf16 %v877_v6, %v877_v6  ;;  %v878_v11 = vsel %vm622_vm6, %v494_v56, %v750_v3  ;;  %v879_v12 = vsel %vm623_vm7, %v495_v57, %v751_v4  ;;  %vm624_vm8 = vcmp.ge.f32.partialorder %v496_v5, 0.0 }
  0x62   : > { %v1844_v16 = vpack.c.bf16 %v878_v11, %v878_v11  ;;  %v1845_v17 = vpack.c.bf16 %v879_v12, %v879_v12  ;;  %v752_v18 = vmul.f32 0.1, %v496_v5  ;;  %vm625_vm9 = vcmp.ge.f32.partialorder %v497_v7, 0.0 }
  0x63   : > { %1518 = vst.msk [vmem:[%s2012_s26 + $0xc4] sm:$0xf] %vm1468_vm0, %v1843_v10  ;;  %v753_v19 = vmul.f32 0.1, %v497_v7  ;;  %vm626_vm10 = vcmp.ge.f32.partialorder %v498_v8, 0.0  ;;  %v499_v21 = vadd.f32 %v1984_v1, %v364_v9  ;;  %v366_v24 = vmul.f32 %v1974_v0, %v231_v14  ;;  %v241_v9 = vld [vmem:[%s1979_s20 + $0x218] sm:$0xff] }
  0x64   : > { %v754_v20 = vmul.f32 0.1, %v498_v8  ;;  %1519 = vst.msk [vmem:[%s2012_s26 + $0xc8] sm:$0xf] %vm1468_vm0, %v1844_v16  ;;  %1520 = vst.msk [vmem:[%s2012_s26 + $0xcc] sm:$0xf] %vm1468_vm0, %v1845_v17  ;;  %v880_v22 = vsel %vm624_vm8, %v496_v5, %v752_v18  ;;  %v367_v25 = vmul.f32 %v1974_v0, %v232_v15  ;;  %v500_v35 = vadd.f32 %v1984_v1, %v365_v23 }
  0x65   : > { %v1846_v28 = vpack.c.bf16 %v880_v22, %v880_v22  ;;  %v881_v29 = vsel %vm625_vm9, %v497_v7, %v753_v19  ;;  %vm627_vm11 = vcmp.ge.f32.partialorder %v499_v21, 0.0  ;;  %v755_v34 = vmul.f32 0.1, %v499_v21  ;;  %v242_v10 = vld [vmem:[%s1979_s20 + $0x220] sm:$0xff]  ;;  %v243_v22 = vld [vmem:[%s1979_s20 + $0x228] sm:$0xff] }
  0x66   : > { %v882_v30 = vsel %vm626_vm10, %v498_v8, %v754_v20  ;;  %v1847_v32 = vpack.c.bf16 %v881_v29, %v881_v29  ;;  %v501_v36 = vadd.f32 %v1984_v1, %v366_v24  ;;  %v502_v37 = vadd.f32 %v1984_v1, %v367_v25  ;;  %v240_v8 = vld [vmem:[%s1979_s20 + $0x210] sm:$0xff]  ;;  %v2313_v14 = vld [vmem:[%s2647_s2] ss:$0 sm:$0xff] }
  0x67   : > { %v1848_v33 = vpack.c.bf16 %v882_v30, %v882_v30  ;;  %1521 = vst.msk [vmem:[%s2012_s26 + $0xd0] sm:$0xf] %vm1468_vm0, %v1846_v28  ;;  %v368_v38 = vmul.f32 %v1974_v0, %v233_v26  ;;  %v369_v39 = vmul.f32 %v1974_v0, %v234_v27  ;;  %v883_v40 = vsel %vm627_vm11, %v499_v21, %v755_v34  ;;  %v2323_v18 = vld [vmem:[%s2646_s1] ss:$0 sm:$0xff] }
  0x68   : > { %1522 = vst.msk [vmem:[%s2012_s26 + $0xd4] sm:$0xf] %vm1468_vm0, %v1847_v32  ;;  %vm628_vm12 = vcmp.ge.f32.partialorder %v500_v35, 0.0  ;;  %v756_v41 = vmul.f32 0.1, %v500_v35  ;;  %v370_v42 = vmul.f32 %v1974_v0, %v235_v31  ;;  %v1849_v44 = vpack.c.bf16 %v883_v40, %v883_v40 }
  0x69   : > { %1523 = vst.msk [vmem:[%s2012_s26 + $0xd8] sm:$0xf] %vm1468_vm0, %v1848_v33  ;;  %vm629_vm13 = vcmp.ge.f32.partialorder %v501_v36, 0.0  ;;  %v757_v45 = vmul.f32 0.1, %v501_v36  ;;  %vm630_vm14 = vcmp.ge.f32.partialorder %v502_v37, 0.0  ;;  %v503_v48 = vadd.f32 %v1984_v1, %v368_v38 }
  0x6a   : > { %v884_v46 = vsel %vm628_vm12, %v500_v35, %v756_v41  ;;  %v758_v47 = vmul.f32 0.1, %v502_v37  ;;  %v504_v49 = vadd.f32 %v1984_v1, %v369_v39  ;;  %1524 = vst.msk [vmem:[%s2012_s26 + $0xdc] sm:$0xf] %vm1468_vm0, %v1849_v44  ;;  %v505_v52 = vadd.f32 %v1984_v1, %v370_v42  ;;  %v244_v35 = vld [vmem:[%s1979_s20 + $0x230] sm:$0xff] }
  0x6b   : > { %v1850_v50 = vpack.c.bf16 %v884_v46, %v884_v46  ;;  %v885_v51 = vsel %vm629_vm13, %v501_v36, %v757_v45  ;;  %v371_v53 = vmul.f32 %v1974_v0, %v236_v43  ;;  %vm631_vm15 = vcmp.ge.f32.partialorder %v503_v48, 0.0  ;;  %v245_v36 = vld [vmem:[%s1979_s20 + $0x238] sm:$0xff] }
  0x6c   : > { %v1851_v55 = vpack.c.bf16 %v885_v51, %v885_v51  ;;  %v886_v56 = vsel %vm630_vm14, %v502_v37, %v758_v47  ;;  %v759_v57 = vmul.f32 0.1, %v503_v48  ;;  %vm632_vm1 = vcmp.ge.f32.partialorder %v504_v49, 0.0  ;;  %v246_v37 = vld [vmem:[%s1979_s20 + $0x240] sm:$0xff] }
  0x6d   : > { %1525 = vst.msk [vmem:[%s2012_s26 + $0xe0] sm:$0xf] %vm1468_vm0, %v1850_v50  ;;  %v1852_v60 = vpack.c.bf16 %v886_v56, %v886_v56  ;;  %v760_v61 = vmul.f32 0.1, %v504_v49  ;;  %vm633_vm2 = vcmp.ge.f32.partialorder %v505_v52, 0.0  ;;  %v506_v2 = vadd.f32 %v1984_v1, %v371_v53  ;;  %v249_v53 = vld [vmem:[%s1979_s20 + $0x258] sm:$0xff] }
  0x6e   : > { %1526 = vst.msk [vmem:[%s2012_s26 + $0xe4] sm:$0xf] %vm1468_vm0, %v1851_v55  ;;  %v887_v62 = vsel %vm631_vm15, %v503_v48, %v759_v57  ;;  %v761_v63 = vmul.f32 0.1, %v505_v52  ;;  %v372_v3 = vmul.f32 %v1974_v0, %v237_v54  ;;  %v373_v6 = vmul.f32 %v1974_v0, %v238_v58  ;;  %v247_v48 = vld [vmem:[%s1979_s20 + $0x248] sm:$0xff] }
  0x6f   : > { %1527 = vst.msk [vmem:[%s2012_s26 + $0xe8] sm:$0xf] %vm1468_vm0, %v1852_v60  ;;  %v1853_v4 = vpack.c.bf16 %v887_v62, %v887_v62  ;;  %v888_v5 = vsel %vm632_vm1, %v504_v49, %v760_v61  ;;  %v374_v7 = vmul.f32 %v1974_v0, %v239_v59  ;;  %vm634_vm3 = vcmp.ge.f32.partialorder %v506_v2, 0.0  ;;  %v248_v49 = vld [vmem:[%s1979_s20 + $0x250] sm:$0xff] }
  0x70   : > { %v1854_v11 = vpack.c.bf16 %v888_v5, %v888_v5  ;;  %v889_v12 = vsel %vm633_vm2, %v505_v52, %v761_v63  ;;  %v762_v1 = vmul.f32 0.1, %v506_v2  ;;  %v507_v15 = vadd.f32 %v2313_v14, %v372_v3  ;;  %v250_v3 = vld [vmem:[%s1979_s20 + $0x260] sm:$0xff] }
  0x71   : > { %1528 = vst.msk [vmem:[%s2012_s26 + $0xec] sm:$0xf] %vm1468_vm0, %v1853_v4  ;;  %v1855_v13 = vpack.c.bf16 %v889_v12, %v889_v12  ;;  %v508_v0 = vadd.f32 %v2313_v14, %v373_v6  ;;  %v509_v16 = vadd.f32 %v2313_v14, %v374_v7  ;;  %v375_v19 = vmul.f32 %v2323_v18, %v240_v8 }
  0x72   : > { %1529 = vst.msk [vmem:[%s2012_s26 + $0xf0] sm:$0xf] %vm1468_vm0, %v1854_v11  ;;  %v890_v17 = vsel %vm634_vm3, %v506_v2, %v762_v1  ;;  %v376_v20 = vmul.f32 %v2323_v18, %v241_v9  ;;  %v377_v21 = vmul.f32 %v2323_v18, %v242_v10  ;;  %vm635_vm4 = vcmp.ge.f32.partialorder %v507_v15, 0.0 }
  0x73   : > { %1530 = vst.msk [vmem:[%s2012_s26 + $0xf4] sm:$0xf] %vm1468_vm0, %v1855_v13  ;;  %v1856_v23 = vpack.c.bf16 %v890_v17, %v890_v17  ;;  %v763_v24 = vmul.f32 0.1, %v507_v15  ;;  %vm636_vm5 = vcmp.ge.f32.partialorder %v508_v0, 0.0  ;;  %vm637_vm6 = vcmp.ge.f32.partialorder %v509_v16, 0.0 }
  0x74   : > { %v764_v25 = vmul.f32 0.1, %v508_v0  ;;  %v765_v26 = vmul.f32 0.1, %v509_v16  ;;  %v510_v27 = vadd.f32 %v2313_v14, %v375_v19  ;;  %v511_v29 = vadd.f32 %v2313_v14, %v376_v20  ;;  %v251_v13 = vld [vmem:[%s1979_s20 + $0x268] sm:$0xff]  ;;  %v252_v17 = vld [vmem:[%s1979_s20 + $0x270] sm:$0xff] }
  0x75   : > { %1531 = vst.msk [vmem:[%s2012_s26 + $0xf8] sm:$0xf] %vm1468_vm0, %v1856_v23  ;;  %v891_v28 = vsel %vm635_vm4, %v507_v15, %v763_v24  ;;  %v512_v30 = vadd.f32 %v2313_v14, %v377_v21  ;;  %v378_v31 = vmul.f32 %v2323_v18, %v243_v22  ;;  %v379_v45 = vmul.f32 %v2323_v18, %v244_v35  ;;  %v253_v19 = vld [vmem:[%s1979_s20 + $0x278] sm:$0xff] }
  0x76   : > { %v1857_v32 = vpack.c.bf16 %v891_v28, %v891_v28  ;;  %v892_v33 = vsel %vm636_vm5, %v508_v0, %v764_v25  ;;  %v893_v34 = vsel %vm637_vm6, %v509_v16, %v765_v26  ;;  %vm638_vm7 = vcmp.ge.f32.partialorder %v510_v27, 0.0 }
  0x77   : > { %v1858_v38 = vpack.c.bf16 %v892_v33, %v892_v33  ;;  %v1859_v39 = vpack.c.bf16 %v893_v34, %v893_v34  ;;  %v766_v40 = vmul.f32 0.1, %v510_v27  ;;  %vm639_vm8 = vcmp.ge.f32.partialorder %v511_v29, 0.0 }
  0x78   : > { %1532 = vst.msk [vmem:[%s2012_s26 + $0xfc] sm:$0xf] %vm1468_vm0, %v1857_v32  ;;  %v767_v41 = vmul.f32 0.1, %v511_v29  ;;  %vm640_vm9 = vcmp.ge.f32.partialorder %v512_v30, 0.0  ;;  %v513_v43 = vadd.f32 %v2313_v14, %v378_v31  ;;  %v380_v46 = vmul.f32 %v2323_v18, %v245_v36  ;;  %v255_v31 = vld [vmem:[%s1979_s20 + $0x288] sm:$0xff] }
  0x79   : > { %v768_v42 = vmul.f32 0.1, %v512_v30  ;;  %1533 = vst.msk [vmem:[%s2012_s26 + $0x100] sm:$0xf] %vm1468_vm0, %v1858_v38  ;;  %1534 = vst.msk [vmem:[%s2012_s26 + $0x104] sm:$0xf] %vm1468_vm0, %v1859_v39  ;;  %v894_v44 = vsel %vm638_vm7, %v510_v27, %v766_v40  ;;  %v381_v47 = vmul.f32 %v2323_v18, %v246_v37  ;;  %v514_v57 = vadd.f32 %v2313_v14, %v379_v45 }
  0x7a   : > { %v1860_v50 = vpack.c.bf16 %v894_v44, %v894_v44  ;;  %v895_v51 = vsel %vm639_vm8, %v511_v29, %v767_v41  ;;  %vm641_vm10 = vcmp.ge.f32.partialorder %v513_v43, 0.0  ;;  %v769_v56 = vmul.f32 0.1, %v513_v43  ;;  %v256_v32 = vld [vmem:[%s1979_s20 + $0x290] sm:$0xff]  ;;  %v257_v44 = vld [vmem:[%s1979_s20 + $0x298] sm:$0xff] }
  0x7b   : > { %v896_v52 = vsel %vm640_vm9, %v512_v30, %v768_v42  ;;  %v1861_v54 = vpack.c.bf16 %v895_v51, %v895_v51  ;;  %v515_v58 = vadd.f32 %v2313_v14, %v380_v46  ;;  %v516_v59 = vadd.f32 %v2313_v14, %v381_v47  ;;  %v254_v30 = vld [vmem:[%s1979_s20 + $0x280] sm:$0xff] }
  0x7c   : > { %v1862_v55 = vpack.c.bf16 %v896_v52, %v896_v52  ;;  %1535 = vst.msk [vmem:[%s2012_s26 + $0x108] sm:$0xf] %vm1468_vm0, %v1860_v50  ;;  %v382_v60 = vmul.f32 %v2323_v18, %v247_v48  ;;  %v383_v61 = vmul.f32 %v2323_v18, %v248_v49  ;;  %v897_v62 = vsel %vm641_vm10, %v513_v43, %v769_v56 }
  0x7d   : > { %1536 = vst.msk [vmem:[%s2012_s26 + $0x10c] sm:$0xf] %vm1468_vm0, %v1861_v54  ;;  %vm642_vm11 = vcmp.ge.f32.partialorder %v514_v57, 0.0  ;;  %v770_v63 = vmul.f32 0.1, %v514_v57  ;;  %v384_v2 = vmul.f32 %v2323_v18, %v249_v53  ;;  %v1863_v4 = vpack.c.bf16 %v897_v62, %v897_v62 }
  0x7e   : > { %1537 = vst.msk [vmem:[%s2012_s26 + $0x110] sm:$0xf] %vm1468_vm0, %v1862_v55  ;;  %vm643_vm12 = vcmp.ge.f32.partialorder %v515_v58, 0.0  ;;  %v771_v5 = vmul.f32 0.1, %v515_v58  ;;  %vm644_vm13 = vcmp.ge.f32.partialorder %v516_v59, 0.0  ;;  %v517_v8 = vadd.f32 %v2313_v14, %v382_v60 }
  0x7f   : > { %v898_v6 = vsel %vm642_vm11, %v514_v57, %v770_v63  ;;  %v772_v7 = vmul.f32 0.1, %v516_v59  ;;  %v518_v9 = vadd.f32 %v2313_v14, %v383_v61  ;;  %1538 = vst.msk [vmem:[%s2012_s26 + $0x114] sm:$0xf] %vm1468_vm0, %v1863_v4  ;;  %v519_v12 = vadd.f32 %v2313_v14, %v384_v2  ;;  %v258_v57 = vld [vmem:[%s1979_s20 + $0x2a0] sm:$0xff] }
  0x80   : > { %v1864_v10 = vpack.c.bf16 %v898_v6, %v898_v6  ;;  %v899_v11 = vsel %vm643_vm12, %v515_v58, %v771_v5  ;;  %v385_v1 = vmul.f32 %v2323_v18, %v250_v3  ;;  %vm645_vm14 = vcmp.ge.f32.partialorder %v517_v8, 0.0  ;;  %v259_v58 = vld [vmem:[%s1979_s20 + $0x2a8] sm:$0xff] }
  0x81   : > { %v1865_v15 = vpack.c.bf16 %v899_v11, %v899_v11  ;;  %v900_v0 = vsel %vm644_vm13, %v516_v59, %v772_v7  ;;  %v773_v16 = vmul.f32 0.1, %v517_v8  ;;  %vm646_vm15 = vcmp.ge.f32.partialorder %v518_v9, 0.0  ;;  %v260_v59 = vld [vmem:[%s1979_s20 + $0x2b0] sm:$0xff] }
  0x82   : > { %1539 = vst.msk [vmem:[%s2012_s26 + $0x118] sm:$0xf] %vm1468_vm0, %v1864_v10  ;;  %v1866_v20 = vpack.c.bf16 %v900_v0, %v900_v0  ;;  %v774_v21 = vmul.f32 0.1, %v518_v9  ;;  %vm647_vm1 = vcmp.ge.f32.partialorder %v519_v12, 0.0  ;;  %v520_v24 = vadd.f32 %v2313_v14, %v385_v1  ;;  %v263_v1 = vld [vmem:[%s1979_s20 + $0x2c8] sm:$0xff] }
  0x83   : > { %1540 = vst.msk [vmem:[%s2012_s26 + $0x11c] sm:$0xf] %vm1468_vm0, %v1865_v15  ;;  %v901_v22 = vsel %vm645_vm14, %v517_v8, %v773_v16  ;;  %v775_v23 = vmul.f32 0.1, %v519_v12  ;;  %v386_v25 = vmul.f32 %v2323_v18, %v251_v13  ;;  %v387_v28 = vmul.f32 %v2323_v18, %v252_v17  ;;  %v261_v8 = vld [vmem:[%s1979_s20 + $0x2b8] sm:$0xff] }
  0x84   : > { %1541 = vst.msk [vmem:[%s2012_s26 + $0x120] sm:$0xf] %vm1468_vm0, %v1866_v20  ;;  %v1867_v26 = vpack.c.bf16 %v901_v22, %v901_v22  ;;  %v902_v27 = vsel %vm646_vm15, %v518_v9, %v774_v21  ;;  %v388_v29 = vmul.f32 %v2323_v18, %v253_v19  ;;  %vm648_vm2 = vcmp.ge.f32.partialorder %v520_v24, 0.0  ;;  %v262_v9 = vld [vmem:[%s1979_s20 + $0x2c0] sm:$0xff] }
  0x85   : > { %v1868_v33 = vpack.c.bf16 %v902_v27, %v902_v27  ;;  %v903_v34 = vsel %vm647_vm1, %v519_v12, %v775_v23  ;;  %v776_v35 = vmul.f32 0.1, %v520_v24  ;;  %v521_v37 = vadd.f32 %v2313_v14, %v386_v25  ;;  %v264_v25 = vld [vmem:[%s1979_s20 + $0x2d0] sm:$0xff] }
  0x86   : > { %1542 = vst.msk [vmem:[%s2012_s26 + $0x124] sm:$0xf] %vm1468_vm0, %v1867_v26  ;;  %v1869_v36 = vpack.c.bf16 %v903_v34, %v903_v34  ;;  %v522_v38 = vadd.f32 %v2313_v14, %v387_v28  ;;  %v523_v39 = vadd.f32 %v2313_v14, %v388_v29  ;;  %v389_v41 = vmul.f32 %v2323_v18, %v254_v30 }
  0x87   : > { %1543 = vst.msk [vmem:[%s2012_s26 + $0x128] sm:$0xf] %vm1468_vm0, %v1868_v33  ;;  %v904_v40 = vsel %vm648_vm2, %v520_v24, %v776_v35  ;;  %v390_v42 = vmul.f32 %v2323_v18, %v255_v31  ;;  %v391_v43 = vmul.f32 %v2323_v18, %v256_v32  ;;  %vm649_vm3 = vcmp.ge.f32.partialorder %v521_v37, 0.0 }
  0x88   : > { %1544 = vst.msk [vmem:[%s2012_s26 + $0x12c] sm:$0xf] %vm1468_vm0, %v1869_v36  ;;  %v1870_v45 = vpack.c.bf16 %v904_v40, %v904_v40  ;;  %v777_v46 = vmul.f32 0.1, %v521_v37  ;;  %vm650_vm4 = vcmp.ge.f32.partialorder %v522_v38, 0.0  ;;  %vm651_vm5 = vcmp.ge.f32.partialorder %v523_v39, 0.0 }
  0x89   : > { %v778_v47 = vmul.f32 0.1, %v522_v38  ;;  %v779_v48 = vmul.f32 0.1, %v523_v39  ;;  %v524_v49 = vadd.f32 %v2313_v14, %v389_v41  ;;  %v525_v51 = vadd.f32 %v2313_v14, %v390_v42  ;;  %v265_v36 = vld [vmem:[%s1979_s20 + $0x2d8] sm:$0xff]  ;;  %v266_v40 = vld [vmem:[%s1979_s20 + $0x2e0] sm:$0xff] }
  0x8a   : > { %1545 = vst.msk [vmem:[%s2012_s26 + $0x130] sm:$0xf] %vm1468_vm0, %v1870_v45  ;;  %v905_v50 = vsel %vm649_vm3, %v521_v37, %v777_v46  ;;  %v526_v52 = vadd.f32 %v2313_v14, %v391_v43  ;;  %v392_v53 = vmul.f32 %v2323_v18, %v257_v44  ;;  %v393_v5 = vmul.f32 %v2323_v18, %v258_v57  ;;  %v267_v41 = vld [vmem:[%s1979_s20 + $0x2e8] sm:$0xff] }
  0x8b   : > { %v1871_v54 = vpack.c.bf16 %v905_v50, %v905_v50  ;;  %v906_v55 = vsel %vm650_vm4, %v522_v38, %v778_v47  ;;  %v907_v56 = vsel %vm651_vm5, %v523_v39, %v779_v48  ;;  %vm652_vm6 = vcmp.ge.f32.partialorder %v524_v49, 0.0 }
  0x8c   : > { %v1872_v60 = vpack.c.bf16 %v906_v55, %v906_v55  ;;  %v1873_v61 = vpack.c.bf16 %v907_v56, %v907_v56  ;;  %v780_v62 = vmul.f32 0.1, %v524_v49  ;;  %vm653_vm7 = vcmp.ge.f32.partialorder %v525_v51, 0.0 }
  0x8d   : > { %1546 = vst.msk [vmem:[%s2012_s26 + $0x134] sm:$0xf] %vm1468_vm0, %v1871_v54  ;;  %v781_v63 = vmul.f32 0.1, %v525_v51  ;;  %vm654_vm8 = vcmp.ge.f32.partialorder %v526_v52, 0.0  ;;  %v527_v3 = vadd.f32 %v2313_v14, %v392_v53  ;;  %v394_v6 = vmul.f32 %v2323_v18, %v259_v58  ;;  %v269_v53 = vld [vmem:[%s1979_s20 + $0x2f8] sm:$0xff] }
  0x8e   : > { %v782_v2 = vmul.f32 0.1, %v526_v52  ;;  %1547 = vst.msk [vmem:[%s2012_s26 + $0x138] sm:$0xf] %vm1468_vm0, %v1872_v60  ;;  %1548 = vst.msk [vmem:[%s2012_s26 + $0x13c] sm:$0xf] %vm1468_vm0, %v1873_v61  ;;  %v908_v4 = vsel %vm652_vm6, %v524_v49, %v780_v62  ;;  %v395_v7 = vmul.f32 %v2323_v18, %v260_v59  ;;  %v528_v16 = vadd.f32 %v2313_v14, %v393_v5 }
  0x8f   : > { %v1874_v10 = vpack.c.bf16 %v908_v4, %v908_v4  ;;  %v909_v11 = vsel %vm653_vm7, %v525_v51, %v781_v63  ;;  %vm655_vm9 = vcmp.ge.f32.partialorder %v527_v3, 0.0  ;;  %v783_v0 = vmul.f32 0.1, %v527_v3  ;;  %v270_v54 = vld [vmem:[%s1979_s20 + $0x300] sm:$0xff]  ;;  %v271_v4 = vld [vmem:[%s1979_s20 + $0x308] sm:$0xff] }
  0x90   : > { %v910_v12 = vsel %vm654_vm8, %v526_v52, %v782_v2  ;;  %v1875_v13 = vpack.c.bf16 %v909_v11, %v909_v11  ;;  %v529_v17 = vadd.f32 %v2313_v14, %v394_v6  ;;  %v530_v19 = vadd.f32 %v2313_v14, %v395_v7  ;;  %v268_v52 = vld [vmem:[%s1979_s20 + $0x2f0] sm:$0xff] }
  0x91   : > { %v1876_v15 = vpack.c.bf16 %v910_v12, %v910_v12  ;;  %1549 = vst.msk [vmem:[%s2012_s26 + $0x140] sm:$0xf] %vm1468_vm0, %v1874_v10  ;;  %v396_v20 = vmul.f32 %v2323_v18, %v261_v8  ;;  %v397_v21 = vmul.f32 %v2323_v18, %v262_v9  ;;  %v911_v22 = vsel %vm655_vm9, %v527_v3, %v783_v0 }
  0x92   : > { %1550 = vst.msk [vmem:[%s2012_s26 + $0x144] sm:$0xf] %vm1468_vm0, %v1875_v13  ;;  %vm656_vm10 = vcmp.ge.f32.partialorder %v528_v16, 0.0  ;;  %v784_v23 = vmul.f32 0.1, %v528_v16  ;;  %v398_v24 = vmul.f32 %v2323_v18, %v263_v1  ;;  %v1877_v26 = vpack.c.bf16 %v911_v22, %v911_v22 }
  0x93   : > { %1551 = vst.msk [vmem:[%s2012_s26 + $0x148] sm:$0xf] %vm1468_vm0, %v1876_v15  ;;  %vm657_vm11 = vcmp.ge.f32.partialorder %v529_v17, 0.0  ;;  %v785_v27 = vmul.f32 0.1, %v529_v17  ;;  %vm658_vm12 = vcmp.ge.f32.partialorder %v530_v19, 0.0  ;;  %v531_v30 = vadd.f32 %v2313_v14, %v396_v20 }
  0x94   : > { %v912_v28 = vsel %vm656_vm10, %v528_v16, %v784_v23  ;;  %v786_v29 = vmul.f32 0.1, %v530_v19  ;;  %v532_v31 = vadd.f32 %v2313_v14, %v397_v21  ;;  %1552 = vst.msk [vmem:[%s2012_s26 + $0x14c] sm:$0xf] %vm1468_vm0, %v1877_v26  ;;  %v533_v34 = vadd.f32 %v2313_v14, %v398_v24  ;;  %v272_v16 = vld [vmem:[%s1979_s20 + $0x310] sm:$0xff] }
  0x95   : > { %v1878_v32 = vpack.c.bf16 %v912_v28, %v912_v28  ;;  %v913_v33 = vsel %vm657_vm11, %v529_v17, %v785_v27  ;;  %v399_v35 = vmul.f32 %v2323_v18, %v264_v25  ;;  %vm659_vm13 = vcmp.ge.f32.partialorder %v531_v30, 0.0  ;;  %v273_v17 = vld [vmem:[%s1979_s20 + $0x318] sm:$0xff] }
  0x96   : > { %v1879_v37 = vpack.c.bf16 %v913_v33, %v913_v33  ;;  %v914_v38 = vsel %vm658_vm12, %v530_v19, %v786_v29  ;;  %v787_v39 = vmul.f32 0.1, %v531_v30  ;;  %vm660_vm14 = vcmp.ge.f32.partialorder %v532_v31, 0.0  ;;  %v274_v19 = vld [vmem:[%s1979_s20 + $0x320] sm:$0xff] }
  0x97   : > { %1553 = vst.msk [vmem:[%s2012_s26 + $0x150] sm:$0xf] %vm1468_vm0, %v1878_v32  ;;  %v1880_v42 = vpack.c.bf16 %v914_v38, %v914_v38  ;;  %v788_v43 = vmul.f32 0.1, %v532_v31  ;;  %vm661_vm15 = vcmp.ge.f32.partialorder %v533_v34, 0.0  ;;  %v534_v46 = vadd.f32 %v2313_v14, %v399_v35  ;;  %v277_v35 = vld [vmem:[%s1979_s20 + $0x338] sm:$0xff] }
  0x98   : > { %1554 = vst.msk [vmem:[%s2012_s26 + $0x154] sm:$0xf] %vm1468_vm0, %v1879_v37  ;;  %v915_v44 = vsel %vm659_vm13, %v531_v30, %v787_v39  ;;  %v789_v45 = vmul.f32 0.1, %v533_v34  ;;  %v400_v47 = vmul.f32 %v2323_v18, %v265_v36  ;;  %v401_v50 = vmul.f32 %v2323_v18, %v266_v40  ;;  %v275_v30 = vld [vmem:[%s1979_s20 + $0x328] sm:$0xff] }
  0x99   : > { %1555 = vst.msk [vmem:[%s2012_s26 + $0x158] sm:$0xf] %vm1468_vm0, %v1880_v42  ;;  %v1881_v48 = vpack.c.bf16 %v915_v44, %v915_v44  ;;  %v916_v49 = vsel %vm660_vm14, %v532_v31, %v788_v43  ;;  %v402_v51 = vmul.f32 %v2323_v18, %v267_v41  ;;  %vm662_vm1 = vcmp.ge.f32.partialorder %v534_v46, 0.0  ;;  %v276_v31 = vld [vmem:[%s1979_s20 + $0x330] sm:$0xff] }
  0x9a   : > { %v1882_v55 = vpack.c.bf16 %v916_v49, %v916_v49  ;;  %v917_v56 = vsel %vm661_vm15, %v533_v34, %v789_v45  ;;  %v790_v57 = vmul.f32 0.1, %v534_v46  ;;  %v535_v59 = vadd.f32 %v2313_v14, %v400_v47  ;;  %v278_v47 = vld [vmem:[%s1979_s20 + $0x340] sm:$0xff] }
  0x9b   : > { %1556 = vst.msk [vmem:[%s2012_s26 + $0x15c] sm:$0xf] %vm1468_vm0, %v1881_v48  ;;  %v1883_v58 = vpack.c.bf16 %v917_v56, %v917_v56  ;;  %v536_v60 = vadd.f32 %v2313_v14, %v401_v50  ;;  %v537_v61 = vadd.f32 %v2313_v14, %v402_v51  ;;  %v403_v63 = vmul.f32 %v2323_v18, %v268_v52 }
  0x9c   : > { %1557 = vst.msk [vmem:[%s2012_s26 + $0x160] sm:$0xf] %vm1468_vm0, %v1882_v55  ;;  %v918_v62 = vsel %vm662_vm1, %v534_v46, %v790_v57  ;;  %v404_v2 = vmul.f32 %v2323_v18, %v269_v53  ;;  %v405_v3 = vmul.f32 %v2323_v18, %v270_v54  ;;  %vm663_vm2 = vcmp.ge.f32.partialorder %v535_v59, 0.0 }
  0x9d   : > { %1558 = vst.msk [vmem:[%s2012_s26 + $0x164] sm:$0xf] %vm1468_vm0, %v1883_v58  ;;  %v1884_v5 = vpack.c.bf16 %v918_v62, %v918_v62  ;;  %v791_v6 = vmul.f32 0.1, %v535_v59  ;;  %vm664_vm3 = vcmp.ge.f32.partialorder %v536_v60, 0.0  ;;  %vm665_vm4 = vcmp.ge.f32.partialorder %v537_v61, 0.0 }
  0x9e   : > { %v792_v7 = vmul.f32 0.1, %v536_v60  ;;  %v793_v8 = vmul.f32 0.1, %v537_v61  ;;  %v538_v9 = vadd.f32 %v2313_v14, %v403_v63  ;;  %v539_v11 = vadd.f32 %v2313_v14, %v404_v2  ;;  %v279_v58 = vld [vmem:[%s1979_s20 + $0x348] sm:$0xff]  ;;  %v280_v62 = vld [vmem:[%s1979_s20 + $0x350] sm:$0xff] }
  0x9f   : > { %1559 = vst.msk [vmem:[%s2012_s26 + $0x168] sm:$0xf] %vm1468_vm0, %v1884_v5  ;;  %v919_v10 = vsel %vm663_vm2, %v535_v59, %v791_v6  ;;  %v540_v12 = vadd.f32 %v2313_v14, %v405_v3  ;;  %v406_v1 = vmul.f32 %v2323_v18, %v271_v4  ;;  %v407_v27 = vmul.f32 %v2323_v18, %v272_v16  ;;  %v281_v63 = vld [vmem:[%s1979_s20 + $0x358] sm:$0xff] }
  0xa0   : > { %v1885_v13 = vpack.c.bf16 %v919_v10, %v919_v10  ;;  %v920_v15 = vsel %vm664_vm3, %v536_v60, %v792_v7  ;;  %v921_v0 = vsel %vm665_vm4, %v537_v61, %v793_v8  ;;  %vm666_vm5 = vcmp.ge.f32.partialorder %v538_v9, 0.0 }
  0xa1   : > { %v1886_v20 = vpack.c.bf16 %v920_v15, %v920_v15  ;;  %v1887_v21 = vpack.c.bf16 %v921_v0, %v921_v0  ;;  %v794_v22 = vmul.f32 0.1, %v538_v9  ;;  %vm667_vm6 = vcmp.ge.f32.partialorder %v539_v11, 0.0 }
  0xa2   : > { %1560 = vst.msk [vmem:[%s2012_s26 + $0x16c] sm:$0xf] %vm1468_vm0, %v1885_v13  ;;  %v795_v23 = vmul.f32 0.1, %v539_v11  ;;  %vm668_vm7 = vcmp.ge.f32.partialorder %v540_v12, 0.0  ;;  %v541_v25 = vadd.f32 %v2313_v14, %v406_v1  ;;  %v408_v28 = vmul.f32 %v2323_v18, %v273_v17  ;;  %v283_v1 = vld [vmem:[%s1979_s20 + $0x368] sm:$0xff] }
  0xa3   : > { %v796_v24 = vmul.f32 0.1, %v540_v12  ;;  %1561 = vst.msk [vmem:[%s2012_s26 + $0x170] sm:$0xf] %vm1468_vm0, %v1886_v20  ;;  %1562 = vst.msk [vmem:[%s2012_s26 + $0x174] sm:$0xf] %vm1468_vm0, %v1887_v21  ;;  %v922_v26 = vsel %vm666_vm5, %v538_v9, %v794_v22  ;;  %v409_v29 = vmul.f32 %v2323_v18, %v274_v19  ;;  %v542_v39 = vadd.f32 %v2313_v14, %v407_v27 }
  0xa4   : > { %v1888_v32 = vpack.c.bf16 %v922_v26, %v922_v26  ;;  %v923_v33 = vsel %vm667_vm6, %v539_v11, %v795_v23  ;;  %vm669_vm8 = vcmp.ge.f32.partialorder %v541_v25, 0.0  ;;  %v797_v38 = vmul.f32 0.1, %v541_v25  ;;  %v284_v13 = vld [vmem:[%s1979_s20 + $0x370] sm:$0xff]  ;;  %v285_v26 = vld [vmem:[%s1979_s20 + $0x378] sm:$0xff] }
  0xa5   : > { %v924_v34 = vsel %vm668_vm7, %v540_v12, %v796_v24  ;;  %v1889_v36 = vpack.c.bf16 %v923_v33, %v923_v33  ;;  %v543_v40 = vadd.f32 %v2313_v14, %v408_v28  ;;  %v544_v41 = vadd.f32 %v2313_v14, %v409_v29  ;;  %v282_v12 = vld [vmem:[%s1979_s20 + $0x360] sm:$0xff] }
  0xa6   : > { %v1890_v37 = vpack.c.bf16 %v924_v34, %v924_v34  ;;  %1563 = vst.msk [vmem:[%s2012_s26 + $0x178] sm:$0xf] %vm1468_vm0, %v1888_v32  ;;  %v410_v42 = vmul.f32 %v2323_v18, %v275_v30  ;;  %v411_v43 = vmul.f32 %v2323_v18, %v276_v31  ;;  %v925_v44 = vsel %vm669_vm8, %v541_v25, %v797_v38 }
  0xa7   : > { %1564 = vst.msk [vmem:[%s2012_s26 + $0x17c] sm:$0xf] %vm1468_vm0, %v1889_v36  ;;  %vm670_vm9 = vcmp.ge.f32.partialorder %v542_v39, 0.0  ;;  %v798_v45 = vmul.f32 0.1, %v542_v39  ;;  %v412_v46 = vmul.f32 %v2323_v18, %v277_v35  ;;  %v1891_v48 = vpack.c.bf16 %v925_v44, %v925_v44 }
  0xa8   : > { %1565 = vst.msk [vmem:[%s2012_s26 + $0x180] sm:$0xf] %vm1468_vm0, %v1890_v37  ;;  %vm671_vm10 = vcmp.ge.f32.partialorder %v543_v40, 0.0  ;;  %v799_v49 = vmul.f32 0.1, %v543_v40  ;;  %vm672_vm11 = vcmp.ge.f32.partialorder %v544_v41, 0.0  ;;  %v545_v52 = vadd.f32 %v2313_v14, %v410_v42 }
  0xa9   : > { %v926_v50 = vsel %vm670_vm9, %v542_v39, %v798_v45  ;;  %v800_v51 = vmul.f32 0.1, %v544_v41  ;;  %v546_v53 = vadd.f32 %v2313_v14, %v411_v43  ;;  %1566 = vst.msk [vmem:[%s2012_s26 + $0x184] sm:$0xf] %vm1468_vm0, %v1891_v48  ;;  %v547_v56 = vadd.f32 %v2313_v14, %v412_v46  ;;  %v286_v39 = vld [vmem:[%s1979_s20 + $0x380] sm:$0xff] }
  0xaa   : > { %v1892_v54 = vpack.c.bf16 %v926_v50, %v926_v50  ;;  %v927_v55 = vsel %vm671_vm10, %v543_v40, %v799_v49  ;;  %v413_v57 = vmul.f32 %v2323_v18, %v278_v47  ;;  %vm673_vm12 = vcmp.ge.f32.partialorder %v545_v52, 0.0  ;;  %v287_v40 = vld [vmem:[%s1979_s20 + $0x388] sm:$0xff] }
  0xab   : > { %v1893_v59 = vpack.c.bf16 %v927_v55, %v927_v55  ;;  %v928_v60 = vsel %vm672_vm11, %v544_v41, %v800_v51  ;;  %v801_v61 = vmul.f32 0.1, %v545_v52  ;;  %vm674_vm13 = vcmp.ge.f32.partialorder %v546_v53, 0.0  ;;  %v288_v41 = vld [vmem:[%s1979_s20 + $0x390] sm:$0xff] }
  0xac   : > { %1567 = vst.msk [vmem:[%s2012_s26 + $0x188] sm:$0xf] %vm1468_vm0, %v1892_v54  ;;  %v1894_v2 = vpack.c.bf16 %v928_v60, %v928_v60  ;;  %v802_v3 = vmul.f32 0.1, %v546_v53  ;;  %vm675_vm14 = vcmp.ge.f32.partialorder %v547_v56, 0.0  ;;  %v548_v6 = vadd.f32 %v2313_v14, %v413_v57  ;;  %v291_v57 = vld [vmem:[%s1979_s20 + $0x3a8] sm:$0xff] }
  0xad   : > { %1568 = vst.msk [vmem:[%s2012_s26 + $0x18c] sm:$0xf] %vm1468_vm0, %v1893_v59  ;;  %v929_v4 = vsel %vm673_vm12, %v545_v52, %v801_v61  ;;  %v803_v5 = vmul.f32 0.1, %v547_v56  ;;  %v414_v7 = vmul.f32 %v2323_v18, %v279_v58  ;;  %v415_v10 = vmul.f32 %v2323_v18, %v280_v62  ;;  %v289_v52 = vld [vmem:[%s1979_s20 + $0x398] sm:$0xff] }
  0xae   : > { %1569 = vst.msk [vmem:[%s2012_s26 + $0x190] sm:$0xf] %vm1468_vm0, %v1894_v2  ;;  %v1895_v8 = vpack.c.bf16 %v929_v4, %v929_v4  ;;  %v930_v9 = vsel %vm674_vm13, %v546_v53, %v802_v3  ;;  %v416_v11 = vmul.f32 %v2323_v18, %v281_v63  ;;  %vm676_vm15 = vcmp.ge.f32.partialorder %v548_v6, 0.0  ;;  %v290_v53 = vld [vmem:[%s1979_s20 + $0x3a0] sm:$0xff] }
  0xaf   : > { %v1896_v15 = vpack.c.bf16 %v930_v9, %v930_v9  ;;  %v931_v0 = vsel %vm675_vm14, %v547_v56, %v803_v5  ;;  %v804_v16 = vmul.f32 0.1, %v548_v6  ;;  %v549_v19 = vadd.f32 %v2313_v14, %v414_v7  ;;  %v292_v7 = vld [vmem:[%s1979_s20 + $0x3b0] sm:$0xff] }
  0xb0   : > { %1570 = vst.msk [vmem:[%s2012_s26 + $0x194] sm:$0xf] %vm1468_vm0, %v1895_v8  ;;  %v1897_v17 = vpack.c.bf16 %v931_v0, %v931_v0  ;;  %v550_v20 = vadd.f32 %v2313_v14, %v415_v10  ;;  %v551_v21 = vadd.f32 %v2313_v14, %v416_v11  ;;  %v417_v23 = vmul.f32 %v2323_v18, %v282_v12 }
  0xb1   : > { %1571 = vst.msk [vmem:[%s2012_s26 + $0x198] sm:$0xf] %vm1468_vm0, %v1896_v15  ;;  %v932_v22 = vsel %vm676_vm15, %v548_v6, %v804_v16  ;;  %v418_v24 = vmul.f32 %v2323_v18, %v283_v1  ;;  %v419_v25 = vmul.f32 %v2323_v18, %v284_v13  ;;  %vm677_vm1 = vcmp.ge.f32.partialorder %v549_v19, 0.0 }
  0xb2   : > { %1572 = vst.msk [vmem:[%s2012_s26 + $0x19c] sm:$0xf] %vm1468_vm0, %v1897_v17  ;;  %v1898_v27 = vpack.c.bf16 %v932_v22, %v932_v22  ;;  %v805_v28 = vmul.f32 0.1, %v549_v19  ;;  %vm678_vm2 = vcmp.ge.f32.partialorder %v550_v20, 0.0  ;;  %vm679_vm3 = vcmp.ge.f32.partialorder %v551_v21, 0.0 }
  0xb3   : > { %v806_v29 = vmul.f32 0.1, %v550_v20  ;;  %v807_v30 = vmul.f32 0.1, %v551_v21  ;;  %v552_v31 = vadd.f32 %v2313_v14, %v417_v23  ;;  %v553_v33 = vadd.f32 %v2313_v14, %v418_v24  ;;  %v293_v17 = vld [vmem:[%s1979_s20 + $0x3b8] sm:$0xff]  ;;  %v294_v22 = vld [vmem:[%s1979_s20 + $0x3c0] sm:$0xff] }
  0xb4   : > { %1573 = vst.msk [vmem:[%s2012_s26 + $0x1a0] sm:$0xf] %vm1468_vm0, %v1898_v27  ;;  %v933_v32 = vsel %vm677_vm1, %v549_v19, %v805_v28  ;;  %v554_v34 = vadd.f32 %v2313_v14, %v419_v25  ;;  %v420_v35 = vmul.f32 %v2323_v18, %v285_v26  ;;  %v421_v49 = vmul.f32 %v2323_v18, %v286_v39  ;;  %v295_v23 = vld [vmem:[%s1979_s20 + $0x3c8] sm:$0xff] }
  0xb5   : > { %v1899_v36 = vpack.c.bf16 %v933_v32, %v933_v32  ;;  %v934_v37 = vsel %vm678_vm2, %v550_v20, %v806_v29  ;;  %v935_v38 = vsel %vm679_vm3, %v551_v21, %v807_v30  ;;  %vm680_vm4 = vcmp.ge.f32.partialorder %v552_v31, 0.0 }
  0xb6   : > { %v1900_v42 = vpack.c.bf16 %v934_v37, %v934_v37  ;;  %v1901_v43 = vpack.c.bf16 %v935_v38, %v935_v38  ;;  %v808_v44 = vmul.f32 0.1, %v552_v31  ;;  %vm681_vm5 = vcmp.ge.f32.partialorder %v553_v33, 0.0 }
  0xb7   : > { %1574 = vst.msk [vmem:[%s2012_s26 + $0x1a4] sm:$0xf] %vm1468_vm0, %v1899_v36  ;;  %v809_v45 = vmul.f32 0.1, %v553_v33  ;;  %vm682_vm6 = vcmp.ge.f32.partialorder %v554_v34, 0.0  ;;  %v555_v47 = vadd.f32 %v2313_v14, %v420_v35  ;;  %v422_v50 = vmul.f32 %v2323_v18, %v287_v40  ;;  %v297_v35 = vld [vmem:[%s1979_s20 + $0x3d8] sm:$0xff] }
  0xb8   : > { %v810_v46 = vmul.f32 0.1, %v554_v34  ;;  %1575 = vst.msk [vmem:[%s2012_s26 + $0x1a8] sm:$0xf] %vm1468_vm0, %v1900_v42  ;;  %1576 = vst.msk [vmem:[%s2012_s26 + $0x1ac] sm:$0xf] %vm1468_vm0, %v1901_v43  ;;  %v936_v48 = vsel %vm680_vm4, %v552_v31, %v808_v44  ;;  %v423_v51 = vmul.f32 %v2323_v18, %v288_v41  ;;  %v556_v61 = vadd.f32 %v2313_v14, %v421_v49 }
  0xb9   : > { %v1902_v54 = vpack.c.bf16 %v936_v48, %v936_v48  ;;  %v937_v55 = vsel %vm681_vm5, %v553_v33, %v809_v45  ;;  %vm683_vm7 = vcmp.ge.f32.partialorder %v555_v47, 0.0  ;;  %v811_v60 = vmul.f32 0.1, %v555_v47  ;;  %v298_v36 = vld [vmem:[%s1979_s20 + $0x3e0] sm:$0xff]  ;;  %v299_v48 = vld [vmem:[%s1979_s20 + $0x3e8] sm:$0xff] }
  0xba   : > { %v938_v56 = vsel %vm682_vm6, %v554_v34, %v810_v46  ;;  %v1903_v58 = vpack.c.bf16 %v937_v55, %v937_v55  ;;  %v557_v62 = vadd.f32 %v2313_v14, %v422_v50  ;;  %v558_v63 = vadd.f32 %v2313_v14, %v423_v51  ;;  %v296_v34 = vld [vmem:[%s1979_s20 + $0x3d0] sm:$0xff] }
  0xbb   : > { %v1904_v59 = vpack.c.bf16 %v938_v56, %v938_v56  ;;  %1577 = vst.msk [vmem:[%s2012_s26 + $0x1b0] sm:$0xf] %vm1468_vm0, %v1902_v54  ;;  %v424_v2 = vmul.f32 %v2323_v18, %v289_v52  ;;  %v425_v3 = vmul.f32 %v2323_v18, %v290_v53  ;;  %v939_v4 = vsel %vm683_vm7, %v555_v47, %v811_v60 }
  0xbc   : > { %1578 = vst.msk [vmem:[%s2012_s26 + $0x1b4] sm:$0xf] %vm1468_vm0, %v1903_v58  ;;  %vm684_vm8 = vcmp.ge.f32.partialorder %v556_v61, 0.0  ;;  %v812_v5 = vmul.f32 0.1, %v556_v61  ;;  %v426_v6 = vmul.f32 %v2323_v18, %v291_v57  ;;  %v1905_v8 = vpack.c.bf16 %v939_v4, %v939_v4 }
  0xbd   : > { %1579 = vst.msk [vmem:[%s2012_s26 + $0x1b8] sm:$0xf] %vm1468_vm0, %v1904_v59  ;;  %vm685_vm9 = vcmp.ge.f32.partialorder %v557_v62, 0.0  ;;  %v813_v9 = vmul.f32 0.1, %v557_v62  ;;  %vm686_vm10 = vcmp.ge.f32.partialorder %v558_v63, 0.0  ;;  %v559_v12 = vadd.f32 %v2313_v14, %v424_v2 }
  0xbe   : > { %v940_v10 = vsel %vm684_vm8, %v556_v61, %v812_v5  ;;  %v814_v11 = vmul.f32 0.1, %v558_v63  ;;  %v560_v1 = vadd.f32 %v2313_v14, %v425_v3  ;;  %1580 = vst.msk [vmem:[%s2012_s26 + $0x1bc] sm:$0xf] %vm1468_vm0, %v1905_v8  ;;  %v561_v0 = vadd.f32 %v2313_v14, %v426_v6  ;;  %v300_v61 = vld [vmem:[%s1979_s20 + $0x3f0] sm:$0xff] }
  0xbf   : > { %v1906_v13 = vpack.c.bf16 %v940_v10, %v940_v10  ;;  %v941_v15 = vsel %vm685_vm9, %v557_v62, %v813_v9  ;;  %v427_v16 = vmul.f32 %v2323_v18, %v292_v7  ;;  %vm687_vm11 = vcmp.ge.f32.partialorder %v559_v12, 0.0  ;;  %v301_v62 = vld [vmem:[%s1979_s20 + $0x3f8] sm:$0xff] }
  0xc0   : > { %v1907_v19 = vpack.c.bf16 %v941_v15, %v941_v15  ;;  %v942_v20 = vsel %vm686_vm10, %v558_v63, %v814_v11  ;;  %v815_v21 = vmul.f32 0.1, %v559_v12  ;;  %vm688_vm12 = vcmp.ge.f32.partialorder %v560_v1, 0.0 }
  0xc1   : > { %1581 = vst.msk [vmem:[%s2012_s26 + $0x1c0] sm:$0xf] %vm1468_vm0, %v1906_v13  ;;  %v1908_v24 = vpack.c.bf16 %v942_v20, %v942_v20  ;;  %v816_v25 = vmul.f32 0.1, %v560_v1  ;;  %vm689_vm13 = vcmp.ge.f32.partialorder %v561_v0, 0.0  ;;  %v562_v28 = vadd.f32 %v2313_v14, %v427_v16 }
  0xc2   : > { %1582 = vst.msk [vmem:[%s2012_s26 + $0x1c4] sm:$0xf] %vm1468_vm0, %v1907_v19  ;;  %v943_v26 = vsel %vm687_vm11, %v559_v12, %v815_v21  ;;  %v817_v27 = vmul.f32 0.1, %v561_v0  ;;  %v428_v29 = vmul.f32 %v2323_v18, %v293_v17  ;;  %v429_v32 = vmul.f32 %v2323_v18, %v294_v22 }
  0xc3   : > { %1583 = vst.msk [vmem:[%s2012_s26 + $0x1c8] sm:$0xf] %vm1468_vm0, %v1908_v24  ;;  %v1909_v30 = vpack.c.bf16 %v943_v26, %v943_v26  ;;  %v944_v31 = vsel %vm688_vm12, %v560_v1, %v816_v25  ;;  %v430_v33 = vmul.f32 %v2323_v18, %v295_v23  ;;  %vm690_vm14 = vcmp.ge.f32.partialorder %v562_v28, 0.0 }
  0xc4   : > { %v1910_v37 = vpack.c.bf16 %v944_v31, %v944_v31  ;;  %v945_v38 = vsel %vm689_vm13, %v561_v0, %v817_v27  ;;  %v818_v39 = vmul.f32 0.1, %v562_v28  ;;  %v563_v41 = vadd.f32 %v2313_v14, %v428_v29 }
  0xc5   : > { %1584 = vst.msk [vmem:[%s2012_s26 + $0x1cc] sm:$0xf] %vm1468_vm0, %v1909_v30  ;;  %v1911_v40 = vpack.c.bf16 %v945_v38, %v945_v38  ;;  %v564_v42 = vadd.f32 %v2313_v14, %v429_v32  ;;  %v565_v43 = vadd.f32 %v2313_v14, %v430_v33  ;;  %v431_v45 = vmul.f32 %v2323_v18, %v296_v34 }
  0xc6   : > { %1585 = vst.msk [vmem:[%s2012_s26 + $0x1d0] sm:$0xf] %vm1468_vm0, %v1910_v37  ;;  %v946_v44 = vsel %vm690_vm14, %v562_v28, %v818_v39  ;;  %v432_v46 = vmul.f32 %v2323_v18, %v297_v35  ;;  %v433_v47 = vmul.f32 %v2323_v18, %v298_v36  ;;  %vm691_vm15 = vcmp.ge.f32.partialorder %v563_v41, 0.0 }
  0xc7   : > { %1586 = vst.msk [vmem:[%s2012_s26 + $0x1d4] sm:$0xf] %vm1468_vm0, %v1911_v40  ;;  %v1912_v49 = vpack.c.bf16 %v946_v44, %v946_v44  ;;  %v819_v50 = vmul.f32 0.1, %v563_v41  ;;  %vm692_vm1 = vcmp.ge.f32.partialorder %v564_v42, 0.0  ;;  %vm693_vm2 = vcmp.ge.f32.partialorder %v565_v43, 0.0 }
  0xc8   : > { %v820_v51 = vmul.f32 0.1, %v564_v42  ;;  %v821_v52 = vmul.f32 0.1, %v565_v43  ;;  %v566_v53 = vadd.f32 %v2313_v14, %v431_v45  ;;  %v567_v55 = vadd.f32 %v2313_v14, %v432_v46 }
  0xc9   : > { %1587 = vst.msk [vmem:[%s2012_s26 + $0x1d8] sm:$0xf] %vm1468_vm0, %v1912_v49  ;;  %v947_v54 = vsel %vm691_vm15, %v563_v41, %v819_v50  ;;  %v568_v56 = vadd.f32 %v2313_v14, %v433_v47  ;;  %v434_v57 = vmul.f32 %v2323_v18, %v299_v48  ;;  %v435_v8 = vmul.f32 %v2323_v18, %v300_v61 }
  0xca   : > { %v1913_v58 = vpack.c.bf16 %v947_v54, %v947_v54  ;;  %v948_v59 = vsel %vm692_vm1, %v564_v42, %v820_v51  ;;  %v949_v60 = vsel %vm693_vm2, %v565_v43, %v821_v52  ;;  %vm694_vm3 = vcmp.ge.f32.partialorder %v566_v53, 0.0 }
  0xcb   : > { %v1914_v63 = vpack.c.bf16 %v948_v59, %v948_v59  ;;  %v1915_v2 = vpack.c.bf16 %v949_v60, %v949_v60  ;;  %v822_v3 = vmul.f32 0.1, %v566_v53  ;;  %vm695_vm4 = vcmp.ge.f32.partialorder %v567_v55, 0.0 }
  0xcc   : > { %1588 = vst.msk [vmem:[%s2012_s26 + $0x1dc] sm:$0xf] %vm1468_vm0, %v1913_v58  ;;  %v823_v4 = vmul.f32 0.1, %v567_v55  ;;  %vm696_vm5 = vcmp.ge.f32.partialorder %v568_v56, 0.0  ;;  %v569_v6 = vadd.f32 %v2313_v14, %v434_v57  ;;  %v436_v9 = vmul.f32 %v2323_v18, %v301_v62 }
  0xcd   : > { %v824_v5 = vmul.f32 0.1, %v568_v56  ;;  %1589 = vst.msk [vmem:[%s2012_s26 + $0x1e0] sm:$0xf] %vm1468_vm0, %v1914_v63  ;;  %1590 = vst.msk [vmem:[%s2012_s26 + $0x1e4] sm:$0xf] %vm1468_vm0, %v1915_v2  ;;  %v950_v7 = vsel %vm694_vm3, %v566_v53, %v822_v3  ;;  %v570_v0 = vadd.f32 %v2313_v14, %v435_v8 }
  0xce   : > { %v1916_v10 = vpack.c.bf16 %v950_v7, %v950_v7  ;;  %v951_v11 = vsel %vm695_vm4, %v567_v55, %v823_v4  ;;  %vm697_vm6 = vcmp.ge.f32.partialorder %v569_v6, 0.0  ;;  %v825_v15 = vmul.f32 0.1, %v569_v6 }
  0xcf   : > { %v952_v12 = vsel %vm696_vm5, %v568_v56, %v824_v5  ;;  %v1917_v1 = vpack.c.bf16 %v951_v11, %v951_v11  ;;  %v571_v16 = vadd.f32 %v2313_v14, %v436_v9  ;;  %vm698_vm7 = vcmp.ge.f32.partialorder %v570_v0, 0.0 }
  0xd0   : > { %v1918_v13 = vpack.c.bf16 %v952_v12, %v952_v12  ;;  %1591 = vst.msk [vmem:[%s2012_s26 + $0x1e8] sm:$0xf] %vm1468_vm0, %v1916_v10  ;;  %v953_v18 = vsel %vm697_vm6, %v569_v6, %v825_v15  ;;  %v826_v17 = vmul.f32 0.1, %v570_v0 }
  0xd1   : > { %1592 = vst.msk [vmem:[%s2012_s26 + $0x1ec] sm:$0xf] %vm1468_vm0, %v1917_v1  ;;  %v1919_v19 = vpack.c.bf16 %v953_v18, %v953_v18  ;;  %vm699_vm8 = vcmp.ge.f32.partialorder %v571_v16, 0.0  ;;  %v827_v20 = vmul.f32 0.1, %v571_v16 }
  0xd2   : > { %1593 = vst.msk [vmem:[%s2012_s26 + $0x1f0] sm:$0xf] %vm1468_vm0, %v1918_v13  ;;  %v954_v21 = vsel %vm698_vm7, %v570_v0, %v826_v17 }
  0xd3   : > { %1594 = vst.msk [vmem:[%s2012_s26 + $0x1f4] sm:$0xf] %vm1468_vm0, %v1919_v19  ;;  %v1920_v22 = vpack.c.bf16 %v954_v21, %v954_v21  ;;  %v955_v23 = vsel %vm699_vm8, %v571_v16, %v827_v20 }
  0xd4   : > { %v1921_v24 = vpack.c.bf16 %v955_v23, %v955_v23 }
  0xd5   : > { %1595 = vst.msk [vmem:[%s2012_s26 + $0x1f8] sm:$0xf] %vm1468_vm0, %v1920_v22 }
  0xd6   : > { %1596 = vst.msk [vmem:[%s2012_s26 + $0x1fc] sm:$0xf] %vm1468_vm0, %v1921_v24 }
  0xd7 PF: > { %s13_s12 = sadd.s32 1, %s1938_s12  }
  0xd8   : > { %p10_p4 = scmp.ge.s32.totalorder %s13_s12, 4  }
  0xda   :  { %12 = sbr.rel (!%p10_p4) target bundleno = 1 (0x1), region = 62 }

// kernel: wideresnet_forward.15
= control target key start
LH: loop header
LB: loop body
LE: loop exit
PB: predicated region body
PF: predicated region fallthrough
CT: control target
= control target key end

     0   :  { %s2142_s15 = smov 0   ;;  %s2548_s0 = inlined_call_operand.vmem [shape: bf16[2048,144], index: 0, kind: input, shape index: {}]   ;;  %s2549_s1 = inlined_call_operand.vmem [shape: bf16[144,16], index: 1, kind: input, shape index: {}]   ;;  %s2550_s2 = inlined_call_operand.vmem [shape: f32[1,16], index: 2, kind: input, shape index: {}]   ;;  %s2551_s3 = inlined_call_operand.vmem [shape: f32[1,16], index: 3, kind: input, shape index: {}]   ;;  %s2552_s4 = inlined_call_operand.vmem [shape: bf16[2048,16], index: 4, kind: output, shape index: {}]  }
   0x1 LB: > { %s1726_s16 = sadd.s32 4294967295, %s2114_s15   ;;  %p1730_p0 = scmp.ge.s32.totalorder %s2114_s15, 1  ;;  %s2114_s15 = sphi %s2142_s15, %s14_s15  }
   0x2   : > { %p164_p1 = scmp.lt.s32.totalorder %s2114_s15, 5 }
   0x4   : > { %p165_p2 = pnand %p1730_p0, %p164_p1 }
   0x5   : > { %v2001_v0 = vld [vmem:[%s2549_s1] sm:$0xff] (!%p165_p2)   ;;  %v2116_v1 = vmov (!%p165_p2), 0   ;;  %s1731_s19 = sshll.u32 (!%p165_p2), %s1726_s16, 6  ;;  %v2002_v2 = vld [vmem:[%s2549_s1 + $0x8] sm:$0xff] (!%p165_p2)   ;;  %v2003_v3 = vld [vmem:[%s2549_s1 + $0x10] sm:$0xff] (!%p165_p2)   ;;  %vm629_vm0 = vcmask (!%p165_p2), 130048  }
   0x6   : > { %168 = sbr.rel (%p165_p2) target bundleno = 388 (0x184), region = 36  ;;  %726 = vmatprep.subr.bf16.mxu0 (!%p165_p2), %v2116_v1  ;;  %1974 = vmatprep.subr.bf16.mxu1 (!%p165_p2), %v2116_v1  ;;  %p192_p3 = scmp.lt.s32.totalorder (!%p165_p2), %s1731_s19, 255  ;;  %v2004_v4 = vld [vmem:[%s2549_s1 + $0x18] sm:$0xff] (!%p165_p2)   ;;  %v2005_v7 = vld [vmem:[%s2549_s1 + $0x20] sm:$0xff] (!%p165_p2)   ;;  %v2006_v8 = vld [vmem:[%s2549_s1 + $0x28] sm:$0xff] (!%p165_p2)   ;;  %vm1605_vm3 = vcmask (!%p165_p2), 125952  }
   0x7   : > { %727 = vmatpush1.bf16.msra.mxu0 (!%p165_p2), %v2001_v0  ;;  %1983 = vmatpush1.bf16.msra.mxu1 (!%p165_p2), %v2001_v0  ;;  %v2007_v9 = vld [vmem:[%s2549_s1 + $0x30] sm:$0xff] (!%p165_p2)   ;;  %v2008_v10 = vld [vmem:[%s2549_s1 + $0x38] sm:$0xff] (!%p165_p2)   ;;  %v2009_v11 = vld [vmem:[%s2549_s1 + $0x40] sm:$0xff] (!%p165_p2)  }
   0x8   : > { %728 = vmatprep.subr.bf16.mxu0 (!%p165_p2), %v2116_v1  ;;  %1975 = vmatprep.subr.bf16.mxu1 (!%p165_p2), %v2116_v1 }
   0xb   : > { %729 = vmatpush1.bf16.msra.mxu0 (!%p165_p2), %v2002_v2  ;;  %1984 = vmatpush1.bf16.msra.mxu1 (!%p165_p2), %v2002_v2 }
   0xc   : > { %730 = vmatprep.subr.bf16.mxu0 (!%p165_p2), %v2116_v1  ;;  %1976 = vmatprep.subr.bf16.mxu1 (!%p165_p2), %v2116_v1 }
   0xd   : > { %s2554_s19 = smov (!%p192_p3, %s1731_s19), 255 }
   0xe   : > { %s1909_s24 = sshll.u32 %s2554_s19, 3  ;;  %s1735_s20 = sshll.u32 %s2554_s19, 2 }
   0xf   : > { %s2165_s27 = scalar_lea.vmem %s2548_s0, %s1909_s24  ;;  %731 = vmatpush1.bf16.msra.mxu0 %v2003_v3  ;;  %1985 = vmatpush1.bf16.msra.mxu1 %v2003_v3  ;;  %s2303_s23 = scalar_lea.vmem %s2552_s4, %s1735_s20 }
  0x10   : > { %v2012_v5 = vld [vmem:[%s2165_s27 + $0x4] ss:$8 sps:$4 sm:$0xff]   ;;  %732 = vmatprep.subr.bf16.mxu0 %v2116_v1  ;;  %1977 = vmatprep.subr.bf16.mxu1 %v2116_v1  ;;  %v2010_v12 = vld [vmem:[%s2165_s27] ss:$8 sps:$4 sm:$0xff]   ;;  %v2016_v14 = vld [vmem:[%s2165_s27 + $0x14] ss:$8 sps:$4 sm:$0xff]  }
  0x11   : > { %v2015_v6 = vld [vmem:[%s2165_s27 + $0x104] ss:$8 sps:$4 sm:$0xff]   ;;  %1809 = vmatprep.mubr.msk.bf16.mxu0 %vm629_vm0, %v2012_v5  ;;  %v2013_v13 = vld [vmem:[%s2165_s27 + $0x100] ss:$8 sps:$4 sm:$0xff]   ;;  %v2018_v15 = vld [vmem:[%s2165_s27 + $0x114] ss:$8 sps:$4 sm:$0xff]  }
  0x12   : > { %1825 = vmatprep.mubr.msk.bf16.mxu1 %vm629_vm0, %v2015_v6  ;;  %v2020_v16 = vld [vmem:[%s2165_s27 + $0x10] ss:$8 sps:$4 sm:$0xff]   ;;  %v2022_v18 = vld [vmem:[%s2165_s27 + $0x24] ss:$8 sps:$4 sm:$0xff]   ;;  %v2026_v20 = vld [vmem:[%s2165_s27 + $0x20] ss:$8 sps:$4 sm:$0xff]  }
  0x13   : > { %733 = vmatpush1.bf16.msra.mxu0 %v2004_v4  ;;  %1986 = vmatpush1.bf16.msra.mxu1 %v2004_v4  ;;  %v2021_v17 = vld [vmem:[%s2165_s27 + $0x110] ss:$8 sps:$4 sm:$0xff]   ;;  %v2024_v19 = vld [vmem:[%s2165_s27 + $0x124] ss:$8 sps:$4 sm:$0xff]   ;;  %v2027_v21 = vld [vmem:[%s2165_s27 + $0x120] ss:$8 sps:$4 sm:$0xff]  }
  0x14   : > { %734 = vmatprep.subr.bf16.mxu0 %v2116_v1  ;;  %1978 = vmatprep.subr.bf16.mxu1 %v2116_v1  ;;  %v2028_v22 = vld [vmem:[%s2165_s27 + $0x34] ss:$8 sps:$4 sm:$0xff]   ;;  %v2032_v24 = vld [vmem:[%s2165_s27 + $0x30] ss:$8 sps:$4 sm:$0xff]   ;;  %v2034_v26 = vld [vmem:[%s2165_s27 + $0x44] ss:$8 sps:$4 sm:$0xff]  }
  0x15   : > { %v2030_v23 = vld [vmem:[%s2165_s27 + $0x134] ss:$8 sps:$4 sm:$0xff]   ;;  %v2033_v25 = vld [vmem:[%s2165_s27 + $0x130] ss:$8 sps:$4 sm:$0xff]   ;;  %v2036_v27 = vld [vmem:[%s2165_s27 + $0x144] ss:$8 sps:$4 sm:$0xff]  }
  0x16   : > { %v2038_v28 = vld [vmem:[%s2165_s27 + $0x40] ss:$8 sps:$4 sm:$0xff]   ;;  %v2040_v30 = vld [vmem:[%s2165_s27 + $0x54] ss:$8 sps:$4 sm:$0xff]   ;;  %v2044_v32 = vld [vmem:[%s2165_s27 + $0x50] ss:$8 sps:$4 sm:$0xff]  }
  0x17   : > { %735 = vmatpush1.bf16.msra.mxu0 %v2005_v7  ;;  %1987 = vmatpush1.bf16.msra.mxu1 %v2005_v7  ;;  %v2039_v29 = vld [vmem:[%s2165_s27 + $0x140] ss:$8 sps:$4 sm:$0xff]   ;;  %v2042_v31 = vld [vmem:[%s2165_s27 + $0x154] ss:$8 sps:$4 sm:$0xff]   ;;  %v2045_v33 = vld [vmem:[%s2165_s27 + $0x150] ss:$8 sps:$4 sm:$0xff]  }
  0x18   : > { %736 = vmatprep.subr.bf16.mxu0 %v2116_v1  ;;  %1979 = vmatprep.subr.bf16.mxu1 %v2116_v1  ;;  %v2046_v34 = vld [vmem:[%s2165_s27 + $0x64] ss:$8 sps:$4 sm:$0xff]   ;;  %v2050_v36 = vld [vmem:[%s2165_s27 + $0x60] ss:$8 sps:$4 sm:$0xff]   ;;  %v2052_v38 = vld [vmem:[%s2165_s27 + $0x74] ss:$8 sps:$4 sm:$0xff]  }
  0x19   : > { %v2048_v35 = vld [vmem:[%s2165_s27 + $0x164] ss:$8 sps:$4 sm:$0xff]   ;;  %v2051_v37 = vld [vmem:[%s2165_s27 + $0x160] ss:$8 sps:$4 sm:$0xff]   ;;  %v2054_v39 = vld [vmem:[%s2165_s27 + $0x174] ss:$8 sps:$4 sm:$0xff]  }
  0x1a   : > { %v2056_v40 = vld [vmem:[%s2165_s27 + $0x70] ss:$8 sps:$4 sm:$0xff]   ;;  %v2058_v42 = vld [vmem:[%s2165_s27 + $0x84] ss:$8 sps:$4 sm:$0xff]   ;;  %v2062_v44 = vld [vmem:[%s2165_s27 + $0x80] ss:$8 sps:$4 sm:$0xff]  }
  0x1b   : > { %737 = vmatpush1.bf16.msra.mxu0 %v2006_v8  ;;  %1988 = vmatpush1.bf16.msra.mxu1 %v2006_v8  ;;  %v2057_v41 = vld [vmem:[%s2165_s27 + $0x170] ss:$8 sps:$4 sm:$0xff]   ;;  %v2060_v43 = vld [vmem:[%s2165_s27 + $0x184] ss:$8 sps:$4 sm:$0xff]   ;;  %v2063_v45 = vld [vmem:[%s2165_s27 + $0x180] ss:$8 sps:$4 sm:$0xff]  }
  0x1c   : > { %738 = vmatprep.subr.bf16.mxu0 %v2116_v1  ;;  %1980 = vmatprep.subr.bf16.mxu1 %v2116_v1  ;;  %v2064_v46 = vld [vmem:[%s2165_s27 + $0x94] ss:$8 sps:$4 sm:$0xff]   ;;  %v2068_v48 = vld [vmem:[%s2165_s27 + $0x90] ss:$8 sps:$4 sm:$0xff]   ;;  %v2070_v50 = vld [vmem:[%s2165_s27 + $0xa4] ss:$8 sps:$4 sm:$0xff]  }
  0x1d   : > { %v2066_v47 = vld [vmem:[%s2165_s27 + $0x194] ss:$8 sps:$4 sm:$0xff]   ;;  %v2069_v49 = vld [vmem:[%s2165_s27 + $0x190] ss:$8 sps:$4 sm:$0xff]   ;;  %v2072_v51 = vld [vmem:[%s2165_s27 + $0x1a4] ss:$8 sps:$4 sm:$0xff]  }
  0x1e   : > { %v2074_v52 = vld [vmem:[%s2165_s27 + $0xa0] ss:$8 sps:$4 sm:$0xff]   ;;  %v2076_v54 = vld [vmem:[%s2165_s27 + $0xb4] ss:$8 sps:$4 sm:$0xff]   ;;  %v2080_v56 = vld [vmem:[%s2165_s27 + $0xb0] ss:$8 sps:$4 sm:$0xff]  }
  0x1f   : > { %739 = vmatpush1.bf16.msra.mxu0 %v2007_v9  ;;  %1989 = vmatpush1.bf16.msra.mxu1 %v2007_v9  ;;  %v2075_v53 = vld [vmem:[%s2165_s27 + $0x1a0] ss:$8 sps:$4 sm:$0xff]   ;;  %v2078_v55 = vld [vmem:[%s2165_s27 + $0x1b4] ss:$8 sps:$4 sm:$0xff]   ;;  %v2081_v57 = vld [vmem:[%s2165_s27 + $0x1b0] ss:$8 sps:$4 sm:$0xff]  }
  0x20   : > { %740 = vmatprep.subr.bf16.mxu0 %v2116_v1  ;;  %1981 = vmatprep.subr.bf16.mxu1 %v2116_v1  ;;  %v2082_v58 = vld [vmem:[%s2165_s27 + $0xc4] ss:$8 sps:$4 sm:$0xff]   ;;  %v2086_v60 = vld [vmem:[%s2165_s27 + $0xc0] ss:$8 sps:$4 sm:$0xff]   ;;  %v2088_v62 = vld [vmem:[%s2165_s27 + $0xd4] ss:$8 sps:$4 sm:$0xff]  }
  0x21   : > { %v2084_v59 = vld [vmem:[%s2165_s27 + $0x1c4] ss:$8 sps:$4 sm:$0xff]   ;;  %v2087_v61 = vld [vmem:[%s2165_s27 + $0x1c0] ss:$8 sps:$4 sm:$0xff]   ;;  %v2090_v63 = vld [vmem:[%s2165_s27 + $0x1d4] ss:$8 sps:$4 sm:$0xff]  }
  0x22   : > { %v2092_v0 = vld [vmem:[%s2165_s27 + $0xd0] ss:$8 sps:$4 sm:$0xff]   ;;  %v2094_v2 = vld [vmem:[%s2165_s27 + $0xe4] ss:$8 sps:$4 sm:$0xff]   ;;  %v2098_v4 = vld [vmem:[%s2165_s27 + $0xe0] ss:$8 sps:$4 sm:$0xff]  }
  0x23   : > { %741 = vmatpush1.bf16.msra.mxu0 %v2008_v10  ;;  %1990 = vmatpush1.bf16.msra.mxu1 %v2008_v10  ;;  %v2096_v3 = vld [vmem:[%s2165_s27 + $0x1e4] ss:$8 sps:$4 sm:$0xff]   ;;  %v2099_v5 = vld [vmem:[%s2165_s27 + $0x1e0] ss:$8 sps:$4 sm:$0xff]   ;;  %v2100_v6 = vld [vmem:[%s2165_s27 + $0xf4] ss:$8 sps:$4 sm:$0xff]  }
  0x24   : > { %742 = vmatprep.subr.bf16.mxu0 %v2116_v1  ;;  %1982 = vmatprep.subr.bf16.mxu1 %v2116_v1  ;;  %v2093_v1 = vld [vmem:[%s2165_s27 + $0x1d0] ss:$8 sps:$4 sm:$0xff]   ;;  %v2102_v7 = vld [vmem:[%s2165_s27 + $0x1f4] ss:$8 sps:$4 sm:$0xff]   ;;  %v2284_v10 = vld [vmem:[%s2550_s2] ss:$0 sm:$0xff] }
  0x25   : > { %v2104_v8 = vld [vmem:[%s2165_s27 + $0xf0] ss:$8 sps:$4 sm:$0xff]  }
  0x26   : > { %v2105_v9 = vld [vmem:[%s2165_s27 + $0x1f0] ss:$8 sps:$4 sm:$0xff]  }
  0x27   : > { %743 = vmatpush1.bf16.msra.mxu0 %v2009_v11  ;;  %1991 = vmatpush1.bf16.msra.mxu1 %v2009_v11 }
  0x2a   : > { %759 = vmatmul.mubr.bf16.vlgmr.msra.gmra.mrb[0].mxu0 %v2010_v12  ;;  %887 = vmatmul.mubr.bf16.vlgmr.msra.gmra.mrb[0].mxu1 %v2013_v13  ;;  %v2289_v12 = vld [vmem:[%s2551_s3] ss:$0 sm:$0xff] }
  0x2b   : > { %1810 = vmatprep.mubr.msk.bf16.mxu0 %vm629_vm0, %v2016_v14  ;;  %1826 = vmatprep.mubr.msk.bf16.mxu1 %vm629_vm0, %v2018_v15 }
  0x32   : > { %767 = vmatmul.mubr.bf16.gmra.mrb[4].mxu0 %v2020_v16  ;;  %895 = vmatmul.mubr.bf16.gmra.mrb[4].mxu1 %v2021_v17 }
  0x33   : > { %1811 = vmatprep.mubr.msk.bf16.mxu0 %vm629_vm0, %v2022_v18  ;;  %1827 = vmatprep.mubr.msk.bf16.mxu1 %vm629_vm0, %v2024_v19 }
  0x3a   : > { %775 = vmatmul.mubr.bf16.gmra.mrb[8].mxu0 %v2026_v20  ;;  %903 = vmatmul.mubr.bf16.gmra.mrb[8].mxu1 %v2027_v21 }
  0x3b   : > { %1812 = vmatprep.mubr.msk.bf16.mxu0 %vm629_vm0, %v2028_v22  ;;  %1828 = vmatprep.mubr.msk.bf16.mxu1 %vm629_vm0, %v2030_v23 }
  0x42   : > { %783 = vmatmul.mubr.bf16.gmra.mrb[12].mxu0 %v2032_v24  ;;  %911 = vmatmul.mubr.bf16.gmra.mrb[12].mxu1 %v2033_v25 }
  0x43   : > { %1813 = vmatprep.mubr.msk.bf16.mxu0 %vm629_vm0, %v2034_v26  ;;  %1829 = vmatprep.mubr.msk.bf16.mxu1 %vm629_vm0, %v2036_v27 }
  0x4a   : > { %791 = vmatmul.mubr.bf16.gmra.mrb[16].mxu0 %v2038_v28  ;;  %919 = vmatmul.mubr.bf16.gmra.mrb[16].mxu1 %v2039_v29 }
  0x4b   : > { %1814 = vmatprep.mubr.msk.bf16.mxu0 %vm629_vm0, %v2040_v30  ;;  %1830 = vmatprep.mubr.msk.bf16.mxu1 %vm629_vm0, %v2042_v31 }
  0x52   : > { %799 = vmatmul.mubr.bf16.gmra.mrb[20].mxu0 %v2044_v32  ;;  %927 = vmatmul.mubr.bf16.gmra.mrb[20].mxu1 %v2045_v33 }
  0x53   : > { %1815 = vmatprep.mubr.msk.bf16.mxu0 %vm629_vm0, %v2046_v34  ;;  %1831 = vmatprep.mubr.msk.bf16.mxu1 %vm629_vm0, %v2048_v35 }
  0x5a   : > { %807 = vmatmul.mubr.bf16.gmra.mrb[24].mxu0 %v2050_v36  ;;  %935 = vmatmul.mubr.bf16.gmra.mrb[24].mxu1 %v2051_v37 }
  0x5b   : > { %1816 = vmatprep.mubr.msk.bf16.mxu0 %vm629_vm0, %v2052_v38  ;;  %1832 = vmatprep.mubr.msk.bf16.mxu1 %vm629_vm0, %v2054_v39 }
  0x62   : > { %815 = vmatmul.mubr.bf16.gmra.mrb[28].mxu0 %v2056_v40  ;;  %943 = vmatmul.mubr.bf16.gmra.mrb[28].mxu1 %v2057_v41 }
  0x63   : > { %1817 = vmatprep.mubr.msk.bf16.mxu0 %vm629_vm0, %v2058_v42  ;;  %1833 = vmatprep.mubr.msk.bf16.mxu1 %vm629_vm0, %v2060_v43 }
  0x6a   : > { %823 = vmatmul.mubr.bf16.gmra.mrb[32].mxu0 %v2062_v44  ;;  %951 = vmatmul.mubr.bf16.gmra.mrb[32].mxu1 %v2063_v45 }
  0x6b   : > { %1818 = vmatprep.mubr.msk.bf16.mxu0 %vm629_vm0, %v2064_v46  ;;  %1834 = vmatprep.mubr.msk.bf16.mxu1 %vm629_vm0, %v2066_v47 }
  0x72   : > { %831 = vmatmul.mubr.bf16.gmra.mrb[36].mxu0 %v2068_v48  ;;  %959 = vmatmul.mubr.bf16.gmra.mrb[36].mxu1 %v2069_v49 }
  0x73   : > { %1819 = vmatprep.mubr.msk.bf16.mxu0 %vm629_vm0, %v2070_v50  ;;  %1835 = vmatprep.mubr.msk.bf16.mxu1 %vm629_vm0, %v2072_v51 }
  0x7a   : > { %839 = vmatmul.mubr.bf16.gmra.mrb[40].mxu0 %v2074_v52  ;;  %967 = vmatmul.mubr.bf16.gmra.mrb[40].mxu1 %v2075_v53 }
  0x7b   : > { %1820 = vmatprep.mubr.msk.bf16.mxu0 %vm629_vm0, %v2076_v54  ;;  %1836 = vmatprep.mubr.msk.bf16.mxu1 %vm629_vm0, %v2078_v55 }
  0x82   : > { %847 = vmatmul.mubr.bf16.gmra.mrb[44].mxu0 %v2080_v56  ;;  %975 = vmatmul.mubr.bf16.gmra.mrb[44].mxu1 %v2081_v57 }
  0x83   : > { %1821 = vmatprep.mubr.msk.bf16.mxu0 %vm629_vm0, %v2082_v58  ;;  %1837 = vmatprep.mubr.msk.bf16.mxu1 %vm629_vm0, %v2084_v59 }
  0x8a   : > { %855 = vmatmul.mubr.bf16.gmra.mrb[48].mxu0 %v2086_v60  ;;  %983 = vmatmul.mubr.bf16.gmra.mrb[48].mxu1 %v2087_v61 }
  0x8b   : > { %1822 = vmatprep.mubr.msk.bf16.mxu0 %vm629_vm0, %v2088_v62  ;;  %1838 = vmatprep.mubr.msk.bf16.mxu1 %vm629_vm0, %v2090_v63 }
  0x92   : > { %863 = vmatmul.mubr.bf16.gmra.mrb[52].mxu0 %v2092_v0  ;;  %991 = vmatmul.mubr.bf16.gmra.mrb[52].mxu1 %v2093_v1 }
  0x93   : > { %1823 = vmatprep.mubr.msk.bf16.mxu0 %vm629_vm0, %v2094_v2  ;;  %1839 = vmatprep.mubr.msk.bf16.mxu1 %vm629_vm0, %v2096_v3 }
  0x9a   : > { %871 = vmatmul.mubr.bf16.gmra.mrb[56].mxu0 %v2098_v4  ;;  %999 = vmatmul.mubr.bf16.gmra.mrb[56].mxu1 %v2099_v5 }
  0x9b   : > { %1824 = vmatprep.mubr.msk.bf16.mxu0 %vm629_vm0, %v2100_v6  ;;  %1840 = vmatprep.mubr.msk.bf16.mxu1 %vm629_vm0, %v2102_v7 }
  0xa2   : > { %879 = vmatmul.mubr.bf16.gmra.mrb[60].mxu0 %v2104_v8  ;;  %1007 = vmatmul.mubr.bf16.gmra.mrb[60].mxu1 %v2105_v9 }
  0xfd   : > { %v760_v11 = vpop.f32.mrb[0].mxu0  ;;  %v888_v13 = vpop.f32.mrb[0].mxu1 }
  0xfe   : > { %v1022_v14 = vmul.f32 %v2284_v10, %v760_v11  ;;  %v1054_v15 = vmul.f32 %v2284_v10, %v888_v13  ;;  %v762_v16 = vpop.f32.mrb[1].mxu0  ;;  %v890_v17 = vpop.f32.mrb[1].mxu1 }
  0xff   : > { %v763_v18 = vpop.f32.mrb[2].mxu0  ;;  %v891_v19 = vpop.f32.mrb[2].mxu1 }
 0x100   : > { %v1093_v20 = vadd.f32 %v2289_v12, %v1022_v14  ;;  %v1125_v21 = vadd.f32 %v2289_v12, %v1054_v15  ;;  %v1023_v22 = vmul.f32 %v2284_v10, %v763_v18  ;;  %v1055_v23 = vmul.f32 %v2284_v10, %v891_v19  ;;  %v765_v24 = vpop.f32.mrb[3].mxu0  ;;  %v893_v25 = vpop.f32.mrb[3].mxu1 }
 0x102   : > { %vm1157_vm1 = vcmp.ge.f32.partialorder %v1093_v20, 0.0  ;;  %v1221_v26 = vmul.f32 0.1, %v1093_v20  ;;  %vm1189_vm2 = vcmp.ge.f32.partialorder %v1125_v21, 0.0  ;;  %v1253_v27 = vmul.f32 0.1, %v1125_v21 }
 0x103   : > { %v1094_v28 = vadd.f32 %v2289_v12, %v1023_v22  ;;  %v1126_v29 = vadd.f32 %v2289_v12, %v1055_v23 }
 0x104   : > { %v1285_v30 = vsel %vm1157_vm1, %v1093_v20, %v1221_v26  ;;  %v1317_v31 = vsel %vm1189_vm2, %v1125_v21, %v1253_v27 }
 0x105   : > { %v1910_v32 = vpack.c.bf16 %v1285_v30, %v1285_v30  ;;  %v1942_v33 = vpack.c.bf16 %v1317_v31, %v1317_v31  ;;  %vm1158_vm4 = vcmp.ge.f32.partialorder %v1094_v28, 0.0  ;;  %v1222_v34 = vmul.f32 0.1, %v1094_v28  ;;  %v768_v35 = vpop.f32.mrb[4].mxu0  ;;  %v896_v36 = vpop.f32.mrb[4].mxu1 }
 0x106   : > { %vm1190_vm5 = vcmp.ge.f32.partialorder %v1126_v29, 0.0  ;;  %v1254_v37 = vmul.f32 0.1, %v1126_v29  ;;  %v1024_v38 = vmul.f32 %v2284_v10, %v768_v35  ;;  %v1056_v39 = vmul.f32 %v2284_v10, %v896_v36  ;;  %v770_v40 = vpop.f32.mrb[5].mxu0  ;;  %v898_v41 = vpop.f32.mrb[5].mxu1 }
 0x107   : > { %1606 = vst.msk [vmem:[%s2303_s23] sm:$0xf] %vm1605_vm3, %v1910_v32  ;;  %1638 = vst.msk [vmem:[%s2303_s23 + $0x80] sm:$0xf] %vm1605_vm3, %v1942_v33  ;;  %v1286_v42 = vsel %vm1158_vm4, %v1094_v28, %v1222_v34  ;;  %v771_v43 = vpop.f32.mrb[6].mxu0  ;;  %v899_v44 = vpop.f32.mrb[6].mxu1 }
 0x108   : > { %v1911_v45 = vpack.c.bf16 %v1286_v42, %v1286_v42  ;;  %v1318_v46 = vsel %vm1190_vm5, %v1126_v29, %v1254_v37  ;;  %v1095_v47 = vadd.f32 %v2289_v12, %v1024_v38  ;;  %v1127_v48 = vadd.f32 %v2289_v12, %v1056_v39  ;;  %v773_v49 = vpop.f32.mrb[7].mxu0  ;;  %v901_v50 = vpop.f32.mrb[7].mxu1 }
 0x109   : > { %v1943_v51 = vpack.c.bf16 %v1318_v46, %v1318_v46  ;;  %v1025_v52 = vmul.f32 %v2284_v10, %v771_v43  ;;  %v1057_v53 = vmul.f32 %v2284_v10, %v899_v44 }
 0x10a   : > { %1607 = vst.msk [vmem:[%s2303_s23 + $0x4] sm:$0xf] %vm1605_vm3, %v1911_v45  ;;  %vm1159_vm6 = vcmp.ge.f32.partialorder %v1095_v47, 0.0  ;;  %v1223_v54 = vmul.f32 0.1, %v1095_v47  ;;  %vm1191_vm7 = vcmp.ge.f32.partialorder %v1127_v48, 0.0 }
 0x10b   : > { %v1255_v55 = vmul.f32 0.1, %v1127_v48  ;;  %1639 = vst.msk [vmem:[%s2303_s23 + $0x84] sm:$0xf] %vm1605_vm3, %v1943_v51  ;;  %v1096_v56 = vadd.f32 %v2289_v12, %v1025_v52  ;;  %v1128_v57 = vadd.f32 %v2289_v12, %v1057_v53 }
 0x10c   : > { %v1287_v58 = vsel %vm1159_vm6, %v1095_v47, %v1223_v54 }
 0x10d   : > { %v1319_v59 = vsel %vm1191_vm7, %v1127_v48, %v1255_v55  ;;  %v1912_v60 = vpack.c.bf16 %v1287_v58, %v1287_v58  ;;  %vm1160_vm8 = vcmp.ge.f32.partialorder %v1096_v56, 0.0  ;;  %v1224_v62 = vmul.f32 0.1, %v1096_v56  ;;  %v776_v63 = vpop.f32.mrb[8].mxu0  ;;  %v904_v0 = vpop.f32.mrb[8].mxu1 }
 0x10e   : > { %v1944_v61 = vpack.c.bf16 %v1319_v59, %v1319_v59  ;;  %vm1192_vm9 = vcmp.ge.f32.partialorder %v1128_v57, 0.0  ;;  %v1256_v1 = vmul.f32 0.1, %v1128_v57  ;;  %v1026_v2 = vmul.f32 %v2284_v10, %v776_v63  ;;  %v778_v4 = vpop.f32.mrb[9].mxu0  ;;  %v906_v5 = vpop.f32.mrb[9].mxu1 }
 0x10f   : > { %v1058_v3 = vmul.f32 %v2284_v10, %v904_v0  ;;  %1608 = vst.msk [vmem:[%s2303_s23 + $0x8] sm:$0xf] %vm1605_vm3, %v1912_v60  ;;  %v1288_v6 = vsel %vm1160_vm8, %v1096_v56, %v1224_v62  ;;  %v779_v7 = vpop.f32.mrb[10].mxu0  ;;  %v907_v8 = vpop.f32.mrb[10].mxu1 }
 0x110   : > { %1640 = vst.msk [vmem:[%s2303_s23 + $0x88] sm:$0xf] %vm1605_vm3, %v1944_v61  ;;  %v1913_v9 = vpack.c.bf16 %v1288_v6, %v1288_v6  ;;  %v1320_v11 = vsel %vm1192_vm9, %v1128_v57, %v1256_v1  ;;  %v1097_v13 = vadd.f32 %v2289_v12, %v1026_v2  ;;  %v781_v15 = vpop.f32.mrb[11].mxu0  ;;  %v909_v16 = vpop.f32.mrb[11].mxu1  ;;  %v1027_v18 = vmul.f32 %v2284_v10, %v779_v7 }
 0x111   : > { %v1129_v14 = vadd.f32 %v2289_v12, %v1058_v3  ;;  %v1945_v17 = vpack.c.bf16 %v1320_v11, %v1320_v11  ;;  %v1059_v19 = vmul.f32 %v2284_v10, %v907_v8 }
 0x112   : > { %1609 = vst.msk [vmem:[%s2303_s23 + $0xc] sm:$0xf] %vm1605_vm3, %v1913_v9  ;;  %vm1161_vm10 = vcmp.ge.f32.partialorder %v1097_v13, 0.0  ;;  %v1225_v20 = vmul.f32 0.1, %v1097_v13  ;;  %v1098_v22 = vadd.f32 %v2289_v12, %v1027_v18 }
 0x113   : > { %vm1193_vm11 = vcmp.ge.f32.partialorder %v1129_v14, 0.0  ;;  %v1257_v21 = vmul.f32 0.1, %v1129_v14  ;;  %1641 = vst.msk [vmem:[%s2303_s23 + $0x8c] sm:$0xf] %vm1605_vm3, %v1945_v17  ;;  %v1130_v23 = vadd.f32 %v2289_v12, %v1059_v19 }
 0x114   : > { %v1289_v24 = vsel %vm1161_vm10, %v1097_v13, %v1225_v20  ;;  %vm1162_vm12 = vcmp.ge.f32.partialorder %v1098_v22, 0.0  ;;  %v1226_v28 = vmul.f32 0.1, %v1098_v22 }
 0x115   : > { %v1321_v25 = vsel %vm1193_vm11, %v1129_v14, %v1257_v21  ;;  %v1914_v26 = vpack.c.bf16 %v1289_v24, %v1289_v24  ;;  %v784_v29 = vpop.f32.mrb[12].mxu0  ;;  %v912_v30 = vpop.f32.mrb[12].mxu1  ;;  %vm1194_vm13 = vcmp.ge.f32.partialorder %v1130_v23, 0.0  ;;  %v1258_v31 = vmul.f32 0.1, %v1130_v23 }
 0x116   : > { %v1946_v27 = vpack.c.bf16 %v1321_v25, %v1321_v25  ;;  %v1028_v32 = vmul.f32 %v2284_v10, %v784_v29  ;;  %v1060_v33 = vmul.f32 %v2284_v10, %v912_v30  ;;  %v786_v34 = vpop.f32.mrb[13].mxu0  ;;  %v914_v35 = vpop.f32.mrb[13].mxu1  ;;  %v1290_v36 = vsel %vm1162_vm12, %v1098_v22, %v1226_v28 }
 0x117   : > { %1610 = vst.msk [vmem:[%s2303_s23 + $0x10] sm:$0xf] %vm1605_vm3, %v1914_v26  ;;  %v787_v37 = vpop.f32.mrb[14].mxu0  ;;  %v915_v38 = vpop.f32.mrb[14].mxu1  ;;  %v1915_v39 = vpack.c.bf16 %v1290_v36, %v1290_v36  ;;  %v1322_v40 = vsel %vm1194_vm13, %v1130_v23, %v1258_v31 }
 0x118   : > { %1642 = vst.msk [vmem:[%s2303_s23 + $0x90] sm:$0xf] %vm1605_vm3, %v1946_v27  ;;  %v1099_v41 = vadd.f32 %v2289_v12, %v1028_v32  ;;  %v1131_v42 = vadd.f32 %v2289_v12, %v1060_v33  ;;  %v789_v43 = vpop.f32.mrb[15].mxu0  ;;  %v917_v44 = vpop.f32.mrb[15].mxu1  ;;  %v1947_v45 = vpack.c.bf16 %v1322_v40, %v1322_v40  ;;  %v1029_v46 = vmul.f32 %v2284_v10, %v787_v37 }
 0x119   : > { %v1061_v47 = vmul.f32 %v2284_v10, %v915_v38  ;;  %1611 = vst.msk [vmem:[%s2303_s23 + $0x14] sm:$0xf] %vm1605_vm3, %v1915_v39 }
 0x11a   : > { %vm1163_vm14 = vcmp.ge.f32.partialorder %v1099_v41, 0.0  ;;  %v1227_v48 = vmul.f32 0.1, %v1099_v41  ;;  %vm1195_vm15 = vcmp.ge.f32.partialorder %v1131_v42, 0.0  ;;  %v1259_v49 = vmul.f32 0.1, %v1131_v42 }
 0x11b   : > { %1643 = vst.msk [vmem:[%s2303_s23 + $0x94] sm:$0xf] %vm1605_vm3, %v1947_v45  ;;  %v1100_v50 = vadd.f32 %v2289_v12, %v1029_v46  ;;  %v1132_v51 = vadd.f32 %v2289_v12, %v1061_v47 }
 0x11c   : > { %v1291_v52 = vsel %vm1163_vm14, %v1099_v41, %v1227_v48  ;;  %v1323_v53 = vsel %vm1195_vm15, %v1131_v42, %v1259_v49 }
 0x11d   : > { %v1916_v54 = vpack.c.bf16 %v1291_v52, %v1291_v52  ;;  %v1948_v55 = vpack.c.bf16 %v1323_v53, %v1323_v53  ;;  %vm1164_vm0 = vcmp.ge.f32.partialorder %v1100_v50, 0.0  ;;  %v1228_v56 = vmul.f32 0.1, %v1100_v50  ;;  %v792_v57 = vpop.f32.mrb[16].mxu0  ;;  %v920_v58 = vpop.f32.mrb[16].mxu1 }
 0x11e   : > { %vm1196_vm1 = vcmp.ge.f32.partialorder %v1132_v51, 0.0  ;;  %v1260_v59 = vmul.f32 0.1, %v1132_v51  ;;  %v1030_v60 = vmul.f32 %v2284_v10, %v792_v57  ;;  %v1062_v61 = vmul.f32 %v2284_v10, %v920_v58  ;;  %v794_v62 = vpop.f32.mrb[17].mxu0  ;;  %v922_v63 = vpop.f32.mrb[17].mxu1 }
 0x11f   : > { %1612 = vst.msk [vmem:[%s2303_s23 + $0x18] sm:$0xf] %vm1605_vm3, %v1916_v54  ;;  %1644 = vst.msk [vmem:[%s2303_s23 + $0x98] sm:$0xf] %vm1605_vm3, %v1948_v55  ;;  %v1292_v0 = vsel %vm1164_vm0, %v1100_v50, %v1228_v56  ;;  %v795_v1 = vpop.f32.mrb[18].mxu0  ;;  %v923_v2 = vpop.f32.mrb[18].mxu1 }
 0x120   : > { %v1917_v3 = vpack.c.bf16 %v1292_v0, %v1292_v0  ;;  %v1324_v4 = vsel %vm1196_vm1, %v1132_v51, %v1260_v59  ;;  %v1101_v5 = vadd.f32 %v2289_v12, %v1030_v60  ;;  %v1133_v6 = vadd.f32 %v2289_v12, %v1062_v61  ;;  %v797_v7 = vpop.f32.mrb[19].mxu0  ;;  %v925_v8 = vpop.f32.mrb[19].mxu1 }
 0x121   : > { %v1949_v9 = vpack.c.bf16 %v1324_v4, %v1324_v4  ;;  %v1031_v11 = vmul.f32 %v2284_v10, %v795_v1  ;;  %v1063_v13 = vmul.f32 %v2284_v10, %v923_v2 }
 0x122   : > { %1613 = vst.msk [vmem:[%s2303_s23 + $0x1c] sm:$0xf] %vm1605_vm3, %v1917_v3  ;;  %vm1165_vm2 = vcmp.ge.f32.partialorder %v1101_v5, 0.0  ;;  %v1229_v14 = vmul.f32 0.1, %v1101_v5  ;;  %vm1197_vm4 = vcmp.ge.f32.partialorder %v1133_v6, 0.0 }
 0x123   : > { %v1261_v15 = vmul.f32 0.1, %v1133_v6  ;;  %1645 = vst.msk [vmem:[%s2303_s23 + $0x9c] sm:$0xf] %vm1605_vm3, %v1949_v9  ;;  %v1102_v16 = vadd.f32 %v2289_v12, %v1031_v11  ;;  %v1134_v17 = vadd.f32 %v2289_v12, %v1063_v13 }
 0x124   : > { %v1293_v18 = vsel %vm1165_vm2, %v1101_v5, %v1229_v14 }
 0x125   : > { %v1325_v19 = vsel %vm1197_vm4, %v1133_v6, %v1261_v15  ;;  %v1918_v20 = vpack.c.bf16 %v1293_v18, %v1293_v18  ;;  %vm1166_vm5 = vcmp.ge.f32.partialorder %v1102_v16, 0.0  ;;  %v1230_v22 = vmul.f32 0.1, %v1102_v16  ;;  %v800_v23 = vpop.f32.mrb[20].mxu0  ;;  %v928_v24 = vpop.f32.mrb[20].mxu1 }
 0x126   : > { %v1950_v21 = vpack.c.bf16 %v1325_v19, %v1325_v19  ;;  %vm1198_vm6 = vcmp.ge.f32.partialorder %v1134_v17, 0.0  ;;  %v1262_v25 = vmul.f32 0.1, %v1134_v17  ;;  %v1032_v26 = vmul.f32 %v2284_v10, %v800_v23  ;;  %v802_v28 = vpop.f32.mrb[21].mxu0  ;;  %v930_v29 = vpop.f32.mrb[21].mxu1 }
 0x127   : > { %v1064_v27 = vmul.f32 %v2284_v10, %v928_v24  ;;  %1614 = vst.msk [vmem:[%s2303_s23 + $0x20] sm:$0xf] %vm1605_vm3, %v1918_v20  ;;  %v1294_v30 = vsel %vm1166_vm5, %v1102_v16, %v1230_v22  ;;  %v803_v31 = vpop.f32.mrb[22].mxu0  ;;  %v931_v32 = vpop.f32.mrb[22].mxu1 }
 0x128   : > { %1646 = vst.msk [vmem:[%s2303_s23 + $0xa0] sm:$0xf] %vm1605_vm3, %v1950_v21  ;;  %v1919_v33 = vpack.c.bf16 %v1294_v30, %v1294_v30  ;;  %v1326_v34 = vsel %vm1198_vm6, %v1134_v17, %v1262_v25  ;;  %v1103_v35 = vadd.f32 %v2289_v12, %v1032_v26  ;;  %v805_v37 = vpop.f32.mrb[23].mxu0  ;;  %v933_v38 = vpop.f32.mrb[23].mxu1  ;;  %v1033_v40 = vmul.f32 %v2284_v10, %v803_v31 }
 0x129   : > { %v1135_v36 = vadd.f32 %v2289_v12, %v1064_v27  ;;  %v1951_v39 = vpack.c.bf16 %v1326_v34, %v1326_v34  ;;  %v1065_v41 = vmul.f32 %v2284_v10, %v931_v32 }
 0x12a   : > { %1615 = vst.msk [vmem:[%s2303_s23 + $0x24] sm:$0xf] %vm1605_vm3, %v1919_v33  ;;  %vm1167_vm7 = vcmp.ge.f32.partialorder %v1103_v35, 0.0  ;;  %v1231_v42 = vmul.f32 0.1, %v1103_v35  ;;  %v1104_v44 = vadd.f32 %v2289_v12, %v1033_v40 }
 0x12b   : > { %vm1199_vm8 = vcmp.ge.f32.partialorder %v1135_v36, 0.0  ;;  %v1263_v43 = vmul.f32 0.1, %v1135_v36  ;;  %1647 = vst.msk [vmem:[%s2303_s23 + $0xa4] sm:$0xf] %vm1605_vm3, %v1951_v39  ;;  %v1136_v45 = vadd.f32 %v2289_v12, %v1065_v41 }
 0x12c   : > { %v1295_v46 = vsel %vm1167_vm7, %v1103_v35, %v1231_v42  ;;  %vm1168_vm9 = vcmp.ge.f32.partialorder %v1104_v44, 0.0  ;;  %v1232_v50 = vmul.f32 0.1, %v1104_v44 }
 0x12d   : > { %v1327_v47 = vsel %vm1199_vm8, %v1135_v36, %v1263_v43  ;;  %v1920_v48 = vpack.c.bf16 %v1295_v46, %v1295_v46  ;;  %v808_v51 = vpop.f32.mrb[24].mxu0  ;;  %v936_v52 = vpop.f32.mrb[24].mxu1  ;;  %vm1200_vm10 = vcmp.ge.f32.partialorder %v1136_v45, 0.0  ;;  %v1264_v53 = vmul.f32 0.1, %v1136_v45 }
 0x12e   : > { %v1952_v49 = vpack.c.bf16 %v1327_v47, %v1327_v47  ;;  %v1034_v54 = vmul.f32 %v2284_v10, %v808_v51  ;;  %v1066_v55 = vmul.f32 %v2284_v10, %v936_v52  ;;  %v810_v56 = vpop.f32.mrb[25].mxu0  ;;  %v938_v57 = vpop.f32.mrb[25].mxu1  ;;  %v1296_v58 = vsel %vm1168_vm9, %v1104_v44, %v1232_v50 }
 0x12f   : > { %1616 = vst.msk [vmem:[%s2303_s23 + $0x28] sm:$0xf] %vm1605_vm3, %v1920_v48  ;;  %v811_v59 = vpop.f32.mrb[26].mxu0  ;;  %v939_v60 = vpop.f32.mrb[26].mxu1  ;;  %v1921_v61 = vpack.c.bf16 %v1296_v58, %v1296_v58  ;;  %v1328_v62 = vsel %vm1200_vm10, %v1136_v45, %v1264_v53 }
 0x130   : > { %1648 = vst.msk [vmem:[%s2303_s23 + $0xa8] sm:$0xf] %vm1605_vm3, %v1952_v49  ;;  %v1105_v63 = vadd.f32 %v2289_v12, %v1034_v54  ;;  %v1137_v0 = vadd.f32 %v2289_v12, %v1066_v55  ;;  %v813_v1 = vpop.f32.mrb[27].mxu0  ;;  %v941_v2 = vpop.f32.mrb[27].mxu1  ;;  %v1953_v3 = vpack.c.bf16 %v1328_v62, %v1328_v62  ;;  %v1035_v4 = vmul.f32 %v2284_v10, %v811_v59 }
 0x131   : > { %v1067_v5 = vmul.f32 %v2284_v10, %v939_v60  ;;  %1617 = vst.msk [vmem:[%s2303_s23 + $0x2c] sm:$0xf] %vm1605_vm3, %v1921_v61 }
 0x132   : > { %vm1169_vm11 = vcmp.ge.f32.partialorder %v1105_v63, 0.0  ;;  %v1233_v6 = vmul.f32 0.1, %v1105_v63  ;;  %vm1201_vm12 = vcmp.ge.f32.partialorder %v1137_v0, 0.0  ;;  %v1265_v7 = vmul.f32 0.1, %v1137_v0 }
 0x133   : > { %1649 = vst.msk [vmem:[%s2303_s23 + $0xac] sm:$0xf] %vm1605_vm3, %v1953_v3  ;;  %v1106_v8 = vadd.f32 %v2289_v12, %v1035_v4  ;;  %v1138_v9 = vadd.f32 %v2289_v12, %v1067_v5 }
 0x134   : > { %v1297_v11 = vsel %vm1169_vm11, %v1105_v63, %v1233_v6  ;;  %v1329_v13 = vsel %vm1201_vm12, %v1137_v0, %v1265_v7 }
 0x135   : > { %v1922_v14 = vpack.c.bf16 %v1297_v11, %v1297_v11  ;;  %v1954_v15 = vpack.c.bf16 %v1329_v13, %v1329_v13  ;;  %vm1170_vm13 = vcmp.ge.f32.partialorder %v1106_v8, 0.0  ;;  %v1234_v16 = vmul.f32 0.1, %v1106_v8  ;;  %v816_v17 = vpop.f32.mrb[28].mxu0  ;;  %v944_v18 = vpop.f32.mrb[28].mxu1 }
 0x136   : > { %vm1202_vm14 = vcmp.ge.f32.partialorder %v1138_v9, 0.0  ;;  %v1266_v19 = vmul.f32 0.1, %v1138_v9  ;;  %v1036_v20 = vmul.f32 %v2284_v10, %v816_v17  ;;  %v1068_v21 = vmul.f32 %v2284_v10, %v944_v18  ;;  %v818_v22 = vpop.f32.mrb[29].mxu0  ;;  %v946_v23 = vpop.f32.mrb[29].mxu1 }
 0x137   : > { %1618 = vst.msk [vmem:[%s2303_s23 + $0x30] sm:$0xf] %vm1605_vm3, %v1922_v14  ;;  %1650 = vst.msk [vmem:[%s2303_s23 + $0xb0] sm:$0xf] %vm1605_vm3, %v1954_v15  ;;  %v1298_v24 = vsel %vm1170_vm13, %v1106_v8, %v1234_v16  ;;  %v819_v25 = vpop.f32.mrb[30].mxu0  ;;  %v947_v26 = vpop.f32.mrb[30].mxu1 }
 0x138   : > { %v1923_v27 = vpack.c.bf16 %v1298_v24, %v1298_v24  ;;  %v1330_v28 = vsel %vm1202_vm14, %v1138_v9, %v1266_v19  ;;  %v1107_v29 = vadd.f32 %v2289_v12, %v1036_v20  ;;  %v1139_v30 = vadd.f32 %v2289_v12, %v1068_v21  ;;  %v821_v31 = vpop.f32.mrb[31].mxu0  ;;  %v949_v32 = vpop.f32.mrb[31].mxu1 }
 0x139   : > { %v1955_v33 = vpack.c.bf16 %v1330_v28, %v1330_v28  ;;  %v1037_v34 = vmul.f32 %v2284_v10, %v819_v25  ;;  %v1069_v35 = vmul.f32 %v2284_v10, %v947_v26 }
 0x13a   : > { %1619 = vst.msk [vmem:[%s2303_s23 + $0x34] sm:$0xf] %vm1605_vm3, %v1923_v27  ;;  %vm1171_vm15 = vcmp.ge.f32.partialorder %v1107_v29, 0.0  ;;  %v1235_v36 = vmul.f32 0.1, %v1107_v29  ;;  %vm1203_vm0 = vcmp.ge.f32.partialorder %v1139_v30, 0.0 }
 0x13b   : > { %v1267_v37 = vmul.f32 0.1, %v1139_v30  ;;  %1651 = vst.msk [vmem:[%s2303_s23 + $0xb4] sm:$0xf] %vm1605_vm3, %v1955_v33  ;;  %v1108_v38 = vadd.f32 %v2289_v12, %v1037_v34  ;;  %v1140_v39 = vadd.f32 %v2289_v12, %v1069_v35 }
 0x13c   : > { %v1299_v40 = vsel %vm1171_vm15, %v1107_v29, %v1235_v36 }
 0x13d   : > { %v1331_v41 = vsel %vm1203_vm0, %v1139_v30, %v1267_v37  ;;  %v1924_v42 = vpack.c.bf16 %v1299_v40, %v1299_v40  ;;  %vm1172_vm1 = vcmp.ge.f32.partialorder %v1108_v38, 0.0  ;;  %v1236_v44 = vmul.f32 0.1, %v1108_v38  ;;  %v824_v45 = vpop.f32.mrb[32].mxu0  ;;  %v952_v46 = vpop.f32.mrb[32].mxu1 }
 0x13e   : > { %v1956_v43 = vpack.c.bf16 %v1331_v41, %v1331_v41  ;;  %vm1204_vm2 = vcmp.ge.f32.partialorder %v1140_v39, 0.0  ;;  %v1268_v47 = vmul.f32 0.1, %v1140_v39  ;;  %v1038_v48 = vmul.f32 %v2284_v10, %v824_v45  ;;  %v826_v50 = vpop.f32.mrb[33].mxu0  ;;  %v954_v51 = vpop.f32.mrb[33].mxu1 }
 0x13f   : > { %v1070_v49 = vmul.f32 %v2284_v10, %v952_v46  ;;  %1620 = vst.msk [vmem:[%s2303_s23 + $0x38] sm:$0xf] %vm1605_vm3, %v1924_v42  ;;  %v1300_v52 = vsel %vm1172_vm1, %v1108_v38, %v1236_v44  ;;  %v827_v53 = vpop.f32.mrb[34].mxu0  ;;  %v955_v54 = vpop.f32.mrb[34].mxu1 }
 0x140   : > { %1652 = vst.msk [vmem:[%s2303_s23 + $0xb8] sm:$0xf] %vm1605_vm3, %v1956_v43  ;;  %v1925_v55 = vpack.c.bf16 %v1300_v52, %v1300_v52  ;;  %v1332_v56 = vsel %vm1204_vm2, %v1140_v39, %v1268_v47  ;;  %v1109_v57 = vadd.f32 %v2289_v12, %v1038_v48  ;;  %v829_v59 = vpop.f32.mrb[35].mxu0  ;;  %v957_v60 = vpop.f32.mrb[35].mxu1  ;;  %v1039_v62 = vmul.f32 %v2284_v10, %v827_v53 }
 0x141   : > { %v1141_v58 = vadd.f32 %v2289_v12, %v1070_v49  ;;  %v1957_v61 = vpack.c.bf16 %v1332_v56, %v1332_v56  ;;  %v1071_v63 = vmul.f32 %v2284_v10, %v955_v54 }
 0x142   : > { %1621 = vst.msk [vmem:[%s2303_s23 + $0x3c] sm:$0xf] %vm1605_vm3, %v1925_v55  ;;  %vm1173_vm4 = vcmp.ge.f32.partialorder %v1109_v57, 0.0  ;;  %v1237_v0 = vmul.f32 0.1, %v1109_v57  ;;  %v1110_v2 = vadd.f32 %v2289_v12, %v1039_v62 }
 0x143   : > { %vm1205_vm5 = vcmp.ge.f32.partialorder %v1141_v58, 0.0  ;;  %v1269_v1 = vmul.f32 0.1, %v1141_v58  ;;  %1653 = vst.msk [vmem:[%s2303_s23 + $0xbc] sm:$0xf] %vm1605_vm3, %v1957_v61  ;;  %v1142_v3 = vadd.f32 %v2289_v12, %v1071_v63 }
 0x144   : > { %v1301_v4 = vsel %vm1173_vm4, %v1109_v57, %v1237_v0  ;;  %vm1174_vm6 = vcmp.ge.f32.partialorder %v1110_v2, 0.0  ;;  %v1238_v8 = vmul.f32 0.1, %v1110_v2 }
 0x145   : > { %v1333_v5 = vsel %vm1205_vm5, %v1141_v58, %v1269_v1  ;;  %v1926_v6 = vpack.c.bf16 %v1301_v4, %v1301_v4  ;;  %v832_v9 = vpop.f32.mrb[36].mxu0  ;;  %v960_v11 = vpop.f32.mrb[36].mxu1  ;;  %vm1206_vm7 = vcmp.ge.f32.partialorder %v1142_v3, 0.0  ;;  %v1270_v13 = vmul.f32 0.1, %v1142_v3 }
 0x146   : > { %v1958_v7 = vpack.c.bf16 %v1333_v5, %v1333_v5  ;;  %v1040_v14 = vmul.f32 %v2284_v10, %v832_v9  ;;  %v1072_v15 = vmul.f32 %v2284_v10, %v960_v11  ;;  %v834_v16 = vpop.f32.mrb[37].mxu0  ;;  %v962_v17 = vpop.f32.mrb[37].mxu1  ;;  %v1302_v18 = vsel %vm1174_vm6, %v1110_v2, %v1238_v8 }
 0x147   : > { %1622 = vst.msk [vmem:[%s2303_s23 + $0x40] sm:$0xf] %vm1605_vm3, %v1926_v6  ;;  %v835_v19 = vpop.f32.mrb[38].mxu0  ;;  %v963_v20 = vpop.f32.mrb[38].mxu1  ;;  %v1927_v21 = vpack.c.bf16 %v1302_v18, %v1302_v18  ;;  %v1334_v22 = vsel %vm1206_vm7, %v1142_v3, %v1270_v13 }
 0x148   : > { %1654 = vst.msk [vmem:[%s2303_s23 + $0xc0] sm:$0xf] %vm1605_vm3, %v1958_v7  ;;  %v1111_v23 = vadd.f32 %v2289_v12, %v1040_v14  ;;  %v1143_v24 = vadd.f32 %v2289_v12, %v1072_v15  ;;  %v837_v25 = vpop.f32.mrb[39].mxu0  ;;  %v965_v26 = vpop.f32.mrb[39].mxu1  ;;  %v1959_v27 = vpack.c.bf16 %v1334_v22, %v1334_v22  ;;  %v1041_v28 = vmul.f32 %v2284_v10, %v835_v19 }
 0x149   : > { %v1073_v29 = vmul.f32 %v2284_v10, %v963_v20  ;;  %1623 = vst.msk [vmem:[%s2303_s23 + $0x44] sm:$0xf] %vm1605_vm3, %v1927_v21 }
 0x14a   : > { %vm1175_vm8 = vcmp.ge.f32.partialorder %v1111_v23, 0.0  ;;  %v1239_v30 = vmul.f32 0.1, %v1111_v23  ;;  %vm1207_vm9 = vcmp.ge.f32.partialorder %v1143_v24, 0.0  ;;  %v1271_v31 = vmul.f32 0.1, %v1143_v24 }
 0x14b   : > { %1655 = vst.msk [vmem:[%s2303_s23 + $0xc4] sm:$0xf] %vm1605_vm3, %v1959_v27  ;;  %v1112_v32 = vadd.f32 %v2289_v12, %v1041_v28  ;;  %v1144_v33 = vadd.f32 %v2289_v12, %v1073_v29 }
 0x14c   : > { %v1303_v34 = vsel %vm1175_vm8, %v1111_v23, %v1239_v30  ;;  %v1335_v35 = vsel %vm1207_vm9, %v1143_v24, %v1271_v31 }
 0x14d   : > { %v1928_v36 = vpack.c.bf16 %v1303_v34, %v1303_v34  ;;  %v1960_v37 = vpack.c.bf16 %v1335_v35, %v1335_v35  ;;  %vm1176_vm10 = vcmp.ge.f32.partialorder %v1112_v32, 0.0  ;;  %v1240_v38 = vmul.f32 0.1, %v1112_v32  ;;  %v840_v39 = vpop.f32.mrb[40].mxu0  ;;  %v968_v40 = vpop.f32.mrb[40].mxu1 }
 0x14e   : > { %vm1208_vm11 = vcmp.ge.f32.partialorder %v1144_v33, 0.0  ;;  %v1272_v41 = vmul.f32 0.1, %v1144_v33  ;;  %v1042_v42 = vmul.f32 %v2284_v10, %v840_v39  ;;  %v1074_v43 = vmul.f32 %v2284_v10, %v968_v40  ;;  %v842_v44 = vpop.f32.mrb[41].mxu0  ;;  %v970_v45 = vpop.f32.mrb[41].mxu1 }
 0x14f   : > { %1624 = vst.msk [vmem:[%s2303_s23 + $0x48] sm:$0xf] %vm1605_vm3, %v1928_v36  ;;  %1656 = vst.msk [vmem:[%s2303_s23 + $0xc8] sm:$0xf] %vm1605_vm3, %v1960_v37  ;;  %v1304_v46 = vsel %vm1176_vm10, %v1112_v32, %v1240_v38  ;;  %v843_v47 = vpop.f32.mrb[42].mxu0  ;;  %v971_v48 = vpop.f32.mrb[42].mxu1 }
 0x150   : > { %v1929_v49 = vpack.c.bf16 %v1304_v46, %v1304_v46  ;;  %v1336_v50 = vsel %vm1208_vm11, %v1144_v33, %v1272_v41  ;;  %v1113_v51 = vadd.f32 %v2289_v12, %v1042_v42  ;;  %v1145_v52 = vadd.f32 %v2289_v12, %v1074_v43  ;;  %v845_v53 = vpop.f32.mrb[43].mxu0  ;;  %v973_v54 = vpop.f32.mrb[43].mxu1 }
 0x151   : > { %v1961_v55 = vpack.c.bf16 %v1336_v50, %v1336_v50  ;;  %v1043_v56 = vmul.f32 %v2284_v10, %v843_v47  ;;  %v1075_v57 = vmul.f32 %v2284_v10, %v971_v48 }
 0x152   : > { %1625 = vst.msk [vmem:[%s2303_s23 + $0x4c] sm:$0xf] %vm1605_vm3, %v1929_v49  ;;  %vm1177_vm12 = vcmp.ge.f32.partialorder %v1113_v51, 0.0  ;;  %v1241_v58 = vmul.f32 0.1, %v1113_v51  ;;  %vm1209_vm13 = vcmp.ge.f32.partialorder %v1145_v52, 0.0 }
 0x153   : > { %v1273_v59 = vmul.f32 0.1, %v1145_v52  ;;  %1657 = vst.msk [vmem:[%s2303_s23 + $0xcc] sm:$0xf] %vm1605_vm3, %v1961_v55  ;;  %v1114_v60 = vadd.f32 %v2289_v12, %v1043_v56  ;;  %v1146_v61 = vadd.f32 %v2289_v12, %v1075_v57 }
 0x154   : > { %v1305_v62 = vsel %vm1177_vm12, %v1113_v51, %v1241_v58 }
 0x155   : > { %v1337_v63 = vsel %vm1209_vm13, %v1145_v52, %v1273_v59  ;;  %v1930_v0 = vpack.c.bf16 %v1305_v62, %v1305_v62  ;;  %vm1178_vm14 = vcmp.ge.f32.partialorder %v1114_v60, 0.0  ;;  %v1242_v2 = vmul.f32 0.1, %v1114_v60  ;;  %v848_v3 = vpop.f32.mrb[44].mxu0  ;;  %v976_v4 = vpop.f32.mrb[44].mxu1 }
 0x156   : > { %v1962_v1 = vpack.c.bf16 %v1337_v63, %v1337_v63  ;;  %vm1210_vm15 = vcmp.ge.f32.partialorder %v1146_v61, 0.0  ;;  %v1274_v5 = vmul.f32 0.1, %v1146_v61  ;;  %v1044_v6 = vmul.f32 %v2284_v10, %v848_v3  ;;  %v850_v8 = vpop.f32.mrb[45].mxu0  ;;  %v978_v9 = vpop.f32.mrb[45].mxu1 }
 0x157   : > { %v1076_v7 = vmul.f32 %v2284_v10, %v976_v4  ;;  %1626 = vst.msk [vmem:[%s2303_s23 + $0x50] sm:$0xf] %vm1605_vm3, %v1930_v0  ;;  %v1306_v11 = vsel %vm1178_vm14, %v1114_v60, %v1242_v2  ;;  %v851_v13 = vpop.f32.mrb[46].mxu0  ;;  %v979_v14 = vpop.f32.mrb[46].mxu1 }
 0x158   : > { %1658 = vst.msk [vmem:[%s2303_s23 + $0xd0] sm:$0xf] %vm1605_vm3, %v1962_v1  ;;  %v1931_v15 = vpack.c.bf16 %v1306_v11, %v1306_v11  ;;  %v1338_v16 = vsel %vm1210_vm15, %v1146_v61, %v1274_v5  ;;  %v1115_v17 = vadd.f32 %v2289_v12, %v1044_v6  ;;  %v853_v19 = vpop.f32.mrb[47].mxu0  ;;  %v981_v20 = vpop.f32.mrb[47].mxu1  ;;  %v1045_v22 = vmul.f32 %v2284_v10, %v851_v13 }
 0x159   : > { %v1147_v18 = vadd.f32 %v2289_v12, %v1076_v7  ;;  %v1963_v21 = vpack.c.bf16 %v1338_v16, %v1338_v16  ;;  %v1077_v23 = vmul.f32 %v2284_v10, %v979_v14 }
 0x15a   : > { %1627 = vst.msk [vmem:[%s2303_s23 + $0x54] sm:$0xf] %vm1605_vm3, %v1931_v15  ;;  %vm1179_vm0 = vcmp.ge.f32.partialorder %v1115_v17, 0.0  ;;  %v1243_v24 = vmul.f32 0.1, %v1115_v17  ;;  %v1116_v26 = vadd.f32 %v2289_v12, %v1045_v22 }
 0x15b   : > { %vm1211_vm1 = vcmp.ge.f32.partialorder %v1147_v18, 0.0  ;;  %v1275_v25 = vmul.f32 0.1, %v1147_v18  ;;  %1659 = vst.msk [vmem:[%s2303_s23 + $0xd4] sm:$0xf] %vm1605_vm3, %v1963_v21  ;;  %v1148_v27 = vadd.f32 %v2289_v12, %v1077_v23 }
 0x15c   : > { %v1307_v28 = vsel %vm1179_vm0, %v1115_v17, %v1243_v24  ;;  %vm1180_vm2 = vcmp.ge.f32.partialorder %v1116_v26, 0.0  ;;  %v1244_v32 = vmul.f32 0.1, %v1116_v26 }
 0x15d   : > { %v1339_v29 = vsel %vm1211_vm1, %v1147_v18, %v1275_v25  ;;  %v1932_v30 = vpack.c.bf16 %v1307_v28, %v1307_v28  ;;  %v856_v33 = vpop.f32.mrb[48].mxu0  ;;  %v984_v34 = vpop.f32.mrb[48].mxu1  ;;  %vm1212_vm4 = vcmp.ge.f32.partialorder %v1148_v27, 0.0  ;;  %v1276_v35 = vmul.f32 0.1, %v1148_v27 }
 0x15e   : > { %v1964_v31 = vpack.c.bf16 %v1339_v29, %v1339_v29  ;;  %v1046_v36 = vmul.f32 %v2284_v10, %v856_v33  ;;  %v1078_v37 = vmul.f32 %v2284_v10, %v984_v34  ;;  %v858_v38 = vpop.f32.mrb[49].mxu0  ;;  %v986_v39 = vpop.f32.mrb[49].mxu1  ;;  %v1308_v40 = vsel %vm1180_vm2, %v1116_v26, %v1244_v32 }
 0x15f   : > { %1628 = vst.msk [vmem:[%s2303_s23 + $0x58] sm:$0xf] %vm1605_vm3, %v1932_v30  ;;  %v859_v41 = vpop.f32.mrb[50].mxu0  ;;  %v987_v42 = vpop.f32.mrb[50].mxu1  ;;  %v1933_v43 = vpack.c.bf16 %v1308_v40, %v1308_v40  ;;  %v1340_v44 = vsel %vm1212_vm4, %v1148_v27, %v1276_v35  ;;  %v2106_v38 = vld [vmem:[%s2551_s3] ss:$0 sm:$0xff] }
 0x160   : > { %1660 = vst.msk [vmem:[%s2303_s23 + $0xd8] sm:$0xf] %vm1605_vm3, %v1964_v31  ;;  %v1117_v45 = vadd.f32 %v2289_v12, %v1046_v36  ;;  %v1149_v46 = vadd.f32 %v2289_v12, %v1078_v37  ;;  %v861_v47 = vpop.f32.mrb[51].mxu0  ;;  %v989_v48 = vpop.f32.mrb[51].mxu1  ;;  %v1965_v49 = vpack.c.bf16 %v1340_v44, %v1340_v44  ;;  %v1047_v50 = vmul.f32 %v2284_v10, %v859_v41 }
 0x161   : > { %v1079_v51 = vmul.f32 %v2284_v10, %v987_v42  ;;  %1629 = vst.msk [vmem:[%s2303_s23 + $0x5c] sm:$0xf] %vm1605_vm3, %v1933_v43  ;;  %v2107_v43 = vld [vmem:[%s2550_s2] ss:$0 sm:$0xff] }
 0x162   : > { %vm1181_vm5 = vcmp.ge.f32.partialorder %v1117_v45, 0.0  ;;  %v1245_v52 = vmul.f32 0.1, %v1117_v45  ;;  %vm1213_vm6 = vcmp.ge.f32.partialorder %v1149_v46, 0.0  ;;  %v1277_v53 = vmul.f32 0.1, %v1149_v46 }
 0x163   : > { %1661 = vst.msk [vmem:[%s2303_s23 + $0xdc] sm:$0xf] %vm1605_vm3, %v1965_v49  ;;  %v1118_v54 = vadd.f32 %v2289_v12, %v1047_v50  ;;  %v1150_v55 = vadd.f32 %v2289_v12, %v1079_v51 }
 0x164   : > { %v1309_v56 = vsel %vm1181_vm5, %v1117_v45, %v1245_v52  ;;  %v1341_v57 = vsel %vm1213_vm6, %v1149_v46, %v1277_v53 }
 0x165   : > { %v1934_v58 = vpack.c.bf16 %v1309_v56, %v1309_v56  ;;  %v1966_v59 = vpack.c.bf16 %v1341_v57, %v1341_v57  ;;  %vm1182_vm7 = vcmp.ge.f32.partialorder %v1118_v54, 0.0  ;;  %v1246_v60 = vmul.f32 0.1, %v1118_v54  ;;  %v864_v61 = vpop.f32.mrb[52].mxu0  ;;  %v992_v62 = vpop.f32.mrb[52].mxu1 }
 0x166   : > { %vm1214_vm8 = vcmp.ge.f32.partialorder %v1150_v55, 0.0  ;;  %v1278_v63 = vmul.f32 0.1, %v1150_v55  ;;  %v1048_v0 = vmul.f32 %v2284_v10, %v864_v61  ;;  %v1080_v1 = vmul.f32 %v2284_v10, %v992_v62  ;;  %v866_v2 = vpop.f32.mrb[53].mxu0  ;;  %v994_v3 = vpop.f32.mrb[53].mxu1 }
 0x167   : > { %1630 = vst.msk [vmem:[%s2303_s23 + $0x60] sm:$0xf] %vm1605_vm3, %v1934_v58  ;;  %1662 = vst.msk [vmem:[%s2303_s23 + $0xe0] sm:$0xf] %vm1605_vm3, %v1966_v59  ;;  %v1310_v4 = vsel %vm1182_vm7, %v1118_v54, %v1246_v60  ;;  %v867_v5 = vpop.f32.mrb[54].mxu0  ;;  %v995_v6 = vpop.f32.mrb[54].mxu1 }
 0x168   : > { %v1935_v7 = vpack.c.bf16 %v1310_v4, %v1310_v4  ;;  %v1342_v8 = vsel %vm1214_vm8, %v1150_v55, %v1278_v63  ;;  %v1119_v9 = vadd.f32 %v2289_v12, %v1048_v0  ;;  %v1151_v11 = vadd.f32 %v2289_v12, %v1080_v1  ;;  %v869_v13 = vpop.f32.mrb[55].mxu0  ;;  %v997_v14 = vpop.f32.mrb[55].mxu1 }
 0x169   : > { %v1967_v15 = vpack.c.bf16 %v1342_v8, %v1342_v8  ;;  %v1049_v16 = vmul.f32 %v2284_v10, %v867_v5  ;;  %v1081_v17 = vmul.f32 %v2284_v10, %v995_v6 }
 0x16a   : > { %1631 = vst.msk [vmem:[%s2303_s23 + $0x64] sm:$0xf] %vm1605_vm3, %v1935_v7  ;;  %vm1183_vm9 = vcmp.ge.f32.partialorder %v1119_v9, 0.0  ;;  %v1247_v18 = vmul.f32 0.1, %v1119_v9  ;;  %vm1215_vm10 = vcmp.ge.f32.partialorder %v1151_v11, 0.0 }
 0x16b   : > { %v1279_v19 = vmul.f32 0.1, %v1151_v11  ;;  %1663 = vst.msk [vmem:[%s2303_s23 + $0xe4] sm:$0xf] %vm1605_vm3, %v1967_v15  ;;  %v1120_v20 = vadd.f32 %v2289_v12, %v1049_v16  ;;  %v1152_v21 = vadd.f32 %v2289_v12, %v1081_v17 }
 0x16c   : > { %v1311_v22 = vsel %vm1183_vm9, %v1119_v9, %v1247_v18 }
 0x16d   : > { %v1343_v23 = vsel %vm1215_vm10, %v1151_v11, %v1279_v19  ;;  %v1936_v24 = vpack.c.bf16 %v1311_v22, %v1311_v22  ;;  %vm1184_vm11 = vcmp.ge.f32.partialorder %v1120_v20, 0.0  ;;  %v1248_v26 = vmul.f32 0.1, %v1120_v20  ;;  %v872_v27 = vpop.f32.mrb[56].mxu0  ;;  %v1000_v28 = vpop.f32.mrb[56].mxu1 }
 0x16e   : > { %v1968_v25 = vpack.c.bf16 %v1343_v23, %v1343_v23  ;;  %vm1216_vm12 = vcmp.ge.f32.partialorder %v1152_v21, 0.0  ;;  %v1280_v29 = vmul.f32 0.1, %v1152_v21  ;;  %v1050_v30 = vmul.f32 %v2284_v10, %v872_v27  ;;  %v874_v32 = vpop.f32.mrb[57].mxu0  ;;  %v1002_v33 = vpop.f32.mrb[57].mxu1 }
 0x16f   : > { %v1082_v31 = vmul.f32 %v2284_v10, %v1000_v28  ;;  %1632 = vst.msk [vmem:[%s2303_s23 + $0x68] sm:$0xf] %vm1605_vm3, %v1936_v24  ;;  %v1312_v12 = vsel %vm1184_vm11, %v1120_v20, %v1248_v26  ;;  %v875_v34 = vpop.f32.mrb[58].mxu0  ;;  %v1003_v35 = vpop.f32.mrb[58].mxu1 }
 0x170   : > { %1664 = vst.msk [vmem:[%s2303_s23 + $0xe8] sm:$0xf] %vm1605_vm3, %v1968_v25  ;;  %v1937_v36 = vpack.c.bf16 %v1312_v12, %v1312_v12  ;;  %v1344_v37 = vsel %vm1216_vm12, %v1152_v21, %v1280_v29  ;;  %v1121_v39 = vadd.f32 %v2106_v38, %v1050_v30  ;;  %v877_v10 = vpop.f32.mrb[59].mxu0  ;;  %v1005_v41 = vpop.f32.mrb[59].mxu1  ;;  %v1051_v44 = vmul.f32 %v2107_v43, %v875_v34 }
 0x171   : > { %v1153_v40 = vadd.f32 %v2106_v38, %v1082_v31  ;;  %v1969_v42 = vpack.c.bf16 %v1344_v37, %v1344_v37  ;;  %v1083_v45 = vmul.f32 %v2107_v43, %v1003_v35 }
 0x172   : > { %1633 = vst.msk [vmem:[%s2303_s23 + $0x6c] sm:$0xf] %vm1605_vm3, %v1937_v36  ;;  %vm1185_vm13 = vcmp.ge.f32.partialorder %v1121_v39, 0.0  ;;  %v1249_v46 = vmul.f32 0.1, %v1121_v39  ;;  %v1122_v48 = vadd.f32 %v2106_v38, %v1051_v44 }
 0x173   : > { %vm1217_vm14 = vcmp.ge.f32.partialorder %v1153_v40, 0.0  ;;  %v1281_v47 = vmul.f32 0.1, %v1153_v40  ;;  %1665 = vst.msk [vmem:[%s2303_s23 + $0xec] sm:$0xf] %vm1605_vm3, %v1969_v42  ;;  %v1154_v49 = vadd.f32 %v2106_v38, %v1083_v45 }
 0x174   : > { %v1313_v50 = vsel %vm1185_vm13, %v1121_v39, %v1249_v46  ;;  %vm1186_vm15 = vcmp.ge.f32.partialorder %v1122_v48, 0.0  ;;  %v1250_v54 = vmul.f32 0.1, %v1122_v48 }
 0x175   : > { %v1345_v51 = vsel %vm1217_vm14, %v1153_v40, %v1281_v47  ;;  %v1938_v52 = vpack.c.bf16 %v1313_v50, %v1313_v50  ;;  %v880_v55 = vpop.f32.mrb[60].mxu0  ;;  %v1008_v56 = vpop.f32.mrb[60].mxu1  ;;  %vm1218_vm0 = vcmp.ge.f32.partialorder %v1154_v49, 0.0  ;;  %v1282_v57 = vmul.f32 0.1, %v1154_v49 }
 0x176   : > { %v1970_v53 = vpack.c.bf16 %v1345_v51, %v1345_v51  ;;  %v1052_v58 = vmul.f32 %v2107_v43, %v880_v55  ;;  %v1084_v59 = vmul.f32 %v2107_v43, %v1008_v56  ;;  %v882_v60 = vpop.f32.mrb[61].mxu0  ;;  %v1010_v61 = vpop.f32.mrb[61].mxu1  ;;  %v1314_v62 = vsel %vm1186_vm15, %v1122_v48, %v1250_v54 }
 0x177   : > { %1634 = vst.msk [vmem:[%s2303_s23 + $0x70] sm:$0xf] %vm1605_vm3, %v1938_v52  ;;  %v883_v63 = vpop.f32.mrb[62].mxu0  ;;  %v1011_v0 = vpop.f32.mrb[62].mxu1  ;;  %v1939_v1 = vpack.c.bf16 %v1314_v62, %v1314_v62  ;;  %v1346_v2 = vsel %vm1218_vm0, %v1154_v49, %v1282_v57 }
 0x178   : > { %1666 = vst.msk [vmem:[%s2303_s23 + $0xf0] sm:$0xf] %vm1605_vm3, %v1970_v53  ;;  %v1123_v3 = vadd.f32 %v2106_v38, %v1052_v58  ;;  %v1155_v4 = vadd.f32 %v2106_v38, %v1084_v59  ;;  %v885_v5 = vpop.f32.mrb[63].mxu0  ;;  %v1013_v6 = vpop.f32.mrb[63].mxu1  ;;  %v1971_v7 = vpack.c.bf16 %v1346_v2, %v1346_v2  ;;  %v1053_v8 = vmul.f32 %v2107_v43, %v883_v63 }
 0x179   : > { %v1085_v9 = vmul.f32 %v2107_v43, %v1011_v0  ;;  %1635 = vst.msk [vmem:[%s2303_s23 + $0x74] sm:$0xf] %vm1605_vm3, %v1939_v1 }
 0x17a   : > { %vm1187_vm1 = vcmp.ge.f32.partialorder %v1123_v3, 0.0  ;;  %v1251_v11 = vmul.f32 0.1, %v1123_v3  ;;  %vm1219_vm2 = vcmp.ge.f32.partialorder %v1155_v4, 0.0  ;;  %v1283_v13 = vmul.f32 0.1, %v1155_v4 }
 0x17b   : > { %1667 = vst.msk [vmem:[%s2303_s23 + $0xf4] sm:$0xf] %vm1605_vm3, %v1971_v7  ;;  %v1124_v14 = vadd.f32 %v2106_v38, %v1053_v8  ;;  %v1156_v15 = vadd.f32 %v2106_v38, %v1085_v9 }
 0x17c   : > { %v1315_v16 = vsel %vm1187_vm1, %v1123_v3, %v1251_v11  ;;  %v1347_v17 = vsel %vm1219_vm2, %v1155_v4, %v1283_v13 }
 0x17d   : > { %v1940_v18 = vpack.c.bf16 %v1315_v16, %v1315_v16  ;;  %v1972_v19 = vpack.c.bf16 %v1347_v17, %v1347_v17  ;;  %vm1188_vm4 = vcmp.ge.f32.partialorder %v1124_v14, 0.0  ;;  %v1252_v20 = vmul.f32 0.1, %v1124_v14 }
 0x17e   : > { %vm1220_vm5 = vcmp.ge.f32.partialorder %v1156_v15, 0.0  ;;  %v1284_v21 = vmul.f32 0.1, %v1156_v15 }
 0x17f   : > { %1636 = vst.msk [vmem:[%s2303_s23 + $0x78] sm:$0xf] %vm1605_vm3, %v1940_v18  ;;  %1668 = vst.msk [vmem:[%s2303_s23 + $0xf8] sm:$0xf] %vm1605_vm3, %v1972_v19  ;;  %v1316_v22 = vsel %vm1188_vm4, %v1124_v14, %v1252_v20 }
 0x180   : > { %v1941_v23 = vpack.c.bf16 %v1316_v22, %v1316_v22  ;;  %v1348_v24 = vsel %vm1220_vm5, %v1156_v15, %v1284_v21 }
 0x181   : > { %v1973_v25 = vpack.c.bf16 %v1348_v24, %v1348_v24 }
 0x182   : > { %1637 = vst.msk [vmem:[%s2303_s23 + $0x7c] sm:$0xf] %vm1605_vm3, %v1941_v23 }
 0x183   : > { %1669 = vst.msk [vmem:[%s2303_s23 + $0xfc] sm:$0xf] %vm1605_vm3, %v1973_v25 }
 0x184 PF: > { %s14_s15 = sadd.s32 1, %s2114_s15  }
 0x185   : > { %p11_p4 = scmp.ge.s32.totalorder %s14_s15, 6  }
 0x187   :  { %13 = sbr.rel (!%p11_p4) target bundleno = 1 (0x1), region = 66 }

// kernel: wideresnet_forward.16
= control target key start
LH: loop header
LB: loop body
LE: loop exit
PB: predicated region body
PF: predicated region fallthrough
CT: control target
= control target key end

     0   :  { %s1487_s12 = smov 0   ;;  %s1833_s0 = inlined_call_operand.vmem [shape: bf16[2048,144], index: 0, kind: input, shape index: {}]   ;;  %s1834_s1 = inlined_call_operand.vmem [shape: bf16[144,16], index: 1, kind: input, shape index: {}]   ;;  %s1835_s2 = inlined_call_operand.vmem [shape: f32[2048,16], index: 2, kind: input, shape index: {}]   ;;  %s1836_s3 = inlined_call_operand.vmem [shape: f32[2048,16], index: 3, kind: output, shape index: {}]  }
   0x1 LB: > { %s1206_s13 = sadd.s32 4294967295, %s1464_s12   ;;  %p1210_p0 = scmp.ge.s32.totalorder %s1464_s12, 1  ;;  %s1464_s12 = sphi %s1487_s12, %s13_s12  }
   0x2   : > { %p150_p1 = scmp.lt.s32.totalorder %s1464_s12, 5 }
   0x4   : > { %p151_p2 = pnand %p1210_p0, %p150_p1 }
   0x5   : > { %v1353_v0 = vld [vmem:[%s1834_s1] sm:$0xff] (!%p151_p2)   ;;  %v1466_v1 = vmov (!%p151_p2), 0   ;;  %s1211_s16 = sshll.u32 (!%p151_p2), %s1206_s13, 6  ;;  %v1354_v2 = vld [vmem:[%s1834_s1 + $0x8] sm:$0xff] (!%p151_p2)   ;;  %v1355_v3 = vld [vmem:[%s1834_s1 + $0x10] sm:$0xff] (!%p151_p2)   ;;  %vm688_vm0 = vcmask (!%p151_p2), 130048  }
   0x6   : > { %154 = sbr.rel (%p151_p2) target bundleno = 379 (0x17b), region = 32  ;;  %785 = vmatprep.subr.bf16.mxu0 (!%p151_p2), %v1466_v1  ;;  %1326 = vmatprep.subr.bf16.mxu1 (!%p151_p2), %v1466_v1  ;;  %p181_p3 = scmp.lt.s32.totalorder (!%p151_p2), %s1211_s16, 255  ;;  %v1356_v4 = vld [vmem:[%s1834_s1 + $0x18] sm:$0xff] (!%p151_p2)   ;;  %v1357_v7 = vld [vmem:[%s1834_s1 + $0x20] sm:$0xff] (!%p151_p2)   ;;  %v1358_v8 = vld [vmem:[%s1834_s1 + $0x28] sm:$0xff] (!%p151_p2)  }
   0x7   : > { %786 = vmatpush1.bf16.msra.mxu0 (!%p151_p2), %v1353_v0  ;;  %1335 = vmatpush1.bf16.msra.mxu1 (!%p151_p2), %v1353_v0  ;;  %v1359_v9 = vld [vmem:[%s1834_s1 + $0x30] sm:$0xff] (!%p151_p2)   ;;  %v1360_v10 = vld [vmem:[%s1834_s1 + $0x38] sm:$0xff] (!%p151_p2)   ;;  %v1361_v11 = vld [vmem:[%s1834_s1 + $0x40] sm:$0xff] (!%p151_p2)  }
   0x8   : > { %787 = vmatprep.subr.bf16.mxu0 (!%p151_p2), %v1466_v1  ;;  %1327 = vmatprep.subr.bf16.mxu1 (!%p151_p2), %v1466_v1 }
   0xb   : > { %788 = vmatpush1.bf16.msra.mxu0 (!%p151_p2), %v1354_v2  ;;  %1336 = vmatpush1.bf16.msra.mxu1 (!%p151_p2), %v1354_v2 }
   0xc   : > { %789 = vmatprep.subr.bf16.mxu0 (!%p151_p2), %v1466_v1  ;;  %1328 = vmatprep.subr.bf16.mxu1 (!%p151_p2), %v1466_v1 }
   0xd   : > { %s1838_s16 = smov (!%p181_p3, %s1211_s16), 255 }
   0xe   : > { %s1504_s21 = sshll.u32 %s1838_s16, 3 }
   0xf   : > { %s1510_s24 = scalar_lea.vmem %s1833_s0, %s1504_s21  ;;  %790 = vmatpush1.bf16.msra.mxu0 %v1355_v3  ;;  %1337 = vmatpush1.bf16.msra.mxu1 %v1355_v3  ;;  %s1630_s13 = scalar_lea.vmem %s1835_s2, %s1504_s21 }
  0x10   : > { %v1364_v5 = vld [vmem:[%s1510_s24 + $0x4] ss:$8 sps:$4 sm:$0xff]   ;;  %791 = vmatprep.subr.bf16.mxu0 %v1466_v1  ;;  %1329 = vmatprep.subr.bf16.mxu1 %v1466_v1  ;;  %v1362_v12 = vld [vmem:[%s1510_s24] ss:$8 sps:$4 sm:$0xff]   ;;  %v1368_v14 = vld [vmem:[%s1510_s24 + $0x14] ss:$8 sps:$4 sm:$0xff]   ;;  %s1638_s16 = scalar_lea.vmem %s1836_s3, %s1504_s21 }
  0x11   : > { %v1367_v6 = vld [vmem:[%s1510_s24 + $0x104] ss:$8 sps:$4 sm:$0xff]   ;;  %1291 = vmatprep.mubr.msk.bf16.mxu0 %vm688_vm0, %v1364_v5  ;;  %v1365_v13 = vld [vmem:[%s1510_s24 + $0x100] ss:$8 sps:$4 sm:$0xff]   ;;  %v1370_v15 = vld [vmem:[%s1510_s24 + $0x114] ss:$8 sps:$4 sm:$0xff]  }
  0x12   : > { %1307 = vmatprep.mubr.msk.bf16.mxu1 %vm688_vm0, %v1367_v6  ;;  %v1372_v16 = vld [vmem:[%s1510_s24 + $0x10] ss:$8 sps:$4 sm:$0xff]   ;;  %v1374_v18 = vld [vmem:[%s1510_s24 + $0x24] ss:$8 sps:$4 sm:$0xff]   ;;  %v1378_v20 = vld [vmem:[%s1510_s24 + $0x20] ss:$8 sps:$4 sm:$0xff]  }
  0x13   : > { %792 = vmatpush1.bf16.msra.mxu0 %v1356_v4  ;;  %1338 = vmatpush1.bf16.msra.mxu1 %v1356_v4  ;;  %v1373_v17 = vld [vmem:[%s1510_s24 + $0x110] ss:$8 sps:$4 sm:$0xff]   ;;  %v1376_v19 = vld [vmem:[%s1510_s24 + $0x124] ss:$8 sps:$4 sm:$0xff]   ;;  %v1379_v21 = vld [vmem:[%s1510_s24 + $0x120] ss:$8 sps:$4 sm:$0xff]  }
  0x14   : > { %793 = vmatprep.subr.bf16.mxu0 %v1466_v1  ;;  %1330 = vmatprep.subr.bf16.mxu1 %v1466_v1  ;;  %v1380_v22 = vld [vmem:[%s1510_s24 + $0x34] ss:$8 sps:$4 sm:$0xff]   ;;  %v1384_v24 = vld [vmem:[%s1510_s24 + $0x30] ss:$8 sps:$4 sm:$0xff]   ;;  %v1386_v26 = vld [vmem:[%s1510_s24 + $0x44] ss:$8 sps:$4 sm:$0xff]  }
  0x15   : > { %v1382_v23 = vld [vmem:[%s1510_s24 + $0x134] ss:$8 sps:$4 sm:$0xff]   ;;  %v1385_v25 = vld [vmem:[%s1510_s24 + $0x130] ss:$8 sps:$4 sm:$0xff]   ;;  %v1388_v27 = vld [vmem:[%s1510_s24 + $0x144] ss:$8 sps:$4 sm:$0xff]  }
  0x16   : > { %v1390_v28 = vld [vmem:[%s1510_s24 + $0x40] ss:$8 sps:$4 sm:$0xff]   ;;  %v1392_v30 = vld [vmem:[%s1510_s24 + $0x54] ss:$8 sps:$4 sm:$0xff]   ;;  %v1396_v32 = vld [vmem:[%s1510_s24 + $0x50] ss:$8 sps:$4 sm:$0xff]  }
  0x17   : > { %794 = vmatpush1.bf16.msra.mxu0 %v1357_v7  ;;  %1339 = vmatpush1.bf16.msra.mxu1 %v1357_v7  ;;  %v1391_v29 = vld [vmem:[%s1510_s24 + $0x140] ss:$8 sps:$4 sm:$0xff]   ;;  %v1394_v31 = vld [vmem:[%s1510_s24 + $0x154] ss:$8 sps:$4 sm:$0xff]   ;;  %v1397_v33 = vld [vmem:[%s1510_s24 + $0x150] ss:$8 sps:$4 sm:$0xff]  }
  0x18   : > { %795 = vmatprep.subr.bf16.mxu0 %v1466_v1  ;;  %1331 = vmatprep.subr.bf16.mxu1 %v1466_v1  ;;  %v1398_v34 = vld [vmem:[%s1510_s24 + $0x64] ss:$8 sps:$4 sm:$0xff]   ;;  %v1402_v36 = vld [vmem:[%s1510_s24 + $0x60] ss:$8 sps:$4 sm:$0xff]   ;;  %v1404_v38 = vld [vmem:[%s1510_s24 + $0x74] ss:$8 sps:$4 sm:$0xff]  }
  0x19   : > { %v1400_v35 = vld [vmem:[%s1510_s24 + $0x164] ss:$8 sps:$4 sm:$0xff]   ;;  %v1403_v37 = vld [vmem:[%s1510_s24 + $0x160] ss:$8 sps:$4 sm:$0xff]   ;;  %v1406_v39 = vld [vmem:[%s1510_s24 + $0x174] ss:$8 sps:$4 sm:$0xff]  }
  0x1a   : > { %v1408_v40 = vld [vmem:[%s1510_s24 + $0x70] ss:$8 sps:$4 sm:$0xff]   ;;  %v1410_v42 = vld [vmem:[%s1510_s24 + $0x84] ss:$8 sps:$4 sm:$0xff]   ;;  %v1414_v44 = vld [vmem:[%s1510_s24 + $0x80] ss:$8 sps:$4 sm:$0xff]  }
  0x1b   : > { %796 = vmatpush1.bf16.msra.mxu0 %v1358_v8  ;;  %1340 = vmatpush1.bf16.msra.mxu1 %v1358_v8  ;;  %v1409_v41 = vld [vmem:[%s1510_s24 + $0x170] ss:$8 sps:$4 sm:$0xff]   ;;  %v1412_v43 = vld [vmem:[%s1510_s24 + $0x184] ss:$8 sps:$4 sm:$0xff]   ;;  %v1415_v45 = vld [vmem:[%s1510_s24 + $0x180] ss:$8 sps:$4 sm:$0xff]  }
  0x1c   : > { %797 = vmatprep.subr.bf16.mxu0 %v1466_v1  ;;  %1332 = vmatprep.subr.bf16.mxu1 %v1466_v1  ;;  %v1416_v46 = vld [vmem:[%s1510_s24 + $0x94] ss:$8 sps:$4 sm:$0xff]   ;;  %v1420_v48 = vld [vmem:[%s1510_s24 + $0x90] ss:$8 sps:$4 sm:$0xff]   ;;  %v1422_v50 = vld [vmem:[%s1510_s24 + $0xa4] ss:$8 sps:$4 sm:$0xff]  }
  0x1d   : > { %v1418_v47 = vld [vmem:[%s1510_s24 + $0x194] ss:$8 sps:$4 sm:$0xff]   ;;  %v1421_v49 = vld [vmem:[%s1510_s24 + $0x190] ss:$8 sps:$4 sm:$0xff]   ;;  %v1424_v51 = vld [vmem:[%s1510_s24 + $0x1a4] ss:$8 sps:$4 sm:$0xff]  }
  0x1e   : > { %v1426_v52 = vld [vmem:[%s1510_s24 + $0xa0] ss:$8 sps:$4 sm:$0xff]   ;;  %v1428_v54 = vld [vmem:[%s1510_s24 + $0xb4] ss:$8 sps:$4 sm:$0xff]   ;;  %v1432_v56 = vld [vmem:[%s1510_s24 + $0xb0] ss:$8 sps:$4 sm:$0xff]  }
  0x1f   : > { %798 = vmatpush1.bf16.msra.mxu0 %v1359_v9  ;;  %1341 = vmatpush1.bf16.msra.mxu1 %v1359_v9  ;;  %v1427_v53 = vld [vmem:[%s1510_s24 + $0x1a0] ss:$8 sps:$4 sm:$0xff]   ;;  %v1430_v55 = vld [vmem:[%s1510_s24 + $0x1b4] ss:$8 sps:$4 sm:$0xff]   ;;  %v1433_v57 = vld [vmem:[%s1510_s24 + $0x1b0] ss:$8 sps:$4 sm:$0xff]  }
  0x20   : > { %799 = vmatprep.subr.bf16.mxu0 %v1466_v1  ;;  %1333 = vmatprep.subr.bf16.mxu1 %v1466_v1  ;;  %v1434_v58 = vld [vmem:[%s1510_s24 + $0xc4] ss:$8 sps:$4 sm:$0xff]   ;;  %v1438_v60 = vld [vmem:[%s1510_s24 + $0xc0] ss:$8 sps:$4 sm:$0xff]   ;;  %v1440_v62 = vld [vmem:[%s1510_s24 + $0xd4] ss:$8 sps:$4 sm:$0xff]  }
  0x21   : > { %v1436_v59 = vld [vmem:[%s1510_s24 + $0x1c4] ss:$8 sps:$4 sm:$0xff]   ;;  %v1439_v61 = vld [vmem:[%s1510_s24 + $0x1c0] ss:$8 sps:$4 sm:$0xff]   ;;  %v1442_v63 = vld [vmem:[%s1510_s24 + $0x1d4] ss:$8 sps:$4 sm:$0xff]  }
  0x22   : > { %v1444_v0 = vld [vmem:[%s1510_s24 + $0xd0] ss:$8 sps:$4 sm:$0xff]   ;;  %v1446_v2 = vld [vmem:[%s1510_s24 + $0xe4] ss:$8 sps:$4 sm:$0xff]   ;;  %v1450_v4 = vld [vmem:[%s1510_s24 + $0xe0] ss:$8 sps:$4 sm:$0xff]  }
  0x23   : > { %800 = vmatpush1.bf16.msra.mxu0 %v1360_v10  ;;  %1342 = vmatpush1.bf16.msra.mxu1 %v1360_v10  ;;  %v1448_v3 = vld [vmem:[%s1510_s24 + $0x1e4] ss:$8 sps:$4 sm:$0xff]   ;;  %v1451_v5 = vld [vmem:[%s1510_s24 + $0x1e0] ss:$8 sps:$4 sm:$0xff]   ;;  %v1452_v6 = vld [vmem:[%s1510_s24 + $0xf4] ss:$8 sps:$4 sm:$0xff]  }
  0x24   : > { %801 = vmatprep.subr.bf16.mxu0 %v1466_v1  ;;  %1334 = vmatprep.subr.bf16.mxu1 %v1466_v1  ;;  %v1445_v1 = vld [vmem:[%s1510_s24 + $0x1d0] ss:$8 sps:$4 sm:$0xff]   ;;  %v1454_v7 = vld [vmem:[%s1510_s24 + $0x1f4] ss:$8 sps:$4 sm:$0xff]   ;;  %v282_v10 = vld [vmem:[%s1630_s13] sm:$0xff] }
  0x25   : > { %v1456_v8 = vld [vmem:[%s1510_s24 + $0xf0] ss:$8 sps:$4 sm:$0xff]  }
  0x26   : > { %v1457_v9 = vld [vmem:[%s1510_s24 + $0x1f0] ss:$8 sps:$4 sm:$0xff]  }
  0x27   : > { %802 = vmatpush1.bf16.msra.mxu0 %v1361_v11  ;;  %1343 = vmatpush1.bf16.msra.mxu1 %v1361_v11  ;;  %v314_v11 = vld [vmem:[%s1630_s13 + $0x100] sm:$0xff] }
  0x2a   : > { %818 = vmatmul.mubr.bf16.vlgmr.msra.gmra.mrb[0].mxu0 %v1362_v12  ;;  %946 = vmatmul.mubr.bf16.vlgmr.msra.gmra.mrb[0].mxu1 %v1365_v13 }
  0x2b   : > { %1292 = vmatprep.mubr.msk.bf16.mxu0 %vm688_vm0, %v1368_v14  ;;  %1308 = vmatprep.mubr.msk.bf16.mxu1 %vm688_vm0, %v1370_v15  ;;  %v283_v14 = vld [vmem:[%s1630_s13 + $0x8] sm:$0xff] }
  0x2c   : > { %v315_v15 = vld [vmem:[%s1630_s13 + $0x108] sm:$0xff] }
  0x32   : > { %826 = vmatmul.mubr.bf16.gmra.mrb[4].mxu0 %v1372_v16  ;;  %954 = vmatmul.mubr.bf16.gmra.mrb[4].mxu1 %v1373_v17 }
  0x33   : > { %1293 = vmatprep.mubr.msk.bf16.mxu0 %vm688_vm0, %v1374_v18  ;;  %1309 = vmatprep.mubr.msk.bf16.mxu1 %vm688_vm0, %v1376_v19 }
  0x3a   : > { %834 = vmatmul.mubr.bf16.gmra.mrb[8].mxu0 %v1378_v20  ;;  %962 = vmatmul.mubr.bf16.gmra.mrb[8].mxu1 %v1379_v21 }
  0x3b   : > { %1294 = vmatprep.mubr.msk.bf16.mxu0 %vm688_vm0, %v1380_v22  ;;  %1310 = vmatprep.mubr.msk.bf16.mxu1 %vm688_vm0, %v1382_v23 }
  0x42   : > { %842 = vmatmul.mubr.bf16.gmra.mrb[12].mxu0 %v1384_v24  ;;  %970 = vmatmul.mubr.bf16.gmra.mrb[12].mxu1 %v1385_v25 }
  0x43   : > { %1295 = vmatprep.mubr.msk.bf16.mxu0 %vm688_vm0, %v1386_v26  ;;  %1311 = vmatprep.mubr.msk.bf16.mxu1 %vm688_vm0, %v1388_v27  ;;  %v284_v26 = vld [vmem:[%s1630_s13 + $0x10] sm:$0xff] }
  0x44   : > { %v316_v27 = vld [vmem:[%s1630_s13 + $0x110] sm:$0xff] }
  0x4a   : > { %850 = vmatmul.mubr.bf16.gmra.mrb[16].mxu0 %v1390_v28  ;;  %978 = vmatmul.mubr.bf16.gmra.mrb[16].mxu1 %v1391_v29 }
  0x4b   : > { %1296 = vmatprep.mubr.msk.bf16.mxu0 %vm688_vm0, %v1392_v30  ;;  %1312 = vmatprep.mubr.msk.bf16.mxu1 %vm688_vm0, %v1394_v31  ;;  %v285_v30 = vld [vmem:[%s1630_s13 + $0x18] sm:$0xff] }
  0x4c   : > { %v317_v31 = vld [vmem:[%s1630_s13 + $0x118] sm:$0xff] }
  0x52   : > { %858 = vmatmul.mubr.bf16.gmra.mrb[20].mxu0 %v1396_v32  ;;  %986 = vmatmul.mubr.bf16.gmra.mrb[20].mxu1 %v1397_v33 }
  0x53   : > { %1297 = vmatprep.mubr.msk.bf16.mxu0 %vm688_vm0, %v1398_v34  ;;  %1313 = vmatprep.mubr.msk.bf16.mxu1 %vm688_vm0, %v1400_v35 }
  0x5a   : > { %866 = vmatmul.mubr.bf16.gmra.mrb[24].mxu0 %v1402_v36  ;;  %994 = vmatmul.mubr.bf16.gmra.mrb[24].mxu1 %v1403_v37 }
  0x5b   : > { %1298 = vmatprep.mubr.msk.bf16.mxu0 %vm688_vm0, %v1404_v38  ;;  %1314 = vmatprep.mubr.msk.bf16.mxu1 %vm688_vm0, %v1406_v39 }
  0x62   : > { %874 = vmatmul.mubr.bf16.gmra.mrb[28].mxu0 %v1408_v40  ;;  %1002 = vmatmul.mubr.bf16.gmra.mrb[28].mxu1 %v1409_v41 }
  0x63   : > { %1299 = vmatprep.mubr.msk.bf16.mxu0 %vm688_vm0, %v1410_v42  ;;  %1315 = vmatprep.mubr.msk.bf16.mxu1 %vm688_vm0, %v1412_v43  ;;  %v286_v42 = vld [vmem:[%s1630_s13 + $0x20] sm:$0xff] }
  0x64   : > { %v318_v43 = vld [vmem:[%s1630_s13 + $0x120] sm:$0xff] }
  0x6a   : > { %882 = vmatmul.mubr.bf16.gmra.mrb[32].mxu0 %v1414_v44  ;;  %1010 = vmatmul.mubr.bf16.gmra.mrb[32].mxu1 %v1415_v45 }
  0x6b   : > { %1300 = vmatprep.mubr.msk.bf16.mxu0 %vm688_vm0, %v1416_v46  ;;  %1316 = vmatprep.mubr.msk.bf16.mxu1 %vm688_vm0, %v1418_v47  ;;  %v287_v46 = vld [vmem:[%s1630_s13 + $0x28] sm:$0xff] }
  0x6c   : > { %v319_v47 = vld [vmem:[%s1630_s13 + $0x128] sm:$0xff] }
  0x72   : > { %890 = vmatmul.mubr.bf16.gmra.mrb[36].mxu0 %v1420_v48  ;;  %1018 = vmatmul.mubr.bf16.gmra.mrb[36].mxu1 %v1421_v49 }
  0x73   : > { %1301 = vmatprep.mubr.msk.bf16.mxu0 %vm688_vm0, %v1422_v50  ;;  %1317 = vmatprep.mubr.msk.bf16.mxu1 %vm688_vm0, %v1424_v51 }
  0x7a   : > { %898 = vmatmul.mubr.bf16.gmra.mrb[40].mxu0 %v1426_v52  ;;  %1026 = vmatmul.mubr.bf16.gmra.mrb[40].mxu1 %v1427_v53 }
  0x7b   : > { %1302 = vmatprep.mubr.msk.bf16.mxu0 %vm688_vm0, %v1428_v54  ;;  %1318 = vmatprep.mubr.msk.bf16.mxu1 %vm688_vm0, %v1430_v55 }
  0x82   : > { %906 = vmatmul.mubr.bf16.gmra.mrb[44].mxu0 %v1432_v56  ;;  %1034 = vmatmul.mubr.bf16.gmra.mrb[44].mxu1 %v1433_v57 }
  0x83   : > { %1303 = vmatprep.mubr.msk.bf16.mxu0 %vm688_vm0, %v1434_v58  ;;  %1319 = vmatprep.mubr.msk.bf16.mxu1 %vm688_vm0, %v1436_v59  ;;  %v288_v58 = vld [vmem:[%s1630_s13 + $0x30] sm:$0xff] }
  0x84   : > { %v320_v59 = vld [vmem:[%s1630_s13 + $0x130] sm:$0xff] }
  0x8a   : > { %914 = vmatmul.mubr.bf16.gmra.mrb[48].mxu0 %v1438_v60  ;;  %1042 = vmatmul.mubr.bf16.gmra.mrb[48].mxu1 %v1439_v61 }
  0x8b   : > { %1304 = vmatprep.mubr.msk.bf16.mxu0 %vm688_vm0, %v1440_v62  ;;  %1320 = vmatprep.mubr.msk.bf16.mxu1 %vm688_vm0, %v1442_v63  ;;  %v289_v62 = vld [vmem:[%s1630_s13 + $0x38] sm:$0xff] }
  0x8c   : > { %v321_v63 = vld [vmem:[%s1630_s13 + $0x138] sm:$0xff] }
  0x92   : > { %922 = vmatmul.mubr.bf16.gmra.mrb[52].mxu0 %v1444_v0  ;;  %1050 = vmatmul.mubr.bf16.gmra.mrb[52].mxu1 %v1445_v1 }
  0x93   : > { %1305 = vmatprep.mubr.msk.bf16.mxu0 %vm688_vm0, %v1446_v2  ;;  %1321 = vmatprep.mubr.msk.bf16.mxu1 %vm688_vm0, %v1448_v3 }
  0x9a   : > { %930 = vmatmul.mubr.bf16.gmra.mrb[56].mxu0 %v1450_v4  ;;  %1058 = vmatmul.mubr.bf16.gmra.mrb[56].mxu1 %v1451_v5 }
  0x9b   : > { %1306 = vmatprep.mubr.msk.bf16.mxu0 %vm688_vm0, %v1452_v6  ;;  %1322 = vmatprep.mubr.msk.bf16.mxu1 %vm688_vm0, %v1454_v7 }
  0xa2   : > { %938 = vmatmul.mubr.bf16.gmra.mrb[60].mxu0 %v1456_v8  ;;  %1066 = vmatmul.mubr.bf16.gmra.mrb[60].mxu1 %v1457_v9 }
  0xfd   : > { %v819_v12 = vpop.f32.mrb[0].mxu0  ;;  %v947_v13 = vpop.f32.mrb[0].mxu1 }
  0xfe   : > { %v820_v16 = vadd.f32 %v819_v12, %v282_v10  ;;  %v948_v17 = vadd.f32 %v947_v13, %v314_v11  ;;  %v821_v18 = vpop.f32.mrb[1].mxu0  ;;  %v949_v19 = vpop.f32.mrb[1].mxu1  ;;  %v290_v10 = vld [vmem:[%s1630_s13 + $0x40] sm:$0xff] }
  0xff   : > { %v822_v20 = vpop.f32.mrb[2].mxu0  ;;  %v950_v21 = vpop.f32.mrb[2].mxu1  ;;  %v322_v11 = vld [vmem:[%s1630_s13 + $0x140] sm:$0xff] }
 0x100   : > { %1074 = vst.msk [vmem:[%s1638_s16] sm:$0xff] %vm688_vm0, %v820_v16  ;;  %1106 = vst.msk [vmem:[%s1638_s16 + $0x100] sm:$0xff] %vm688_vm0, %v948_v17  ;;  %v823_v22 = vadd.f32 %v822_v20, %v283_v14  ;;  %v951_v23 = vadd.f32 %v950_v21, %v315_v15  ;;  %v824_v24 = vpop.f32.mrb[3].mxu0  ;;  %v952_v25 = vpop.f32.mrb[3].mxu1  ;;  %v291_v14 = vld [vmem:[%s1630_s13 + $0x48] sm:$0xff] }
 0x101   : > { %v323_v15 = vld [vmem:[%s1630_s13 + $0x148] sm:$0xff] }
 0x102   : > { %1075 = vst.msk [vmem:[%s1638_s16 + $0x8] sm:$0xff] %vm688_vm0, %v823_v22  ;;  %1107 = vst.msk [vmem:[%s1638_s16 + $0x108] sm:$0xff] %vm688_vm0, %v951_v23 }
 0x105   : > { %v827_v28 = vpop.f32.mrb[4].mxu0  ;;  %v955_v29 = vpop.f32.mrb[4].mxu1 }
 0x106   : > { %v828_v32 = vadd.f32 %v827_v28, %v284_v26  ;;  %v956_v33 = vadd.f32 %v955_v29, %v316_v27  ;;  %v829_v34 = vpop.f32.mrb[5].mxu0  ;;  %v957_v35 = vpop.f32.mrb[5].mxu1  ;;  %v292_v26 = vld [vmem:[%s1630_s13 + $0x50] sm:$0xff] }
 0x107   : > { %v830_v36 = vpop.f32.mrb[6].mxu0  ;;  %v958_v37 = vpop.f32.mrb[6].mxu1  ;;  %v324_v27 = vld [vmem:[%s1630_s13 + $0x150] sm:$0xff] }
 0x108   : > { %1076 = vst.msk [vmem:[%s1638_s16 + $0x10] sm:$0xff] %vm688_vm0, %v828_v32  ;;  %1108 = vst.msk [vmem:[%s1638_s16 + $0x110] sm:$0xff] %vm688_vm0, %v956_v33  ;;  %v831_v38 = vadd.f32 %v830_v36, %v285_v30  ;;  %v959_v39 = vadd.f32 %v958_v37, %v317_v31  ;;  %v832_v40 = vpop.f32.mrb[7].mxu0  ;;  %v960_v41 = vpop.f32.mrb[7].mxu1  ;;  %v293_v30 = vld [vmem:[%s1630_s13 + $0x58] sm:$0xff] }
 0x109   : > { %v325_v31 = vld [vmem:[%s1630_s13 + $0x158] sm:$0xff] }
 0x10a   : > { %1077 = vst.msk [vmem:[%s1638_s16 + $0x18] sm:$0xff] %vm688_vm0, %v831_v38  ;;  %1109 = vst.msk [vmem:[%s1638_s16 + $0x118] sm:$0xff] %vm688_vm0, %v959_v39 }
 0x10d   : > { %v835_v44 = vpop.f32.mrb[8].mxu0  ;;  %v963_v45 = vpop.f32.mrb[8].mxu1 }
 0x10e   : > { %v836_v48 = vadd.f32 %v835_v44, %v286_v42  ;;  %v964_v49 = vadd.f32 %v963_v45, %v318_v43  ;;  %v837_v50 = vpop.f32.mrb[9].mxu0  ;;  %v965_v51 = vpop.f32.mrb[9].mxu1  ;;  %v294_v42 = vld [vmem:[%s1630_s13 + $0x60] sm:$0xff] }
 0x10f   : > { %v838_v52 = vpop.f32.mrb[10].mxu0  ;;  %v966_v53 = vpop.f32.mrb[10].mxu1  ;;  %v326_v43 = vld [vmem:[%s1630_s13 + $0x160] sm:$0xff] }
 0x110   : > { %1078 = vst.msk [vmem:[%s1638_s16 + $0x20] sm:$0xff] %vm688_vm0, %v836_v48  ;;  %1110 = vst.msk [vmem:[%s1638_s16 + $0x120] sm:$0xff] %vm688_vm0, %v964_v49  ;;  %v839_v54 = vadd.f32 %v838_v52, %v287_v46  ;;  %v967_v55 = vadd.f32 %v966_v53, %v319_v47  ;;  %v840_v56 = vpop.f32.mrb[11].mxu0  ;;  %v968_v57 = vpop.f32.mrb[11].mxu1  ;;  %v295_v46 = vld [vmem:[%s1630_s13 + $0x68] sm:$0xff] }
 0x111   : > { %v327_v47 = vld [vmem:[%s1630_s13 + $0x168] sm:$0xff] }
 0x112   : > { %1079 = vst.msk [vmem:[%s1638_s16 + $0x28] sm:$0xff] %vm688_vm0, %v839_v54  ;;  %1111 = vst.msk [vmem:[%s1638_s16 + $0x128] sm:$0xff] %vm688_vm0, %v967_v55 }
 0x115   : > { %v843_v60 = vpop.f32.mrb[12].mxu0  ;;  %v971_v61 = vpop.f32.mrb[12].mxu1 }
 0x116   : > { %v844_v0 = vadd.f32 %v843_v60, %v288_v58  ;;  %v972_v1 = vadd.f32 %v971_v61, %v320_v59  ;;  %v845_v2 = vpop.f32.mrb[13].mxu0  ;;  %v973_v3 = vpop.f32.mrb[13].mxu1  ;;  %v296_v58 = vld [vmem:[%s1630_s13 + $0x70] sm:$0xff] }
 0x117   : > { %v846_v4 = vpop.f32.mrb[14].mxu0  ;;  %v974_v5 = vpop.f32.mrb[14].mxu1  ;;  %v328_v59 = vld [vmem:[%s1630_s13 + $0x170] sm:$0xff] }
 0x118   : > { %1080 = vst.msk [vmem:[%s1638_s16 + $0x30] sm:$0xff] %vm688_vm0, %v844_v0  ;;  %1112 = vst.msk [vmem:[%s1638_s16 + $0x130] sm:$0xff] %vm688_vm0, %v972_v1  ;;  %v847_v6 = vadd.f32 %v846_v4, %v289_v62  ;;  %v975_v7 = vadd.f32 %v974_v5, %v321_v63  ;;  %v848_v8 = vpop.f32.mrb[15].mxu0  ;;  %v976_v9 = vpop.f32.mrb[15].mxu1  ;;  %v297_v62 = vld [vmem:[%s1630_s13 + $0x78] sm:$0xff] }
 0x119   : > { %v329_v63 = vld [vmem:[%s1630_s13 + $0x178] sm:$0xff] }
 0x11a   : > { %1081 = vst.msk [vmem:[%s1638_s16 + $0x38] sm:$0xff] %vm688_vm0, %v847_v6  ;;  %1113 = vst.msk [vmem:[%s1638_s16 + $0x138] sm:$0xff] %vm688_vm0, %v975_v7 }
 0x11d   : > { %v851_v12 = vpop.f32.mrb[16].mxu0  ;;  %v979_v13 = vpop.f32.mrb[16].mxu1 }
 0x11e   : > { %v852_v16 = vadd.f32 %v851_v12, %v290_v10  ;;  %v980_v17 = vadd.f32 %v979_v13, %v322_v11  ;;  %v853_v18 = vpop.f32.mrb[17].mxu0  ;;  %v981_v19 = vpop.f32.mrb[17].mxu1  ;;  %v298_v10 = vld [vmem:[%s1630_s13 + $0x80] sm:$0xff] }
 0x11f   : > { %v854_v20 = vpop.f32.mrb[18].mxu0  ;;  %v982_v21 = vpop.f32.mrb[18].mxu1  ;;  %v330_v11 = vld [vmem:[%s1630_s13 + $0x180] sm:$0xff] }
 0x120   : > { %1082 = vst.msk [vmem:[%s1638_s16 + $0x40] sm:$0xff] %vm688_vm0, %v852_v16  ;;  %1114 = vst.msk [vmem:[%s1638_s16 + $0x140] sm:$0xff] %vm688_vm0, %v980_v17  ;;  %v855_v22 = vadd.f32 %v854_v20, %v291_v14  ;;  %v983_v23 = vadd.f32 %v982_v21, %v323_v15  ;;  %v856_v24 = vpop.f32.mrb[19].mxu0  ;;  %v984_v25 = vpop.f32.mrb[19].mxu1  ;;  %v299_v14 = vld [vmem:[%s1630_s13 + $0x88] sm:$0xff] }
 0x121   : > { %v331_v15 = vld [vmem:[%s1630_s13 + $0x188] sm:$0xff] }
 0x122   : > { %1083 = vst.msk [vmem:[%s1638_s16 + $0x48] sm:$0xff] %vm688_vm0, %v855_v22  ;;  %1115 = vst.msk [vmem:[%s1638_s16 + $0x148] sm:$0xff] %vm688_vm0, %v983_v23 }
 0x125   : > { %v859_v28 = vpop.f32.mrb[20].mxu0  ;;  %v987_v29 = vpop.f32.mrb[20].mxu1 }
 0x126   : > { %v860_v32 = vadd.f32 %v859_v28, %v292_v26  ;;  %v988_v33 = vadd.f32 %v987_v29, %v324_v27  ;;  %v861_v34 = vpop.f32.mrb[21].mxu0  ;;  %v989_v35 = vpop.f32.mrb[21].mxu1  ;;  %v300_v26 = vld [vmem:[%s1630_s13 + $0x90] sm:$0xff] }
 0x127   : > { %v862_v36 = vpop.f32.mrb[22].mxu0  ;;  %v990_v37 = vpop.f32.mrb[22].mxu1  ;;  %v332_v27 = vld [vmem:[%s1630_s13 + $0x190] sm:$0xff] }
 0x128   : > { %1084 = vst.msk [vmem:[%s1638_s16 + $0x50] sm:$0xff] %vm688_vm0, %v860_v32  ;;  %1116 = vst.msk [vmem:[%s1638_s16 + $0x150] sm:$0xff] %vm688_vm0, %v988_v33  ;;  %v863_v38 = vadd.f32 %v862_v36, %v293_v30  ;;  %v991_v39 = vadd.f32 %v990_v37, %v325_v31  ;;  %v864_v40 = vpop.f32.mrb[23].mxu0  ;;  %v992_v41 = vpop.f32.mrb[23].mxu1  ;;  %v301_v30 = vld [vmem:[%s1630_s13 + $0x98] sm:$0xff] }
 0x129   : > { %v333_v31 = vld [vmem:[%s1630_s13 + $0x198] sm:$0xff] }
 0x12a   : > { %1085 = vst.msk [vmem:[%s1638_s16 + $0x58] sm:$0xff] %vm688_vm0, %v863_v38  ;;  %1117 = vst.msk [vmem:[%s1638_s16 + $0x158] sm:$0xff] %vm688_vm0, %v991_v39 }
 0x12d   : > { %v867_v44 = vpop.f32.mrb[24].mxu0  ;;  %v995_v45 = vpop.f32.mrb[24].mxu1 }
 0x12e   : > { %v868_v48 = vadd.f32 %v867_v44, %v294_v42  ;;  %v996_v49 = vadd.f32 %v995_v45, %v326_v43  ;;  %v869_v50 = vpop.f32.mrb[25].mxu0  ;;  %v997_v51 = vpop.f32.mrb[25].mxu1  ;;  %v302_v42 = vld [vmem:[%s1630_s13 + $0xa0] sm:$0xff] }
 0x12f   : > { %v870_v52 = vpop.f32.mrb[26].mxu0  ;;  %v998_v53 = vpop.f32.mrb[26].mxu1  ;;  %v334_v43 = vld [vmem:[%s1630_s13 + $0x1a0] sm:$0xff] }
 0x130   : > { %1086 = vst.msk [vmem:[%s1638_s16 + $0x60] sm:$0xff] %vm688_vm0, %v868_v48  ;;  %1118 = vst.msk [vmem:[%s1638_s16 + $0x160] sm:$0xff] %vm688_vm0, %v996_v49  ;;  %v871_v54 = vadd.f32 %v870_v52, %v295_v46  ;;  %v999_v55 = vadd.f32 %v998_v53, %v327_v47  ;;  %v872_v56 = vpop.f32.mrb[27].mxu0  ;;  %v1000_v57 = vpop.f32.mrb[27].mxu1  ;;  %v303_v46 = vld [vmem:[%s1630_s13 + $0xa8] sm:$0xff] }
 0x131   : > { %v335_v47 = vld [vmem:[%s1630_s13 + $0x1a8] sm:$0xff] }
 0x132   : > { %1087 = vst.msk [vmem:[%s1638_s16 + $0x68] sm:$0xff] %vm688_vm0, %v871_v54  ;;  %1119 = vst.msk [vmem:[%s1638_s16 + $0x168] sm:$0xff] %vm688_vm0, %v999_v55 }
 0x135   : > { %v875_v60 = vpop.f32.mrb[28].mxu0  ;;  %v1003_v61 = vpop.f32.mrb[28].mxu1 }
 0x136   : > { %v876_v0 = vadd.f32 %v875_v60, %v296_v58  ;;  %v1004_v1 = vadd.f32 %v1003_v61, %v328_v59  ;;  %v877_v2 = vpop.f32.mrb[29].mxu0  ;;  %v1005_v3 = vpop.f32.mrb[29].mxu1  ;;  %v304_v58 = vld [vmem:[%s1630_s13 + $0xb0] sm:$0xff] }
 0x137   : > { %v878_v4 = vpop.f32.mrb[30].mxu0  ;;  %v1006_v5 = vpop.f32.mrb[30].mxu1  ;;  %v336_v59 = vld [vmem:[%s1630_s13 + $0x1b0] sm:$0xff] }
 0x138   : > { %1088 = vst.msk [vmem:[%s1638_s16 + $0x70] sm:$0xff] %vm688_vm0, %v876_v0  ;;  %1120 = vst.msk [vmem:[%s1638_s16 + $0x170] sm:$0xff] %vm688_vm0, %v1004_v1  ;;  %v879_v6 = vadd.f32 %v878_v4, %v297_v62  ;;  %v1007_v7 = vadd.f32 %v1006_v5, %v329_v63  ;;  %v880_v8 = vpop.f32.mrb[31].mxu0  ;;  %v1008_v9 = vpop.f32.mrb[31].mxu1  ;;  %v305_v62 = vld [vmem:[%s1630_s13 + $0xb8] sm:$0xff] }
 0x139   : > { %v337_v63 = vld [vmem:[%s1630_s13 + $0x1b8] sm:$0xff] }
 0x13a   : > { %1089 = vst.msk [vmem:[%s1638_s16 + $0x78] sm:$0xff] %vm688_vm0, %v879_v6  ;;  %1121 = vst.msk [vmem:[%s1638_s16 + $0x178] sm:$0xff] %vm688_vm0, %v1007_v7 }
 0x13d   : > { %v883_v12 = vpop.f32.mrb[32].mxu0  ;;  %v1011_v13 = vpop.f32.mrb[32].mxu1 }
 0x13e   : > { %v884_v16 = vadd.f32 %v883_v12, %v298_v10  ;;  %v1012_v17 = vadd.f32 %v1011_v13, %v330_v11  ;;  %v885_v18 = vpop.f32.mrb[33].mxu0  ;;  %v1013_v19 = vpop.f32.mrb[33].mxu1  ;;  %v306_v10 = vld [vmem:[%s1630_s13 + $0xc0] sm:$0xff] }
 0x13f   : > { %v886_v20 = vpop.f32.mrb[34].mxu0  ;;  %v1014_v21 = vpop.f32.mrb[34].mxu1  ;;  %v338_v11 = vld [vmem:[%s1630_s13 + $0x1c0] sm:$0xff] }
 0x140   : > { %1090 = vst.msk [vmem:[%s1638_s16 + $0x80] sm:$0xff] %vm688_vm0, %v884_v16  ;;  %1122 = vst.msk [vmem:[%s1638_s16 + $0x180] sm:$0xff] %vm688_vm0, %v1012_v17  ;;  %v887_v22 = vadd.f32 %v886_v20, %v299_v14  ;;  %v1015_v23 = vadd.f32 %v1014_v21, %v331_v15  ;;  %v888_v24 = vpop.f32.mrb[35].mxu0  ;;  %v1016_v25 = vpop.f32.mrb[35].mxu1  ;;  %v307_v14 = vld [vmem:[%s1630_s13 + $0xc8] sm:$0xff] }
 0x141   : > { %v339_v15 = vld [vmem:[%s1630_s13 + $0x1c8] sm:$0xff] }
 0x142   : > { %1091 = vst.msk [vmem:[%s1638_s16 + $0x88] sm:$0xff] %vm688_vm0, %v887_v22  ;;  %1123 = vst.msk [vmem:[%s1638_s16 + $0x188] sm:$0xff] %vm688_vm0, %v1015_v23 }
 0x145   : > { %v891_v28 = vpop.f32.mrb[36].mxu0  ;;  %v1019_v29 = vpop.f32.mrb[36].mxu1 }
 0x146   : > { %v892_v32 = vadd.f32 %v891_v28, %v300_v26  ;;  %v1020_v33 = vadd.f32 %v1019_v29, %v332_v27  ;;  %v893_v34 = vpop.f32.mrb[37].mxu0  ;;  %v1021_v35 = vpop.f32.mrb[37].mxu1  ;;  %v308_v26 = vld [vmem:[%s1630_s13 + $0xd0] sm:$0xff] }
 0x147   : > { %v894_v36 = vpop.f32.mrb[38].mxu0  ;;  %v1022_v37 = vpop.f32.mrb[38].mxu1  ;;  %v340_v27 = vld [vmem:[%s1630_s13 + $0x1d0] sm:$0xff] }
 0x148   : > { %1092 = vst.msk [vmem:[%s1638_s16 + $0x90] sm:$0xff] %vm688_vm0, %v892_v32  ;;  %1124 = vst.msk [vmem:[%s1638_s16 + $0x190] sm:$0xff] %vm688_vm0, %v1020_v33  ;;  %v895_v38 = vadd.f32 %v894_v36, %v301_v30  ;;  %v1023_v39 = vadd.f32 %v1022_v37, %v333_v31  ;;  %v896_v40 = vpop.f32.mrb[39].mxu0  ;;  %v1024_v41 = vpop.f32.mrb[39].mxu1  ;;  %v309_v30 = vld [vmem:[%s1630_s13 + $0xd8] sm:$0xff] }
 0x149   : > { %v341_v31 = vld [vmem:[%s1630_s13 + $0x1d8] sm:$0xff] }
 0x14a   : > { %1093 = vst.msk [vmem:[%s1638_s16 + $0x98] sm:$0xff] %vm688_vm0, %v895_v38  ;;  %1125 = vst.msk [vmem:[%s1638_s16 + $0x198] sm:$0xff] %vm688_vm0, %v1023_v39 }
 0x14d   : > { %v899_v44 = vpop.f32.mrb[40].mxu0  ;;  %v1027_v45 = vpop.f32.mrb[40].mxu1 }
 0x14e   : > { %v900_v48 = vadd.f32 %v899_v44, %v302_v42  ;;  %v1028_v49 = vadd.f32 %v1027_v45, %v334_v43  ;;  %v901_v50 = vpop.f32.mrb[41].mxu0  ;;  %v1029_v51 = vpop.f32.mrb[41].mxu1  ;;  %v310_v42 = vld [vmem:[%s1630_s13 + $0xe0] sm:$0xff] }
 0x14f   : > { %v902_v52 = vpop.f32.mrb[42].mxu0  ;;  %v1030_v53 = vpop.f32.mrb[42].mxu1  ;;  %v342_v43 = vld [vmem:[%s1630_s13 + $0x1e0] sm:$0xff] }
 0x150   : > { %1094 = vst.msk [vmem:[%s1638_s16 + $0xa0] sm:$0xff] %vm688_vm0, %v900_v48  ;;  %1126 = vst.msk [vmem:[%s1638_s16 + $0x1a0] sm:$0xff] %vm688_vm0, %v1028_v49  ;;  %v903_v54 = vadd.f32 %v902_v52, %v303_v46  ;;  %v1031_v55 = vadd.f32 %v1030_v53, %v335_v47  ;;  %v904_v56 = vpop.f32.mrb[43].mxu0  ;;  %v1032_v57 = vpop.f32.mrb[43].mxu1  ;;  %v311_v46 = vld [vmem:[%s1630_s13 + $0xe8] sm:$0xff] }
 0x151   : > { %v343_v47 = vld [vmem:[%s1630_s13 + $0x1e8] sm:$0xff] }
 0x152   : > { %1095 = vst.msk [vmem:[%s1638_s16 + $0xa8] sm:$0xff] %vm688_vm0, %v903_v54  ;;  %1127 = vst.msk [vmem:[%s1638_s16 + $0x1a8] sm:$0xff] %vm688_vm0, %v1031_v55 }
 0x155   : > { %v907_v60 = vpop.f32.mrb[44].mxu0  ;;  %v1035_v61 = vpop.f32.mrb[44].mxu1 }
 0x156   : > { %v908_v0 = vadd.f32 %v907_v60, %v304_v58  ;;  %v1036_v1 = vadd.f32 %v1035_v61, %v336_v59  ;;  %v909_v2 = vpop.f32.mrb[45].mxu0  ;;  %v1037_v3 = vpop.f32.mrb[45].mxu1  ;;  %v312_v58 = vld [vmem:[%s1630_s13 + $0xf0] sm:$0xff] }
 0x157   : > { %v910_v4 = vpop.f32.mrb[46].mxu0  ;;  %v1038_v5 = vpop.f32.mrb[46].mxu1  ;;  %v344_v59 = vld [vmem:[%s1630_s13 + $0x1f0] sm:$0xff] }
 0x158   : > { %1096 = vst.msk [vmem:[%s1638_s16 + $0xb0] sm:$0xff] %vm688_vm0, %v908_v0  ;;  %1128 = vst.msk [vmem:[%s1638_s16 + $0x1b0] sm:$0xff] %vm688_vm0, %v1036_v1  ;;  %v911_v6 = vadd.f32 %v910_v4, %v305_v62  ;;  %v1039_v7 = vadd.f32 %v1038_v5, %v337_v63  ;;  %v912_v8 = vpop.f32.mrb[47].mxu0  ;;  %v1040_v9 = vpop.f32.mrb[47].mxu1  ;;  %v313_v62 = vld [vmem:[%s1630_s13 + $0xf8] sm:$0xff] }
 0x159   : > { %v345_v63 = vld [vmem:[%s1630_s13 + $0x1f8] sm:$0xff] }
 0x15a   : > { %1097 = vst.msk [vmem:[%s1638_s16 + $0xb8] sm:$0xff] %vm688_vm0, %v911_v6  ;;  %1129 = vst.msk [vmem:[%s1638_s16 + $0x1b8] sm:$0xff] %vm688_vm0, %v1039_v7 }
 0x15d   : > { %v915_v12 = vpop.f32.mrb[48].mxu0  ;;  %v1043_v13 = vpop.f32.mrb[48].mxu1 }
 0x15e   : > { %v916_v16 = vadd.f32 %v915_v12, %v306_v10  ;;  %v1044_v17 = vadd.f32 %v1043_v13, %v338_v11  ;;  %v917_v18 = vpop.f32.mrb[49].mxu0  ;;  %v1045_v19 = vpop.f32.mrb[49].mxu1 }
 0x15f   : > { %v918_v20 = vpop.f32.mrb[50].mxu0  ;;  %v1046_v21 = vpop.f32.mrb[50].mxu1 }
 0x160   : > { %1098 = vst.msk [vmem:[%s1638_s16 + $0xc0] sm:$0xff] %vm688_vm0, %v916_v16  ;;  %1130 = vst.msk [vmem:[%s1638_s16 + $0x1c0] sm:$0xff] %vm688_vm0, %v1044_v17  ;;  %v919_v22 = vadd.f32 %v918_v20, %v307_v14  ;;  %v1047_v23 = vadd.f32 %v1046_v21, %v339_v15  ;;  %v920_v24 = vpop.f32.mrb[51].mxu0  ;;  %v1048_v25 = vpop.f32.mrb[51].mxu1 }
 0x162   : > { %1099 = vst.msk [vmem:[%s1638_s16 + $0xc8] sm:$0xff] %vm688_vm0, %v919_v22  ;;  %1131 = vst.msk [vmem:[%s1638_s16 + $0x1c8] sm:$0xff] %vm688_vm0, %v1047_v23 }
 0x165   : > { %v923_v28 = vpop.f32.mrb[52].mxu0  ;;  %v1051_v29 = vpop.f32.mrb[52].mxu1 }
 0x166   : > { %v924_v32 = vadd.f32 %v923_v28, %v308_v26  ;;  %v1052_v33 = vadd.f32 %v1051_v29, %v340_v27  ;;  %v925_v34 = vpop.f32.mrb[53].mxu0  ;;  %v1053_v35 = vpop.f32.mrb[53].mxu1 }
 0x167   : > { %v926_v36 = vpop.f32.mrb[54].mxu0  ;;  %v1054_v37 = vpop.f32.mrb[54].mxu1 }
 0x168   : > { %1100 = vst.msk [vmem:[%s1638_s16 + $0xd0] sm:$0xff] %vm688_vm0, %v924_v32  ;;  %1132 = vst.msk [vmem:[%s1638_s16 + $0x1d0] sm:$0xff] %vm688_vm0, %v1052_v33  ;;  %v927_v38 = vadd.f32 %v926_v36, %v309_v30  ;;  %v1055_v39 = vadd.f32 %v1054_v37, %v341_v31  ;;  %v928_v40 = vpop.f32.mrb[55].mxu0  ;;  %v1056_v41 = vpop.f32.mrb[55].mxu1 }
 0x16a   : > { %1101 = vst.msk [vmem:[%s1638_s16 + $0xd8] sm:$0xff] %vm688_vm0, %v927_v38  ;;  %1133 = vst.msk [vmem:[%s1638_s16 + $0x1d8] sm:$0xff] %vm688_vm0, %v1055_v39 }
 0x16d   : > { %v931_v44 = vpop.f32.mrb[56].mxu0  ;;  %v1059_v45 = vpop.f32.mrb[56].mxu1 }
 0x16e   : > { %v932_v48 = vadd.f32 %v931_v44, %v310_v42  ;;  %v1060_v49 = vadd.f32 %v1059_v45, %v342_v43  ;;  %v933_v50 = vpop.f32.mrb[57].mxu0  ;;  %v1061_v51 = vpop.f32.mrb[57].mxu1 }
 0x16f   : > { %v934_v52 = vpop.f32.mrb[58].mxu0  ;;  %v1062_v53 = vpop.f32.mrb[58].mxu1 }
 0x170   : > { %1102 = vst.msk [vmem:[%s1638_s16 + $0xe0] sm:$0xff] %vm688_vm0, %v932_v48  ;;  %1134 = vst.msk [vmem:[%s1638_s16 + $0x1e0] sm:$0xff] %vm688_vm0, %v1060_v49  ;;  %v935_v54 = vadd.f32 %v934_v52, %v311_v46  ;;  %v1063_v55 = vadd.f32 %v1062_v53, %v343_v47  ;;  %v936_v56 = vpop.f32.mrb[59].mxu0  ;;  %v1064_v57 = vpop.f32.mrb[59].mxu1 }
 0x172   : > { %1103 = vst.msk [vmem:[%s1638_s16 + $0xe8] sm:$0xff] %vm688_vm0, %v935_v54  ;;  %1135 = vst.msk [vmem:[%s1638_s16 + $0x1e8] sm:$0xff] %vm688_vm0, %v1063_v55 }
 0x175   : > { %v939_v60 = vpop.f32.mrb[60].mxu0  ;;  %v1067_v61 = vpop.f32.mrb[60].mxu1 }
 0x176   : > { %v940_v0 = vadd.f32 %v939_v60, %v312_v58  ;;  %v1068_v1 = vadd.f32 %v1067_v61, %v344_v59  ;;  %v941_v2 = vpop.f32.mrb[61].mxu0  ;;  %v1069_v3 = vpop.f32.mrb[61].mxu1 }
 0x177   : > { %v942_v4 = vpop.f32.mrb[62].mxu0  ;;  %v1070_v5 = vpop.f32.mrb[62].mxu1 }
 0x178   : > { %1104 = vst.msk [vmem:[%s1638_s16 + $0xf0] sm:$0xff] %vm688_vm0, %v940_v0  ;;  %1136 = vst.msk [vmem:[%s1638_s16 + $0x1f0] sm:$0xff] %vm688_vm0, %v1068_v1  ;;  %v943_v6 = vadd.f32 %v942_v4, %v313_v62  ;;  %v1071_v7 = vadd.f32 %v1070_v5, %v345_v63  ;;  %v944_v8 = vpop.f32.mrb[63].mxu0  ;;  %v1072_v9 = vpop.f32.mrb[63].mxu1 }
 0x17a   : > { %1105 = vst.msk [vmem:[%s1638_s16 + $0xf8] sm:$0xff] %vm688_vm0, %v943_v6  ;;  %1137 = vst.msk [vmem:[%s1638_s16 + $0x1f8] sm:$0xff] %vm688_vm0, %v1071_v7 }
 0x17b PF: > { %s13_s12 = sadd.s32 1, %s1464_s12  }
 0x17c   : > { %p10_p4 = scmp.ge.s32.totalorder %s13_s12, 6  }
 0x17e   :  { %12 = sbr.rel (!%p10_p4) target bundleno = 1 (0x1), region = 65 }

// kernel: wideresnet_forward.19
= control target key start
LH: loop header
LB: loop body
LE: loop exit
PB: predicated region body
PF: predicated region fallthrough
CT: control target
= control target key end

     0   :  { %s1308_s15 = smov 0   ;;  %s1546_s0 = inlined_call_operand.vmem [shape: bf16[512,144], index: 0, kind: input, shape index: {}]   ;;  %s1547_s1 = inlined_call_operand.vmem [shape: bf16[144,32], index: 1, kind: input, shape index: {}]   ;;  %s1548_s2 = inlined_call_operand.vmem [shape: f32[1,32], index: 2, kind: input, shape index: {}]   ;;  %s1549_s3 = inlined_call_operand.vmem [shape: f32[1,32], index: 3, kind: input, shape index: {}]   ;;  %s1550_s4 = inlined_call_operand.vmem [shape: bf16[512,32], index: 4, kind: output, shape index: {}]  }
   0x1 LB: > { %s1054_s16 = sadd.s32 4294967295, %s1280_s15   ;;  %p1058_p0 = scmp.ge.s32.totalorder %s1280_s15, 1  ;;  %s1280_s15 = sphi %s1308_s15, %s14_s15  }
   0x2   : > { %p164_p1 = scmp.lt.s32.totalorder %s1280_s15, 3 }
   0x4   : > { %p165_p2 = pnand %p1058_p0, %p164_p1 }
   0x5   : > { %v1217_v0 = vld [vmem:[%s1547_s1] sm:$0xff] (!%p165_p2)   ;;  %v1282_v1 = vmov (!%p165_p2), 0   ;;  %s1059_s19 = sshll.u32 (!%p165_p2), %s1054_s16, 5  ;;  %v1218_v2 = vld [vmem:[%s1547_s1 + $0x8] sm:$0xff] (!%p165_p2)   ;;  %v1219_v3 = vld [vmem:[%s1547_s1 + $0x10] sm:$0xff] (!%p165_p2)   ;;  %vm453_vm0 = vcmask (!%p165_p2), 130048  }
   0x6   : > { %168 = sbr.rel (%p165_p2) target bundleno = 324 (0x144), region = 36  ;;  %502 = vmatprep.subr.bf16.mxu0 (!%p165_p2), %v1282_v1  ;;  %1190 = vmatprep.subr.bf16.mxu1 (!%p165_p2), %v1282_v1  ;;  %p192_p3 = scmp.lt.s32.totalorder (!%p165_p2), %s1059_s19, 63  ;;  %v1220_v4 = vld [vmem:[%s1547_s1 + $0x18] sm:$0xff] (!%p165_p2)   ;;  %v1221_v7 = vld [vmem:[%s1547_s1 + $0x20] sm:$0xff] (!%p165_p2)   ;;  %v1222_v8 = vld [vmem:[%s1547_s1 + $0x28] sm:$0xff] (!%p165_p2)   ;;  %vm965_vm3 = vcmask (!%p165_p2), 257024  }
   0x7   : > { %503 = vmatpush1.bf16.msra.mxu0 (!%p165_p2), %v1217_v0  ;;  %1199 = vmatpush1.bf16.msra.mxu1 (!%p165_p2), %v1217_v0  ;;  %v1223_v9 = vld [vmem:[%s1547_s1 + $0x30] sm:$0xff] (!%p165_p2)   ;;  %v1224_v10 = vld [vmem:[%s1547_s1 + $0x38] sm:$0xff] (!%p165_p2)   ;;  %v1225_v11 = vld [vmem:[%s1547_s1 + $0x40] sm:$0xff] (!%p165_p2)  }
   0x8   : > { %504 = vmatprep.subr.bf16.mxu0 (!%p165_p2), %v1282_v1  ;;  %1191 = vmatprep.subr.bf16.mxu1 (!%p165_p2), %v1282_v1  ;;  %v1402_v42 = vld [vmem:[%s1548_s2] ss:$0 sm:$0xff] (!%p165_p2) }
   0x9   : > { %v1407_v44 = vld [vmem:[%s1549_s3] ss:$0 sm:$0xff] (!%p165_p2) }
   0xb   : > { %505 = vmatpush1.bf16.msra.mxu0 (!%p165_p2), %v1218_v2  ;;  %1200 = vmatpush1.bf16.msra.mxu1 (!%p165_p2), %v1218_v2 }
   0xc   : > { %506 = vmatprep.subr.bf16.mxu0 (!%p165_p2), %v1282_v1  ;;  %1192 = vmatprep.subr.bf16.mxu1 (!%p165_p2), %v1282_v1 }
   0xd   : > { %s1552_s19 = smov (!%p192_p3, %s1059_s19), 63 }
   0xe   : > { %s1157_s24 = sshll.u32 %s1552_s19, 3  ;;  %s1063_s20 = sshll.u32 %s1552_s19, 2 }
   0xf   : > { %s1331_s27 = scalar_lea.vmem %s1546_s0, %s1157_s24  ;;  %507 = vmatpush1.bf16.msra.mxu0 %v1219_v3  ;;  %1201 = vmatpush1.bf16.msra.mxu1 %v1219_v3  ;;  %s1421_s23 = scalar_lea.vmem %s1550_s4, %s1063_s20 }
  0x10   : > { %v1228_v5 = vld [vmem:[%s1331_s27 + $0x4] ss:$8 sps:$4 sm:$0xff]   ;;  %508 = vmatprep.subr.bf16.mxu0 %v1282_v1  ;;  %1193 = vmatprep.subr.bf16.mxu1 %v1282_v1  ;;  %v1226_v12 = vld [vmem:[%s1331_s27] ss:$8 sps:$4 sm:$0xff]   ;;  %v1232_v14 = vld [vmem:[%s1331_s27 + $0x14] ss:$8 sps:$4 sm:$0xff]  }
  0x11   : > { %v1231_v6 = vld [vmem:[%s1331_s27 + $0x84] ss:$8 sps:$4 sm:$0xff]   ;;  %1105 = vmatprep.mubr.msk.bf16.mxu0 %vm453_vm0, %v1228_v5  ;;  %v1229_v13 = vld [vmem:[%s1331_s27 + $0x80] ss:$8 sps:$4 sm:$0xff]   ;;  %v1234_v15 = vld [vmem:[%s1331_s27 + $0x94] ss:$8 sps:$4 sm:$0xff]  }
  0x12   : > { %1113 = vmatprep.mubr.msk.bf16.mxu1 %vm453_vm0, %v1231_v6  ;;  %v1236_v16 = vld [vmem:[%s1331_s27 + $0x10] ss:$8 sps:$4 sm:$0xff]   ;;  %v1238_v18 = vld [vmem:[%s1331_s27 + $0x24] ss:$8 sps:$4 sm:$0xff]   ;;  %v1242_v20 = vld [vmem:[%s1331_s27 + $0x20] ss:$8 sps:$4 sm:$0xff]  }
  0x13   : > { %509 = vmatpush1.bf16.msra.mxu0 %v1220_v4  ;;  %1202 = vmatpush1.bf16.msra.mxu1 %v1220_v4  ;;  %v1237_v17 = vld [vmem:[%s1331_s27 + $0x90] ss:$8 sps:$4 sm:$0xff]   ;;  %v1240_v19 = vld [vmem:[%s1331_s27 + $0xa4] ss:$8 sps:$4 sm:$0xff]   ;;  %v1243_v21 = vld [vmem:[%s1331_s27 + $0xa0] ss:$8 sps:$4 sm:$0xff]  }
  0x14   : > { %510 = vmatprep.subr.bf16.mxu0 %v1282_v1  ;;  %1194 = vmatprep.subr.bf16.mxu1 %v1282_v1  ;;  %v1244_v22 = vld [vmem:[%s1331_s27 + $0x34] ss:$8 sps:$4 sm:$0xff]   ;;  %v1248_v24 = vld [vmem:[%s1331_s27 + $0x30] ss:$8 sps:$4 sm:$0xff]   ;;  %v1250_v26 = vld [vmem:[%s1331_s27 + $0x44] ss:$8 sps:$4 sm:$0xff]  }
  0x15   : > { %v1246_v23 = vld [vmem:[%s1331_s27 + $0xb4] ss:$8 sps:$4 sm:$0xff]   ;;  %v1249_v25 = vld [vmem:[%s1331_s27 + $0xb0] ss:$8 sps:$4 sm:$0xff]   ;;  %v1252_v27 = vld [vmem:[%s1331_s27 + $0xc4] ss:$8 sps:$4 sm:$0xff]  }
  0x16   : > { %v1254_v28 = vld [vmem:[%s1331_s27 + $0x40] ss:$8 sps:$4 sm:$0xff]   ;;  %v1256_v30 = vld [vmem:[%s1331_s27 + $0x54] ss:$8 sps:$4 sm:$0xff]   ;;  %v1260_v32 = vld [vmem:[%s1331_s27 + $0x50] ss:$8 sps:$4 sm:$0xff]  }
  0x17   : > { %511 = vmatpush1.bf16.msra.mxu0 %v1221_v7  ;;  %1203 = vmatpush1.bf16.msra.mxu1 %v1221_v7  ;;  %v1255_v29 = vld [vmem:[%s1331_s27 + $0xc0] ss:$8 sps:$4 sm:$0xff]   ;;  %v1258_v31 = vld [vmem:[%s1331_s27 + $0xd4] ss:$8 sps:$4 sm:$0xff]   ;;  %v1261_v33 = vld [vmem:[%s1331_s27 + $0xd0] ss:$8 sps:$4 sm:$0xff]  }
  0x18   : > { %512 = vmatprep.subr.bf16.mxu0 %v1282_v1  ;;  %1195 = vmatprep.subr.bf16.mxu1 %v1282_v1  ;;  %v1262_v34 = vld [vmem:[%s1331_s27 + $0x64] ss:$8 sps:$4 sm:$0xff]   ;;  %v1266_v36 = vld [vmem:[%s1331_s27 + $0x60] ss:$8 sps:$4 sm:$0xff]   ;;  %v1268_v38 = vld [vmem:[%s1331_s27 + $0x74] ss:$8 sps:$4 sm:$0xff]  }
  0x19   : > { %v1264_v35 = vld [vmem:[%s1331_s27 + $0xe4] ss:$8 sps:$4 sm:$0xff]   ;;  %v1267_v37 = vld [vmem:[%s1331_s27 + $0xe0] ss:$8 sps:$4 sm:$0xff]   ;;  %v1270_v39 = vld [vmem:[%s1331_s27 + $0xf4] ss:$8 sps:$4 sm:$0xff]  }
  0x1a   : > { %v1272_v40 = vld [vmem:[%s1331_s27 + $0x70] ss:$8 sps:$4 sm:$0xff]  }
  0x1b   : > { %513 = vmatpush1.bf16.msra.mxu0 %v1222_v8  ;;  %1204 = vmatpush1.bf16.msra.mxu1 %v1222_v8  ;;  %v1273_v41 = vld [vmem:[%s1331_s27 + $0xf0] ss:$8 sps:$4 sm:$0xff]  }
  0x1c   : > { %514 = vmatprep.subr.bf16.mxu0 %v1282_v1  ;;  %1196 = vmatprep.subr.bf16.mxu1 %v1282_v1 }
  0x1f   : > { %515 = vmatpush1.bf16.msra.mxu0 %v1223_v9  ;;  %1205 = vmatpush1.bf16.msra.mxu1 %v1223_v9 }
  0x20   : > { %516 = vmatprep.subr.bf16.mxu0 %v1282_v1  ;;  %1197 = vmatprep.subr.bf16.mxu1 %v1282_v1 }
  0x23   : > { %517 = vmatpush1.bf16.msra.mxu0 %v1224_v10  ;;  %1206 = vmatpush1.bf16.msra.mxu1 %v1224_v10 }
  0x24   : > { %518 = vmatprep.subr.bf16.mxu0 %v1282_v1  ;;  %1198 = vmatprep.subr.bf16.mxu1 %v1282_v1 }
  0x27   : > { %519 = vmatpush1.bf16.msra.mxu0 %v1225_v11  ;;  %1207 = vmatpush1.bf16.msra.mxu1 %v1225_v11 }
  0x2a   : > { %535 = vmatmul.mubr.bf16.vlgmr.msra.gmra.mrb[0].mxu0 %v1226_v12  ;;  %599 = vmatmul.mubr.bf16.vlgmr.msra.gmra.mrb[0].mxu1 %v1229_v13 }
  0x2b   : > { %1106 = vmatprep.mubr.msk.bf16.mxu0 %vm453_vm0, %v1232_v14  ;;  %1114 = vmatprep.mubr.msk.bf16.mxu1 %vm453_vm0, %v1234_v15 }
  0x32   : > { %543 = vmatmul.mubr.bf16.gmra.mrb[4].mxu0 %v1236_v16  ;;  %607 = vmatmul.mubr.bf16.gmra.mrb[4].mxu1 %v1237_v17 }
  0x33   : > { %1107 = vmatprep.mubr.msk.bf16.mxu0 %vm453_vm0, %v1238_v18  ;;  %1115 = vmatprep.mubr.msk.bf16.mxu1 %vm453_vm0, %v1240_v19 }
  0x3a   : > { %551 = vmatmul.mubr.bf16.gmra.mrb[8].mxu0 %v1242_v20  ;;  %615 = vmatmul.mubr.bf16.gmra.mrb[8].mxu1 %v1243_v21 }
  0x3b   : > { %1108 = vmatprep.mubr.msk.bf16.mxu0 %vm453_vm0, %v1244_v22  ;;  %1116 = vmatprep.mubr.msk.bf16.mxu1 %vm453_vm0, %v1246_v23 }
  0x42   : > { %559 = vmatmul.mubr.bf16.gmra.mrb[12].mxu0 %v1248_v24  ;;  %623 = vmatmul.mubr.bf16.gmra.mrb[12].mxu1 %v1249_v25 }
  0x43   : > { %1109 = vmatprep.mubr.msk.bf16.mxu0 %vm453_vm0, %v1250_v26  ;;  %1117 = vmatprep.mubr.msk.bf16.mxu1 %vm453_vm0, %v1252_v27 }
  0x4a   : > { %567 = vmatmul.mubr.bf16.gmra.mrb[16].mxu0 %v1254_v28  ;;  %631 = vmatmul.mubr.bf16.gmra.mrb[16].mxu1 %v1255_v29 }
  0x4b   : > { %1110 = vmatprep.mubr.msk.bf16.mxu0 %vm453_vm0, %v1256_v30  ;;  %1118 = vmatprep.mubr.msk.bf16.mxu1 %vm453_vm0, %v1258_v31 }
  0x52   : > { %575 = vmatmul.mubr.bf16.gmra.mrb[20].mxu0 %v1260_v32  ;;  %639 = vmatmul.mubr.bf16.gmra.mrb[20].mxu1 %v1261_v33 }
  0x53   : > { %1111 = vmatprep.mubr.msk.bf16.mxu0 %vm453_vm0, %v1262_v34  ;;  %1119 = vmatprep.mubr.msk.bf16.mxu1 %vm453_vm0, %v1264_v35 }
  0x5a   : > { %583 = vmatmul.mubr.bf16.gmra.mrb[24].mxu0 %v1266_v36  ;;  %647 = vmatmul.mubr.bf16.gmra.mrb[24].mxu1 %v1267_v37 }
  0x5b   : > { %1112 = vmatprep.mubr.msk.bf16.mxu0 %vm453_vm0, %v1268_v38  ;;  %1120 = vmatprep.mubr.msk.bf16.mxu1 %vm453_vm0, %v1270_v39 }
  0x62   : > { %591 = vmatmul.mubr.bf16.gmra.mrb[28].mxu0 %v1272_v40  ;;  %655 = vmatmul.mubr.bf16.gmra.mrb[28].mxu1 %v1273_v41 }
  0xfd   : > { %v536_v43 = vpop.f32.mrb[0].mxu0  ;;  %v600_v45 = vpop.f32.mrb[0].mxu1 }
  0xfe   : > { %v670_v46 = vmul.f32 %v1402_v42, %v536_v43  ;;  %v686_v47 = vmul.f32 %v1402_v42, %v600_v45  ;;  %v538_v48 = vpop.f32.mrb[1].mxu0  ;;  %v602_v49 = vpop.f32.mrb[1].mxu1 }
  0xff   : > { %v539_v50 = vpop.f32.mrb[2].mxu0  ;;  %v603_v51 = vpop.f32.mrb[2].mxu1 }
 0x100   : > { %v709_v52 = vadd.f32 %v1407_v44, %v670_v46  ;;  %v725_v53 = vadd.f32 %v1407_v44, %v686_v47  ;;  %v671_v54 = vmul.f32 %v1402_v42, %v539_v50  ;;  %v687_v55 = vmul.f32 %v1402_v42, %v603_v51  ;;  %v541_v56 = vpop.f32.mrb[3].mxu0  ;;  %v605_v57 = vpop.f32.mrb[3].mxu1 }
 0x102   : > { %vm741_vm1 = vcmp.ge.f32.partialorder %v709_v52, 0.0  ;;  %v773_v58 = vmul.f32 0.1, %v709_v52  ;;  %vm757_vm2 = vcmp.ge.f32.partialorder %v725_v53, 0.0  ;;  %v789_v59 = vmul.f32 0.1, %v725_v53 }
 0x103   : > { %v710_v60 = vadd.f32 %v1407_v44, %v671_v54  ;;  %v726_v61 = vadd.f32 %v1407_v44, %v687_v55 }
 0x104   : > { %v805_v62 = vsel %vm741_vm1, %v709_v52, %v773_v58  ;;  %v821_v63 = vsel %vm757_vm2, %v725_v53, %v789_v59 }
 0x105   : > { %v1158_v0 = vpack.c.bf16 %v805_v62, %v805_v62  ;;  %v1174_v1 = vpack.c.bf16 %v821_v63, %v821_v63  ;;  %vm742_vm4 = vcmp.ge.f32.partialorder %v710_v60, 0.0  ;;  %v774_v2 = vmul.f32 0.1, %v710_v60  ;;  %v544_v3 = vpop.f32.mrb[4].mxu0  ;;  %v608_v4 = vpop.f32.mrb[4].mxu1 }
 0x106   : > { %vm758_vm5 = vcmp.ge.f32.partialorder %v726_v61, 0.0  ;;  %v790_v5 = vmul.f32 0.1, %v726_v61  ;;  %v672_v6 = vmul.f32 %v1402_v42, %v544_v3  ;;  %v688_v7 = vmul.f32 %v1402_v42, %v608_v4  ;;  %v546_v8 = vpop.f32.mrb[5].mxu0  ;;  %v610_v9 = vpop.f32.mrb[5].mxu1 }
 0x107   : > { %966 = vst.msk [vmem:[%s1421_s23] sm:$0xf] %vm965_vm3, %v1158_v0  ;;  %982 = vst.msk [vmem:[%s1421_s23 + $0x40] sm:$0xf] %vm965_vm3, %v1174_v1  ;;  %v806_v10 = vsel %vm742_vm4, %v710_v60, %v774_v2  ;;  %v547_v11 = vpop.f32.mrb[6].mxu0  ;;  %v611_v12 = vpop.f32.mrb[6].mxu1 }
 0x108   : > { %v1159_v13 = vpack.c.bf16 %v806_v10, %v806_v10  ;;  %v822_v14 = vsel %vm758_vm5, %v726_v61, %v790_v5  ;;  %v711_v15 = vadd.f32 %v1407_v44, %v672_v6  ;;  %v727_v16 = vadd.f32 %v1407_v44, %v688_v7  ;;  %v549_v17 = vpop.f32.mrb[7].mxu0  ;;  %v613_v18 = vpop.f32.mrb[7].mxu1 }
 0x109   : > { %v1175_v19 = vpack.c.bf16 %v822_v14, %v822_v14  ;;  %v673_v20 = vmul.f32 %v1402_v42, %v547_v11  ;;  %v689_v21 = vmul.f32 %v1402_v42, %v611_v12 }
 0x10a   : > { %967 = vst.msk [vmem:[%s1421_s23 + $0x4] sm:$0xf] %vm965_vm3, %v1159_v13  ;;  %vm743_vm6 = vcmp.ge.f32.partialorder %v711_v15, 0.0  ;;  %v775_v22 = vmul.f32 0.1, %v711_v15  ;;  %vm759_vm7 = vcmp.ge.f32.partialorder %v727_v16, 0.0 }
 0x10b   : > { %v791_v23 = vmul.f32 0.1, %v727_v16  ;;  %983 = vst.msk [vmem:[%s1421_s23 + $0x44] sm:$0xf] %vm965_vm3, %v1175_v19  ;;  %v712_v24 = vadd.f32 %v1407_v44, %v673_v20  ;;  %v728_v25 = vadd.f32 %v1407_v44, %v689_v21 }
 0x10c   : > { %v807_v26 = vsel %vm743_vm6, %v711_v15, %v775_v22 }
 0x10d   : > { %v823_v27 = vsel %vm759_vm7, %v727_v16, %v791_v23  ;;  %v1160_v28 = vpack.c.bf16 %v807_v26, %v807_v26  ;;  %vm744_vm8 = vcmp.ge.f32.partialorder %v712_v24, 0.0  ;;  %v776_v30 = vmul.f32 0.1, %v712_v24  ;;  %v552_v31 = vpop.f32.mrb[8].mxu0  ;;  %v616_v32 = vpop.f32.mrb[8].mxu1 }
 0x10e   : > { %v1176_v29 = vpack.c.bf16 %v823_v27, %v823_v27  ;;  %vm760_vm9 = vcmp.ge.f32.partialorder %v728_v25, 0.0  ;;  %v792_v33 = vmul.f32 0.1, %v728_v25  ;;  %v674_v34 = vmul.f32 %v1402_v42, %v552_v31  ;;  %v554_v36 = vpop.f32.mrb[9].mxu0  ;;  %v618_v37 = vpop.f32.mrb[9].mxu1 }
 0x10f   : > { %v690_v35 = vmul.f32 %v1402_v42, %v616_v32  ;;  %968 = vst.msk [vmem:[%s1421_s23 + $0x8] sm:$0xf] %vm965_vm3, %v1160_v28  ;;  %v808_v38 = vsel %vm744_vm8, %v712_v24, %v776_v30  ;;  %v555_v39 = vpop.f32.mrb[10].mxu0  ;;  %v619_v40 = vpop.f32.mrb[10].mxu1 }
 0x110   : > { %984 = vst.msk [vmem:[%s1421_s23 + $0x48] sm:$0xf] %vm965_vm3, %v1176_v29  ;;  %v1161_v41 = vpack.c.bf16 %v808_v38, %v808_v38  ;;  %v824_v43 = vsel %vm760_vm9, %v728_v25, %v792_v33  ;;  %v713_v45 = vadd.f32 %v1407_v44, %v674_v34  ;;  %v557_v47 = vpop.f32.mrb[11].mxu0  ;;  %v621_v48 = vpop.f32.mrb[11].mxu1  ;;  %v675_v50 = vmul.f32 %v1402_v42, %v555_v39 }
 0x111   : > { %v729_v46 = vadd.f32 %v1407_v44, %v690_v35  ;;  %v1177_v49 = vpack.c.bf16 %v824_v43, %v824_v43  ;;  %v691_v51 = vmul.f32 %v1402_v42, %v619_v40 }
 0x112   : > { %969 = vst.msk [vmem:[%s1421_s23 + $0xc] sm:$0xf] %vm965_vm3, %v1161_v41  ;;  %vm745_vm10 = vcmp.ge.f32.partialorder %v713_v45, 0.0  ;;  %v777_v52 = vmul.f32 0.1, %v713_v45  ;;  %v714_v54 = vadd.f32 %v1407_v44, %v675_v50 }
 0x113   : > { %vm761_vm11 = vcmp.ge.f32.partialorder %v729_v46, 0.0  ;;  %v793_v53 = vmul.f32 0.1, %v729_v46  ;;  %985 = vst.msk [vmem:[%s1421_s23 + $0x4c] sm:$0xf] %vm965_vm3, %v1177_v49  ;;  %v730_v55 = vadd.f32 %v1407_v44, %v691_v51 }
 0x114   : > { %v809_v56 = vsel %vm745_vm10, %v713_v45, %v777_v52  ;;  %vm746_vm12 = vcmp.ge.f32.partialorder %v714_v54, 0.0  ;;  %v778_v60 = vmul.f32 0.1, %v714_v54 }
 0x115   : > { %v825_v57 = vsel %vm761_vm11, %v729_v46, %v793_v53  ;;  %v1162_v58 = vpack.c.bf16 %v809_v56, %v809_v56  ;;  %v560_v61 = vpop.f32.mrb[12].mxu0  ;;  %v624_v62 = vpop.f32.mrb[12].mxu1  ;;  %vm762_vm13 = vcmp.ge.f32.partialorder %v730_v55, 0.0  ;;  %v794_v63 = vmul.f32 0.1, %v730_v55 }
 0x116   : > { %v1178_v59 = vpack.c.bf16 %v825_v57, %v825_v57  ;;  %v676_v0 = vmul.f32 %v1402_v42, %v560_v61  ;;  %v692_v1 = vmul.f32 %v1402_v42, %v624_v62  ;;  %v562_v2 = vpop.f32.mrb[13].mxu0  ;;  %v626_v3 = vpop.f32.mrb[13].mxu1  ;;  %v810_v4 = vsel %vm746_vm12, %v714_v54, %v778_v60 }
 0x117   : > { %970 = vst.msk [vmem:[%s1421_s23 + $0x10] sm:$0xf] %vm965_vm3, %v1162_v58  ;;  %v563_v5 = vpop.f32.mrb[14].mxu0  ;;  %v627_v6 = vpop.f32.mrb[14].mxu1  ;;  %v1163_v7 = vpack.c.bf16 %v810_v4, %v810_v4  ;;  %v826_v8 = vsel %vm762_vm13, %v730_v55, %v794_v63 }
 0x118   : > { %986 = vst.msk [vmem:[%s1421_s23 + $0x50] sm:$0xf] %vm965_vm3, %v1178_v59  ;;  %v715_v9 = vadd.f32 %v1407_v44, %v676_v0  ;;  %v731_v10 = vadd.f32 %v1407_v44, %v692_v1  ;;  %v565_v11 = vpop.f32.mrb[15].mxu0  ;;  %v629_v12 = vpop.f32.mrb[15].mxu1  ;;  %v1179_v13 = vpack.c.bf16 %v826_v8, %v826_v8  ;;  %v677_v14 = vmul.f32 %v1402_v42, %v563_v5 }
 0x119   : > { %v693_v15 = vmul.f32 %v1402_v42, %v627_v6  ;;  %971 = vst.msk [vmem:[%s1421_s23 + $0x14] sm:$0xf] %vm965_vm3, %v1163_v7 }
 0x11a   : > { %vm747_vm14 = vcmp.ge.f32.partialorder %v715_v9, 0.0  ;;  %v779_v16 = vmul.f32 0.1, %v715_v9  ;;  %vm763_vm15 = vcmp.ge.f32.partialorder %v731_v10, 0.0  ;;  %v795_v17 = vmul.f32 0.1, %v731_v10 }
 0x11b   : > { %987 = vst.msk [vmem:[%s1421_s23 + $0x54] sm:$0xf] %vm965_vm3, %v1179_v13  ;;  %v716_v18 = vadd.f32 %v1407_v44, %v677_v14  ;;  %v732_v19 = vadd.f32 %v1407_v44, %v693_v15 }
 0x11c   : > { %v811_v20 = vsel %vm747_vm14, %v715_v9, %v779_v16  ;;  %v827_v21 = vsel %vm763_vm15, %v731_v10, %v795_v17 }
 0x11d   : > { %v1164_v22 = vpack.c.bf16 %v811_v20, %v811_v20  ;;  %v1180_v23 = vpack.c.bf16 %v827_v21, %v827_v21  ;;  %vm748_vm0 = vcmp.ge.f32.partialorder %v716_v18, 0.0  ;;  %v780_v24 = vmul.f32 0.1, %v716_v18  ;;  %v568_v25 = vpop.f32.mrb[16].mxu0  ;;  %v632_v26 = vpop.f32.mrb[16].mxu1 }
 0x11e   : > { %vm764_vm1 = vcmp.ge.f32.partialorder %v732_v19, 0.0  ;;  %v796_v27 = vmul.f32 0.1, %v732_v19  ;;  %v678_v28 = vmul.f32 %v1402_v42, %v568_v25  ;;  %v694_v29 = vmul.f32 %v1402_v42, %v632_v26  ;;  %v570_v30 = vpop.f32.mrb[17].mxu0  ;;  %v634_v31 = vpop.f32.mrb[17].mxu1 }
 0x11f   : > { %972 = vst.msk [vmem:[%s1421_s23 + $0x18] sm:$0xf] %vm965_vm3, %v1164_v22  ;;  %988 = vst.msk [vmem:[%s1421_s23 + $0x58] sm:$0xf] %vm965_vm3, %v1180_v23  ;;  %v812_v32 = vsel %vm748_vm0, %v716_v18, %v780_v24  ;;  %v571_v33 = vpop.f32.mrb[18].mxu0  ;;  %v635_v34 = vpop.f32.mrb[18].mxu1 }
 0x120   : > { %v1165_v35 = vpack.c.bf16 %v812_v32, %v812_v32  ;;  %v828_v36 = vsel %vm764_vm1, %v732_v19, %v796_v27  ;;  %v717_v37 = vadd.f32 %v1407_v44, %v678_v28  ;;  %v733_v38 = vadd.f32 %v1407_v44, %v694_v29  ;;  %v573_v39 = vpop.f32.mrb[19].mxu0  ;;  %v637_v40 = vpop.f32.mrb[19].mxu1 }
 0x121   : > { %v1181_v41 = vpack.c.bf16 %v828_v36, %v828_v36  ;;  %v679_v43 = vmul.f32 %v1402_v42, %v571_v33  ;;  %v695_v45 = vmul.f32 %v1402_v42, %v635_v34 }
 0x122   : > { %973 = vst.msk [vmem:[%s1421_s23 + $0x1c] sm:$0xf] %vm965_vm3, %v1165_v35  ;;  %vm749_vm2 = vcmp.ge.f32.partialorder %v717_v37, 0.0  ;;  %v781_v46 = vmul.f32 0.1, %v717_v37  ;;  %vm765_vm4 = vcmp.ge.f32.partialorder %v733_v38, 0.0 }
 0x123   : > { %v797_v47 = vmul.f32 0.1, %v733_v38  ;;  %989 = vst.msk [vmem:[%s1421_s23 + $0x5c] sm:$0xf] %vm965_vm3, %v1181_v41  ;;  %v718_v48 = vadd.f32 %v1407_v44, %v679_v43  ;;  %v734_v49 = vadd.f32 %v1407_v44, %v695_v45 }
 0x124   : > { %v813_v50 = vsel %vm749_vm2, %v717_v37, %v781_v46 }
 0x125   : > { %v829_v51 = vsel %vm765_vm4, %v733_v38, %v797_v47  ;;  %v1166_v52 = vpack.c.bf16 %v813_v50, %v813_v50  ;;  %vm750_vm5 = vcmp.ge.f32.partialorder %v718_v48, 0.0  ;;  %v782_v54 = vmul.f32 0.1, %v718_v48  ;;  %v576_v55 = vpop.f32.mrb[20].mxu0  ;;  %v640_v56 = vpop.f32.mrb[20].mxu1 }
 0x126   : > { %v1182_v53 = vpack.c.bf16 %v829_v51, %v829_v51  ;;  %vm766_vm6 = vcmp.ge.f32.partialorder %v734_v49, 0.0  ;;  %v798_v57 = vmul.f32 0.1, %v734_v49  ;;  %v680_v58 = vmul.f32 %v1402_v42, %v576_v55  ;;  %v578_v60 = vpop.f32.mrb[21].mxu0  ;;  %v642_v61 = vpop.f32.mrb[21].mxu1 }
 0x127   : > { %v696_v59 = vmul.f32 %v1402_v42, %v640_v56  ;;  %974 = vst.msk [vmem:[%s1421_s23 + $0x20] sm:$0xf] %vm965_vm3, %v1166_v52  ;;  %v814_v62 = vsel %vm750_vm5, %v718_v48, %v782_v54  ;;  %v579_v63 = vpop.f32.mrb[22].mxu0  ;;  %v643_v0 = vpop.f32.mrb[22].mxu1 }
 0x128   : > { %990 = vst.msk [vmem:[%s1421_s23 + $0x60] sm:$0xf] %vm965_vm3, %v1182_v53  ;;  %v1167_v1 = vpack.c.bf16 %v814_v62, %v814_v62  ;;  %v830_v2 = vsel %vm766_vm6, %v734_v49, %v798_v57  ;;  %v719_v3 = vadd.f32 %v1407_v44, %v680_v58  ;;  %v581_v5 = vpop.f32.mrb[23].mxu0  ;;  %v645_v6 = vpop.f32.mrb[23].mxu1  ;;  %v681_v8 = vmul.f32 %v1402_v42, %v579_v63 }
 0x129   : > { %v735_v4 = vadd.f32 %v1407_v44, %v696_v59  ;;  %v1183_v7 = vpack.c.bf16 %v830_v2, %v830_v2  ;;  %v697_v9 = vmul.f32 %v1402_v42, %v643_v0 }
 0x12a   : > { %975 = vst.msk [vmem:[%s1421_s23 + $0x24] sm:$0xf] %vm965_vm3, %v1167_v1  ;;  %vm751_vm7 = vcmp.ge.f32.partialorder %v719_v3, 0.0  ;;  %v783_v10 = vmul.f32 0.1, %v719_v3  ;;  %v720_v12 = vadd.f32 %v1407_v44, %v681_v8 }
 0x12b   : > { %vm767_vm8 = vcmp.ge.f32.partialorder %v735_v4, 0.0  ;;  %v799_v11 = vmul.f32 0.1, %v735_v4  ;;  %991 = vst.msk [vmem:[%s1421_s23 + $0x64] sm:$0xf] %vm965_vm3, %v1183_v7  ;;  %v736_v13 = vadd.f32 %v1407_v44, %v697_v9 }
 0x12c   : > { %v815_v14 = vsel %vm751_vm7, %v719_v3, %v783_v10  ;;  %vm752_vm9 = vcmp.ge.f32.partialorder %v720_v12, 0.0  ;;  %v784_v18 = vmul.f32 0.1, %v720_v12 }
 0x12d   : > { %v831_v15 = vsel %vm767_vm8, %v735_v4, %v799_v11  ;;  %v1168_v16 = vpack.c.bf16 %v815_v14, %v815_v14  ;;  %v584_v19 = vpop.f32.mrb[24].mxu0  ;;  %v648_v20 = vpop.f32.mrb[24].mxu1  ;;  %vm768_vm10 = vcmp.ge.f32.partialorder %v736_v13, 0.0  ;;  %v800_v21 = vmul.f32 0.1, %v736_v13 }
 0x12e   : > { %v1184_v17 = vpack.c.bf16 %v831_v15, %v831_v15  ;;  %v682_v22 = vmul.f32 %v1402_v42, %v584_v19  ;;  %v698_v23 = vmul.f32 %v1402_v42, %v648_v20  ;;  %v586_v24 = vpop.f32.mrb[25].mxu0  ;;  %v650_v25 = vpop.f32.mrb[25].mxu1  ;;  %v816_v26 = vsel %vm752_vm9, %v720_v12, %v784_v18 }
 0x12f   : > { %976 = vst.msk [vmem:[%s1421_s23 + $0x28] sm:$0xf] %vm965_vm3, %v1168_v16  ;;  %v587_v27 = vpop.f32.mrb[26].mxu0  ;;  %v651_v28 = vpop.f32.mrb[26].mxu1  ;;  %v1169_v29 = vpack.c.bf16 %v816_v26, %v816_v26  ;;  %v832_v30 = vsel %vm768_vm10, %v736_v13, %v800_v21 }
 0x130   : > { %992 = vst.msk [vmem:[%s1421_s23 + $0x68] sm:$0xf] %vm965_vm3, %v1184_v17  ;;  %v721_v31 = vadd.f32 %v1407_v44, %v682_v22  ;;  %v737_v32 = vadd.f32 %v1407_v44, %v698_v23  ;;  %v589_v33 = vpop.f32.mrb[27].mxu0  ;;  %v653_v34 = vpop.f32.mrb[27].mxu1  ;;  %v1185_v35 = vpack.c.bf16 %v832_v30, %v832_v30  ;;  %v683_v36 = vmul.f32 %v1402_v42, %v587_v27 }
 0x131   : > { %v699_v37 = vmul.f32 %v1402_v42, %v651_v28  ;;  %977 = vst.msk [vmem:[%s1421_s23 + $0x2c] sm:$0xf] %vm965_vm3, %v1169_v29 }
 0x132   : > { %vm753_vm11 = vcmp.ge.f32.partialorder %v721_v31, 0.0  ;;  %v785_v38 = vmul.f32 0.1, %v721_v31  ;;  %vm769_vm12 = vcmp.ge.f32.partialorder %v737_v32, 0.0  ;;  %v801_v39 = vmul.f32 0.1, %v737_v32 }
 0x133   : > { %993 = vst.msk [vmem:[%s1421_s23 + $0x6c] sm:$0xf] %vm965_vm3, %v1185_v35  ;;  %v722_v40 = vadd.f32 %v1407_v44, %v683_v36  ;;  %v738_v41 = vadd.f32 %v1407_v44, %v699_v37 }
 0x134   : > { %v817_v43 = vsel %vm753_vm11, %v721_v31, %v785_v38  ;;  %v833_v45 = vsel %vm769_vm12, %v737_v32, %v801_v39 }
 0x135   : > { %v1170_v46 = vpack.c.bf16 %v817_v43, %v817_v43  ;;  %v1186_v47 = vpack.c.bf16 %v833_v45, %v833_v45  ;;  %vm754_vm13 = vcmp.ge.f32.partialorder %v722_v40, 0.0  ;;  %v786_v48 = vmul.f32 0.1, %v722_v40  ;;  %v592_v49 = vpop.f32.mrb[28].mxu0  ;;  %v656_v50 = vpop.f32.mrb[28].mxu1 }
 0x136   : > { %vm770_vm14 = vcmp.ge.f32.partialorder %v738_v41, 0.0  ;;  %v802_v51 = vmul.f32 0.1, %v738_v41  ;;  %v684_v52 = vmul.f32 %v1402_v42, %v592_v49  ;;  %v700_v53 = vmul.f32 %v1402_v42, %v656_v50  ;;  %v594_v54 = vpop.f32.mrb[29].mxu0  ;;  %v658_v55 = vpop.f32.mrb[29].mxu1 }
 0x137   : > { %978 = vst.msk [vmem:[%s1421_s23 + $0x30] sm:$0xf] %vm965_vm3, %v1170_v46  ;;  %994 = vst.msk [vmem:[%s1421_s23 + $0x70] sm:$0xf] %vm965_vm3, %v1186_v47  ;;  %v818_v56 = vsel %vm754_vm13, %v722_v40, %v786_v48  ;;  %v595_v57 = vpop.f32.mrb[30].mxu0  ;;  %v659_v58 = vpop.f32.mrb[30].mxu1 }
 0x138   : > { %v1171_v59 = vpack.c.bf16 %v818_v56, %v818_v56  ;;  %v834_v60 = vsel %vm770_vm14, %v738_v41, %v802_v51  ;;  %v723_v61 = vadd.f32 %v1407_v44, %v684_v52  ;;  %v739_v62 = vadd.f32 %v1407_v44, %v700_v53  ;;  %v597_v63 = vpop.f32.mrb[31].mxu0  ;;  %v661_v0 = vpop.f32.mrb[31].mxu1 }
 0x139   : > { %v1187_v1 = vpack.c.bf16 %v834_v60, %v834_v60  ;;  %v685_v2 = vmul.f32 %v1402_v42, %v595_v57  ;;  %v701_v3 = vmul.f32 %v1402_v42, %v659_v58 }
 0x13a   : > { %979 = vst.msk [vmem:[%s1421_s23 + $0x34] sm:$0xf] %vm965_vm3, %v1171_v59  ;;  %vm755_vm15 = vcmp.ge.f32.partialorder %v723_v61, 0.0  ;;  %v787_v4 = vmul.f32 0.1, %v723_v61  ;;  %vm771_vm0 = vcmp.ge.f32.partialorder %v739_v62, 0.0 }
 0x13b   : > { %v803_v5 = vmul.f32 0.1, %v739_v62  ;;  %995 = vst.msk [vmem:[%s1421_s23 + $0x74] sm:$0xf] %vm965_vm3, %v1187_v1  ;;  %v724_v6 = vadd.f32 %v1407_v44, %v685_v2  ;;  %v740_v7 = vadd.f32 %v1407_v44, %v701_v3 }
 0x13c   : > { %v819_v8 = vsel %vm755_vm15, %v723_v61, %v787_v4 }
 0x13d   : > { %v835_v9 = vsel %vm771_vm0, %v739_v62, %v803_v5  ;;  %v1172_v10 = vpack.c.bf16 %v819_v8, %v819_v8  ;;  %vm756_vm1 = vcmp.ge.f32.partialorder %v724_v6, 0.0  ;;  %v788_v11 = vmul.f32 0.1, %v724_v6 }
 0x13e   : > { %v1188_v42 = vpack.c.bf16 %v835_v9, %v835_v9  ;;  %vm772_vm2 = vcmp.ge.f32.partialorder %v740_v7, 0.0  ;;  %v804_v12 = vmul.f32 0.1, %v740_v7 }
 0x13f   : > { %980 = vst.msk [vmem:[%s1421_s23 + $0x38] sm:$0xf] %vm965_vm3, %v1172_v10  ;;  %v820_v13 = vsel %vm756_vm1, %v724_v6, %v788_v11 }
 0x140   : > { %996 = vst.msk [vmem:[%s1421_s23 + $0x78] sm:$0xf] %vm965_vm3, %v1188_v42  ;;  %v1173_v14 = vpack.c.bf16 %v820_v13, %v820_v13  ;;  %v836_v15 = vsel %vm772_vm2, %v740_v7, %v804_v12 }
 0x141   : > { %v1189_v16 = vpack.c.bf16 %v836_v15, %v836_v15 }
 0x142   : > { %981 = vst.msk [vmem:[%s1421_s23 + $0x3c] sm:$0xf] %vm965_vm3, %v1173_v14 }
 0x143   : > { %997 = vst.msk [vmem:[%s1421_s23 + $0x7c] sm:$0xf] %vm965_vm3, %v1189_v16 }
 0x144 PF: > { %s14_s15 = sadd.s32 1, %s1280_s15  }
 0x145   : > { %p11_p4 = scmp.ge.s32.totalorder %s14_s15, 4  }
 0x147   :  { %13 = sbr.rel (!%p11_p4) target bundleno = 1 (0x1), region = 66 }

// kernel: wideresnet_forward.18
= control target key start
LH: loop header
LB: loop body
LE: loop exit
PB: predicated region body
PF: predicated region fallthrough
CT: control target
= control target key end

     0   :  { %s712_s9 = smov 0   ;;  %s836_s0 = inlined_call_operand.vmem [shape: bf16[512,16], index: 0, kind: input, shape index: {}]   ;;  %s837_s1 = inlined_call_operand.vmem [shape: bf16[16,32], index: 1, kind: input, shape index: {}]   ;;  %s838_s2 = inlined_call_operand.vmem [shape: f32[512,32], index: 2, kind: output, shape index: {}]  }
   0x1 LB: > { %s567_s10 = sadd.s32 4294967295, %s695_s9   ;;  %p571_p0 = scmp.ge.s32.totalorder %s695_s9, 1  ;;  %s695_s9 = sphi %s712_s9, %s12_s9  }
   0x2   : > { %p113_p1 = scmp.lt.s32.totalorder %s695_s9, 3 }
   0x4   : > { %p114_p2 = pnand %p571_p0, %p113_p1 }
   0x5   : > { %v672_v0 = vld [vmem:[%s837_s1] sm:$0xff] (!%p114_p2)   ;;  %s572_s13 = sshll.u32 (!%p114_p2), %s567_s10, 5  ;;  %vm268_vm0 = vcmask (!%p114_p2), 130048   ;;  %vm478_vm1 = vcmask (!%p114_p2), 261120  }
   0x6   : > { %117 = sbr.rel (%p114_p2) target bundleno = 259 (0x103), region = 28  ;;  %p136_p3 = scmp.lt.s32.totalorder (!%p114_p2), %s572_s13, 63  ;;  %628 = vmatprep.subr.bf16.mxu0 (!%p114_p2), %v672_v0  ;;  %662 = vmatprep.subr.bf16.mxu1 (!%p114_p2), %v672_v0 }
   0x7   : > { %629 = vmatpush3.bf16.msra.mxu0 (!%p114_p2), %v672_v0  ;;  %663 = vmatpush3.bf16.msra.mxu1 (!%p114_p2), %v672_v0 }
   0xd   : > { %s840_s13 = smov (!%p136_p3, %s572_s13), 63 }
   0xe   : > { %s573_s14 = sshll.u32 %s840_s13, 2  ;;  %s575_s18 = sshll.u32 %s840_s13, 3 }
   0xf   : > { %s729_s17 = scalar_lea.vmem %s836_s0, %s573_s14  ;;  %s767_s21 = scalar_lea.vmem %s838_s2, %s575_s18 }
  0x10   : > { %v673_v1 = vld [vmem:[%s729_s17] sm:$0xff]   ;;  %v675_v3 = vld [vmem:[%s729_s17 + $0x8] sm:$0xff]   ;;  %v677_v5 = vld [vmem:[%s729_s17 + $0x10] sm:$0xff]  }
  0x11   : > { %v674_v2 = vld [vmem:[%s729_s17 + $0x40] sm:$0xff]   ;;  %630 = vmatprep.mubr.msk.bf16.mxu0 %vm268_vm0, %v673_v1  ;;  %v676_v4 = vld [vmem:[%s729_s17 + $0x48] sm:$0xff]   ;;  %v678_v6 = vld [vmem:[%s729_s17 + $0x50] sm:$0xff]  }
  0x12   : > { %646 = vmatprep.mubr.msk.bf16.mxu1 %vm268_vm0, %v674_v2  ;;  %631 = vmatmul.mubr.msk.bf16.vlgmr.msra.gmra.mrb[0].mxu0 %vm268_vm0, %v675_v3  ;;  %v679_v7 = vld [vmem:[%s729_s17 + $0x18] sm:$0xff]   ;;  %v681_v9 = vld [vmem:[%s729_s17 + $0x20] sm:$0xff]   ;;  %v683_v11 = vld [vmem:[%s729_s17 + $0x28] sm:$0xff]  }
  0x13   : > { %647 = vmatmul.mubr.msk.bf16.vlgmr.msra.gmra.mrb[0].mxu1 %vm268_vm0, %v676_v4  ;;  %634 = vmatprep.mubr.msk.bf16.mxu0 %vm268_vm0, %v677_v5  ;;  %v680_v8 = vld [vmem:[%s729_s17 + $0x58] sm:$0xff]   ;;  %v682_v10 = vld [vmem:[%s729_s17 + $0x60] sm:$0xff]   ;;  %v684_v12 = vld [vmem:[%s729_s17 + $0x68] sm:$0xff]  }
  0x14   : > { %650 = vmatprep.mubr.msk.bf16.mxu1 %vm268_vm0, %v678_v6  ;;  %v685_v13 = vld [vmem:[%s729_s17 + $0x30] sm:$0xff]   ;;  %v687_v15 = vld [vmem:[%s729_s17 + $0x38] sm:$0xff]  }
  0x15   : > { %v686_v14 = vld [vmem:[%s729_s17 + $0x70] sm:$0xff]   ;;  %v688_v16 = vld [vmem:[%s729_s17 + $0x78] sm:$0xff]  }
  0x1a   : > { %635 = vmatmul.mubr.msk.bf16.gmra.mrb[4].mxu0 %vm268_vm0, %v679_v7 }
  0x1b   : > { %651 = vmatmul.mubr.msk.bf16.gmra.mrb[4].mxu1 %vm268_vm0, %v680_v8  ;;  %638 = vmatprep.mubr.msk.bf16.mxu0 %vm268_vm0, %v681_v9 }
  0x1c   : > { %654 = vmatprep.mubr.msk.bf16.mxu1 %vm268_vm0, %v682_v10 }
  0x22   : > { %639 = vmatmul.mubr.msk.bf16.gmra.mrb[8].mxu0 %vm268_vm0, %v683_v11 }
  0x23   : > { %655 = vmatmul.mubr.msk.bf16.gmra.mrb[8].mxu1 %vm268_vm0, %v684_v12  ;;  %642 = vmatprep.mubr.msk.bf16.mxu0 %vm268_vm0, %v685_v13 }
  0x24   : > { %658 = vmatprep.mubr.msk.bf16.mxu1 %vm268_vm0, %v686_v14 }
  0x2a   : > { %643 = vmatmul.mubr.msk.bf16.gmra.mrb[12].mxu0 %vm268_vm0, %v687_v15 }
  0x2b   : > { %659 = vmatmul.mubr.msk.bf16.gmra.mrb[12].mxu1 %vm268_vm0, %v688_v16 }
  0xe5   : > { %v632_v17 = vpop.f32.mrb[0].mxu0 }
  0xe6   : > { %481 = vst.msk [vmem:[%s767_s21 + $0x10] sm:$0xff] %vm478_vm1, %v632_v17  ;;  %v648_v18 = vpop.f32.mrb[0].mxu1  ;;  %v351_v19 = vpop.f32.mrb[1].mxu0 }
  0xe7   : > { %497 = vst.msk [vmem:[%s767_s21 + $0x90] sm:$0xff] %vm478_vm1, %v648_v18  ;;  %479 = vst.msk [vmem:[%s767_s21] sm:$0xff] %vm478_vm1, %v351_v19  ;;  %v415_v20 = vpop.f32.mrb[1].mxu1  ;;  %v633_v21 = vpop.f32.mrb[2].mxu0 }
  0xe8   : > { %495 = vst.msk [vmem:[%s767_s21 + $0x80] sm:$0xff] %vm478_vm1, %v415_v20  ;;  %482 = vst.msk [vmem:[%s767_s21 + $0x18] sm:$0xff] %vm478_vm1, %v633_v21  ;;  %v649_v22 = vpop.f32.mrb[2].mxu1  ;;  %v354_v23 = vpop.f32.mrb[3].mxu0 }
  0xe9   : > { %498 = vst.msk [vmem:[%s767_s21 + $0x98] sm:$0xff] %vm478_vm1, %v649_v22  ;;  %480 = vst.msk [vmem:[%s767_s21 + $0x8] sm:$0xff] %vm478_vm1, %v354_v23  ;;  %v418_v24 = vpop.f32.mrb[3].mxu1 }
  0xea   : > { %496 = vst.msk [vmem:[%s767_s21 + $0x88] sm:$0xff] %vm478_vm1, %v418_v24 }
  0xed   : > { %v636_v25 = vpop.f32.mrb[4].mxu0 }
  0xee   : > { %485 = vst.msk [vmem:[%s767_s21 + $0x30] sm:$0xff] %vm478_vm1, %v636_v25  ;;  %v652_v26 = vpop.f32.mrb[4].mxu1  ;;  %v367_v27 = vpop.f32.mrb[5].mxu0 }
  0xef   : > { %501 = vst.msk [vmem:[%s767_s21 + $0xb0] sm:$0xff] %vm478_vm1, %v652_v26  ;;  %483 = vst.msk [vmem:[%s767_s21 + $0x20] sm:$0xff] %vm478_vm1, %v367_v27  ;;  %v431_v28 = vpop.f32.mrb[5].mxu1  ;;  %v637_v29 = vpop.f32.mrb[6].mxu0 }
  0xf0   : > { %499 = vst.msk [vmem:[%s767_s21 + $0xa0] sm:$0xff] %vm478_vm1, %v431_v28  ;;  %486 = vst.msk [vmem:[%s767_s21 + $0x38] sm:$0xff] %vm478_vm1, %v637_v29  ;;  %v653_v30 = vpop.f32.mrb[6].mxu1  ;;  %v370_v31 = vpop.f32.mrb[7].mxu0 }
  0xf1   : > { %502 = vst.msk [vmem:[%s767_s21 + $0xb8] sm:$0xff] %vm478_vm1, %v653_v30  ;;  %484 = vst.msk [vmem:[%s767_s21 + $0x28] sm:$0xff] %vm478_vm1, %v370_v31  ;;  %v434_v32 = vpop.f32.mrb[7].mxu1 }
  0xf2   : > { %500 = vst.msk [vmem:[%s767_s21 + $0xa8] sm:$0xff] %vm478_vm1, %v434_v32 }
  0xf5   : > { %v640_v33 = vpop.f32.mrb[8].mxu0 }
  0xf6   : > { %489 = vst.msk [vmem:[%s767_s21 + $0x50] sm:$0xff] %vm478_vm1, %v640_v33  ;;  %v656_v34 = vpop.f32.mrb[8].mxu1  ;;  %v383_v35 = vpop.f32.mrb[9].mxu0 }
  0xf7   : > { %505 = vst.msk [vmem:[%s767_s21 + $0xd0] sm:$0xff] %vm478_vm1, %v656_v34  ;;  %487 = vst.msk [vmem:[%s767_s21 + $0x40] sm:$0xff] %vm478_vm1, %v383_v35  ;;  %v447_v36 = vpop.f32.mrb[9].mxu1  ;;  %v641_v37 = vpop.f32.mrb[10].mxu0 }
  0xf8   : > { %503 = vst.msk [vmem:[%s767_s21 + $0xc0] sm:$0xff] %vm478_vm1, %v447_v36  ;;  %490 = vst.msk [vmem:[%s767_s21 + $0x58] sm:$0xff] %vm478_vm1, %v641_v37  ;;  %v657_v38 = vpop.f32.mrb[10].mxu1  ;;  %v386_v39 = vpop.f32.mrb[11].mxu0 }
  0xf9   : > { %506 = vst.msk [vmem:[%s767_s21 + $0xd8] sm:$0xff] %vm478_vm1, %v657_v38  ;;  %488 = vst.msk [vmem:[%s767_s21 + $0x48] sm:$0xff] %vm478_vm1, %v386_v39  ;;  %v450_v40 = vpop.f32.mrb[11].mxu1 }
  0xfa   : > { %504 = vst.msk [vmem:[%s767_s21 + $0xc8] sm:$0xff] %vm478_vm1, %v450_v40 }
  0xfd   : > { %v644_v41 = vpop.f32.mrb[12].mxu0 }
  0xfe   : > { %493 = vst.msk [vmem:[%s767_s21 + $0x70] sm:$0xff] %vm478_vm1, %v644_v41  ;;  %v660_v42 = vpop.f32.mrb[12].mxu1  ;;  %v399_v43 = vpop.f32.mrb[13].mxu0 }
  0xff   : > { %509 = vst.msk [vmem:[%s767_s21 + $0xf0] sm:$0xff] %vm478_vm1, %v660_v42  ;;  %491 = vst.msk [vmem:[%s767_s21 + $0x60] sm:$0xff] %vm478_vm1, %v399_v43  ;;  %v463_v44 = vpop.f32.mrb[13].mxu1  ;;  %v645_v45 = vpop.f32.mrb[14].mxu0 }
 0x100   : > { %507 = vst.msk [vmem:[%s767_s21 + $0xe0] sm:$0xff] %vm478_vm1, %v463_v44  ;;  %494 = vst.msk [vmem:[%s767_s21 + $0x78] sm:$0xff] %vm478_vm1, %v645_v45  ;;  %v661_v46 = vpop.f32.mrb[14].mxu1  ;;  %v402_v47 = vpop.f32.mrb[15].mxu0 }
 0x101   : > { %510 = vst.msk [vmem:[%s767_s21 + $0xf8] sm:$0xff] %vm478_vm1, %v661_v46  ;;  %492 = vst.msk [vmem:[%s767_s21 + $0x68] sm:$0xff] %vm478_vm1, %v402_v47  ;;  %v466_v48 = vpop.f32.mrb[15].mxu1 }
 0x102   : > { %508 = vst.msk [vmem:[%s767_s21 + $0xe8] sm:$0xff] %vm478_vm1, %v466_v48 }
 0x103 PF: > { %s12_s9 = sadd.s32 1, %s695_s9  }
 0x104   : > { %p9_p4 = scmp.ge.s32.totalorder %s12_s9, 4  }
 0x106   :  { %11 = sbr.rel (!%p9_p4) target bundleno = 1 (0x1), region = 58 }

// kernel: wideresnet_forward.21
= control target key start
LH: loop header
LB: loop body
LE: loop exit
PB: predicated region body
PF: predicated region fallthrough
CT: control target
= control target key end

     0   :  { %s710_s12 = smov 0   ;;  %s905_s0 = inlined_call_operand.vmem [shape: f32[512,32], index: 0, kind: input, shape index: {}]   ;;  %s906_s1 = inlined_call_operand.vmem [shape: f32[1,32], index: 1, kind: input, shape index: {}]   ;;  %s907_s2 = inlined_call_operand.vmem [shape: f32[1,32], index: 2, kind: input, shape index: {}]   ;;  %s908_s3 = inlined_call_operand.vmem [shape: bf16[512,32], index: 3, kind: output, shape index: {}]  }
   0x1 LB: > { %s597_s13 = sadd.s32 4294967295, %s688_s12   ;;  %p601_p0 = scmp.ge.s32.totalorder %s688_s12, 1  ;;  %s688_s12 = sphi %s710_s12, %s13_s12  }
   0x2   : > { %p138_p1 = scmp.lt.s32.totalorder %s688_s12, 3 }
   0x4   : > { %p139_p2 = pnand %p601_p0, %p138_p1 }
   0x5   : > { %s602_s14 = sshll.u32 (!%p139_p2), %s597_s13, 5  ;;  %v724_v0 = vld [vmem:[%s906_s1] ss:$0 sm:$0xff] (!%p139_p2)  ;;  %vm508_vm0 = vcmask (!%p139_p2), 257024  }
   0x6   : > { %142 = sbr.rel (%p139_p2) target bundleno = 72 (0x48), region = 32  ;;  %p163_p3 = scmp.lt.s32.totalorder (!%p139_p2), %s602_s14, 63  ;;  %v734_v1 = vld [vmem:[%s907_s2] ss:$0 sm:$0xff] (!%p139_p2) }
   0xd   : > { %s910_s14 = smov (!%p163_p3, %s602_s14), 63 }
   0xe   : > { %s603_s15 = sshll.u32 %s910_s14, 3  ;;  %s605_s23 = sshll.u32 %s910_s14, 2 }
   0xf   : > { %s729_s20 = scalar_lea.vmem %s905_s0, %s603_s15  ;;  %s762_s26 = scalar_lea.vmem %s908_s3, %s605_s23 }
  0x10   : > { %v174_v2 = vld [vmem:[%s729_s20] sm:$0xff]  ;;  %v175_v3 = vld [vmem:[%s729_s20 + $0x8] sm:$0xff]  ;;  %v176_v4 = vld [vmem:[%s729_s20 + $0x10] sm:$0xff] }
  0x11   : > { %v213_v5 = vmul.f32 %v724_v0, %v174_v2  ;;  %v214_v6 = vmul.f32 %v724_v0, %v175_v3  ;;  %v215_v7 = vmul.f32 %v724_v0, %v176_v4  ;;  %v177_v8 = vld [vmem:[%s729_s20 + $0x18] sm:$0xff]  ;;  %v178_v9 = vld [vmem:[%s729_s20 + $0x20] sm:$0xff]  ;;  %v179_v10 = vld [vmem:[%s729_s20 + $0x28] sm:$0xff] }
  0x12   : > { %v216_v11 = vmul.f32 %v724_v0, %v177_v8  ;;  %v217_v12 = vmul.f32 %v724_v0, %v178_v9  ;;  %v218_v13 = vmul.f32 %v724_v0, %v179_v10  ;;  %v180_v14 = vld [vmem:[%s729_s20 + $0x30] sm:$0xff]  ;;  %v181_v15 = vld [vmem:[%s729_s20 + $0x38] sm:$0xff]  ;;  %v182_v31 = vld [vmem:[%s729_s20 + $0x40] sm:$0xff] }
  0x13   : > { %v252_v16 = vadd.f32 %v734_v1, %v213_v5  ;;  %v253_v17 = vadd.f32 %v734_v1, %v214_v6  ;;  %v254_v18 = vadd.f32 %v734_v1, %v215_v7  ;;  %v219_v19 = vmul.f32 %v724_v0, %v180_v14  ;;  %v183_v36 = vld [vmem:[%s729_s20 + $0x48] sm:$0xff]  ;;  %v184_v37 = vld [vmem:[%s729_s20 + $0x50] sm:$0xff]  ;;  %v185_v38 = vld [vmem:[%s729_s20 + $0x58] sm:$0xff] }
  0x14   : > { %v255_v20 = vadd.f32 %v734_v1, %v216_v11  ;;  %v256_v21 = vadd.f32 %v734_v1, %v217_v12  ;;  %v257_v22 = vadd.f32 %v734_v1, %v218_v13  ;;  %v220_v23 = vmul.f32 %v724_v0, %v181_v15  ;;  %v186_v50 = vld [vmem:[%s729_s20 + $0x60] sm:$0xff]  ;;  %v187_v2 = vld [vmem:[%s729_s20 + $0x68] sm:$0xff]  ;;  %v188_v5 = vld [vmem:[%s729_s20 + $0x70] sm:$0xff] }
  0x15   : > { %vm284_vm1 = vcmp.ge.f32.partialorder %v252_v16, 0.0  ;;  %v316_v24 = vmul.f32 0.1, %v252_v16  ;;  %vm285_vm2 = vcmp.ge.f32.partialorder %v253_v17, 0.0  ;;  %v317_v25 = vmul.f32 0.1, %v253_v17 }
  0x16   : > { %vm286_vm3 = vcmp.ge.f32.partialorder %v254_v18, 0.0  ;;  %v318_v26 = vmul.f32 0.1, %v254_v18  ;;  %vm287_vm4 = vcmp.ge.f32.partialorder %v255_v20, 0.0  ;;  %v319_v27 = vmul.f32 0.1, %v255_v20 }
  0x17   : > { %v348_v28 = vsel %vm284_vm1, %v252_v16, %v316_v24  ;;  %v349_v29 = vsel %vm285_vm2, %v253_v17, %v317_v25  ;;  %vm288_vm5 = vcmp.ge.f32.partialorder %v256_v21, 0.0  ;;  %v320_v30 = vmul.f32 0.1, %v256_v21  ;;  %v189_v13 = vld [vmem:[%s729_s20 + $0x78] sm:$0xff]  ;;  %v190_v14 = vld [vmem:[%s729_s20 + $0x80] sm:$0xff] }
  0x18   : > { %v642_v32 = vpack.c.bf16 %v348_v28, %v348_v28  ;;  %v643_v33 = vpack.c.bf16 %v349_v29, %v349_v29  ;;  %v350_v34 = vsel %vm286_vm3, %v254_v18, %v318_v26  ;;  %v351_v35 = vsel %vm287_vm4, %v255_v20, %v319_v27  ;;  %v192_v20 = vld [vmem:[%s729_s20 + $0x90] sm:$0xff] }
  0x19   : > { %v644_v39 = vpack.c.bf16 %v350_v34, %v350_v34  ;;  %v645_v40 = vpack.c.bf16 %v351_v35, %v351_v35  ;;  %v352_v41 = vsel %vm288_vm5, %v256_v21, %v320_v30  ;;  %vm289_vm6 = vcmp.ge.f32.partialorder %v257_v22, 0.0  ;;  %v193_v21 = vld [vmem:[%s729_s20 + $0x98] sm:$0xff] }
  0x1a   : > { %509 = vst.msk [vmem:[%s762_s26] sm:$0xf] %vm508_vm0, %v642_v32  ;;  %510 = vst.msk [vmem:[%s762_s26 + $0x4] sm:$0xf] %vm508_vm0, %v643_v33  ;;  %v646_v42 = vpack.c.bf16 %v352_v41, %v352_v41  ;;  %v321_v43 = vmul.f32 0.1, %v257_v22  ;;  %v258_v44 = vadd.f32 %v734_v1, %v219_v19  ;;  %v259_v45 = vadd.f32 %v734_v1, %v220_v23 }
  0x1b   : > { %511 = vst.msk [vmem:[%s762_s26 + $0x8] sm:$0xf] %vm508_vm0, %v644_v39  ;;  %512 = vst.msk [vmem:[%s762_s26 + $0xc] sm:$0xf] %vm508_vm0, %v645_v40  ;;  %v221_v46 = vmul.f32 %v724_v0, %v182_v31  ;;  %v222_v47 = vmul.f32 %v724_v0, %v183_v36  ;;  %v223_v48 = vmul.f32 %v724_v0, %v184_v37  ;;  %v191_v19 = vld [vmem:[%s729_s20 + $0x88] sm:$0xff]  ;;  %v194_v33 = vld [vmem:[%s729_s20 + $0xa0] sm:$0xff] }
  0x1c   : > { %v224_v49 = vmul.f32 %v724_v0, %v185_v38  ;;  %513 = vst.msk [vmem:[%s762_s26 + $0x10] sm:$0xf] %vm508_vm0, %v646_v42  ;;  %v353_v51 = vsel %vm289_vm6, %v257_v22, %v321_v43  ;;  %vm290_vm7 = vcmp.ge.f32.partialorder %v258_v44, 0.0  ;;  %v322_v52 = vmul.f32 0.1, %v258_v44 }
  0x1d   : > { %vm291_vm8 = vcmp.ge.f32.partialorder %v259_v45, 0.0  ;;  %v647_v53 = vpack.c.bf16 %v353_v51, %v353_v51  ;;  %v323_v54 = vmul.f32 0.1, %v259_v45  ;;  %v260_v55 = vadd.f32 %v734_v1, %v221_v46 }
  0x1e   : > { %v261_v56 = vadd.f32 %v734_v1, %v222_v47  ;;  %v354_v57 = vsel %vm290_vm7, %v258_v44, %v322_v52  ;;  %v262_v58 = vadd.f32 %v734_v1, %v223_v48  ;;  %v263_v59 = vadd.f32 %v734_v1, %v224_v49  ;;  %v195_v52 = vld [vmem:[%s729_s20 + $0xa8] sm:$0xff] }
  0x1f   : > { %v225_v60 = vmul.f32 %v724_v0, %v186_v50  ;;  %514 = vst.msk [vmem:[%s762_s26 + $0x14] sm:$0xf] %vm508_vm0, %v647_v53  ;;  %v648_v61 = vpack.c.bf16 %v354_v57, %v354_v57  ;;  %v355_v62 = vsel %vm291_vm8, %v259_v45, %v323_v54  ;;  %vm292_vm9 = vcmp.ge.f32.partialorder %v260_v55, 0.0 }
  0x20   : > { %v324_v63 = vmul.f32 0.1, %v260_v55  ;;  %v649_v3 = vpack.c.bf16 %v355_v62, %v355_v62  ;;  %vm293_vm10 = vcmp.ge.f32.partialorder %v261_v56, 0.0  ;;  %v325_v4 = vmul.f32 0.1, %v261_v56  ;;  %v198_v62 = vld [vmem:[%s729_s20 + $0xc0] sm:$0xff] }
  0x21   : > { %vm294_vm11 = vcmp.ge.f32.partialorder %v262_v58, 0.0  ;;  %515 = vst.msk [vmem:[%s762_s26 + $0x18] sm:$0xf] %vm508_vm0, %v648_v61  ;;  %v326_v7 = vmul.f32 0.1, %v262_v58  ;;  %vm295_vm12 = vcmp.ge.f32.partialorder %v263_v59, 0.0  ;;  %v264_v11 = vadd.f32 %v734_v1, %v225_v60 }
  0x22   : > { %v356_v6 = vsel %vm292_vm9, %v260_v55, %v324_v63  ;;  %v327_v8 = vmul.f32 0.1, %v263_v59  ;;  %516 = vst.msk [vmem:[%s762_s26 + $0x1c] sm:$0xf] %vm508_vm0, %v649_v3  ;;  %v357_v10 = vsel %vm293_vm10, %v261_v56, %v325_v4  ;;  %v226_v12 = vmul.f32 %v724_v0, %v187_v2  ;;  %v196_v56 = vld [vmem:[%s729_s20 + $0xb0] sm:$0xff]  ;;  %v197_v61 = vld [vmem:[%s729_s20 + $0xb8] sm:$0xff] }
  0x23   : > { %v650_v9 = vpack.c.bf16 %v356_v6, %v356_v6  ;;  %v651_v15 = vpack.c.bf16 %v357_v10, %v357_v10  ;;  %v358_v16 = vsel %vm294_vm11, %v262_v58, %v326_v7  ;;  %v227_v18 = vmul.f32 %v724_v0, %v188_v5  ;;  %v199_v63 = vld [vmem:[%s729_s20 + $0xc8] sm:$0xff]  ;;  %v200_v6 = vld [vmem:[%s729_s20 + $0xd0] sm:$0xff]  ;;  %v201_v7 = vld [vmem:[%s729_s20 + $0xd8] sm:$0xff] }
  0x24   : > { %v359_v17 = vsel %vm295_vm12, %v263_v59, %v327_v8  ;;  %v652_v22 = vpack.c.bf16 %v358_v16, %v358_v16  ;;  %vm296_vm13 = vcmp.ge.f32.partialorder %v264_v11, 0.0  ;;  %v328_v24 = vmul.f32 0.1, %v264_v11 }
  0x25   : > { %517 = vst.msk [vmem:[%s762_s26 + $0x20] sm:$0xf] %vm508_vm0, %v650_v9  ;;  %v653_v23 = vpack.c.bf16 %v359_v17, %v359_v17  ;;  %518 = vst.msk [vmem:[%s762_s26 + $0x24] sm:$0xf] %vm508_vm0, %v651_v15  ;;  %v265_v25 = vadd.f32 %v734_v1, %v226_v12  ;;  %v266_v26 = vadd.f32 %v734_v1, %v227_v18 }
  0x26   : > { %v228_v27 = vmul.f32 %v724_v0, %v189_v13  ;;  %v229_v28 = vmul.f32 %v724_v0, %v190_v14  ;;  %519 = vst.msk [vmem:[%s762_s26 + $0x28] sm:$0xf] %vm508_vm0, %v652_v22  ;;  %v360_v29 = vsel %vm296_vm13, %v264_v11, %v328_v24  ;;  %v230_v30 = vmul.f32 %v724_v0, %v191_v19 }
  0x27   : > { %520 = vst.msk [vmem:[%s762_s26 + $0x2c] sm:$0xf] %vm508_vm0, %v653_v23  ;;  %v231_v31 = vmul.f32 %v724_v0, %v192_v20  ;;  %v232_v32 = vmul.f32 %v724_v0, %v193_v21  ;;  %v654_v34 = vpack.c.bf16 %v360_v29, %v360_v29  ;;  %vm297_vm14 = vcmp.ge.f32.partialorder %v265_v25, 0.0 }
  0x28   : > { %v329_v35 = vmul.f32 0.1, %v265_v25  ;;  %vm298_vm15 = vcmp.ge.f32.partialorder %v266_v26, 0.0  ;;  %v330_v36 = vmul.f32 0.1, %v266_v26  ;;  %v267_v37 = vadd.f32 %v734_v1, %v228_v27 }
  0x29   : > { %v268_v38 = vadd.f32 %v734_v1, %v229_v28  ;;  %v269_v39 = vadd.f32 %v734_v1, %v230_v30  ;;  %521 = vst.msk [vmem:[%s762_s26 + $0x30] sm:$0xf] %vm508_vm0, %v654_v34  ;;  %v270_v41 = vadd.f32 %v734_v1, %v231_v31  ;;  %v271_v42 = vadd.f32 %v734_v1, %v232_v32  ;;  %v202_v31 = vld [vmem:[%s729_s20 + $0xe0] sm:$0xff] }
  0x2a   : > { %v361_v40 = vsel %vm297_vm14, %v265_v25, %v329_v35  ;;  %v233_v43 = vmul.f32 %v724_v0, %v194_v33  ;;  %v362_v45 = vsel %vm298_vm15, %v266_v26, %v330_v36  ;;  %vm299_vm1 = vcmp.ge.f32.partialorder %v267_v37, 0.0  ;;  %v203_v35 = vld [vmem:[%s729_s20 + $0xe8] sm:$0xff]  ;;  %v204_v36 = vld [vmem:[%s729_s20 + $0xf0] sm:$0xff] }
  0x2b   : > { %v655_v44 = vpack.c.bf16 %v361_v40, %v361_v40  ;;  %v331_v46 = vmul.f32 0.1, %v267_v37  ;;  %v656_v47 = vpack.c.bf16 %v362_v45, %v362_v45  ;;  %vm300_vm2 = vcmp.ge.f32.partialorder %v268_v38, 0.0 }
  0x2c   : > { %v332_v48 = vmul.f32 0.1, %v268_v38  ;;  %vm301_vm3 = vcmp.ge.f32.partialorder %v269_v39, 0.0  ;;  %v333_v50 = vmul.f32 0.1, %v269_v39  ;;  %vm302_vm4 = vcmp.ge.f32.partialorder %v270_v41, 0.0 }
  0x2d   : > { %522 = vst.msk [vmem:[%s762_s26 + $0x34] sm:$0xf] %vm508_vm0, %v655_v44  ;;  %v363_v49 = vsel %vm299_vm1, %v267_v37, %v331_v46  ;;  %v334_v51 = vmul.f32 0.1, %v270_v41  ;;  %523 = vst.msk [vmem:[%s762_s26 + $0x38] sm:$0xf] %vm508_vm0, %v656_v47  ;;  %v272_v60 = vadd.f32 %v734_v1, %v233_v43  ;;  %v234_v5 = vmul.f32 %v724_v0, %v195_v52 }
  0x2e   : > { %v657_v53 = vpack.c.bf16 %v363_v49, %v363_v49  ;;  %v364_v54 = vsel %vm300_vm2, %v268_v38, %v332_v48  ;;  %vm303_vm5 = vcmp.ge.f32.partialorder %v271_v42, 0.0  ;;  %v335_v55 = vmul.f32 0.1, %v271_v42  ;;  %v205_v44 = vld [vmem:[%s729_s20 + $0xf8] sm:$0xff] }
  0x2f   : > { %v658_v57 = vpack.c.bf16 %v364_v54, %v364_v54  ;;  %v365_v58 = vsel %vm301_vm3, %v269_v39, %v333_v50  ;;  %v366_v59 = vsel %vm302_vm4, %v270_v41, %v334_v51  ;;  %vm304_vm6 = vcmp.ge.f32.partialorder %v272_v60, 0.0 }
  0x30   : > { %524 = vst.msk [vmem:[%s762_s26 + $0x3c] sm:$0xf] %vm508_vm0, %v657_v53  ;;  %v659_v2 = vpack.c.bf16 %v365_v58, %v365_v58  ;;  %v660_v3 = vpack.c.bf16 %v366_v59, %v366_v59  ;;  %v367_v4 = vsel %vm303_vm5, %v271_v42, %v335_v55  ;;  %v336_v9 = vmul.f32 0.1, %v272_v60 }
  0x31   : > { %525 = vst.msk [vmem:[%s762_s26 + $0x40] sm:$0xf] %vm508_vm0, %v658_v57  ;;  %v661_v8 = vpack.c.bf16 %v367_v4, %v367_v4  ;;  %v235_v10 = vmul.f32 %v724_v0, %v196_v56  ;;  %v273_v11 = vadd.f32 %v734_v1, %v234_v5  ;;  %v236_v12 = vmul.f32 %v724_v0, %v197_v61 }
  0x32   : > { %526 = vst.msk [vmem:[%s762_s26 + $0x44] sm:$0xf] %vm508_vm0, %v659_v2  ;;  %527 = vst.msk [vmem:[%s762_s26 + $0x48] sm:$0xf] %vm508_vm0, %v660_v3  ;;  %v237_v13 = vmul.f32 %v724_v0, %v198_v62  ;;  %v238_v14 = vmul.f32 %v724_v0, %v199_v63  ;;  %v368_v15 = vsel %vm304_vm6, %v272_v60, %v336_v9 }
  0x33   : > { %528 = vst.msk [vmem:[%s762_s26 + $0x4c] sm:$0xf] %vm508_vm0, %v661_v8  ;;  %v274_v16 = vadd.f32 %v734_v1, %v235_v10  ;;  %v239_v17 = vmul.f32 %v724_v0, %v200_v6  ;;  %v240_v18 = vmul.f32 %v724_v0, %v201_v7  ;;  %v662_v19 = vpack.c.bf16 %v368_v15, %v368_v15 }
  0x34   : > { %vm305_vm7 = vcmp.ge.f32.partialorder %v273_v11, 0.0  ;;  %v337_v20 = vmul.f32 0.1, %v273_v11  ;;  %v275_v21 = vadd.f32 %v734_v1, %v236_v12  ;;  %v276_v23 = vadd.f32 %v734_v1, %v237_v13 }
  0x35   : > { %vm306_vm8 = vcmp.ge.f32.partialorder %v274_v16, 0.0  ;;  %v338_v22 = vmul.f32 0.1, %v274_v16  ;;  %v277_v24 = vadd.f32 %v734_v1, %v238_v14  ;;  %529 = vst.msk [vmem:[%s762_s26 + $0x50] sm:$0xf] %vm508_vm0, %v662_v19  ;;  %v278_v27 = vadd.f32 %v734_v1, %v239_v17 }
  0x36   : > { %v369_v25 = vsel %vm305_vm7, %v273_v11, %v337_v20  ;;  %vm307_vm9 = vcmp.ge.f32.partialorder %v275_v21, 0.0  ;;  %v339_v26 = vmul.f32 0.1, %v275_v21  ;;  %vm308_vm10 = vcmp.ge.f32.partialorder %v276_v23, 0.0 }
  0x37   : > { %v663_v28 = vpack.c.bf16 %v369_v25, %v369_v25  ;;  %v370_v29 = vsel %vm306_vm8, %v274_v16, %v338_v22  ;;  %v340_v30 = vmul.f32 0.1, %v276_v23  ;;  %vm309_vm11 = vcmp.ge.f32.partialorder %v277_v24, 0.0 }
  0x38   : > { %v664_v32 = vpack.c.bf16 %v370_v29, %v370_v29  ;;  %v371_v33 = vsel %vm307_vm9, %v275_v21, %v339_v26  ;;  %v341_v34 = vmul.f32 0.1, %v277_v24  ;;  %vm310_vm12 = vcmp.ge.f32.partialorder %v278_v27, 0.0 }
  0x39   : > { %530 = vst.msk [vmem:[%s762_s26 + $0x54] sm:$0xf] %vm508_vm0, %v663_v28  ;;  %v665_v37 = vpack.c.bf16 %v371_v33, %v371_v33  ;;  %v372_v38 = vsel %vm308_vm10, %v276_v23, %v340_v30  ;;  %v342_v39 = vmul.f32 0.1, %v278_v27  ;;  %v279_v42 = vadd.f32 %v734_v1, %v240_v18 }
  0x3a   : > { %531 = vst.msk [vmem:[%s762_s26 + $0x58] sm:$0xf] %vm508_vm0, %v664_v32  ;;  %v666_v40 = vpack.c.bf16 %v372_v38, %v372_v38  ;;  %v373_v41 = vsel %vm309_vm11, %v277_v24, %v341_v34  ;;  %v241_v43 = vmul.f32 %v724_v0, %v202_v31  ;;  %v242_v47 = vmul.f32 %v724_v0, %v203_v35 }
  0x3b   : > { %532 = vst.msk [vmem:[%s762_s26 + $0x5c] sm:$0xf] %vm508_vm0, %v665_v37  ;;  %v667_v45 = vpack.c.bf16 %v373_v41, %v373_v41  ;;  %v374_v46 = vsel %vm310_vm12, %v278_v27, %v342_v39  ;;  %v243_v48 = vmul.f32 %v724_v0, %v204_v36  ;;  %vm311_vm13 = vcmp.ge.f32.partialorder %v279_v42, 0.0 }
  0x3c   : > { %533 = vst.msk [vmem:[%s762_s26 + $0x60] sm:$0xf] %vm508_vm0, %v666_v40  ;;  %v668_v49 = vpack.c.bf16 %v374_v46, %v374_v46  ;;  %v343_v50 = vmul.f32 0.1, %v279_v42  ;;  %v280_v51 = vadd.f32 %v734_v1, %v241_v43  ;;  %v281_v52 = vadd.f32 %v734_v1, %v242_v47 }
  0x3d   : > { %534 = vst.msk [vmem:[%s762_s26 + $0x64] sm:$0xf] %vm508_vm0, %v667_v45  ;;  %v282_v53 = vadd.f32 %v734_v1, %v243_v48  ;;  %v244_v54 = vmul.f32 %v724_v0, %v205_v44 }
  0x3e   : > { %535 = vst.msk [vmem:[%s762_s26 + $0x68] sm:$0xf] %vm508_vm0, %v668_v49  ;;  %v375_v55 = vsel %vm311_vm13, %v279_v42, %v343_v50  ;;  %vm312_vm14 = vcmp.ge.f32.partialorder %v280_v51, 0.0  ;;  %v344_v56 = vmul.f32 0.1, %v280_v51  ;;  %vm313_vm15 = vcmp.ge.f32.partialorder %v281_v52, 0.0 }
  0x3f   : > { %v669_v57 = vpack.c.bf16 %v375_v55, %v375_v55  ;;  %v345_v58 = vmul.f32 0.1, %v281_v52  ;;  %vm314_vm1 = vcmp.ge.f32.partialorder %v282_v53, 0.0  ;;  %v346_v60 = vmul.f32 0.1, %v282_v53 }
  0x40   : > { %v376_v59 = vsel %vm312_vm14, %v280_v51, %v344_v56  ;;  %v283_v61 = vadd.f32 %v734_v1, %v244_v54 }
  0x41   : > { %536 = vst.msk [vmem:[%s762_s26 + $0x6c] sm:$0xf] %vm508_vm0, %v669_v57  ;;  %v670_v0 = vpack.c.bf16 %v376_v59, %v376_v59  ;;  %v377_v62 = vsel %vm313_vm15, %v281_v52, %v345_v58  ;;  %v378_v2 = vsel %vm314_vm1, %v282_v53, %v346_v60 }
  0x42   : > { %v671_v63 = vpack.c.bf16 %v377_v62, %v377_v62  ;;  %vm315_vm2 = vcmp.ge.f32.partialorder %v283_v61, 0.0  ;;  %v347_v3 = vmul.f32 0.1, %v283_v61  ;;  %v672_v4 = vpack.c.bf16 %v378_v2, %v378_v2 }
  0x43   : > { %537 = vst.msk [vmem:[%s762_s26 + $0x70] sm:$0xf] %vm508_vm0, %v670_v0 }
  0x44   : > { %538 = vst.msk [vmem:[%s762_s26 + $0x74] sm:$0xf] %vm508_vm0, %v671_v63  ;;  %v379_v5 = vsel %vm315_vm2, %v283_v61, %v347_v3  ;;  %539 = vst.msk [vmem:[%s762_s26 + $0x78] sm:$0xf] %vm508_vm0, %v672_v4 }
  0x45   : > { %v673_v6 = vpack.c.bf16 %v379_v5, %v379_v5 }
  0x47   : > { %540 = vst.msk [vmem:[%s762_s26 + $0x7c] sm:$0xf] %vm508_vm0, %v673_v6 }
  0x48 PF: > { %s13_s12 = sadd.s32 1, %s688_s12  }
  0x49   : > { %p10_p4 = scmp.ge.s32.totalorder %s13_s12, 4  }
  0x4b   :  { %12 = sbr.rel (!%p10_p4) target bundleno = 1 (0x1), region = 62 }

// kernel: wideresnet_forward.20
= control target key start
LH: loop header
LB: loop body
LE: loop exit
PB: predicated region body
PF: predicated region fallthrough
CT: control target
= control target key end

     0   :  { %s1547_s12 = smov 0   ;;  %s1821_s0 = inlined_call_operand.vmem [shape: bf16[512,288], index: 0, kind: input, shape index: {}]   ;;  %s1822_s1 = inlined_call_operand.vmem [shape: bf16[288,32], index: 1, kind: input, shape index: {}]   ;;  %s1823_s2 = inlined_call_operand.vmem [shape: f32[512,32], index: 2, kind: input, shape index: {}]   ;;  %s1824_s3 = inlined_call_operand.vmem [shape: f32[512,32], index: 3, kind: output, shape index: {}]  }
   0x1 LB: > { %s1151_s13 = sadd.s32 4294967295, %s1525_s12   ;;  %p1155_p0 = scmp.ge.s32.totalorder %s1525_s12, 1  ;;  %s1525_s12 = sphi %s1547_s12, %s13_s12  }
   0x2   : > { %p150_p1 = scmp.lt.s32.totalorder %s1525_s12, 3 }
   0x4   : > { %p151_p2 = pnand %p1155_p0, %p150_p1 }
   0x5   : > { %v1437_v0 = vld [vmem:[%s1822_s1 + $0x40] sm:$0xff] (!%p151_p2)   ;;  %s1156_s16 = sshll.u32 (!%p151_p2), %s1151_s13, 5  ;;  %v1439_v2 = vld [vmem:[%s1822_s1 + $0x48] sm:$0xff] (!%p151_p2)   ;;  %v1441_v4 = vld [vmem:[%s1822_s1 + $0x50] sm:$0xff] (!%p151_p2)   ;;  %vm680_vm0 = vcmask (!%p151_p2), 261120  }
   0x6   : > { %154 = sbr.rel (%p151_p2) target bundleno = 348 (0x15c), region = 32  ;;  %v1438_v1 = vld [vmem:[%s1822_s1] sm:$0xff] (!%p151_p2)   ;;  %1246 = vmatprep.subr.bf16.mxu0 (!%p151_p2), %v1437_v0  ;;  %1412 = vmatprep.subr.bf16.mxu1 (!%p151_p2), %v1437_v0  ;;  %p181_p3 = scmp.lt.s32.totalorder (!%p151_p2), %s1156_s16, 63  ;;  %v1440_v3 = vld [vmem:[%s1822_s1 + $0x8] sm:$0xff] (!%p151_p2)   ;;  %v1442_v5 = vld [vmem:[%s1822_s1 + $0x10] sm:$0xff] (!%p151_p2)  }
   0x7   : > { %1247 = vmatpush3.bf16.msra.mxu0 (!%p151_p2), %v1438_v1  ;;  %1420 = vmatpush3.bf16.msra.mxu1 (!%p151_p2), %v1438_v1  ;;  %v1443_v6 = vld [vmem:[%s1822_s1 + $0x58] sm:$0xff] (!%p151_p2)   ;;  %v1445_v8 = vld [vmem:[%s1822_s1 + $0x60] sm:$0xff] (!%p151_p2)   ;;  %v1447_v10 = vld [vmem:[%s1822_s1 + $0x68] sm:$0xff] (!%p151_p2)  }
   0x8   : > { %1248 = vmatprep.subr.bf16.mxu0 (!%p151_p2), %v1439_v2  ;;  %1413 = vmatprep.subr.bf16.mxu1 (!%p151_p2), %v1439_v2  ;;  %v1444_v7 = vld [vmem:[%s1822_s1 + $0x18] sm:$0xff] (!%p151_p2)   ;;  %v1446_v9 = vld [vmem:[%s1822_s1 + $0x20] sm:$0xff] (!%p151_p2)   ;;  %v1448_v13 = vld [vmem:[%s1822_s1 + $0x28] sm:$0xff] (!%p151_p2)  }
   0x9   : > { %v1449_v14 = vld [vmem:[%s1822_s1 + $0x70] sm:$0xff] (!%p151_p2)   ;;  %v1451_v16 = vld [vmem:[%s1822_s1 + $0x78] sm:$0xff] (!%p151_p2)   ;;  %v1459_v18 = vld [vmem:[%s1822_s1 + $0x80] sm:$0xff] (!%p151_p2)  }
   0xa   : > { %v1450_v15 = vld [vmem:[%s1822_s1 + $0x30] sm:$0xff] (!%p151_p2)   ;;  %v1452_v17 = vld [vmem:[%s1822_s1 + $0x38] sm:$0xff] (!%p151_p2)   ;;  %v1472_v23 = vld [vmem:[%s1822_s1 + $0x88] sm:$0xff] (!%p151_p2)  }
   0xb   : > { %1249 = vmatpush3.bf16.msra.mxu0 (!%p151_p2), %v1440_v3  ;;  %1421 = vmatpush3.bf16.msra.mxu1 (!%p151_p2), %v1440_v3 }
   0xc   : > { %1250 = vmatprep.subr.bf16.mxu0 (!%p151_p2), %v1441_v4  ;;  %1414 = vmatprep.subr.bf16.mxu1 (!%p151_p2), %v1441_v4 }
   0xd   : > { %s1826_s16 = smov (!%p181_p3, %s1156_s16), 63 }
   0xe   : > { %s1428_s29 = smul.u32 12, %s1826_s16  ;;  %s1159_s30 = sshll.u32 %s1826_s16, 3 }
   0xf   : > { %1251 = vmatpush3.bf16.msra.mxu0 %v1442_v5  ;;  %1422 = vmatpush3.bf16.msra.mxu1 %v1442_v5  ;;  %s1699_s6 = scalar_lea.vmem %s1823_s2, %s1159_s30  ;;  %s1710_s8 = scalar_lea.vmem %s1824_s3, %s1159_s30 }
  0x10   : > { %1252 = vmatprep.subr.bf16.mxu0 %v1443_v6  ;;  %1415 = vmatprep.subr.bf16.mxu1 %v1443_v6  ;;  %s1588_s9 = scalar_lea.vmem %s1821_s0, %s1428_s29 }
  0x11   : > { %v1455_v11 = vld [vmem:[%s1588_s9 + $0x4] ss:$12 sps:$4 sm:$0xff]   ;;  %v1453_v19 = vld [vmem:[%s1588_s9] ss:$12 sps:$4 sm:$0xff]   ;;  %v1460_v21 = vld [vmem:[%s1588_s9 + $0x1c] ss:$12 sps:$4 sm:$0xff]  }
  0x12   : > { %v1458_v12 = vld [vmem:[%s1588_s9 + $0x124] ss:$12 sps:$4 sm:$0xff]   ;;  %761 = vmatprep.mubr.bf16.mxu0 %v1455_v11  ;;  %v1456_v20 = vld [vmem:[%s1588_s9 + $0x120] ss:$12 sps:$4 sm:$0xff]   ;;  %v1462_v22 = vld [vmem:[%s1588_s9 + $0x13c] ss:$12 sps:$4 sm:$0xff]  }
  0x13   : > { %1253 = vmatpush3.bf16.msra.mxu0 %v1444_v7  ;;  %1423 = vmatpush3.bf16.msra.mxu1 %v1444_v7  ;;  %v1464_v24 = vld [vmem:[%s1588_s9 + $0x18] ss:$12 sps:$4 sm:$0xff]   ;;  %v1466_v26 = vld [vmem:[%s1588_s9 + $0x34] ss:$12 sps:$4 sm:$0xff]   ;;  %v1470_v28 = vld [vmem:[%s1588_s9 + $0x30] ss:$12 sps:$4 sm:$0xff]  }
  0x14   : > { %1254 = vmatprep.subr.bf16.mxu0 %v1445_v8  ;;  %1416 = vmatprep.subr.bf16.mxu1 %v1445_v8  ;;  %v1465_v25 = vld [vmem:[%s1588_s9 + $0x138] ss:$12 sps:$4 sm:$0xff]   ;;  %v1468_v27 = vld [vmem:[%s1588_s9 + $0x154] ss:$12 sps:$4 sm:$0xff]   ;;  %v1471_v29 = vld [vmem:[%s1588_s9 + $0x150] ss:$12 sps:$4 sm:$0xff]  }
  0x15   : > { %857 = vmatprep.mubr.bf16.mxu1 %v1458_v12  ;;  %v1473_v30 = vld [vmem:[%s1588_s9 + $0x4c] ss:$12 sps:$4 sm:$0xff]   ;;  %v1477_v32 = vld [vmem:[%s1588_s9 + $0x48] ss:$12 sps:$4 sm:$0xff]   ;;  %v1479_v34 = vld [vmem:[%s1588_s9 + $0x64] ss:$12 sps:$4 sm:$0xff]  }
  0x16   : > { %v1475_v31 = vld [vmem:[%s1588_s9 + $0x16c] ss:$12 sps:$4 sm:$0xff]   ;;  %v1478_v33 = vld [vmem:[%s1588_s9 + $0x168] ss:$12 sps:$4 sm:$0xff]   ;;  %v1488_v41 = vld [vmem:[%s1588_s9 + $0x50] ss:$12 sps:$4 sm:$0xff]  }
  0x17   : > { %1255 = vmatpush3.bf16.msra.mxu0 %v1446_v9  ;;  %1424 = vmatpush3.bf16.msra.mxu1 %v1446_v9  ;;  %v1481_v35 = vld [vmem:[%s1588_s9 + $0x8] ss:$12 sps:$4 sm:$0xff]   ;;  %v1482_v36 = vld [vmem:[%s1588_s9 + $0x60] ss:$12 sps:$4 sm:$0xff]   ;;  %v1486_v39 = vld [vmem:[%s1588_s9 + $0x38] ss:$12 sps:$4 sm:$0xff]  }
  0x18   : > { %1256 = vmatprep.subr.bf16.mxu0 %v1447_v10  ;;  %1417 = vmatprep.subr.bf16.mxu1 %v1447_v10  ;;  %v1483_v37 = vld [vmem:[%s1588_s9 + $0x20] ss:$12 sps:$4 sm:$0xff]   ;;  %v1484_v38 = vld [vmem:[%s1588_s9 + $0x7c] ss:$12 sps:$4 sm:$0xff]   ;;  %v1487_v40 = vld [vmem:[%s1588_s9 + $0x78] ss:$12 sps:$4 sm:$0xff]  }
  0x19   : > { %v1489_v42 = vld [vmem:[%s1588_s9 + $0x94] ss:$12 sps:$4 sm:$0xff]   ;;  %v1492_v44 = vld [vmem:[%s1588_s9 + $0x90] ss:$12 sps:$4 sm:$0xff]   ;;  %v1494_v46 = vld [vmem:[%s1588_s9 + $0xac] ss:$12 sps:$4 sm:$0xff]  }
  0x1a   : > { %v1491_v43 = vld [vmem:[%s1588_s9 + $0x68] ss:$12 sps:$4 sm:$0xff]   ;;  %v1493_v45 = vld [vmem:[%s1588_s9 + $0x80] ss:$12 sps:$4 sm:$0xff]   ;;  %v1496_v47 = vld [vmem:[%s1588_s9 + $0x98] ss:$12 sps:$4 sm:$0xff]  }
  0x1b   : > { %1257 = vmatpush3.bf16.msra.mxu0 %v1448_v13  ;;  %1425 = vmatpush3.bf16.msra.mxu1 %v1448_v13  ;;  %v1497_v48 = vld [vmem:[%s1588_s9 + $0xa8] ss:$12 sps:$4 sm:$0xff]   ;;  %v1498_v49 = vld [vmem:[%s1588_s9 + $0xb0] ss:$12 sps:$4 sm:$0xff]   ;;  %v1502_v52 = vld [vmem:[%s1588_s9 + $0xc0] ss:$12 sps:$4 sm:$0xff]  }
  0x1c   : > { %1258 = vmatprep.subr.bf16.mxu0 %v1449_v14  ;;  %1418 = vmatprep.subr.bf16.mxu1 %v1449_v14  ;;  %v1499_v50 = vld [vmem:[%s1588_s9 + $0xc4] ss:$12 sps:$4 sm:$0xff]   ;;  %v1501_v51 = vld [vmem:[%s1588_s9 + $0xc8] ss:$12 sps:$4 sm:$0xff]   ;;  %v1503_v53 = vld [vmem:[%s1588_s9 + $0xe0] ss:$12 sps:$4 sm:$0xff]  }
  0x1d   : > { %v1504_v54 = vld [vmem:[%s1588_s9 + $0xdc] ss:$12 sps:$4 sm:$0xff]   ;;  %v1506_v55 = vld [vmem:[%s1588_s9 + $0xf8] ss:$12 sps:$4 sm:$0xff]   ;;  %v1509_v58 = vld [vmem:[%s1588_s9 + $0xf4] ss:$12 sps:$4 sm:$0xff]  }
  0x1e   : > { %v1507_v56 = vld [vmem:[%s1588_s9 + $0xd8] ss:$12 sps:$4 sm:$0xff]   ;;  %v1508_v57 = vld [vmem:[%s1588_s9 + $0x110] ss:$12 sps:$4 sm:$0xff]   ;;  %v1511_v59 = vld [vmem:[%s1588_s9 + $0x128] ss:$12 sps:$4 sm:$0xff]  }
  0x1f   : > { %1259 = vmatpush3.bf16.msra.mxu0 %v1450_v15  ;;  %1426 = vmatpush3.bf16.msra.mxu1 %v1450_v15  ;;  %v1512_v60 = vld [vmem:[%s1588_s9 + $0xf0] ss:$12 sps:$4 sm:$0xff]   ;;  %v1513_v61 = vld [vmem:[%s1588_s9 + $0x140] ss:$12 sps:$4 sm:$0xff]   ;;  %v1516_v63 = vld [vmem:[%s1588_s9 + $0x158] ss:$12 sps:$4 sm:$0xff]  }
  0x20   : > { %1260 = vmatprep.subr.bf16.mxu0 %v1451_v16  ;;  %1419 = vmatprep.subr.bf16.mxu1 %v1451_v16  ;;  %v1514_v62 = vld [vmem:[%s1588_s9 + $0x10c] ss:$12 sps:$4 sm:$0xff]   ;;  %v1517_v0 = vld [vmem:[%s1588_s9 + $0x108] ss:$12 sps:$4 sm:$0xff]   ;;  %v1518_v1 = vld [vmem:[%s1588_s9 + $0x170] ss:$12 sps:$4 sm:$0xff]  }
  0x23   : > { %1261 = vmatpush3.bf16.msra.mxu0 %v1452_v17  ;;  %1427 = vmatpush3.bf16.msra.mxu1 %v1452_v17 }
  0x24   : > { %1376 = vmatprep.subr.bf16.mxu1 %v1459_v18 }
  0x26   : > { %762 = vmatmul.mubr.bf16.vlgmr.msra.gmra.mrb[0].mxu0 %v1453_v19  ;;  %858 = vmatmul.mubr.bf16.vlgmr.msra.gmra.mrb[0].mxu1 %v1456_v20 }
  0x27   : > { %1377 = vmatpush3.bf16.msra.mxu1 %v1459_v18  ;;  %769 = vmatprep.mubr.bf16.mxu0 %v1460_v21 }
  0x28   : > { %865 = vmatprep.mubr.bf16.mxu1 %v1462_v22  ;;  %1378 = vmatprep.subr.bf16.mxu1 %v1472_v23 }
  0x2b   : > { %1379 = vmatpush3.bf16.msra.mxu1 %v1472_v23 }
  0x2e   : > { %770 = vmatmul.mubr.bf16.gmra.mrb[4].mxu0 %v1464_v24  ;;  %866 = vmatmul.mubr.bf16.gmra.mrb[4].mxu1 %v1465_v25 }
  0x2f   : > { %777 = vmatprep.mubr.bf16.mxu0 %v1466_v26  ;;  %873 = vmatprep.mubr.bf16.mxu1 %v1468_v27 }
  0x36   : > { %778 = vmatmul.mubr.bf16.gmra.mrb[8].mxu0 %v1470_v28  ;;  %874 = vmatmul.mubr.bf16.gmra.mrb[8].mxu1 %v1471_v29 }
  0x37   : > { %785 = vmatprep.mubr.bf16.mxu0 %v1473_v30  ;;  %881 = vmatprep.mubr.bf16.mxu1 %v1475_v31 }
  0x3e   : > { %786 = vmatmul.mubr.bf16.gmra.mrb[12].mxu0 %v1477_v32  ;;  %882 = vmatmul.mubr.bf16.gmra.mrb[12].mxu1 %v1478_v33 }
  0x3f   : > { %793 = vmatprep.mubr.bf16.mxu0 %v1479_v34  ;;  %1380 = vmatprep.mubr.msk.bf16.mxu1 %vm680_vm0, %v1481_v35 }
  0x46   : > { %794 = vmatmul.mubr.bf16.gmra.mrb[16].mxu0 %v1482_v36  ;;  %1381 = vmatmul.mubr.msk.bf16.vlgmr.msra.gmra.mrb[16].mxu1 %vm680_vm0, %v1483_v37 }
  0x47   : > { %801 = vmatprep.mubr.bf16.mxu0 %v1484_v38  ;;  %1384 = vmatprep.mubr.msk.bf16.mxu1 %vm680_vm0, %v1486_v39 }
  0x4e   : > { %802 = vmatmul.mubr.bf16.gmra.mrb[20].mxu0 %v1487_v40  ;;  %1385 = vmatmul.mubr.msk.bf16.gmra.mrb[20].mxu1 %vm680_vm0, %v1488_v41 }
  0x4f   : > { %809 = vmatprep.mubr.bf16.mxu0 %v1489_v42  ;;  %1388 = vmatprep.mubr.msk.bf16.mxu1 %vm680_vm0, %v1491_v43 }
  0x56   : > { %810 = vmatmul.mubr.bf16.gmra.mrb[24].mxu0 %v1492_v44  ;;  %1389 = vmatmul.mubr.msk.bf16.gmra.mrb[24].mxu1 %vm680_vm0, %v1493_v45 }
  0x57   : > { %817 = vmatprep.mubr.bf16.mxu0 %v1494_v46  ;;  %1392 = vmatprep.mubr.msk.bf16.mxu1 %vm680_vm0, %v1496_v47 }
  0x5e   : > { %818 = vmatmul.mubr.bf16.gmra.mrb[28].mxu0 %v1497_v48  ;;  %1393 = vmatmul.mubr.msk.bf16.gmra.mrb[28].mxu1 %vm680_vm0, %v1498_v49 }
  0x5f   : > { %825 = vmatprep.mubr.bf16.mxu0 %v1499_v50  ;;  %1396 = vmatprep.mubr.msk.bf16.mxu1 %vm680_vm0, %v1501_v51  ;;  %v302_v50 = vld [vmem:[%s1699_s6 + $0x10] sm:$0xff]  ;;  %v300_v51 = vld [vmem:[%s1699_s6] sm:$0xff] }
  0x66   : > { %826 = vmatmul.mubr.bf16.gmra.mrb[32].mxu0 %v1502_v52  ;;  %1397 = vmatmul.mubr.msk.bf16.gmra.mrb[32].mxu1 %vm680_vm0, %v1503_v53  ;;  %v303_v52 = vld [vmem:[%s1699_s6 + $0x18] sm:$0xff] }
  0x67   : > { %833 = vmatprep.mubr.bf16.mxu0 %v1504_v54  ;;  %1400 = vmatprep.mubr.msk.bf16.mxu1 %vm680_vm0, %v1506_v55  ;;  %v301_v54 = vld [vmem:[%s1699_s6 + $0x8] sm:$0xff] }
  0x6e   : > { %834 = vmatmul.mubr.bf16.gmra.mrb[36].mxu0 %v1507_v56  ;;  %1401 = vmatmul.mubr.msk.bf16.gmra.mrb[36].mxu1 %vm680_vm0, %v1508_v57 }
  0x6f   : > { %841 = vmatprep.mubr.bf16.mxu0 %v1509_v58  ;;  %1404 = vmatprep.mubr.msk.bf16.mxu1 %vm680_vm0, %v1511_v59 }
  0x76   : > { %842 = vmatmul.mubr.bf16.gmra.mrb[40].mxu0 %v1512_v60  ;;  %1405 = vmatmul.mubr.msk.bf16.gmra.mrb[40].mxu1 %vm680_vm0, %v1513_v61 }
  0x77   : > { %849 = vmatprep.mubr.bf16.mxu0 %v1514_v62  ;;  %1408 = vmatprep.mubr.msk.bf16.mxu1 %vm680_vm0, %v1516_v63 }
  0x7e   : > { %850 = vmatmul.mubr.bf16.gmra.mrb[44].mxu0 %v1517_v0  ;;  %1409 = vmatmul.mubr.msk.bf16.gmra.mrb[44].mxu1 %vm680_vm0, %v1518_v1 }
  0xf9   : > { %v1262_v2 = vpop.f32.mrb[0].mxu0  ;;  %v1334_v3 = vpop.f32.mrb[0].mxu1 }
  0xfa   : > { %v1263_v4 = vpop.f32.mrb[1].mxu0  ;;  %v1335_v5 = vpop.f32.mrb[1].mxu1 }
  0xfb   : > { %v1264_v6 = vadd.f32 %v1263_v4, %v1262_v2  ;;  %v1265_v7 = vpop.f32.mrb[2].mxu0  ;;  %v1681_v8 = vadd.f32 %v1335_v5, %v1334_v3  ;;  %v1337_v9 = vpop.f32.mrb[2].mxu1 }
  0xfc   : > { %v1266_v10 = vpop.f32.mrb[3].mxu0  ;;  %v1338_v11 = vpop.f32.mrb[3].mxu1 }
  0xfd   : > { %v1267_v12 = vadd.f32 %v1266_v10, %v1265_v7  ;;  %v1683_v13 = vadd.f32 %v1338_v11, %v1337_v9  ;;  %v764_v57 = vadd.f32 %v1264_v6, %v300_v51  ;;  %v306_v9 = vld [vmem:[%s1699_s6 + $0x30] sm:$0xff]  ;;  %v304_v10 = vld [vmem:[%s1699_s6 + $0x20] sm:$0xff]  ;;  %v307_v11 = vld [vmem:[%s1699_s6 + $0x38] sm:$0xff] }
  0xff   : > { %v767_v2 = vadd.f32 %v1267_v12, %v301_v54 }
 0x101   : > { %v1268_v14 = vpop.f32.mrb[4].mxu0  ;;  %v1340_v15 = vpop.f32.mrb[4].mxu1 }
 0x102   : > { %v1269_v16 = vpop.f32.mrb[5].mxu0  ;;  %v1341_v17 = vpop.f32.mrb[5].mxu1 }
 0x103   : > { %v1270_v18 = vadd.f32 %v1269_v16, %v1268_v14  ;;  %v1271_v19 = vpop.f32.mrb[6].mxu0  ;;  %v1685_v20 = vadd.f32 %v1341_v17, %v1340_v15  ;;  %v1343_v21 = vpop.f32.mrb[6].mxu1  ;;  %v305_v15 = vld [vmem:[%s1699_s6 + $0x28] sm:$0xff] }
 0x104   : > { %v1272_v22 = vpop.f32.mrb[7].mxu0  ;;  %v1344_v23 = vpop.f32.mrb[7].mxu1 }
 0x105   : > { %v1273_v24 = vadd.f32 %v1272_v22, %v1271_v19  ;;  %v1687_v25 = vadd.f32 %v1344_v23, %v1343_v21  ;;  %v772_v53 = vadd.f32 %v1270_v18, %v302_v50 }
 0x107   : > { %v775_v61 = vadd.f32 %v1273_v24, %v303_v52 }
 0x109   : > { %v1274_v26 = vpop.f32.mrb[8].mxu0  ;;  %v1346_v27 = vpop.f32.mrb[8].mxu1 }
 0x10a   : > { %v1275_v28 = vpop.f32.mrb[9].mxu0  ;;  %v1347_v29 = vpop.f32.mrb[9].mxu1 }
 0x10b   : > { %v1276_v30 = vadd.f32 %v1275_v28, %v1274_v26  ;;  %v1277_v31 = vpop.f32.mrb[10].mxu0  ;;  %v1689_v32 = vadd.f32 %v1347_v29, %v1346_v27  ;;  %v1349_v33 = vpop.f32.mrb[10].mxu1 }
 0x10c   : > { %v1278_v34 = vpop.f32.mrb[11].mxu0  ;;  %v1350_v35 = vpop.f32.mrb[11].mxu1 }
 0x10d   : > { %v1279_v36 = vadd.f32 %v1278_v34, %v1277_v31  ;;  %v1691_v37 = vadd.f32 %v1350_v35, %v1349_v33  ;;  %v780_v17 = vadd.f32 %v1276_v30, %v304_v10  ;;  %v310_v35 = vld [vmem:[%s1699_s6 + $0x50] sm:$0xff]  ;;  %v315_v10 = vld [vmem:[%s1699_s6 + $0x78] sm:$0xff] }
 0x10f   : > { %v783_v28 = vadd.f32 %v1279_v36, %v305_v15 }
 0x111   : > { %v1280_v38 = vpop.f32.mrb[12].mxu0  ;;  %v1352_v39 = vpop.f32.mrb[12].mxu1 }
 0x112   : > { %v1281_v40 = vpop.f32.mrb[13].mxu0  ;;  %v1353_v41 = vpop.f32.mrb[13].mxu1 }
 0x113   : > { %v1282_v42 = vadd.f32 %v1281_v40, %v1280_v38  ;;  %v1283_v43 = vpop.f32.mrb[14].mxu0  ;;  %v1694_v44 = vadd.f32 %v1353_v41, %v1352_v39  ;;  %v1355_v45 = vpop.f32.mrb[14].mxu1  ;;  %v308_v38 = vld [vmem:[%s1699_s6 + $0x40] sm:$0xff]  ;;  %v311_v39 = vld [vmem:[%s1699_s6 + $0x58] sm:$0xff]  ;;  %v309_v41 = vld [vmem:[%s1699_s6 + $0x48] sm:$0xff] }
 0x114   : > { %v1284_v46 = vpop.f32.mrb[15].mxu0  ;;  %v1356_v47 = vpop.f32.mrb[15].mxu1 }
 0x115   : > { %v1285_v48 = vadd.f32 %v1284_v46, %v1283_v43  ;;  %v1701_v49 = vadd.f32 %v1356_v47, %v1355_v45  ;;  %v788_v14 = vadd.f32 %v1282_v42, %v306_v9 }
 0x117   : > { %v791_v22 = vadd.f32 %v1285_v48, %v307_v11 }
 0x119   : > { %v1286_v55 = vpop.f32.mrb[16].mxu0  ;;  %v1382_v56 = vpop.f32.mrb[16].mxu1 }
 0x11a   : > { %v933_v58 = vadd.f32 %v1382_v56, %v772_v53  ;;  %v1287_v59 = vpop.f32.mrb[17].mxu0  ;;  %v924_v60 = vpop.f32.mrb[17].mxu1 }
 0x11b   : > { %v1288_v62 = vadd.f32 %v1287_v59, %v1286_v55  ;;  %v925_v63 = vadd.f32 %v924_v60, %v764_v57  ;;  %v1289_v0 = vpop.f32.mrb[18].mxu0  ;;  %v1383_v1 = vpop.f32.mrb[18].mxu1  ;;  %v312_v60 = vld [vmem:[%s1699_s6 + $0x60] sm:$0xff] }
 0x11c   : > { %1053 = vst.msk [vmem:[%s1710_s8 + $0x10] sm:$0xff] %vm680_vm0, %v933_v58  ;;  %v936_v3 = vadd.f32 %v1383_v1, %v775_v61  ;;  %v1290_v4 = vpop.f32.mrb[19].mxu0  ;;  %v927_v5 = vpop.f32.mrb[19].mxu1  ;;  %v313_v61 = vld [vmem:[%s1699_s6 + $0x68] sm:$0xff]  ;;  %v314_v1 = vld [vmem:[%s1699_s6 + $0x70] sm:$0xff] }
 0x11d   : > { %1051 = vst.msk [vmem:[%s1710_s8] sm:$0xff] %vm680_vm0, %v925_v63  ;;  %v1291_v6 = vadd.f32 %v1290_v4, %v1289_v0  ;;  %v928_v7 = vadd.f32 %v927_v5, %v767_v2  ;;  %v796_v43 = vadd.f32 %v1288_v62, %v308_v38 }
 0x11e   : > { %1054 = vst.msk [vmem:[%s1710_s8 + $0x18] sm:$0xff] %vm680_vm0, %v936_v3 }
 0x11f   : > { %1052 = vst.msk [vmem:[%s1710_s8 + $0x8] sm:$0xff] %vm680_vm0, %v928_v7  ;;  %v799_v54 = vadd.f32 %v1291_v6, %v309_v41 }
 0x121   : > { %v1292_v12 = vpop.f32.mrb[20].mxu0  ;;  %v1386_v16 = vpop.f32.mrb[20].mxu1 }
 0x122   : > { %v949_v18 = vadd.f32 %v1386_v16, %v788_v14  ;;  %v1293_v19 = vpop.f32.mrb[21].mxu0  ;;  %v940_v21 = vpop.f32.mrb[21].mxu1 }
 0x123   : > { %v1294_v23 = vadd.f32 %v1293_v19, %v1292_v12  ;;  %v941_v24 = vadd.f32 %v940_v21, %v780_v17  ;;  %v1295_v26 = vpop.f32.mrb[22].mxu0  ;;  %v1387_v27 = vpop.f32.mrb[22].mxu1 }
 0x124   : > { %1057 = vst.msk [vmem:[%s1710_s8 + $0x30] sm:$0xff] %vm680_vm0, %v949_v18  ;;  %v952_v29 = vadd.f32 %v1387_v27, %v791_v22  ;;  %v1296_v31 = vpop.f32.mrb[23].mxu0  ;;  %v943_v30 = vpop.f32.mrb[23].mxu1 }
 0x125   : > { %1055 = vst.msk [vmem:[%s1710_s8 + $0x20] sm:$0xff] %vm680_vm0, %v941_v24  ;;  %v1297_v33 = vadd.f32 %v1296_v31, %v1295_v26  ;;  %v944_v34 = vadd.f32 %v943_v30, %v783_v28  ;;  %v804_v40 = vadd.f32 %v1294_v23, %v310_v35  ;;  %v316_v24 = vld [vmem:[%s1699_s6 + $0x80] sm:$0xff]  ;;  %v317_v30 = vld [vmem:[%s1699_s6 + $0x88] sm:$0xff] }
 0x126   : > { %1058 = vst.msk [vmem:[%s1710_s8 + $0x38] sm:$0xff] %vm680_vm0, %v952_v29 }
 0x127   : > { %1056 = vst.msk [vmem:[%s1710_s8 + $0x28] sm:$0xff] %vm680_vm0, %v944_v34  ;;  %v807_v48 = vadd.f32 %v1297_v33, %v311_v39 }
 0x129   : > { %v1298_v36 = vpop.f32.mrb[24].mxu0  ;;  %v1390_v42 = vpop.f32.mrb[24].mxu1 }
 0x12a   : > { %v965_v45 = vadd.f32 %v1390_v42, %v804_v40  ;;  %v1299_v46 = vpop.f32.mrb[25].mxu0  ;;  %v956_v47 = vpop.f32.mrb[25].mxu1  ;;  %v318_v42 = vld [vmem:[%s1699_s6 + $0x90] sm:$0xff] }
 0x12b   : > { %v1300_v50 = vadd.f32 %v1299_v46, %v1298_v36  ;;  %v957_v51 = vadd.f32 %v956_v47, %v796_v43  ;;  %v1301_v52 = vpop.f32.mrb[26].mxu0  ;;  %v1391_v53 = vpop.f32.mrb[26].mxu1 }
 0x12c   : > { %1061 = vst.msk [vmem:[%s1710_s8 + $0x50] sm:$0xff] %vm680_vm0, %v965_v45  ;;  %v968_v55 = vadd.f32 %v1391_v53, %v807_v48  ;;  %v1302_v56 = vpop.f32.mrb[27].mxu0  ;;  %v959_v57 = vpop.f32.mrb[27].mxu1 }
 0x12d   : > { %1059 = vst.msk [vmem:[%s1710_s8 + $0x40] sm:$0xff] %vm680_vm0, %v957_v51  ;;  %v1303_v58 = vadd.f32 %v1302_v56, %v1301_v52  ;;  %v960_v59 = vadd.f32 %v959_v57, %v799_v54  ;;  %v812_v0 = vadd.f32 %v1300_v50, %v312_v60  ;;  %v319_v50 = vld [vmem:[%s1699_s6 + $0x98] sm:$0xff]  ;;  %v324_v56 = vld [vmem:[%s1699_s6 + $0xc0] sm:$0xff] }
 0x12e   : > { %1062 = vst.msk [vmem:[%s1710_s8 + $0x58] sm:$0xff] %vm680_vm0, %v968_v55  ;;  %v326_v55 = vld [vmem:[%s1699_s6 + $0xd0] sm:$0xff] }
 0x12f   : > { %1060 = vst.msk [vmem:[%s1710_s8 + $0x48] sm:$0xff] %vm680_vm0, %v960_v59  ;;  %v815_v9 = vadd.f32 %v1303_v58, %v313_v61  ;;  %v327_v59 = vld [vmem:[%s1699_s6 + $0xd8] sm:$0xff]  ;;  %v868_v60 = vadd.f32 %v1685_v20, %v326_v55  ;;  %v325_v61 = vld [vmem:[%s1699_s6 + $0xc8] sm:$0xff] }
 0x131   : > { %v1304_v62 = vpop.f32.mrb[28].mxu0  ;;  %v1394_v63 = vpop.f32.mrb[28].mxu1 }
 0x132   : > { %v1305_v2 = vpop.f32.mrb[29].mxu0  ;;  %v972_v3 = vpop.f32.mrb[29].mxu1 }
 0x133   : > { %v1306_v4 = vadd.f32 %v1305_v2, %v1304_v62  ;;  %v973_v5 = vadd.f32 %v972_v3, %v812_v0  ;;  %v1307_v6 = vpop.f32.mrb[30].mxu0  ;;  %v1395_v7 = vpop.f32.mrb[30].mxu1  ;;  %v320_v3 = vld [vmem:[%s1699_s6 + $0xa0] sm:$0xff] }
 0x134   : > { %v1308_v11 = vpop.f32.mrb[31].mxu0  ;;  %v975_v14 = vpop.f32.mrb[31].mxu1 }
 0x135   : > { %v820_v15 = vadd.f32 %v1306_v4, %v314_v1  ;;  %1063 = vst.msk [vmem:[%s1710_s8 + $0x60] sm:$0xff] %vm680_vm0, %v973_v5  ;;  %v1309_v12 = vadd.f32 %v1308_v11, %v1307_v6  ;;  %v976_v16 = vadd.f32 %v975_v14, %v815_v9  ;;  %v860_v1 = vadd.f32 %v1681_v8, %v324_v56  ;;  %v321_v14 = vld [vmem:[%s1699_s6 + $0xa8] sm:$0xff] }
 0x136   : > { %v871_v6 = vadd.f32 %v1687_v25, %v327_v59  ;;  %v863_v11 = vadd.f32 %v1683_v13, %v325_v61 }
 0x137   : > { %v981_v17 = vadd.f32 %v1394_v63, %v820_v15  ;;  %v823_v18 = vadd.f32 %v1309_v12, %v315_v10  ;;  %1064 = vst.msk [vmem:[%s1710_s8 + $0x68] sm:$0xff] %vm680_vm0, %v976_v16 }
 0x139   : > { %1065 = vst.msk [vmem:[%s1710_s8 + $0x70] sm:$0xff] %vm680_vm0, %v981_v17  ;;  %v984_v19 = vadd.f32 %v1395_v7, %v823_v18  ;;  %v1310_v21 = vpop.f32.mrb[32].mxu0  ;;  %v1398_v22 = vpop.f32.mrb[32].mxu1  ;;  %v330_v18 = vld [vmem:[%s1699_s6 + $0xf0] sm:$0xff] }
 0x13a   : > { %v1311_v23 = vpop.f32.mrb[33].mxu0  ;;  %v988_v26 = vpop.f32.mrb[33].mxu1 }
 0x13b   : > { %1066 = vst.msk [vmem:[%s1710_s8 + $0x78] sm:$0xff] %vm680_vm0, %v984_v19  ;;  %v1312_v27 = vadd.f32 %v1311_v23, %v1310_v21  ;;  %v1313_v28 = vpop.f32.mrb[34].mxu0  ;;  %v1399_v29 = vpop.f32.mrb[34].mxu1  ;;  %v328_v19 = vld [vmem:[%s1699_s6 + $0xe0] sm:$0xff]  ;;  %v884_v23 = vadd.f32 %v1694_v44, %v330_v18 }
 0x13c   : > { %v1314_v31 = vpop.f32.mrb[35].mxu0  ;;  %v991_v33 = vpop.f32.mrb[35].mxu1 }
 0x13d   : > { %v828_v34 = vadd.f32 %v1312_v27, %v316_v24  ;;  %v1315_v35 = vadd.f32 %v1314_v31, %v1313_v28  ;;  %v329_v24 = vld [vmem:[%s1699_s6 + $0xe8] sm:$0xff] }
 0x13f   : > { %v989_v38 = vadd.f32 %v988_v26, %v828_v34  ;;  %v831_v39 = vadd.f32 %v1315_v35, %v317_v30  ;;  %v322_v30 = vld [vmem:[%s1699_s6 + $0xb0] sm:$0xff] }
 0x141   : > { %1067 = vst.msk [vmem:[%s1710_s8 + $0x80] sm:$0xff] %vm680_vm0, %v989_v38  ;;  %v992_v40 = vadd.f32 %v991_v33, %v831_v39  ;;  %v1316_v41 = vpop.f32.mrb[36].mxu0  ;;  %v1760_v36 = vpop.f32.mrb[36].mxu1 }
 0x142   : > { %v1317_v43 = vpop.f32.mrb[37].mxu0  ;;  %v1004_v45 = vpop.f32.mrb[37].mxu1 }
 0x143   : > { %1068 = vst.msk [vmem:[%s1710_s8 + $0x88] sm:$0xff] %vm680_vm0, %v992_v40  ;;  %v1318_v46 = vadd.f32 %v1317_v43, %v1316_v41  ;;  %v1319_v47 = vpop.f32.mrb[38].mxu0  ;;  %v1765_v48 = vpop.f32.mrb[38].mxu1  ;;  %v879_v41 = vadd.f32 %v1691_v37, %v329_v24 }
 0x144   : > { %v1320_v51 = vpop.f32.mrb[39].mxu0  ;;  %v1007_v52 = vpop.f32.mrb[39].mxu1 }
 0x145   : > { %v836_v53 = vadd.f32 %v1318_v46, %v318_v42  ;;  %v1321_v54 = vadd.f32 %v1320_v51, %v1319_v47  ;;  %v323_v42 = vld [vmem:[%s1699_s6 + $0xb8] sm:$0xff] }
 0x147   : > { %v997_v57 = vadd.f32 %v1398_v22, %v836_v53  ;;  %v839_v58 = vadd.f32 %v1321_v54, %v319_v50  ;;  %v331_v22 = vld [vmem:[%s1699_s6 + $0xf8] sm:$0xff] }
 0x148   : > { %v887_v35 = vadd.f32 %v1701_v49, %v331_v22 }
 0x149   : > { %1069 = vst.msk [vmem:[%s1710_s8 + $0x90] sm:$0xff] %vm680_vm0, %v997_v57  ;;  %v1000_v62 = vadd.f32 %v1399_v29, %v839_v58  ;;  %v1322_v63 = vpop.f32.mrb[40].mxu0  ;;  %v1406_v0 = vpop.f32.mrb[40].mxu1  ;;  %v876_v29 = vadd.f32 %v1689_v32, %v328_v19 }
 0x14a   : > { %v1029_v2 = vadd.f32 %v1406_v0, %v868_v60  ;;  %v1323_v4 = vpop.f32.mrb[41].mxu0  ;;  %v1020_v5 = vpop.f32.mrb[41].mxu1 }
 0x14b   : > { %1070 = vst.msk [vmem:[%s1710_s8 + $0x98] sm:$0xff] %vm680_vm0, %v1000_v62  ;;  %v1324_v20 = vadd.f32 %v1323_v4, %v1322_v63  ;;  %v1021_v7 = vadd.f32 %v1020_v5, %v860_v1  ;;  %v1325_v9 = vpop.f32.mrb[42].mxu0  ;;  %v1407_v10 = vpop.f32.mrb[42].mxu1 }
 0x14c   : > { %1077 = vst.msk [vmem:[%s1710_s8 + $0xd0] sm:$0xff] %vm680_vm0, %v1029_v2  ;;  %v1032_v8 = vadd.f32 %v1407_v10, %v871_v6  ;;  %v1326_v25 = vpop.f32.mrb[43].mxu0  ;;  %v1023_v15 = vpop.f32.mrb[43].mxu1 }
 0x14d   : > { %v844_v12 = vadd.f32 %v1324_v20, %v320_v3  ;;  %1075 = vst.msk [vmem:[%s1710_s8 + $0xc0] sm:$0xff] %vm680_vm0, %v1021_v7  ;;  %v1327_v16 = vadd.f32 %v1326_v25, %v1325_v9  ;;  %v1024_v17 = vadd.f32 %v1023_v15, %v863_v11 }
 0x14e   : > { %1078 = vst.msk [vmem:[%s1710_s8 + $0xd8] sm:$0xff] %vm680_vm0, %v1032_v8 }
 0x14f   : > { %v1005_v13 = vadd.f32 %v1004_v45, %v844_v12  ;;  %v847_v21 = vadd.f32 %v1327_v16, %v321_v14  ;;  %1076 = vst.msk [vmem:[%s1710_s8 + $0xc8] sm:$0xff] %vm680_vm0, %v1024_v17 }
 0x151   : > { %1071 = vst.msk [vmem:[%s1710_s8 + $0xa0] sm:$0xff] %vm680_vm0, %v1005_v13  ;;  %v1008_v26 = vadd.f32 %v1007_v52, %v847_v21  ;;  %v1328_v27 = vpop.f32.mrb[44].mxu0  ;;  %v1410_v28 = vpop.f32.mrb[44].mxu1 }
 0x152   : > { %v1045_v31 = vadd.f32 %v1410_v28, %v884_v23  ;;  %v1329_v33 = vpop.f32.mrb[45].mxu0  ;;  %v1036_v34 = vpop.f32.mrb[45].mxu1 }
 0x153   : > { %1072 = vst.msk [vmem:[%s1710_s8 + $0xa8] sm:$0xff] %vm680_vm0, %v1008_v26  ;;  %v1330_v44 = vadd.f32 %v1329_v33, %v1328_v27  ;;  %v1037_v38 = vadd.f32 %v1036_v34, %v876_v29  ;;  %v1331_v39 = vpop.f32.mrb[46].mxu0  ;;  %v1411_v40 = vpop.f32.mrb[46].mxu1 }
 0x154   : > { %1081 = vst.msk [vmem:[%s1710_s8 + $0xf0] sm:$0xff] %vm680_vm0, %v1045_v31  ;;  %v1048_v32 = vadd.f32 %v1411_v40, %v887_v35  ;;  %v1332_v43 = vpop.f32.mrb[47].mxu0  ;;  %v1039_v45 = vpop.f32.mrb[47].mxu1 }
 0x155   : > { %v852_v46 = vadd.f32 %v1330_v44, %v322_v30  ;;  %1079 = vst.msk [vmem:[%s1710_s8 + $0xe0] sm:$0xff] %vm680_vm0, %v1037_v38  ;;  %v1333_v49 = vadd.f32 %v1332_v43, %v1331_v39  ;;  %v1040_v47 = vadd.f32 %v1039_v45, %v879_v41 }
 0x156   : > { %1082 = vst.msk [vmem:[%s1710_s8 + $0xf8] sm:$0xff] %vm680_vm0, %v1048_v32 }
 0x157   : > { %v1013_v50 = vadd.f32 %v1760_v36, %v852_v46  ;;  %v855_v51 = vadd.f32 %v1333_v49, %v323_v42  ;;  %1080 = vst.msk [vmem:[%s1710_s8 + $0xe8] sm:$0xff] %vm680_vm0, %v1040_v47 }
 0x159   : > { %1073 = vst.msk [vmem:[%s1710_s8 + $0xb0] sm:$0xff] %vm680_vm0, %v1013_v50  ;;  %v1016_v37 = vadd.f32 %v1765_v48, %v855_v51 }
 0x15b   : > { %1074 = vst.msk [vmem:[%s1710_s8 + $0xb8] sm:$0xff] %vm680_vm0, %v1016_v37 }
 0x15c PF: > { %s13_s12 = sadd.s32 1, %s1525_s12  }
 0x15d   : > { %p10_p4 = scmp.ge.s32.totalorder %s13_s12, 4  }
 0x15f   :  { %12 = sbr.rel (!%p10_p4) target bundleno = 1 (0x1), region = 65 }

// kernel: wideresnet_forward.23
= control target key start
LH: loop header
LB: loop body
LE: loop exit
PB: predicated region body
PF: predicated region fallthrough
CT: control target
= control target key end

     0   :  { %s932_s15 = smov 0   ;;  %s1069_s0 = inlined_call_operand.vmem [shape: bf16[128,288], index: 0, kind: input, shape index: {}]   ;;  %s1070_s1 = inlined_call_operand.vmem [shape: bf16[288,64], index: 1, kind: input, shape index: {}]   ;;  %s1071_s2 = inlined_call_operand.vmem [shape: f32[1,64], index: 2, kind: input, shape index: {}]   ;;  %s1072_s3 = inlined_call_operand.vmem [shape: f32[1,64], index: 3, kind: input, shape index: {}]   ;;  %s1073_s4 = inlined_call_operand.vmem [shape: bf16[128,64], index: 4, kind: output, shape index: {}]  }
   0x1 LB: > { %s719_s16 = sadd.s32 4294967295, %s905_s15   ;;  %p723_p0 = scmp.ge.s32.totalorder %s905_s15, 1  ;;  %s905_s15 = sphi %s932_s15, %s14_s15  }
   0x2   : > { %p164_p1 = scmp.lt.s32.totalorder %s905_s15, 3 }
   0x4   : > { %p165_p2 = pnand %p723_p0, %p164_p1 }
   0x5   : > { %v865_v0 = vld [vmem:[%s1070_s1 + $0x40] sm:$0xff] (!%p165_p2)   ;;  %s724_s19 = sshll.u32 (!%p165_p2), %s719_s16, 3  ;;  %v867_v2 = vld [vmem:[%s1070_s1 + $0x48] sm:$0xff] (!%p165_p2)   ;;  %v869_v4 = vld [vmem:[%s1070_s1 + $0x50] sm:$0xff] (!%p165_p2)   ;;  %vm425_vm0 = vcmask (!%p165_p2), 261120   ;;  %vm654_vm2 = vcmask (!%p165_p2), 519168  }
   0x6   : > { %168 = sbr.rel (%p165_p2) target bundleno = 285 (0x11d), region = 36  ;;  %v866_v1 = vld [vmem:[%s1070_s1] sm:$0xff] (!%p165_p2)   ;;  %782 = vmatprep.subr.bf16.mxu0 (!%p165_p2), %v865_v0  ;;  %840 = vmatprep.subr.bf16.mxu1 (!%p165_p2), %v865_v0  ;;  %p192_p3 = scmp.lt.s32.totalorder (!%p165_p2), %s724_s19, 15  ;;  %v868_v3 = vld [vmem:[%s1070_s1 + $0x8] sm:$0xff] (!%p165_p2)   ;;  %v870_v5 = vld [vmem:[%s1070_s1 + $0x10] sm:$0xff] (!%p165_p2)  }
   0x7   : > { %783 = vmatpush3.bf16.msra.mxu0 (!%p165_p2), %v866_v1  ;;  %848 = vmatpush3.bf16.msra.mxu1 (!%p165_p2), %v866_v1  ;;  %v871_v6 = vld [vmem:[%s1070_s1 + $0x58] sm:$0xff] (!%p165_p2)   ;;  %v873_v8 = vld [vmem:[%s1070_s1 + $0x60] sm:$0xff] (!%p165_p2)   ;;  %v875_v10 = vld [vmem:[%s1070_s1 + $0x68] sm:$0xff] (!%p165_p2)  }
   0x8   : > { %784 = vmatprep.subr.bf16.mxu0 (!%p165_p2), %v867_v2  ;;  %841 = vmatprep.subr.bf16.mxu1 (!%p165_p2), %v867_v2  ;;  %v872_v7 = vld [vmem:[%s1070_s1 + $0x18] sm:$0xff] (!%p165_p2)   ;;  %v874_v9 = vld [vmem:[%s1070_s1 + $0x20] sm:$0xff] (!%p165_p2)   ;;  %v876_v13 = vld [vmem:[%s1070_s1 + $0x28] sm:$0xff] (!%p165_p2)  }
   0x9   : > { %v877_v14 = vld [vmem:[%s1070_s1 + $0x70] sm:$0xff] (!%p165_p2)   ;;  %v879_v16 = vld [vmem:[%s1070_s1 + $0x78] sm:$0xff] (!%p165_p2)   ;;  %v887_v18 = vld [vmem:[%s1070_s1 + $0x80] sm:$0xff] (!%p165_p2)  }
   0xa   : > { %v878_v15 = vld [vmem:[%s1070_s1 + $0x30] sm:$0xff] (!%p165_p2)   ;;  %v880_v17 = vld [vmem:[%s1070_s1 + $0x38] sm:$0xff] (!%p165_p2)   ;;  %v888_v22 = vld [vmem:[%s1070_s1 + $0x88] sm:$0xff] (!%p165_p2)  }
   0xb   : > { %785 = vmatpush3.bf16.msra.mxu0 (!%p165_p2), %v868_v3  ;;  %849 = vmatpush3.bf16.msra.mxu1 (!%p165_p2), %v868_v3  ;;  %v1021_v45 = vld [vmem:[%s1071_s2] ss:$0 sm:$0xff] (!%p165_p2) }
   0xc   : > { %786 = vmatprep.subr.bf16.mxu0 (!%p165_p2), %v869_v4  ;;  %842 = vmatprep.subr.bf16.mxu1 (!%p165_p2), %v869_v4  ;;  %v1026_v51 = vld [vmem:[%s1072_s3] ss:$0 sm:$0xff] (!%p165_p2) }
   0xd   : > { %s1075_s19 = smov (!%p192_p3, %s724_s19), 15 }
   0xe   : > { %s856_s6 = smul.u32 12, %s1075_s19  ;;  %s727_s12 = sshll.u32 %s1075_s19, 2 }
   0xf   : > { %787 = vmatpush3.bf16.msra.mxu0 %v870_v5  ;;  %850 = vmatpush3.bf16.msra.mxu1 %v870_v5  ;;  %s1039_s16 = scalar_lea.vmem %s1073_s4, %s727_s12 }
  0x10   : > { %788 = vmatprep.subr.bf16.mxu0 %v871_v6  ;;  %843 = vmatprep.subr.bf16.mxu1 %v871_v6  ;;  %s973_s13 = scalar_lea.vmem %s1069_s0, %s856_s6 }
  0x11   : > { %v883_v11 = vld [vmem:[%s973_s13 + $0x4] ss:$12 sps:$4 sm:$0xff]   ;;  %v886_v12 = vld [vmem:[%s973_s13 + $0x4c] ss:$12 sps:$4 sm:$0xff]   ;;  %v884_v20 = vld [vmem:[%s973_s13 + $0x48] ss:$12 sps:$4 sm:$0xff]  }
  0x12   : > { %470 = vmatprep.mubr.bf16.mxu0 %v883_v11  ;;  %494 = vmatprep.mubr.bf16.mxu1 %v886_v12  ;;  %v881_v19 = vld [vmem:[%s973_s13] ss:$12 sps:$4 sm:$0xff]   ;;  %v889_v21 = vld [vmem:[%s973_s13 + $0x1c] ss:$12 sps:$4 sm:$0xff]   ;;  %v892_v24 = vld [vmem:[%s973_s13 + $0x18] ss:$12 sps:$4 sm:$0xff]  }
  0x13   : > { %789 = vmatpush3.bf16.msra.mxu0 %v872_v7  ;;  %851 = vmatpush3.bf16.msra.mxu1 %v872_v7  ;;  %v891_v23 = vld [vmem:[%s973_s13 + $0x8] ss:$12 sps:$4 sm:$0xff]   ;;  %v893_v25 = vld [vmem:[%s973_s13 + $0x20] ss:$12 sps:$4 sm:$0xff]   ;;  %v896_v27 = vld [vmem:[%s973_s13 + $0x38] ss:$12 sps:$4 sm:$0xff]  }
  0x14   : > { %790 = vmatprep.subr.bf16.mxu0 %v873_v8  ;;  %844 = vmatprep.subr.bf16.mxu1 %v873_v8  ;;  %v894_v26 = vld [vmem:[%s973_s13 + $0x34] ss:$12 sps:$4 sm:$0xff]   ;;  %v897_v28 = vld [vmem:[%s973_s13 + $0x30] ss:$12 sps:$4 sm:$0xff]  }
  0x15   : > { %v898_v29 = vld [vmem:[%s973_s13 + $0x50] ss:$12 sps:$4 sm:$0xff]  }
  0x17   : > { %791 = vmatpush3.bf16.msra.mxu0 %v874_v9  ;;  %852 = vmatpush3.bf16.msra.mxu1 %v874_v9 }
  0x18   : > { %792 = vmatprep.subr.bf16.mxu0 %v875_v10  ;;  %845 = vmatprep.subr.bf16.mxu1 %v875_v10 }
  0x1b   : > { %793 = vmatpush3.bf16.msra.mxu0 %v876_v13  ;;  %853 = vmatpush3.bf16.msra.mxu1 %v876_v13 }
  0x1c   : > { %794 = vmatprep.subr.bf16.mxu0 %v877_v14  ;;  %846 = vmatprep.subr.bf16.mxu1 %v877_v14 }
  0x1f   : > { %795 = vmatpush3.bf16.msra.mxu0 %v878_v15  ;;  %854 = vmatpush3.bf16.msra.mxu1 %v878_v15 }
  0x20   : > { %796 = vmatprep.subr.bf16.mxu0 %v879_v16  ;;  %847 = vmatprep.subr.bf16.mxu1 %v879_v16 }
  0x23   : > { %797 = vmatpush3.bf16.msra.mxu0 %v880_v17  ;;  %855 = vmatpush3.bf16.msra.mxu1 %v880_v17 }
  0x24   : > { %828 = vmatprep.subr.bf16.mxu1 %v887_v18 }
  0x26   : > { %471 = vmatmul.mubr.bf16.vlgmr.msra.gmra.mrb[0].mxu0 %v881_v19  ;;  %495 = vmatmul.mubr.bf16.vlgmr.msra.gmra.mrb[0].mxu1 %v884_v20 }
  0x27   : > { %829 = vmatpush3.bf16.msra.mxu1 %v887_v18  ;;  %478 = vmatprep.mubr.bf16.mxu0 %v889_v21 }
  0x28   : > { %830 = vmatprep.subr.bf16.mxu1 %v888_v22  ;;  %832 = vmatprep.mubr.msk.bf16.mxu1 %vm425_vm0, %v891_v23 }
  0x2b   : > { %831 = vmatpush3.bf16.msra.mxu1 %v888_v22 }
  0x2e   : > { %479 = vmatmul.mubr.bf16.gmra.mrb[4].mxu0 %v892_v24  ;;  %833 = vmatmul.mubr.msk.bf16.vlgmr.msra.gmra.mrb[4].mxu1 %vm425_vm0, %v893_v25 }
  0x2f   : > { %486 = vmatprep.mubr.bf16.mxu0 %v894_v26  ;;  %836 = vmatprep.mubr.msk.bf16.mxu1 %vm425_vm0, %v896_v27 }
  0x36   : > { %487 = vmatmul.mubr.bf16.gmra.mrb[8].mxu0 %v897_v28  ;;  %837 = vmatmul.mubr.msk.bf16.gmra.mrb[8].mxu1 %vm425_vm0, %v898_v29 }
  0xf9   : > { %v798_v30 = vpop.f32.mrb[0].mxu0  ;;  %v816_v31 = vpop.f32.mrb[0].mxu1 }
  0xfa   : > { %v799_v32 = vpop.f32.mrb[1].mxu0  ;;  %v817_v33 = vpop.f32.mrb[1].mxu1 }
  0xfb   : > { %v800_v34 = vadd.f32 %v799_v32, %v798_v30  ;;  %v818_v35 = vadd.f32 %v817_v33, %v816_v31  ;;  %v801_v36 = vpop.f32.mrb[2].mxu0  ;;  %v819_v37 = vpop.f32.mrb[2].mxu1 }
  0xfc   : > { %v802_v38 = vpop.f32.mrb[3].mxu0  ;;  %v820_v39 = vpop.f32.mrb[3].mxu1 }
  0xfd   : > { %v803_v40 = vadd.f32 %v802_v38, %v801_v36  ;;  %v821_v41 = vadd.f32 %v820_v39, %v819_v37 }
 0x101   : > { %v804_v42 = vpop.f32.mrb[4].mxu0  ;;  %v834_v43 = vpop.f32.mrb[4].mxu1 }
 0x102   : > { %v805_v44 = vpop.f32.mrb[5].mxu0  ;;  %v537_v46 = vpop.f32.mrb[5].mxu1 }
 0x103   : > { %v806_v47 = vadd.f32 %v805_v44, %v804_v42  ;;  %v538_v48 = vadd.f32 %v800_v34, %v537_v46  ;;  %v807_v49 = vpop.f32.mrb[6].mxu0  ;;  %v835_v50 = vpop.f32.mrb[6].mxu1 }
 0x104   : > { %v808_v52 = vpop.f32.mrb[7].mxu0  ;;  %v540_v53 = vpop.f32.mrb[7].mxu1 }
 0x105   : > { %v546_v54 = vadd.f32 %v834_v43, %v806_v47  ;;  %v575_v55 = vmul.f32 %v1021_v45, %v538_v48  ;;  %v809_v56 = vadd.f32 %v808_v52, %v807_v49  ;;  %v541_v57 = vadd.f32 %v803_v40, %v540_v53 }
 0x107   : > { %v577_v58 = vmul.f32 %v1021_v45, %v546_v54  ;;  %v590_v59 = vadd.f32 %v1026_v51, %v575_v55  ;;  %v549_v60 = vadd.f32 %v835_v50, %v809_v56  ;;  %v576_v61 = vmul.f32 %v1021_v45, %v541_v57 }
 0x109   : > { %v592_v62 = vadd.f32 %v1026_v51, %v577_v58  ;;  %vm598_vm1 = vcmp.ge.f32.partialorder %v590_v59, 0.0  ;;  %v606_v63 = vmul.f32 0.1, %v590_v59  ;;  %v578_v0 = vmul.f32 %v1021_v45, %v549_v60  ;;  %v810_v1 = vpop.f32.mrb[8].mxu0  ;;  %v838_v2 = vpop.f32.mrb[8].mxu1 }
 0x10a   : > { %v591_v3 = vadd.f32 %v1026_v51, %v576_v61  ;;  %v562_v4 = vadd.f32 %v838_v2, %v818_v35  ;;  %v811_v5 = vpop.f32.mrb[9].mxu0  ;;  %v553_v6 = vpop.f32.mrb[9].mxu1 }
 0x10b   : > { %vm600_vm3 = vcmp.ge.f32.partialorder %v592_v62, 0.0  ;;  %v608_v7 = vmul.f32 0.1, %v592_v62  ;;  %v614_v8 = vsel %vm598_vm1, %v590_v59, %v606_v63  ;;  %v593_v9 = vadd.f32 %v1026_v51, %v578_v0  ;;  %v813_v10 = vpop.f32.mrb[10].mxu0  ;;  %v839_v11 = vpop.f32.mrb[10].mxu1 }
 0x10c   : > { %v774_v12 = vpack.c.bf16 %v614_v8, %v614_v8  ;;  %vm599_vm4 = vcmp.ge.f32.partialorder %v591_v3, 0.0  ;;  %v607_v13 = vmul.f32 0.1, %v591_v3  ;;  %v581_v14 = vmul.f32 %v1021_v45, %v562_v4  ;;  %v814_v15 = vpop.f32.mrb[11].mxu0  ;;  %v556_v16 = vpop.f32.mrb[11].mxu1 }
 0x10d   : > { %v616_v17 = vsel %vm600_vm3, %v592_v62, %v608_v7  ;;  %vm601_vm5 = vcmp.ge.f32.partialorder %v593_v9, 0.0  ;;  %v609_v18 = vmul.f32 0.1, %v593_v9  ;;  %v812_v19 = vadd.f32 %v811_v5, %v810_v1 }
 0x10e   : > { %v776_v20 = vpack.c.bf16 %v616_v17, %v616_v17  ;;  %655 = vst.msk [vmem:[%s1039_s16] sm:$0xf] %vm654_vm2, %v774_v12  ;;  %v615_v21 = vsel %vm599_vm4, %v591_v3, %v607_v13  ;;  %v596_v22 = vadd.f32 %v1026_v51, %v581_v14  ;;  %v565_v23 = vadd.f32 %v839_v11, %v821_v41 }
 0x10f   : > { %v617_v24 = vsel %vm601_vm5, %v593_v9, %v609_v18  ;;  %v775_v25 = vpack.c.bf16 %v615_v21, %v615_v21  ;;  %v554_v26 = vadd.f32 %v812_v19, %v553_v6  ;;  %v815_v27 = vadd.f32 %v814_v15, %v813_v10 }
 0x110   : > { %657 = vst.msk [vmem:[%s1039_s16 + $0x8] sm:$0xf] %vm654_vm2, %v776_v20  ;;  %v777_v28 = vpack.c.bf16 %v617_v24, %v617_v24  ;;  %vm604_vm6 = vcmp.ge.f32.partialorder %v596_v22, 0.0  ;;  %v612_v29 = vmul.f32 0.1, %v596_v22  ;;  %v582_v30 = vmul.f32 %v1021_v45, %v565_v23 }
 0x111   : > { %656 = vst.msk [vmem:[%s1039_s16 + $0x4] sm:$0xf] %vm654_vm2, %v775_v25  ;;  %v579_v31 = vmul.f32 %v1021_v45, %v554_v26  ;;  %v557_v32 = vadd.f32 %v815_v27, %v556_v16 }
 0x112   : > { %658 = vst.msk [vmem:[%s1039_s16 + $0xc] sm:$0xf] %vm654_vm2, %v777_v28  ;;  %v620_v33 = vsel %vm604_vm6, %v596_v22, %v612_v29  ;;  %v597_v34 = vadd.f32 %v1026_v51, %v582_v30 }
 0x113   : > { %v780_v35 = vpack.c.bf16 %v620_v33, %v620_v33  ;;  %v594_v36 = vadd.f32 %v1026_v51, %v579_v31  ;;  %v580_v37 = vmul.f32 %v1021_v45, %v557_v32 }
 0x114   : > { %vm605_vm7 = vcmp.ge.f32.partialorder %v597_v34, 0.0  ;;  %v613_v38 = vmul.f32 0.1, %v597_v34 }
 0x115   : > { %661 = vst.msk [vmem:[%s1039_s16 + $0x18] sm:$0xf] %vm654_vm2, %v780_v35  ;;  %vm602_vm8 = vcmp.ge.f32.partialorder %v594_v36, 0.0  ;;  %v610_v39 = vmul.f32 0.1, %v594_v36  ;;  %v595_v40 = vadd.f32 %v1026_v51, %v580_v37 }
 0x116   : > { %v621_v41 = vsel %vm605_vm7, %v597_v34, %v613_v38 }
 0x117   : > { %v618_v42 = vsel %vm602_vm8, %v594_v36, %v610_v39  ;;  %v781_v43 = vpack.c.bf16 %v621_v41, %v621_v41  ;;  %vm603_vm9 = vcmp.ge.f32.partialorder %v595_v40, 0.0  ;;  %v611_v44 = vmul.f32 0.1, %v595_v40 }
 0x118   : > { %v778_v46 = vpack.c.bf16 %v618_v42, %v618_v42 }
 0x119   : > { %662 = vst.msk [vmem:[%s1039_s16 + $0x1c] sm:$0xf] %vm654_vm2, %v781_v43  ;;  %v619_v47 = vsel %vm603_vm9, %v595_v40, %v611_v44 }
 0x11a   : > { %659 = vst.msk [vmem:[%s1039_s16 + $0x10] sm:$0xf] %vm654_vm2, %v778_v46  ;;  %v779_v45 = vpack.c.bf16 %v619_v47, %v619_v47 }
 0x11c   : > { %660 = vst.msk [vmem:[%s1039_s16 + $0x14] sm:$0xf] %vm654_vm2, %v779_v45 }
 0x11d PF: > { %s14_s15 = sadd.s32 1, %s905_s15  }
 0x11e   : > { %p11_p4 = scmp.ge.s32.totalorder %s14_s15, 4  }
 0x120   :  { %13 = sbr.rel (!%p11_p4) target bundleno = 1 (0x1), region = 66 }

// kernel: wideresnet_forward.22
= control target key start
LH: loop header
LB: loop body
LE: loop exit
PB: predicated region body
PF: predicated region fallthrough
CT: control target
= control target key end

     0   :  { %s415_s9 = smov 0   ;;  %s446_s0 = inlined_call_operand.vmem [shape: bf16[128,32], index: 0, kind: input, shape index: {}]   ;;  %s447_s1 = inlined_call_operand.vmem [shape: bf16[32,64], index: 1, kind: input, shape index: {}]   ;;  %s448_s2 = inlined_call_operand.vmem [shape: f32[128,64], index: 2, kind: output, shape index: {}]  }
   0x1 LB: > { %s335_s10 = sadd.s32 4294967295, %s398_s9   ;;  %p339_p0 = scmp.ge.s32.totalorder %s398_s9, 1  ;;  %s398_s9 = sphi %s415_s9, %s12_s9  }
   0x2   : > { %p113_p1 = scmp.lt.s32.totalorder %s398_s9, 3 }
   0x4   : > { %p114_p2 = pnand %p339_p0, %p113_p1 }
   0x5   : > { %v386_v0 = vld [vmem:[%s447_s1] sm:$0xff] (!%p114_p2)   ;;  %s340_s13 = sshll.u32 (!%p114_p2), %s335_s10, 3  ;;  %v387_v1 = vld [vmem:[%s447_s1 + $0x8] sm:$0xff] (!%p114_p2)   ;;  %vm192_vm0 = vcmask (!%p114_p2), 261120   ;;  %vm270_vm1 = vcmask (!%p114_p2), 523264  }
   0x6   : > { %117 = sbr.rel (%p114_p2) target bundleno = 234 (0xea), region = 28  ;;  %p136_p3 = scmp.lt.s32.totalorder (!%p114_p2), %s340_s13, 15  ;;  %362 = vmatprep.subr.bf16.mxu0 (!%p114_p2), %v386_v0  ;;  %374 = vmatprep.subr.bf16.mxu1 (!%p114_p2), %v386_v0 }
   0x7   : > { %363 = vmatpush3.bf16.msra.mxu0 (!%p114_p2), %v386_v0  ;;  %376 = vmatpush3.bf16.msra.mxu1 (!%p114_p2), %v386_v0 }
   0x8   : > { %364 = vmatprep.subr.bf16.mxu0 (!%p114_p2), %v387_v1  ;;  %375 = vmatprep.subr.bf16.mxu1 (!%p114_p2), %v387_v1 }
   0xb   : > { %365 = vmatpush3.bf16.msra.mxu0 (!%p114_p2), %v387_v1  ;;  %377 = vmatpush3.bf16.msra.mxu1 (!%p114_p2), %v387_v1 }
   0xd   : > { %s450_s13 = smov (!%p136_p3, %s340_s13), 15 }
   0xe   : > { %s341_s16 = sshll.u32 %s450_s13, 2  ;;  %s343_s20 = sshll.u32 %s450_s13, 3 }
   0xf   : > { %s139_s19 = scalar_lea.vmem %s446_s0, %s341_s16  ;;  %s145_s23 = scalar_lea.vmem %s448_s2, %s343_s20 }
  0x10   : > { %v388_v2 = vld [vmem:[%s139_s19] sm:$0xff]   ;;  %v389_v3 = vld [vmem:[%s139_s19 + $0x10] sm:$0xff]   ;;  %v390_v4 = vld [vmem:[%s139_s19 + $0x8] sm:$0xff]  }
  0x11   : > { %366 = vmatprep.mubr.msk.bf16.mxu0 %vm192_vm0, %v388_v2  ;;  %370 = vmatprep.mubr.msk.bf16.mxu1 %vm192_vm0, %v389_v3  ;;  %v391_v5 = vld [vmem:[%s139_s19 + $0x18] sm:$0xff]  }
  0x12   : > { %367 = vmatmul.mubr.msk.bf16.vlgmr.msra.gmra.mrb[0].mxu0 %vm192_vm0, %v390_v4  ;;  %371 = vmatmul.mubr.msk.bf16.vlgmr.msra.gmra.mrb[0].mxu1 %vm192_vm0, %v391_v5 }
  0xe5   : > { %v368_v6 = vpop.f32.mrb[0].mxu0  ;;  %v372_v7 = vpop.f32.mrb[0].mxu1 }
  0xe6   : > { %273 = vst.msk [vmem:[%s145_s23 + $0x10] sm:$0xff] %vm270_vm1, %v368_v6  ;;  %v239_v8 = vpop.f32.mrb[1].mxu0  ;;  %277 = vst.msk [vmem:[%s145_s23 + $0x30] sm:$0xff] %vm270_vm1, %v372_v7  ;;  %v255_v9 = vpop.f32.mrb[1].mxu1 }
  0xe7   : > { %271 = vst.msk [vmem:[%s145_s23] sm:$0xff] %vm270_vm1, %v239_v8  ;;  %v369_v10 = vpop.f32.mrb[2].mxu0  ;;  %275 = vst.msk [vmem:[%s145_s23 + $0x20] sm:$0xff] %vm270_vm1, %v255_v9  ;;  %v373_v11 = vpop.f32.mrb[2].mxu1 }
  0xe8   : > { %274 = vst.msk [vmem:[%s145_s23 + $0x18] sm:$0xff] %vm270_vm1, %v369_v10  ;;  %v242_v12 = vpop.f32.mrb[3].mxu0  ;;  %278 = vst.msk [vmem:[%s145_s23 + $0x38] sm:$0xff] %vm270_vm1, %v373_v11  ;;  %v258_v13 = vpop.f32.mrb[3].mxu1 }
  0xe9   : > { %272 = vst.msk [vmem:[%s145_s23 + $0x8] sm:$0xff] %vm270_vm1, %v242_v12  ;;  %276 = vst.msk [vmem:[%s145_s23 + $0x28] sm:$0xff] %vm270_vm1, %v258_v13 }
  0xea PF: > { %s12_s9 = sadd.s32 1, %s398_s9  }
  0xeb   : > { %p9_p4 = scmp.ge.s32.totalorder %s12_s9, 4  }
  0xed   :  { %11 = sbr.rel (!%p9_p4) target bundleno = 1 (0x1), region = 58 }

// kernel: wideresnet_forward.24
= control target key start
LH: loop header
LB: loop body
LE: loop exit
PB: predicated region body
PF: predicated region fallthrough
CT: control target
= control target key end

     0   :  { %s1190_s12 = smov 0   ;;  %s1375_s0 = inlined_call_operand.vmem [shape: bf16[128,576], index: 0, kind: input, shape index: {}]   ;;  %s1376_s1 = inlined_call_operand.vmem [shape: bf16[576,64], index: 1, kind: input, shape index: {}]   ;;  %s1377_s2 = inlined_call_operand.vmem [shape: f32[128,64], index: 2, kind: input, shape index: {}]   ;;  %s1378_s3 = inlined_call_operand.vmem [shape: f32[128,64], index: 3, kind: output, shape index: {}]  }
   0x1 LB: > { %s904_s13 = sadd.s32 4294967295, %s1168_s12   ;;  %p908_p0 = scmp.ge.s32.totalorder %s1168_s12, 1  ;;  %s1168_s12 = sphi %s1190_s12, %s13_s12  }
   0x2   : > { %p150_p1 = scmp.lt.s32.totalorder %s1168_s12, 3 }
   0x4   : > { %p151_p2 = pnand %p908_p0, %p150_p1 }
   0x5   : > { %v1098_v0 = vld [vmem:[%s1376_s1 + $0x40] sm:$0xff] (!%p151_p2)   ;;  %v1102_v4 = vld [vmem:[%s1376_s1 + $0x48] sm:$0xff] (!%p151_p2)   ;;  %v1106_v8 = vld [vmem:[%s1376_s1 + $0x50] sm:$0xff] (!%p151_p2)   ;;  %s909_s19 = sshll.u32 (!%p151_p2), %s904_s13, 3  ;;  %vm620_vm0 = vcmask (!%p151_p2), 523264  }
   0x6   : > { %154 = sbr.rel (%p151_p2) target bundleno = 290 (0x122), region = 32  ;;  %v1099_v1 = vld [vmem:[%s1376_s1 + $0xc0] sm:$0xff] (!%p151_p2)   ;;  %977 = vmatprep.subr.bf16.mxu0 (!%p151_p2), %v1098_v0  ;;  %v1103_v5 = vld [vmem:[%s1376_s1 + $0xc8] sm:$0xff] (!%p151_p2)   ;;  %v1107_v9 = vld [vmem:[%s1376_s1 + $0xd0] sm:$0xff] (!%p151_p2)   ;;  %p181_p3 = scmp.lt.s32.totalorder (!%p151_p2), %s909_s19, 15 }
   0x7   : > { %v1100_v2 = vld [vmem:[%s1376_s1] sm:$0xff] (!%p151_p2)   ;;  %1017 = vmatprep.subr.bf16.mxu1 (!%p151_p2), %v1099_v1  ;;  %v1104_v6 = vld [vmem:[%s1376_s1 + $0x8] sm:$0xff] (!%p151_p2)   ;;  %v1108_v10 = vld [vmem:[%s1376_s1 + $0x10] sm:$0xff] (!%p151_p2)  }
   0x8   : > { %v1101_v3 = vld [vmem:[%s1376_s1 + $0x80] sm:$0xff] (!%p151_p2)   ;;  %978 = vmatpush3.bf16.msra.mxu0 (!%p151_p2), %v1100_v2  ;;  %v1105_v7 = vld [vmem:[%s1376_s1 + $0x88] sm:$0xff] (!%p151_p2)   ;;  %v1109_v11 = vld [vmem:[%s1376_s1 + $0x90] sm:$0xff] (!%p151_p2)  }
   0x9   : > { %1018 = vmatpush3.bf16.msra.mxu1 (!%p151_p2), %v1101_v3  ;;  %979 = vmatprep.subr.bf16.mxu0 (!%p151_p2), %v1102_v4  ;;  %v1110_v12 = vld [vmem:[%s1376_s1 + $0x58] sm:$0xff] (!%p151_p2)   ;;  %v1114_v16 = vld [vmem:[%s1376_s1 + $0x60] sm:$0xff] (!%p151_p2)   ;;  %v1118_v20 = vld [vmem:[%s1376_s1 + $0x68] sm:$0xff] (!%p151_p2)  }
   0xa   : > { %1019 = vmatprep.subr.bf16.mxu1 (!%p151_p2), %v1103_v5  ;;  %v1111_v13 = vld [vmem:[%s1376_s1 + $0xd8] sm:$0xff] (!%p151_p2)   ;;  %v1115_v17 = vld [vmem:[%s1376_s1 + $0xe0] sm:$0xff] (!%p151_p2)   ;;  %v1119_v21 = vld [vmem:[%s1376_s1 + $0xe8] sm:$0xff] (!%p151_p2)  }
   0xb   : > { %v1112_v14 = vld [vmem:[%s1376_s1 + $0x18] sm:$0xff] (!%p151_p2)   ;;  %v1116_v18 = vld [vmem:[%s1376_s1 + $0x20] sm:$0xff] (!%p151_p2)   ;;  %v1120_v22 = vld [vmem:[%s1376_s1 + $0x28] sm:$0xff] (!%p151_p2)  }
   0xc   : > { %980 = vmatpush3.bf16.msra.mxu0 (!%p151_p2), %v1104_v6  ;;  %v1113_v15 = vld [vmem:[%s1376_s1 + $0x98] sm:$0xff] (!%p151_p2)   ;;  %v1117_v19 = vld [vmem:[%s1376_s1 + $0xa0] sm:$0xff] (!%p151_p2)   ;;  %v1121_v23 = vld [vmem:[%s1376_s1 + $0xa8] sm:$0xff] (!%p151_p2)  }
   0xd   : > { %1020 = vmatpush3.bf16.msra.mxu1 %v1105_v7  ;;  %981 = vmatprep.subr.bf16.mxu0 %v1106_v8  ;;  %s1380_s19 = smov (!%p181_p3, %s909_s19), 15  ;;  %v1122_v24 = vld [vmem:[%s1376_s1 + $0x70] sm:$0xff]   ;;  %v1126_v28 = vld [vmem:[%s1376_s1 + $0x78] sm:$0xff]   ;;  %v1136_v36 = vld [vmem:[%s1376_s1 + $0x100] sm:$0xff]  }
   0xe   : > { %1021 = vmatprep.subr.bf16.mxu1 %v1107_v9  ;;  %v1123_v25 = vld [vmem:[%s1376_s1 + $0xf0] sm:$0xff]   ;;  %s1089_s16 = smul.u32 20, %s1380_s19  ;;  %v1127_v29 = vld [vmem:[%s1376_s1 + $0xf8] sm:$0xff]   ;;  %v1143_v39 = vld [vmem:[%s1376_s1 + $0x108] sm:$0xff]   ;;  %s912_s15 = sshll.u32 %s1380_s19, 3 }
   0xf   : > { %v1124_v26 = vld [vmem:[%s1376_s1 + $0x30] sm:$0xff]   ;;  %v1128_v30 = vld [vmem:[%s1376_s1 + $0x38] sm:$0xff]   ;;  %s1346_s18 = scalar_lea.vmem %s1377_s2, %s912_s15  ;;  %s197_s22 = scalar_lea.vmem %s1378_s3, %s912_s15 }
  0x10   : > { %982 = vmatpush3.bf16.msra.mxu0 %v1108_v10  ;;  %v1125_v27 = vld [vmem:[%s1376_s1 + $0xb0] sm:$0xff]   ;;  %s1296_s13 = scalar_lea.vmem %s1375_s0, %s1089_s16  ;;  %v1129_v31 = vld [vmem:[%s1376_s1 + $0xb8] sm:$0xff]   ;;  %v296_v58 = vld [vmem:[%s1346_s18] sm:$0xff] }
  0x11   : > { %1022 = vmatpush3.bf16.msra.mxu1 %v1109_v11  ;;  %983 = vmatprep.subr.bf16.mxu0 %v1110_v12  ;;  %v1130_v32 = vld [vmem:[%s1296_s13] ss:$20 sps:$4 sm:$0xff]   ;;  %v1132_v33 = vld [vmem:[%s1296_s13 + $0x4] ss:$20 sps:$4 sm:$0xff]   ;;  %v1133_v34 = vld [vmem:[%s1296_s13 + $0x8] ss:$20 sps:$4 sm:$0xff]  }
  0x12   : > { %1023 = vmatprep.subr.bf16.mxu1 %v1111_v13  ;;  %v1135_v35 = vld [vmem:[%s1296_s13 + $0xc] ss:$20 sps:$4 sm:$0xff]   ;;  %665 = vmatprep.mubr.bf16.mxu0 %v1132_v33  ;;  %v1139_v38 = vld [vmem:[%s1296_s13 + $0x34] ss:$20 sps:$4 sm:$0xff]   ;;  %v1142_v41 = vld [vmem:[%s1296_s13 + $0x30] ss:$20 sps:$4 sm:$0xff]  }
  0x13   : > { %730 = vmatprep.mubr.bf16.mxu1 %v1135_v35  ;;  %v1137_v37 = vld [vmem:[%s1296_s13 + $0x2c] ss:$20 sps:$4 sm:$0xff]   ;;  %v1141_v40 = vld [vmem:[%s1296_s13 + $0x28] ss:$20 sps:$4 sm:$0xff]   ;;  %v1150_v44 = vld [vmem:[%s1376_s1 + $0x110] sm:$0xff]  }
  0x14   : > { %984 = vmatpush3.bf16.msra.mxu0 %v1112_v14  ;;  %v1144_v42 = vld [vmem:[%s1296_s13 + $0x54] ss:$20 sps:$4 sm:$0xff]   ;;  %v1146_v43 = vld [vmem:[%s1296_s13 + $0x5c] ss:$20 sps:$4 sm:$0xff]   ;;  %v1149_v47 = vld [vmem:[%s1296_s13 + $0x58] ss:$20 sps:$4 sm:$0xff]  }
  0x15   : > { %1024 = vmatpush3.bf16.msra.mxu1 %v1113_v15  ;;  %985 = vmatprep.subr.bf16.mxu0 %v1114_v16  ;;  %v1157_v45 = vld [vmem:[%s1376_s1 + $0x118] sm:$0xff]   ;;  %v1148_v46 = vld [vmem:[%s1296_s13 + $0x50] ss:$20 sps:$4 sm:$0xff]   ;;  %v1156_v51 = vld [vmem:[%s1296_s13 + $0x80] ss:$20 sps:$4 sm:$0xff]  }
  0x16   : > { %1025 = vmatprep.subr.bf16.mxu1 %v1115_v17  ;;  %v1151_v48 = vld [vmem:[%s1296_s13 + $0x7c] ss:$20 sps:$4 sm:$0xff]   ;;  %v1153_v49 = vld [vmem:[%s1296_s13 + $0x84] ss:$20 sps:$4 sm:$0xff]   ;;  %v1159_v53 = vld [vmem:[%s1296_s13 + $0x60] ss:$20 sps:$4 sm:$0xff]  }
  0x17   : > { %v1155_v50 = vld [vmem:[%s1296_s13 + $0x78] ss:$20 sps:$4 sm:$0xff]   ;;  %v1158_v52 = vld [vmem:[%s1296_s13 + $0x10] ss:$20 sps:$4 sm:$0xff]   ;;  %v1161_v55 = vld [vmem:[%s1296_s13 + $0x88] ss:$20 sps:$4 sm:$0xff]  }
  0x18   : > { %986 = vmatpush3.bf16.msra.mxu0 %v1116_v18  ;;  %v1160_v54 = vld [vmem:[%s1296_s13 + $0x38] ss:$20 sps:$4 sm:$0xff]   ;;  %v298_v12 = vld [vmem:[%s1346_s18 + $0x10] sm:$0xff] }
  0x19   : > { %1026 = vmatpush3.bf16.msra.mxu1 %v1117_v19  ;;  %987 = vmatprep.subr.bf16.mxu0 %v1118_v20  ;;  %v297_v1 = vld [vmem:[%s1346_s18 + $0x8] sm:$0xff]  ;;  %v299_v19 = vld [vmem:[%s1346_s18 + $0x18] sm:$0xff] }
  0x1a   : > { %1027 = vmatprep.subr.bf16.mxu1 %v1119_v21 }
  0x1c   : > { %988 = vmatpush3.bf16.msra.mxu0 %v1120_v22 }
  0x1d   : > { %1028 = vmatpush3.bf16.msra.mxu1 %v1121_v23  ;;  %989 = vmatprep.subr.bf16.mxu0 %v1122_v24 }
  0x1e   : > { %1029 = vmatprep.subr.bf16.mxu1 %v1123_v25 }
  0x20   : > { %990 = vmatpush3.bf16.msra.mxu0 %v1124_v26 }
  0x21   : > { %1030 = vmatpush3.bf16.msra.mxu1 %v1125_v27  ;;  %991 = vmatprep.subr.bf16.mxu0 %v1126_v28 }
  0x22   : > { %1031 = vmatprep.subr.bf16.mxu1 %v1127_v29 }
  0x24   : > { %992 = vmatpush3.bf16.msra.mxu0 %v1128_v30  ;;  %v300_v30 = vld [vmem:[%s1346_s18 + $0x20] sm:$0xff] }
  0x25   : > { %1032 = vmatpush3.bf16.msra.mxu1 %v1129_v31  ;;  %1065 = vmatprep.subr.bf16.mxu0 %v1136_v36 }
  0x26   : > { %1081 = vmatprep.subr.bf16.mxu1 %v1136_v36 }
  0x27   : > { %666 = vmatmul.mubr.bf16.vlgmr.msra.gmra.mrb[0].mxu0 %v1130_v32 }
  0x28   : > { %731 = vmatmul.mubr.bf16.vlgmr.msra.gmra.mrb[0].mxu1 %v1133_v34  ;;  %1066 = vmatpush3.bf16.msra.mxu0 %v1136_v36 }
  0x29   : > { %1085 = vmatpush3.bf16.msra.mxu1 %v1136_v36  ;;  %673 = vmatprep.mubr.bf16.mxu0 %v1137_v37  ;;  %v301_v37 = vld [vmem:[%s1346_s18 + $0x28] sm:$0xff] }
  0x2a   : > { %738 = vmatprep.mubr.bf16.mxu1 %v1139_v38  ;;  %1067 = vmatprep.subr.bf16.mxu0 %v1143_v39 }
  0x2b   : > { %1082 = vmatprep.subr.bf16.mxu1 %v1143_v39 }
  0x2c   : > { %1068 = vmatpush3.bf16.msra.mxu0 %v1143_v39 }
  0x2d   : > { %1086 = vmatpush3.bf16.msra.mxu1 %v1143_v39  ;;  %1069 = vmatprep.subr.bf16.mxu0 %v1150_v44 }
  0x2e   : > { %1083 = vmatprep.subr.bf16.mxu1 %v1150_v44 }
  0x2f   : > { %674 = vmatmul.mubr.bf16.gmra.mrb[4].mxu0 %v1141_v40 }
  0x30   : > { %739 = vmatmul.mubr.bf16.gmra.mrb[4].mxu1 %v1142_v41  ;;  %681 = vmatprep.mubr.bf16.mxu0 %v1144_v42 }
  0x31   : > { %746 = vmatprep.mubr.bf16.mxu1 %v1146_v43  ;;  %1070 = vmatpush3.bf16.msra.mxu0 %v1150_v44 }
  0x32   : > { %1087 = vmatpush3.bf16.msra.mxu1 %v1150_v44  ;;  %1071 = vmatprep.subr.bf16.mxu0 %v1157_v45 }
  0x33   : > { %1084 = vmatprep.subr.bf16.mxu1 %v1157_v45 }
  0x35   : > { %1072 = vmatpush3.bf16.msra.mxu0 %v1157_v45 }
  0x36   : > { %1088 = vmatpush3.bf16.msra.mxu1 %v1157_v45 }
  0x37   : > { %682 = vmatmul.mubr.bf16.gmra.mrb[8].mxu0 %v1148_v46 }
  0x38   : > { %747 = vmatmul.mubr.bf16.gmra.mrb[8].mxu1 %v1149_v47  ;;  %689 = vmatprep.mubr.bf16.mxu0 %v1151_v48  ;;  %v302_v48 = vld [vmem:[%s1346_s18 + $0x30] sm:$0xff] }
  0x39   : > { %754 = vmatprep.mubr.bf16.mxu1 %v1153_v49 }
  0x3f   : > { %690 = vmatmul.mubr.bf16.gmra.mrb[12].mxu0 %v1155_v50 }
  0x40   : > { %755 = vmatmul.mubr.bf16.gmra.mrb[12].mxu1 %v1156_v51  ;;  %1073 = vmatprep.mubr.msk.bf16.mxu0 %vm620_vm0, %v1158_v52 }
  0x41   : > { %1077 = vmatprep.mubr.msk.bf16.mxu1 %vm620_vm0, %v1159_v53 }
  0x47   : > { %1074 = vmatmul.mubr.msk.bf16.vlgmr.msra.gmra.mrb[16].mxu0 %vm620_vm0, %v1160_v54 }
  0x48   : > { %1078 = vmatmul.mubr.msk.bf16.vlgmr.msra.gmra.mrb[16].mxu1 %vm620_vm0, %v1161_v55  ;;  %v303_v55 = vld [vmem:[%s1346_s18 + $0x38] sm:$0xff] }
  0xfa   : > { %v993_v56 = vpop.f32.mrb[0].mxu0 }
  0xfb   : > { %v1033_v57 = vpop.f32.mrb[0].mxu1  ;;  %v994_v59 = vpop.f32.mrb[1].mxu0 }
  0xfc   : > { %v995_v60 = vadd.f32 %v994_v59, %v993_v56  ;;  %v1034_v61 = vpop.f32.mrb[1].mxu1  ;;  %v996_v62 = vpop.f32.mrb[2].mxu0 }
  0xfd   : > { %v1035_v63 = vadd.f32 %v1034_v61, %v1033_v57  ;;  %v1036_v0 = vpop.f32.mrb[2].mxu1  ;;  %v997_v2 = vpop.f32.mrb[3].mxu0 }
  0xfe   : > { %v668_v3 = vadd.f32 %v995_v60, %v296_v58  ;;  %v998_v4 = vadd.f32 %v997_v2, %v996_v62  ;;  %v1037_v5 = vpop.f32.mrb[3].mxu1 }
  0xff   : > { %v1038_v6 = vadd.f32 %v1037_v5, %v1036_v0 }
 0x100   : > { %v671_v7 = vadd.f32 %v998_v4, %v297_v1  ;;  %v733_v8 = vadd.f32 %v1035_v63, %v668_v3 }
 0x102   : > { %v999_v9 = vpop.f32.mrb[4].mxu0  ;;  %v1350_v10 = vadd.f32 %v1038_v6, %v671_v7 }
 0x103   : > { %v1039_v11 = vpop.f32.mrb[4].mxu1  ;;  %v1000_v13 = vpop.f32.mrb[5].mxu0 }
 0x104   : > { %v1001_v14 = vadd.f32 %v1000_v13, %v999_v9  ;;  %v1040_v15 = vpop.f32.mrb[5].mxu1  ;;  %v1002_v16 = vpop.f32.mrb[6].mxu0 }
 0x105   : > { %v1041_v17 = vadd.f32 %v1040_v15, %v1039_v11  ;;  %v1042_v18 = vpop.f32.mrb[6].mxu1  ;;  %v1003_v20 = vpop.f32.mrb[7].mxu0 }
 0x106   : > { %v676_v21 = vadd.f32 %v1001_v14, %v298_v12  ;;  %v1004_v22 = vadd.f32 %v1003_v20, %v1002_v16  ;;  %v1043_v23 = vpop.f32.mrb[7].mxu1 }
 0x107   : > { %v1044_v24 = vadd.f32 %v1043_v23, %v1042_v18 }
 0x108   : > { %v679_v25 = vadd.f32 %v1004_v22, %v299_v19  ;;  %v741_v26 = vadd.f32 %v1041_v17, %v676_v21 }
 0x10a   : > { %v1005_v27 = vpop.f32.mrb[8].mxu0  ;;  %v744_v28 = vadd.f32 %v1044_v24, %v679_v25 }
 0x10b   : > { %v1045_v29 = vpop.f32.mrb[8].mxu1  ;;  %v1006_v31 = vpop.f32.mrb[9].mxu0 }
 0x10c   : > { %v1007_v32 = vadd.f32 %v1006_v31, %v1005_v27  ;;  %v1046_v33 = vpop.f32.mrb[9].mxu1  ;;  %v1008_v34 = vpop.f32.mrb[10].mxu0 }
 0x10d   : > { %v1047_v35 = vadd.f32 %v1046_v33, %v1045_v29  ;;  %v1048_v36 = vpop.f32.mrb[10].mxu1  ;;  %v1009_v38 = vpop.f32.mrb[11].mxu0 }
 0x10e   : > { %v684_v39 = vadd.f32 %v1007_v32, %v300_v30  ;;  %v1010_v40 = vadd.f32 %v1009_v38, %v1008_v34  ;;  %v1049_v41 = vpop.f32.mrb[11].mxu1 }
 0x10f   : > { %v1050_v42 = vadd.f32 %v1049_v41, %v1048_v36 }
 0x110   : > { %v687_v43 = vadd.f32 %v1010_v40, %v301_v37  ;;  %v749_v44 = vadd.f32 %v1047_v35, %v684_v39 }
 0x112   : > { %v1011_v45 = vpop.f32.mrb[12].mxu0  ;;  %v752_v46 = vadd.f32 %v1050_v42, %v687_v43 }
 0x113   : > { %v1051_v47 = vpop.f32.mrb[12].mxu1  ;;  %v1012_v49 = vpop.f32.mrb[13].mxu0 }
 0x114   : > { %v1013_v50 = vadd.f32 %v1012_v49, %v1011_v45  ;;  %v1052_v51 = vpop.f32.mrb[13].mxu1  ;;  %v1014_v52 = vpop.f32.mrb[14].mxu0 }
 0x115   : > { %v1053_v53 = vadd.f32 %v1052_v51, %v1051_v47  ;;  %v1054_v54 = vpop.f32.mrb[14].mxu1  ;;  %v1015_v56 = vpop.f32.mrb[15].mxu0 }
 0x116   : > { %v692_v57 = vadd.f32 %v1013_v50, %v302_v48  ;;  %v1016_v58 = vadd.f32 %v1015_v56, %v1014_v52  ;;  %v1055_v59 = vpop.f32.mrb[15].mxu1 }
 0x117   : > { %v1056_v60 = vadd.f32 %v1055_v59, %v1054_v54 }
 0x118   : > { %v695_v61 = vadd.f32 %v1016_v58, %v303_v55  ;;  %v757_v62 = vadd.f32 %v1053_v53, %v692_v57 }
 0x11a   : > { %v1075_v63 = vpop.f32.mrb[16].mxu0  ;;  %v760_v0 = vadd.f32 %v1056_v60, %v695_v61 }
 0x11b   : > { %v806_v1 = vadd.f32 %v1075_v63, %v741_v26  ;;  %v1079_v2 = vpop.f32.mrb[16].mxu1  ;;  %v797_v3 = vpop.f32.mrb[17].mxu0 }
 0x11c   : > { %v822_v4 = vadd.f32 %v1079_v2, %v757_v62  ;;  %v798_v5 = vadd.f32 %v797_v3, %v733_v8  ;;  %v813_v6 = vpop.f32.mrb[17].mxu1  ;;  %v1076_v7 = vpop.f32.mrb[18].mxu0 }
 0x11d   : > { %830 = vst.msk [vmem:[%s197_s22 + $0x10] sm:$0xff] %vm620_vm0, %v806_v1  ;;  %v814_v9 = vadd.f32 %v813_v6, %v749_v44  ;;  %v809_v11 = vadd.f32 %v1076_v7, %v744_v28  ;;  %v1080_v12 = vpop.f32.mrb[18].mxu1  ;;  %v800_v13 = vpop.f32.mrb[19].mxu0 }
 0x11e   : > { %834 = vst.msk [vmem:[%s197_s22 + $0x30] sm:$0xff] %vm620_vm0, %v822_v4  ;;  %828 = vst.msk [vmem:[%s197_s22] sm:$0xff] %vm620_vm0, %v798_v5  ;;  %v825_v14 = vadd.f32 %v1080_v12, %v760_v0  ;;  %v801_v15 = vadd.f32 %v800_v13, %v1350_v10  ;;  %v816_v16 = vpop.f32.mrb[19].mxu1 }
 0x11f   : > { %832 = vst.msk [vmem:[%s197_s22 + $0x20] sm:$0xff] %vm620_vm0, %v814_v9  ;;  %831 = vst.msk [vmem:[%s197_s22 + $0x18] sm:$0xff] %vm620_vm0, %v809_v11  ;;  %v817_v8 = vadd.f32 %v816_v16, %v752_v46 }
 0x120   : > { %835 = vst.msk [vmem:[%s197_s22 + $0x38] sm:$0xff] %vm620_vm0, %v825_v14  ;;  %829 = vst.msk [vmem:[%s197_s22 + $0x8] sm:$0xff] %vm620_vm0, %v801_v15 }
 0x121   : > { %833 = vst.msk [vmem:[%s197_s22 + $0x28] sm:$0xff] %vm620_vm0, %v817_v8 }
 0x122 PF: > { %s13_s12 = sadd.s32 1, %s1168_s12  }
 0x123   : > { %p10_p4 = scmp.ge.s32.totalorder %s13_s12, 4  }
 0x125   :  { %12 = sbr.rel (!%p10_p4) target bundleno = 1 (0x1), region = 65 }

// kernel: wideresnet_forward.25
= control target key start
LH: loop header
LB: loop body
LE: loop exit
PB: predicated region body
PF: predicated region fallthrough
CT: control target
= control target key end

     0   :  { %s350_s12 = smov 0   ;;  %s394_s0 = inlined_call_operand.vmem [shape: f32[128,64], index: 0, kind: input, shape index: {}]   ;;  %s395_s1 = inlined_call_operand.vmem [shape: f32[1,64], index: 1, kind: input, shape index: {}]   ;;  %s396_s2 = inlined_call_operand.vmem [shape: f32[1,64], index: 2, kind: input, shape index: {}]   ;;  %s397_s3 = inlined_call_operand.vmem [shape: f32[128,64], index: 3, kind: output, shape index: {}]  }
   0x1 LB: > { %s301_s13 = sadd.s32 4294967295, %s328_s12   ;;  %p305_p0 = scmp.ge.s32.totalorder %s328_s12, 1  ;;  %s328_s12 = sphi %s350_s12, %s13_s12  }
   0x2   : > { %p138_p1 = scmp.lt.s32.totalorder %s328_s12, 3 }
   0x4   : > { %p139_p2 = pnand %p305_p0, %p138_p1 }
   0x5   : > { %s306_s14 = sshll.u32 (!%p139_p2), %s301_s13, 3  ;;  %v310_v0 = vld [vmem:[%s395_s1] ss:$0 sm:$0xff] (!%p139_p2)  ;;  %vm236_vm0 = vcmask (!%p139_p2), 523264  }
   0x6   : > { %142 = sbr.rel (%p139_p2) target bundleno = 32 (0x20), region = 32  ;;  %p163_p3 = scmp.lt.s32.totalorder (!%p139_p2), %s306_s14, 15  ;;  %v311_v1 = vld [vmem:[%s396_s2] ss:$0 sm:$0xff] (!%p139_p2) }
   0xd   : > { %s399_s14 = smov (!%p163_p3, %s306_s14), 15 }
   0xe   : > { %s307_s15 = sshll.u32 %s399_s14, 3 }
   0xf   : > { %s166_s20 = scalar_lea.vmem %s394_s0, %s307_s15  ;;  %s373_s25 = scalar_lea.vmem %s397_s3, %s307_s15 }
  0x10   : > { %v174_v2 = vld [vmem:[%s166_s20] sm:$0xff]  ;;  %v175_v3 = vld [vmem:[%s166_s20 + $0x8] sm:$0xff]  ;;  %v176_v4 = vld [vmem:[%s166_s20 + $0x10] sm:$0xff] }
  0x11   : > { %v189_v5 = vmul.f32 %v310_v0, %v174_v2  ;;  %v190_v6 = vmul.f32 %v310_v0, %v175_v3  ;;  %v191_v7 = vmul.f32 %v310_v0, %v176_v4  ;;  %v177_v8 = vld [vmem:[%s166_s20 + $0x18] sm:$0xff]  ;;  %v178_v9 = vld [vmem:[%s166_s20 + $0x20] sm:$0xff]  ;;  %v179_v10 = vld [vmem:[%s166_s20 + $0x28] sm:$0xff] }
  0x12   : > { %v192_v11 = vmul.f32 %v310_v0, %v177_v8  ;;  %v193_v12 = vmul.f32 %v310_v0, %v178_v9  ;;  %v194_v13 = vmul.f32 %v310_v0, %v179_v10  ;;  %v180_v14 = vld [vmem:[%s166_s20 + $0x30] sm:$0xff]  ;;  %v181_v15 = vld [vmem:[%s166_s20 + $0x38] sm:$0xff] }
  0x13   : > { %v204_v16 = vadd.f32 %v311_v1, %v189_v5  ;;  %v205_v17 = vadd.f32 %v311_v1, %v190_v6  ;;  %v206_v18 = vadd.f32 %v311_v1, %v191_v7  ;;  %v195_v19 = vmul.f32 %v310_v0, %v180_v14 }
  0x14   : > { %v207_v20 = vadd.f32 %v311_v1, %v192_v11  ;;  %v208_v21 = vadd.f32 %v311_v1, %v193_v12  ;;  %v209_v22 = vadd.f32 %v311_v1, %v194_v13  ;;  %v196_v23 = vmul.f32 %v310_v0, %v181_v15 }
  0x15   : > { %vm212_vm1 = vcmp.ge.f32.partialorder %v204_v16, 0.0  ;;  %v220_v24 = vmul.f32 0.1, %v204_v16  ;;  %vm213_vm2 = vcmp.ge.f32.partialorder %v205_v17, 0.0  ;;  %v221_v25 = vmul.f32 0.1, %v205_v17 }
  0x16   : > { %vm214_vm3 = vcmp.ge.f32.partialorder %v206_v18, 0.0  ;;  %v222_v26 = vmul.f32 0.1, %v206_v18  ;;  %vm215_vm4 = vcmp.ge.f32.partialorder %v207_v20, 0.0  ;;  %v223_v27 = vmul.f32 0.1, %v207_v20 }
  0x17   : > { %v228_v28 = vsel %vm212_vm1, %v204_v16, %v220_v24  ;;  %v229_v29 = vsel %vm213_vm2, %v205_v17, %v221_v25  ;;  %vm216_vm5 = vcmp.ge.f32.partialorder %v208_v21, 0.0  ;;  %v224_v30 = vmul.f32 0.1, %v208_v21 }
  0x18   : > { %237 = vst.msk [vmem:[%s373_s25] sm:$0xff] %vm236_vm0, %v228_v28  ;;  %238 = vst.msk [vmem:[%s373_s25 + $0x8] sm:$0xff] %vm236_vm0, %v229_v29  ;;  %v230_v31 = vsel %vm214_vm3, %v206_v18, %v222_v26  ;;  %v231_v32 = vsel %vm215_vm4, %v207_v20, %v223_v27  ;;  %vm217_vm6 = vcmp.ge.f32.partialorder %v209_v22, 0.0  ;;  %v225_v33 = vmul.f32 0.1, %v209_v22 }
  0x19   : > { %239 = vst.msk [vmem:[%s373_s25 + $0x10] sm:$0xff] %vm236_vm0, %v230_v31  ;;  %240 = vst.msk [vmem:[%s373_s25 + $0x18] sm:$0xff] %vm236_vm0, %v231_v32  ;;  %v232_v34 = vsel %vm216_vm5, %v208_v21, %v224_v30  ;;  %v210_v35 = vadd.f32 %v311_v1, %v195_v19  ;;  %v211_v36 = vadd.f32 %v311_v1, %v196_v23 }
  0x1a   : > { %241 = vst.msk [vmem:[%s373_s25 + $0x20] sm:$0xff] %vm236_vm0, %v232_v34  ;;  %v233_v37 = vsel %vm217_vm6, %v209_v22, %v225_v33 }
  0x1b   : > { %242 = vst.msk [vmem:[%s373_s25 + $0x28] sm:$0xff] %vm236_vm0, %v233_v37  ;;  %vm218_vm7 = vcmp.ge.f32.partialorder %v210_v35, 0.0  ;;  %v226_v38 = vmul.f32 0.1, %v210_v35  ;;  %vm219_vm8 = vcmp.ge.f32.partialorder %v211_v36, 0.0 }
  0x1c   : > { %v227_v39 = vmul.f32 0.1, %v211_v36 }
  0x1d   : > { %v234_v40 = vsel %vm218_vm7, %v210_v35, %v226_v38 }
  0x1e   : > { %v235_v41 = vsel %vm219_vm8, %v211_v36, %v227_v39  ;;  %243 = vst.msk [vmem:[%s373_s25 + $0x30] sm:$0xff] %vm236_vm0, %v234_v40 }
  0x1f   : > { %244 = vst.msk [vmem:[%s373_s25 + $0x38] sm:$0xff] %vm236_vm0, %v235_v41 }
  0x20 PF: > { %s13_s12 = sadd.s32 1, %s328_s12  }
  0x21   : > { %p10_p4 = scmp.ge.s32.totalorder %s13_s12, 4  }
  0x23   :  { %12 = sbr.rel (!%p10_p4) target bundleno = 1 (0x1), region = 62 }

</bundles_post_ra>
